<compile_context>
chip_gen: v7x
topology: tpu7x:2x2x1
jax: 0.10.0
libtpu: 0.0.40
codegen_flags: <defaults>
</compile_context>

<pallas_src>
import jax
import jax.numpy as jnp
from jax.experimental import pallas as pl
from jax.experimental.pallas import tpu as pltpu


def _round_up(n, m):
    return (n + m - 1) // m * m


def _conv_gemm_kernel(w_ref, p_ref, b_ref, o_ref):
    """(C_out, K) @ (K, cols) + bias -> (C_out, cols); lane-dense output."""
    o_ref[...] = (
        jnp.dot(w_ref[...], p_ref[...], preferred_element_type=jnp.float32)
        + b_ref[...]
    ).astype(o_ref.dtype)


def _im2col_T(x_nhwc, k, stride, padding):
    """NHWC -> transposed patch matrix (KH*KW*C_in, N*H_out*W_out). XLA glue."""
    N, H, W, C = x_nhwc.shape
    h_out = (H + 2 * padding - k) // stride + 1
    w_out = (W + 2 * padding - k) // stride + 1
    xp = jnp.pad(x_nhwc, ((0, 0), (padding, padding), (padding, padding), (0, 0)))
    taps = []
    for i in range(k):
        for j in range(k):
            sl = jax.lax.slice(
                xp,
                (0, i, j, 0),
                (N, i + (h_out - 1) * stride + 1, j + (w_out - 1) * stride + 1, C),
                (1, stride, stride, 1),
            )  # (N, h_out, w_out, C)
            taps.append(sl)
    # K-ordering: ((kh * k + kw) * C_in + c)  -- must match weight flattening.
    pat = jnp.stack(taps, axis=3)                      # (N, h_out, w_out, T, C)
    pat = pat.reshape(N * h_out * w_out, k * k * C)    # (rows, K)
    return pat.T, h_out, w_out                         # (K, rows)


def conv2d_pallas(x_nhwc, w_oihw, b, stride, padding, *, max_col_tile=2048):
    """Conv2d for an NHWC batch as a single folded-K Pallas GEMM per layer."""
    C_out, C_in, KH, KW = w_oihw.shape
    N = x_nhwc.shape[0]

    patT, h_out, w_out = _im2col_T(x_nhwc, KH, stride, padding)
    K, R = patT.shape                       # K = KH*KW*C_in, R = N*H_out*W_out

    K_pad = _round_up(K, 8)                 # sublane alignment of the RHS
    R_pad = _round_up(R, 128)               # lane-dense output columns
    patT = jnp.pad(patT, ((0, K_pad - K), (0, R_pad - R)))

    # (C_out, C_in, KH, KW) -> (C_out, KH, KW, C_in) -> (C_out, K), matching
    # the im2col K-ordering above; zero-pad K.
    w_lhs = jnp.transpose(w_oihw, (0, 2, 3, 1)).reshape(C_out, K)
    w_lhs = jnp.pad(w_lhs, ((0, 0), (0, K_pad - K)))
    b2 = b.reshape(C_out, 1)

    # Column tiling: split only the big layer(s) so the "parallel" grid axis
    # can shard across TensorCores; small layers run as a single grid step.
    if R_pad > max_col_tile and R_pad % max_col_tile == 0:
        col_tile = max_col_tile
    else:
        col_tile = R_pad
    grid = (R_pad // col_tile,)

    out = pl.pallas_call(
        _conv_gemm_kernel,
        out_shape=jax.ShapeDtypeStruct((C_out, R_pad), x_nhwc.dtype),
        grid_spec=pltpu.PrefetchScalarGridSpec(
            num_scalar_prefetch=0,
            grid=grid,
            in_specs=[
                pl.BlockSpec((C_out, K_pad), lambda j: (0, 0)),     # weights
                pl.BlockSpec((K_pad, col_tile), lambda j: (0, j)),  # patches^T
                pl.BlockSpec((C_out, 1), lambda j: (0, 0)),         # bias
            ],
            out_specs=pl.BlockSpec((C_out, col_tile), lambda j: (0, j)),
        ),
        compiler_params=pltpu.CompilerParams(
            dimension_semantics=("parallel",)),
    )(w_lhs, patT, b2)

    out = out[:, :R]                                   # drop column padding
    out = out.reshape(C_out, N, h_out, w_out)
    return jnp.transpose(out, (1, 2, 3, 0))            # NHWC


# (out_channels, in_channels, kernel, stride, padding) — matches Model.__init__
_LAYER_CFG = [
    (16, 3, 7, 1, 3),
    (32, 16, 7, 2, 0),
    (16, 32, 3, 2, 0),
    (32, 16, 3, 2, 0),
    (32, 32, 7, 1, 3),
]


def init_params(key):
    """Deterministic Conv2d-style (uniform +/- 1/sqrt(fan_in)) initialization."""
    params = []
    for (c_out, c_in, k, _, _) in _LAYER_CFG:
        key, kw_, kb_ = jax.random.split(key, 3)
        bound = 1.0 / float(c_in * k * k) ** 0.5
        w = jax.random.uniform(kw_, (c_out, c_in, k, k), jnp.float32, -bound, bound)
        b = jax.random.uniform(kb_, (c_out,), jnp.float32, -bound, bound)
        params.append((w, b))
    return params


def model_forward(x_nchw, params):
    """Reproduces Model.forward (conv1..conv5). Input/output are NCHW."""
    y = jnp.transpose(x_nchw, (0, 2, 3, 1))            # NCHW -> NHWC, whole batch
    for (w, b), (_, _, _, s, p) in zip(params, _LAYER_CFG):
        y = conv2d_pallas(y, w, b, s, p)
    return jnp.transpose(y, (0, 3, 1, 2))              # NHWC -> NCHW


def reference_forward(x_nchw, params):
    """Pure-JAX (XLA) reference for a numerical sanity check."""
    y = x_nchw
    for (w, b), (_, _, _, s, p) in zip(params, _LAYER_CFG):
        y = jax.lax.conv_general_dilated(
            y, w, window_strides=(s, s), padding=[(p, p), (p, p)],
            dimension_numbers=("NCHW", "OIHW", "NCHW"),
            precision=jax.lax.Precision.HIGHEST,
        ) + b.reshape(1, -1, 1, 1)
    return y


if __name__ == "__main__":
    key = jax.random.PRNGKey(0)
    kx, kp = jax.random.split(key)
    x = jax.random.normal(kx, (1, 3, 64, 64), jnp.float32)
    params = init_params(kp)

    out = jax.jit(model_forward)(x, params)
    out = jax.block_until_ready(out)
    assert out.shape == (1, 32, 6, 6), out.shape

    ref = reference_forward(x, params)
    max_err = float(jnp.max(jnp.abs(out - ref)))
    # Kernel uses default MXU matmul precision (f32 accumulation); reference is
    # f32-HIGHEST, so allow a slightly looser tolerance than bit-exact f32.
    assert jnp.allclose(out, ref, rtol=1e-2, atol=1e-2), max_err

    print("KERNEL_OK")
</pallas_src>

<mosaic_0001>
module attributes {stable_mosaic.version = 11 : i64} {
  func.func @_conv_gemm_kernel(%arg0: i32, %arg1: memref<16x152xf32, #tpu.memory_space<vmem>>, %arg2: memref<152x2048xf32, #tpu.memory_space<vmem>>, %arg3: memref<16x1xf32, #tpu.memory_space<vmem>>, %arg4: memref<16x2048xf32, #tpu.memory_space<vmem>>) attributes {dimension_semantics = [#tpu.dimension_semantics<parallel>], iteration_bounds = array<i64: 2>, scalar_prefetch = 0 : i64, scratch_operands = 0 : i64, tpu.core_type = #tpu.core_type<tc>, window_params = [{pipeline_mode = #tpu.pipeline_mode<synchronous>, transform_indices = @transform_0, window_bounds = array<i64: 16, 152>}, {transform_indices = @transform_1, window_bounds = array<i64: 152, 2048>}, {pipeline_mode = #tpu.pipeline_mode<synchronous>, transform_indices = @transform_2, window_bounds = array<i64: 16, 1>}, {transform_indices = @transform_3, window_bounds = array<i64: 16, 2048>}]} {
    %c0 = arith.constant 0 : index
    %c0_0 = arith.constant 0 : index
    %0 = vector.load %arg1[%c0, %c0_0] : memref<16x152xf32, #tpu.memory_space<vmem>>, vector<16x152xf32>
    %c0_1 = arith.constant 0 : index
    %c0_2 = arith.constant 0 : index
    %1 = vector.load %arg2[%c0_1, %c0_2] : memref<152x2048xf32, #tpu.memory_space<vmem>>, vector<152x2048xf32>
    %cst = arith.constant dense<0.000000e+00> : vector<16x2048xf32>
    %2 = tpu.matmul %0, %1, %cst {dimension_numbers = #tpu.dot_dimension_numbers<[1], [0], [0], [1], [0, 0, 1, 1], [], []>} : vector<16x152xf32>, vector<152x2048xf32>, vector<16x2048xf32> -> vector<16x2048xf32>
    %c0_3 = arith.constant 0 : index
    %c0_4 = arith.constant 0 : index
    %3 = vector.load %arg3[%c0_3, %c0_4] : memref<16x1xf32, #tpu.memory_space<vmem>>, vector<16x1xf32>
    %4 = vector.broadcast %3 : vector<16x1xf32> to vector<16x2048xf32>
    %5 = arith.addf %2, %4 : vector<16x2048xf32>
    %c0_5 = arith.constant 0 : index
    %c0_6 = arith.constant 0 : index
    %6 = vector.load %arg4[%c0_5, %c0_6] : memref<16x2048xf32, #tpu.memory_space<vmem>>, vector<16x2048xf32>
    tpu.vector_store %arg4[%c0_5, %c0_6], %5 {strides = array<i32>} : memref<16x2048xf32, #tpu.memory_space<vmem>>, vector<16x2048xf32>,
    return
  }
  func.func @transform_0(%arg0: i32) -> (i32, i32) {
    %c0_i32 = arith.constant 0 : i32
    %c0_i32_0 = arith.constant 0 : i32
    %c0_i32_1 = arith.constant 0 : i32
    return %c0_i32, %c0_i32_0 : i32, i32
  }
  func.func @transform_1(%arg0: i32) -> (i32, i32) {
    %c0_i32 = arith.constant 0 : i32
    %c0_i32_0 = arith.constant 0 : i32
    return %c0_i32, %arg0 : i32, i32
  }
  func.func @transform_2(%arg0: i32) -> (i32, i32) {
    %c0_i32 = arith.constant 0 : i32
    %c0_i32_0 = arith.constant 0 : i32
    %c0_i32_1 = arith.constant 0 : i32
    return %c0_i32, %c0_i32_0 : i32, i32
  }
  func.func @transform_3(%arg0: i32) -> (i32, i32) {
    %c0_i32 = arith.constant 0 : i32
    %c0_i32_0 = arith.constant 0 : i32
    return %c0_i32, %arg0 : i32, i32
  }
}

module attributes {stable_mosaic.version = 11 : i64} {
  func.func @_conv_gemm_kernel(%arg0: i32, %arg1: memref<32x784xf32, #tpu.memory_space<vmem>>, %arg2: memref<784x896xf32, #tpu.memory_space<vmem>>, %arg3: memref<32x1xf32, #tpu.memory_space<vmem>>, %arg4: memref<32x896xf32, #tpu.memory_space<vmem>>) attributes {dimension_semantics = [#tpu.dimension_semantics<parallel>], iteration_bounds = array<i64: 1>, scalar_prefetch = 0 : i64, scratch_operands = 0 : i64, tpu.core_type = #tpu.core_type<tc>, window_params = [{pipeline_mode = #tpu.pipeline_mode<synchronous>, transform_indices = @transform_0, window_bounds = array<i64: 32, 784>}, {transform_indices = @transform_1, window_bounds = array<i64: 784, 896>}, {pipeline_mode = #tpu.pipeline_mode<synchronous>, transform_indices = @transform_2, window_bounds = array<i64: 32, 1>}, {transform_indices = @transform_3, window_bounds = array<i64: 32, 896>}]} {
    %c0 = arith.constant 0 : index
    %c0_0 = arith.constant 0 : index
    %0 = vector.load %arg1[%c0, %c0_0] : memref<32x784xf32, #tpu.memory_space<vmem>>, vector<32x784xf32>
    %c0_1 = arith.constant 0 : index
    %c0_2 = arith.constant 0 : index
    %1 = vector.load %arg2[%c0_1, %c0_2] : memref<784x896xf32, #tpu.memory_space<vmem>>, vector<784x896xf32>
    %cst = arith.constant dense<0.000000e+00> : vector<32x896xf32>
    %2 = tpu.matmul %0, %1, %cst {dimension_numbers = #tpu.dot_dimension_numbers<[1], [0], [0], [1], [0, 0, 1, 1], [], []>} : vector<32x784xf32>, vector<784x896xf32>, vector<32x896xf32> -> vector<32x896xf32>
    %c0_3 = arith.constant 0 : index
    %c0_4 = arith.constant 0 : index
    %3 = vector.load %arg3[%c0_3, %c0_4] : memref<32x1xf32, #tpu.memory_space<vmem>>, vector<32x1xf32>
    %4 = vector.broadcast %3 : vector<32x1xf32> to vector<32x896xf32>
    %5 = arith.addf %2, %4 : vector<32x896xf32>
    %c0_5 = arith.constant 0 : index
    %c0_6 = arith.constant 0 : index
    %6 = vector.load %arg4[%c0_5, %c0_6] : memref<32x896xf32, #tpu.memory_space<vmem>>, vector<32x896xf32>
    tpu.vector_store %arg4[%c0_5, %c0_6], %5 {strides = array<i32>} : memref<32x896xf32, #tpu.memory_space<vmem>>, vector<32x896xf32>,
    return
  }
  func.func @transform_0(%arg0: i32) -> (i32, i32) {
    %c0_i32 = arith.constant 0 : i32
    %c0_i32_0 = arith.constant 0 : i32
    %c0_i32_1 = arith.constant 0 : i32
    return %c0_i32, %c0_i32_0 : i32, i32
  }
  func.func @transform_1(%arg0: i32) -> (i32, i32) {
    %c0_i32 = arith.constant 0 : i32
    %c0_i32_0 = arith.constant 0 : i32
    return %c0_i32, %arg0 : i32, i32
  }
  func.func @transform_2(%arg0: i32) -> (i32, i32) {
    %c0_i32 = arith.constant 0 : i32
    %c0_i32_0 = arith.constant 0 : i32
    %c0_i32_1 = arith.constant 0 : i32
    return %c0_i32, %c0_i32_0 : i32, i32
  }
  func.func @transform_3(%arg0: i32) -> (i32, i32) {
    %c0_i32 = arith.constant 0 : i32
    %c0_i32_0 = arith.constant 0 : i32
    return %c0_i32, %arg0 : i32, i32
  }
}

module attributes {stable_mosaic.version = 11 : i64} {
  func.func @_conv_gemm_kernel(%arg0: i32, %arg1: memref<16x288xf32, #tpu.memory_space<vmem>>, %arg2: memref<288x256xf32, #tpu.memory_space<vmem>>, %arg3: memref<16x1xf32, #tpu.memory_space<vmem>>, %arg4: memref<16x256xf32, #tpu.memory_space<vmem>>) attributes {dimension_semantics = [#tpu.dimension_semantics<parallel>], iteration_bounds = array<i64: 1>, scalar_prefetch = 0 : i64, scratch_operands = 0 : i64, tpu.core_type = #tpu.core_type<tc>, window_params = [{pipeline_mode = #tpu.pipeline_mode<synchronous>, transform_indices = @transform_0, window_bounds = array<i64: 16, 288>}, {transform_indices = @transform_1, window_bounds = array<i64: 288, 256>}, {pipeline_mode = #tpu.pipeline_mode<synchronous>, transform_indices = @transform_2, window_bounds = array<i64: 16, 1>}, {transform_indices = @transform_3, window_bounds = array<i64: 16, 256>}]} {
    %c0 = arith.constant 0 : index
    %c0_0 = arith.constant 0 : index
    %0 = vector.load %arg1[%c0, %c0_0] : memref<16x288xf32, #tpu.memory_space<vmem>>, vector<16x288xf32>
    %c0_1 = arith.constant 0 : index
    %c0_2 = arith.constant 0 : index
    %1 = vector.load %arg2[%c0_1, %c0_2] : memref<288x256xf32, #tpu.memory_space<vmem>>, vector<288x256xf32>
    %cst = arith.constant dense<0.000000e+00> : vector<16x256xf32>
    %2 = tpu.matmul %0, %1, %cst {dimension_numbers = #tpu.dot_dimension_numbers<[1], [0], [0], [1], [0, 0, 1, 1], [], []>} : vector<16x288xf32>, vector<288x256xf32>, vector<16x256xf32> -> vector<16x256xf32>
    %c0_3 = arith.constant 0 : index
    %c0_4 = arith.constant 0 : index
    %3 = vector.load %arg3[%c0_3, %c0_4] : memref<16x1xf32, #tpu.memory_space<vmem>>, vector<16x1xf32>
    %4 = vector.broadcast %3 : vector<16x1xf32> to vector<16x256xf32>
    %5 = arith.addf %2, %4 : vector<16x256xf32>
    %c0_5 = arith.constant 0 : index
    %c0_6 = arith.constant 0 : index
    %6 = vector.load %arg4[%c0_5, %c0_6] : memref<16x256xf32, #tpu.memory_space<vmem>>, vector<16x256xf32>
    tpu.vector_store %arg4[%c0_5, %c0_6], %5 {strides = array<i32>} : memref<16x256xf32, #tpu.memory_space<vmem>>, vector<16x256xf32>,
    return
  }
  func.func @transform_0(%arg0: i32) -> (i32, i32) {
    %c0_i32 = arith.constant 0 : i32
    %c0_i32_0 = arith.constant 0 : i32
    %c0_i32_1 = arith.constant 0 : i32
    return %c0_i32, %c0_i32_0 : i32, i32
  }
  func.func @transform_1(%arg0: i32) -> (i32, i32) {
    %c0_i32 = arith.constant 0 : i32
    %c0_i32_0 = arith.constant 0 : i32
    return %c0_i32, %arg0 : i32, i32
  }
  func.func @transform_2(%arg0: i32) -> (i32, i32) {
    %c0_i32 = arith.constant 0 : i32
    %c0_i32_0 = arith.constant 0 : i32
    %c0_i32_1 = arith.constant 0 : i32
    return %c0_i32, %c0_i32_0 : i32, i32
  }
  func.func @transform_3(%arg0: i32) -> (i32, i32) {
    %c0_i32 = arith.constant 0 : i32
    %c0_i32_0 = arith.constant 0 : i32
    return %c0_i32, %arg0 : i32, i32
  }
}

module attributes {stable_mosaic.version = 11 : i64} {
  func.func @_conv_gemm_kernel(%arg0: i32, %arg1: memref<32x144xf32, #tpu.memory_space<vmem>>, %arg2: memref<144x128xf32, #tpu.memory_space<vmem>>, %arg3: memref<32x1xf32, #tpu.memory_space<vmem>>, %arg4: memref<32x128xf32, #tpu.memory_space<vmem>>) attributes {dimension_semantics = [#tpu.dimension_semantics<parallel>], iteration_bounds = array<i64: 1>, scalar_prefetch = 0 : i64, scratch_operands = 0 : i64, tpu.core_type = #tpu.core_type<tc>, window_params = [{pipeline_mode = #tpu.pipeline_mode<synchronous>, transform_indices = @transform_0, window_bounds = array<i64: 32, 144>}, {transform_indices = @transform_1, window_bounds = array<i64: 144, 128>}, {pipeline_mode = #tpu.pipeline_mode<synchronous>, transform_indices = @transform_2, window_bounds = array<i64: 32, 1>}, {transform_indices = @transform_3, window_bounds = array<i64: 32, 128>}]} {
    %c0 = arith.constant 0 : index
    %c0_0 = arith.constant 0 : index
    %0 = vector.load %arg1[%c0, %c0_0] : memref<32x144xf32, #tpu.memory_space<vmem>>, vector<32x144xf32>
    %c0_1 = arith.constant 0 : index
    %c0_2 = arith.constant 0 : index
    %1 = vector.load %arg2[%c0_1, %c0_2] : memref<144x128xf32, #tpu.memory_space<vmem>>, vector<144x128xf32>
    %cst = arith.constant dense<0.000000e+00> : vector<32x128xf32>
    %2 = tpu.matmul %0, %1, %cst {dimension_numbers = #tpu.dot_dimension_numbers<[1], [0], [0], [1], [0, 0, 1, 1], [], []>} : vector<32x144xf32>, vector<144x128xf32>, vector<32x128xf32> -> vector<32x128xf32>
    %c0_3 = arith.constant 0 : index
    %c0_4 = arith.constant 0 : index
    %3 = vector.load %arg3[%c0_3, %c0_4] : memref<32x1xf32, #tpu.memory_space<vmem>>, vector<32x1xf32>
    %4 = vector.broadcast %3 : vector<32x1xf32> to vector<32x128xf32>
    %5 = arith.addf %2, %4 : vector<32x128xf32>
    %c0_5 = arith.constant 0 : index
    %c0_6 = arith.constant 0 : index
    %6 = vector.load %arg4[%c0_5, %c0_6] : memref<32x128xf32, #tpu.memory_space<vmem>>, vector<32x128xf32>
    tpu.vector_store %arg4[%c0_5, %c0_6], %5 {strides = array<i32>} : memref<32x128xf32, #tpu.memory_space<vmem>>, vector<32x128xf32>,
    return
  }
  func.func @transform_0(%arg0: i32) -> (i32, i32) {
    %c0_i32 = arith.constant 0 : i32
    %c0_i32_0 = arith.constant 0 : i32
    %c0_i32_1 = arith.constant 0 : i32
    return %c0_i32, %c0_i32_0 : i32, i32
  }
  func.func @transform_1(%arg0: i32) -> (i32, i32) {
    %c0_i32 = arith.constant 0 : i32
    %c0_i32_0 = arith.constant 0 : i32
    return %c0_i32, %arg0 : i32, i32
  }
  func.func @transform_2(%arg0: i32) -> (i32, i32) {
    %c0_i32 = arith.constant 0 : i32
    %c0_i32_0 = arith.constant 0 : i32
    %c0_i32_1 = arith.constant 0 : i32
    return %c0_i32, %c0_i32_0 : i32, i32
  }
  func.func @transform_3(%arg0: i32) -> (i32, i32) {
    %c0_i32 = arith.constant 0 : i32
    %c0_i32_0 = arith.constant 0 : i32
    return %c0_i32, %arg0 : i32, i32
  }
}

module attributes {stable_mosaic.version = 11 : i64} {
  func.func @_conv_gemm_kernel(%arg0: i32, %arg1: memref<32x1568xf32, #tpu.memory_space<vmem>>, %arg2: memref<1568x128xf32, #tpu.memory_space<vmem>>, %arg3: memref<32x1xf32, #tpu.memory_space<vmem>>, %arg4: memref<32x128xf32, #tpu.memory_space<vmem>>) attributes {dimension_semantics = [#tpu.dimension_semantics<parallel>], iteration_bounds = array<i64: 1>, scalar_prefetch = 0 : i64, scratch_operands = 0 : i64, tpu.core_type = #tpu.core_type<tc>, window_params = [{pipeline_mode = #tpu.pipeline_mode<synchronous>, transform_indices = @transform_0, window_bounds = array<i64: 32, 1568>}, {transform_indices = @transform_1, window_bounds = array<i64: 1568, 128>}, {pipeline_mode = #tpu.pipeline_mode<synchronous>, transform_indices = @transform_2, window_bounds = array<i64: 32, 1>}, {transform_indices = @transform_3, window_bounds = array<i64: 32, 128>}]} {
    %c0 = arith.constant 0 : index
    %c0_0 = arith.constant 0 : index
    %0 = vector.load %arg1[%c0, %c0_0] : memref<32x1568xf32, #tpu.memory_space<vmem>>, vector<32x1568xf32>
    %c0_1 = arith.constant 0 : index
    %c0_2 = arith.constant 0 : index
    %1 = vector.load %arg2[%c0_1, %c0_2] : memref<1568x128xf32, #tpu.memory_space<vmem>>, vector<1568x128xf32>
    %cst = arith.constant dense<0.000000e+00> : vector<32x128xf32>
    %2 = tpu.matmul %0, %1, %cst {dimension_numbers = #tpu.dot_dimension_numbers<[1], [0], [0], [1], [0, 0, 1, 1], [], []>} : vector<32x1568xf32>, vector<1568x128xf32>, vector<32x128xf32> -> vector<32x128xf32>
    %c0_3 = arith.constant 0 : index
    %c0_4 = arith.constant 0 : index
    %3 = vector.load %arg3[%c0_3, %c0_4] : memref<32x1xf32, #tpu.memory_space<vmem>>, vector<32x1xf32>
    %4 = vector.broadcast %3 : vector<32x1xf32> to vector<32x128xf32>
    %5 = arith.addf %2, %4 : vector<32x128xf32>
    %c0_5 = arith.constant 0 : index
    %c0_6 = arith.constant 0 : index
    %6 = vector.load %arg4[%c0_5, %c0_6] : memref<32x128xf32, #tpu.memory_space<vmem>>, vector<32x128xf32>
    tpu.vector_store %arg4[%c0_5, %c0_6], %5 {strides = array<i32>} : memref<32x128xf32, #tpu.memory_space<vmem>>, vector<32x128xf32>,
    return
  }
  func.func @transform_0(%arg0: i32) -> (i32, i32) {
    %c0_i32 = arith.constant 0 : i32
    %c0_i32_0 = arith.constant 0 : i32
    %c0_i32_1 = arith.constant 0 : i32
    return %c0_i32, %c0_i32_0 : i32, i32
  }
  func.func @transform_1(%arg0: i32) -> (i32, i32) {
    %c0_i32 = arith.constant 0 : i32
    %c0_i32_0 = arith.constant 0 : i32
    return %c0_i32, %arg0 : i32, i32
  }
  func.func @transform_2(%arg0: i32) -> (i32, i32) {
    %c0_i32 = arith.constant 0 : i32
    %c0_i32_0 = arith.constant 0 : i32
    %c0_i32_1 = arith.constant 0 : i32
    return %c0_i32, %c0_i32_0 : i32, i32
  }
  func.func @transform_3(%arg0: i32) -> (i32, i32) {
    %c0_i32 = arith.constant 0 : i32
    %c0_i32_0 = arith.constant 0 : i32
    return %c0_i32, %arg0 : i32, i32
  }
}

</mosaic_0001>

<bundles_post_ra>
// kernel: model_forward.5
= control target key start
LH: loop header
LB: loop body
LE: loop exit
PB: predicated region body
PF: predicated region fallthrough
CT: control target
= control target key end

     0   :  { %s2306_s12 = smov 0   ;;  %s2308_s13 = smov 0   ;;  %s3499_s0 = inlined_call_operand.vmem [shape: f32[16,152], index: 0, kind: input, shape index: {}]   ;;  %s3500_s1 = inlined_call_operand.vmem [shape: f32[152,4096], index: 1, kind: input, shape index: {}]   ;;  %s3501_s2 = inlined_call_operand.vmem [shape: f32[16,1], index: 2, kind: input, shape index: {}]   ;;  %s3502_s3 = inlined_call_operand.vmem [shape: f32[16,4096], index: 3, kind: output, shape index: {}]  }
   0x1   :  { %s2310_s14 = smov 0  }
   0x2 LB: > { %s1913_s15 = sadd.s32 4294967295, %s2283_s14   ;;  %s2323_s16 = sadd.s32 1, %s2283_s14   ;;  %s2283_s14 = sphi %s2310_s14, %s3506_s14   ;;  %s2279_s13 = sphi %s2308_s13, %s3505_s13   ;;  %s2275_s12 = sphi %s2306_s12, %s3504_s12  }
   0x3   : > { %s38_s17 = ssub.s32 %s2283_s14, %s2323_s16  ;;  %s41_s18 = sadd.s32 1, %s2279_s13 }
   0x4   : > { %p39_p0 = scmp.eq.s32.totalorder %s38_s17, 0  ;;  %p48_p1 = scmp.ne.s32.totalorder %s2279_s13, %s2275_s12 }
   0x5   : > { %p49_p2 = scmp.eq.s32.totalorder %s2283_s14, 0  ;;  %p99_p3 = scmp.eq.s32.totalorder %s1913_s15, 1 }
   0x6   : > { %s2334_s19 = scalar_select %p39_p0, %s2279_s13, %s41_s18  }
   0x7   : > { %p50_p4 = por %p49_p2, %p48_p1  ;;  %p2336_p5 = por %p99_p3, %p48_p1 }
   0x8   : > { %p1916_p6 = scmp.ge.s32.totalorder %s2283_s14, 2 }
   0xa   : > { %127 = sbr.rel (%p1916_p6) target bundleno = 174 (0xae), region = 24 }
  0x11   : > { %130 = sbr.rel (!%p50_p4) target bundleno = 174 (0xae), region = 28  ;;  %s132_s21 = sand.u32 (%p50_p4), 1, %s2279_s13  }
  0x12   : > { %s1942_s22 = sshll.u32 (%p50_p4), %s2283_s14, 7  ;;  %s2232_s23 = smul.u32 (%p50_p4), 2432, %s132_s21 }
  0x13   : > { %s2346_s26 = scalar_lea.vmem (%p50_p4), %s3500_s1, %s1942_s22 }
  0x14   : > { %v150_v0 = vld [vmem:[%s2346_s26] sm:$0xff] (%p50_p4)  ;;  %v152_v1 = vld [vmem:[%s2346_s26 + $0x8] sm:$0xff] (%p50_p4)  ;;  %v154_v2 = vld [vmem:[%s2346_s26 + $0x10] sm:$0xff] (%p50_p4)  ;;  %s2354_s27 = scalar_lea.vmem (%p50_p4), [#allocation2], %s2232_s23 }
  0x15   : > { %v156_v3 = vld [vmem:[%s2346_s26 + $0x18] sm:$0xff] (%p50_p4)  ;;  %v158_v4 = vld [vmem:[%s2346_s26 + $0x20] sm:$0xff] (%p50_p4)  ;;  %v160_v5 = vld [vmem:[%s2346_s26 + $0x28] sm:$0xff] (%p50_p4)  ;;  %151 = vst [vmem:[%s2354_s27] sm:$0xff] (%p50_p4), %v150_v0 }
  0x16   : > { %153 = vst [vmem:[%s2354_s27 + $0x8] sm:$0xff] (%p50_p4), %v152_v1  ;;  %155 = vst [vmem:[%s2354_s27 + $0x10] sm:$0xff] (%p50_p4), %v154_v2  ;;  %v162_v6 = vld [vmem:[%s2346_s26 + $0x30] sm:$0xff] (%p50_p4)  ;;  %v164_v7 = vld [vmem:[%s2346_s26 + $0x38] sm:$0xff] (%p50_p4) }
  0x17   : > { %157 = vst [vmem:[%s2354_s27 + $0x18] sm:$0xff] (%p50_p4), %v156_v3  ;;  %159 = vst [vmem:[%s2354_s27 + $0x20] sm:$0xff] (%p50_p4), %v158_v4  ;;  %v166_v8 = vld [vmem:[%s2346_s26 + $0x40] sm:$0xff] (%p50_p4)  ;;  %v168_v9 = vld [vmem:[%s2346_s26 + $0x48] sm:$0xff] (%p50_p4) }
  0x18   : > { %161 = vst [vmem:[%s2354_s27 + $0x28] sm:$0xff] %v160_v5  ;;  %163 = vst [vmem:[%s2354_s27 + $0x30] sm:$0xff] %v162_v6  ;;  %v170_v10 = vld [vmem:[%s2346_s26 + $0x50] sm:$0xff]  ;;  %v172_v11 = vld [vmem:[%s2346_s26 + $0x58] sm:$0xff] }
  0x19   : > { %165 = vst [vmem:[%s2354_s27 + $0x38] sm:$0xff] %v164_v7  ;;  %167 = vst [vmem:[%s2354_s27 + $0x40] sm:$0xff] %v166_v8  ;;  %v174_v12 = vld [vmem:[%s2346_s26 + $0x60] sm:$0xff]  ;;  %v176_v13 = vld [vmem:[%s2346_s26 + $0x68] sm:$0xff] }
  0x1a   : > { %169 = vst [vmem:[%s2354_s27 + $0x48] sm:$0xff] %v168_v9  ;;  %171 = vst [vmem:[%s2354_s27 + $0x50] sm:$0xff] %v170_v10  ;;  %v178_v14 = vld [vmem:[%s2346_s26 + $0x70] sm:$0xff]  ;;  %v180_v15 = vld [vmem:[%s2346_s26 + $0x78] sm:$0xff] }
  0x1b   : > { %173 = vst [vmem:[%s2354_s27 + $0x58] sm:$0xff] %v172_v11  ;;  %175 = vst [vmem:[%s2354_s27 + $0x60] sm:$0xff] %v174_v12  ;;  %v182_v16 = vld [vmem:[%s2346_s26 + $0x100] sm:$0xff]  ;;  %v184_v17 = vld [vmem:[%s2346_s26 + $0x108] sm:$0xff] }
  0x1c   : > { %177 = vst [vmem:[%s2354_s27 + $0x68] sm:$0xff] %v176_v13  ;;  %179 = vst [vmem:[%s2354_s27 + $0x70] sm:$0xff] %v178_v14  ;;  %v186_v18 = vld [vmem:[%s2346_s26 + $0x110] sm:$0xff]  ;;  %v188_v19 = vld [vmem:[%s2346_s26 + $0x118] sm:$0xff] }
  0x1d   : > { %181 = vst [vmem:[%s2354_s27 + $0x78] sm:$0xff] %v180_v15  ;;  %183 = vst [vmem:[%s2354_s27 + $0x80] sm:$0xff] %v182_v16  ;;  %v190_v20 = vld [vmem:[%s2346_s26 + $0x120] sm:$0xff]  ;;  %v192_v21 = vld [vmem:[%s2346_s26 + $0x128] sm:$0xff] }
  0x1e   : > { %185 = vst [vmem:[%s2354_s27 + $0x88] sm:$0xff] %v184_v17  ;;  %187 = vst [vmem:[%s2354_s27 + $0x90] sm:$0xff] %v186_v18  ;;  %v194_v22 = vld [vmem:[%s2346_s26 + $0x130] sm:$0xff]  ;;  %v196_v23 = vld [vmem:[%s2346_s26 + $0x138] sm:$0xff] }
  0x1f   : > { %189 = vst [vmem:[%s2354_s27 + $0x98] sm:$0xff] %v188_v19  ;;  %191 = vst [vmem:[%s2354_s27 + $0xa0] sm:$0xff] %v190_v20  ;;  %v198_v24 = vld [vmem:[%s2346_s26 + $0x140] sm:$0xff]  ;;  %v200_v25 = vld [vmem:[%s2346_s26 + $0x148] sm:$0xff] }
  0x20   : > { %193 = vst [vmem:[%s2354_s27 + $0xa8] sm:$0xff] %v192_v21  ;;  %195 = vst [vmem:[%s2354_s27 + $0xb0] sm:$0xff] %v194_v22  ;;  %v202_v26 = vld [vmem:[%s2346_s26 + $0x150] sm:$0xff]  ;;  %v204_v27 = vld [vmem:[%s2346_s26 + $0x158] sm:$0xff] }
  0x21   : > { %197 = vst [vmem:[%s2354_s27 + $0xb8] sm:$0xff] %v196_v23  ;;  %199 = vst [vmem:[%s2354_s27 + $0xc0] sm:$0xff] %v198_v24  ;;  %v206_v28 = vld [vmem:[%s2346_s26 + $0x160] sm:$0xff]  ;;  %v208_v29 = vld [vmem:[%s2346_s26 + $0x168] sm:$0xff] }
  0x22   : > { %201 = vst [vmem:[%s2354_s27 + $0xc8] sm:$0xff] %v200_v25  ;;  %203 = vst [vmem:[%s2354_s27 + $0xd0] sm:$0xff] %v202_v26  ;;  %v210_v30 = vld [vmem:[%s2346_s26 + $0x170] sm:$0xff]  ;;  %v212_v31 = vld [vmem:[%s2346_s26 + $0x178] sm:$0xff] }
  0x23   : > { %205 = vst [vmem:[%s2354_s27 + $0xd8] sm:$0xff] %v204_v27  ;;  %207 = vst [vmem:[%s2354_s27 + $0xe0] sm:$0xff] %v206_v28  ;;  %v214_v32 = vld [vmem:[%s2346_s26 + $0x200] sm:$0xff]  ;;  %v216_v33 = vld [vmem:[%s2346_s26 + $0x208] sm:$0xff] }
  0x24   : > { %209 = vst [vmem:[%s2354_s27 + $0xe8] sm:$0xff] %v208_v29  ;;  %211 = vst [vmem:[%s2354_s27 + $0xf0] sm:$0xff] %v210_v30  ;;  %v218_v34 = vld [vmem:[%s2346_s26 + $0x210] sm:$0xff]  ;;  %v220_v35 = vld [vmem:[%s2346_s26 + $0x218] sm:$0xff] }
  0x25   : > { %213 = vst [vmem:[%s2354_s27 + $0xf8] sm:$0xff] %v212_v31  ;;  %215 = vst [vmem:[%s2354_s27 + $0x100] sm:$0xff] %v214_v32  ;;  %v222_v36 = vld [vmem:[%s2346_s26 + $0x220] sm:$0xff]  ;;  %v224_v37 = vld [vmem:[%s2346_s26 + $0x228] sm:$0xff] }
  0x26   : > { %217 = vst [vmem:[%s2354_s27 + $0x108] sm:$0xff] %v216_v33  ;;  %219 = vst [vmem:[%s2354_s27 + $0x110] sm:$0xff] %v218_v34  ;;  %v226_v38 = vld [vmem:[%s2346_s26 + $0x230] sm:$0xff]  ;;  %v228_v39 = vld [vmem:[%s2346_s26 + $0x238] sm:$0xff] }
  0x27   : > { %221 = vst [vmem:[%s2354_s27 + $0x118] sm:$0xff] %v220_v35  ;;  %223 = vst [vmem:[%s2354_s27 + $0x120] sm:$0xff] %v222_v36  ;;  %v230_v40 = vld [vmem:[%s2346_s26 + $0x240] sm:$0xff]  ;;  %v232_v41 = vld [vmem:[%s2346_s26 + $0x248] sm:$0xff] }
  0x28   : > { %225 = vst [vmem:[%s2354_s27 + $0x128] sm:$0xff] %v224_v37  ;;  %227 = vst [vmem:[%s2354_s27 + $0x130] sm:$0xff] %v226_v38  ;;  %v234_v42 = vld [vmem:[%s2346_s26 + $0x250] sm:$0xff]  ;;  %v236_v43 = vld [vmem:[%s2346_s26 + $0x258] sm:$0xff] }
  0x29   : > { %229 = vst [vmem:[%s2354_s27 + $0x138] sm:$0xff] %v228_v39  ;;  %231 = vst [vmem:[%s2354_s27 + $0x140] sm:$0xff] %v230_v40  ;;  %v238_v44 = vld [vmem:[%s2346_s26 + $0x260] sm:$0xff]  ;;  %v240_v45 = vld [vmem:[%s2346_s26 + $0x268] sm:$0xff] }
  0x2a   : > { %233 = vst [vmem:[%s2354_s27 + $0x148] sm:$0xff] %v232_v41  ;;  %235 = vst [vmem:[%s2354_s27 + $0x150] sm:$0xff] %v234_v42  ;;  %v242_v46 = vld [vmem:[%s2346_s26 + $0x270] sm:$0xff]  ;;  %v244_v47 = vld [vmem:[%s2346_s26 + $0x278] sm:$0xff] }
  0x2b   : > { %237 = vst [vmem:[%s2354_s27 + $0x158] sm:$0xff] %v236_v43  ;;  %239 = vst [vmem:[%s2354_s27 + $0x160] sm:$0xff] %v238_v44  ;;  %v246_v48 = vld [vmem:[%s2346_s26 + $0x300] sm:$0xff]  ;;  %v248_v49 = vld [vmem:[%s2346_s26 + $0x308] sm:$0xff] }
  0x2c   : > { %241 = vst [vmem:[%s2354_s27 + $0x168] sm:$0xff] %v240_v45  ;;  %243 = vst [vmem:[%s2354_s27 + $0x170] sm:$0xff] %v242_v46  ;;  %v250_v50 = vld [vmem:[%s2346_s26 + $0x310] sm:$0xff]  ;;  %v252_v51 = vld [vmem:[%s2346_s26 + $0x318] sm:$0xff] }
  0x2d   : > { %245 = vst [vmem:[%s2354_s27 + $0x178] sm:$0xff] %v244_v47  ;;  %247 = vst [vmem:[%s2354_s27 + $0x180] sm:$0xff] %v246_v48  ;;  %v254_v52 = vld [vmem:[%s2346_s26 + $0x320] sm:$0xff]  ;;  %v256_v53 = vld [vmem:[%s2346_s26 + $0x328] sm:$0xff] }
  0x2e   : > { %249 = vst [vmem:[%s2354_s27 + $0x188] sm:$0xff] %v248_v49  ;;  %251 = vst [vmem:[%s2354_s27 + $0x190] sm:$0xff] %v250_v50  ;;  %v258_v54 = vld [vmem:[%s2346_s26 + $0x330] sm:$0xff]  ;;  %v260_v55 = vld [vmem:[%s2346_s26 + $0x338] sm:$0xff] }
  0x2f   : > { %253 = vst [vmem:[%s2354_s27 + $0x198] sm:$0xff] %v252_v51  ;;  %255 = vst [vmem:[%s2354_s27 + $0x1a0] sm:$0xff] %v254_v52  ;;  %v262_v56 = vld [vmem:[%s2346_s26 + $0x340] sm:$0xff]  ;;  %v264_v57 = vld [vmem:[%s2346_s26 + $0x348] sm:$0xff] }
  0x30   : > { %257 = vst [vmem:[%s2354_s27 + $0x1a8] sm:$0xff] %v256_v53  ;;  %259 = vst [vmem:[%s2354_s27 + $0x1b0] sm:$0xff] %v258_v54  ;;  %v266_v58 = vld [vmem:[%s2346_s26 + $0x350] sm:$0xff]  ;;  %v268_v59 = vld [vmem:[%s2346_s26 + $0x358] sm:$0xff] }
  0x31   : > { %261 = vst [vmem:[%s2354_s27 + $0x1b8] sm:$0xff] %v260_v55  ;;  %263 = vst [vmem:[%s2354_s27 + $0x1c0] sm:$0xff] %v262_v56  ;;  %v270_v60 = vld [vmem:[%s2346_s26 + $0x360] sm:$0xff]  ;;  %v272_v61 = vld [vmem:[%s2346_s26 + $0x368] sm:$0xff] }
  0x32   : > { %265 = vst [vmem:[%s2354_s27 + $0x1c8] sm:$0xff] %v264_v57  ;;  %267 = vst [vmem:[%s2354_s27 + $0x1d0] sm:$0xff] %v266_v58  ;;  %v274_v62 = vld [vmem:[%s2346_s26 + $0x370] sm:$0xff]  ;;  %v276_v63 = vld [vmem:[%s2346_s26 + $0x378] sm:$0xff] }
  0x33   : > { %269 = vst [vmem:[%s2354_s27 + $0x1d8] sm:$0xff] %v268_v59  ;;  %271 = vst [vmem:[%s2354_s27 + $0x1e0] sm:$0xff] %v270_v60  ;;  %v278_v0 = vld [vmem:[%s2346_s26 + $0x400] sm:$0xff]  ;;  %v280_v1 = vld [vmem:[%s2346_s26 + $0x408] sm:$0xff] }
  0x34   : > { %273 = vst [vmem:[%s2354_s27 + $0x1e8] sm:$0xff] %v272_v61  ;;  %275 = vst [vmem:[%s2354_s27 + $0x1f0] sm:$0xff] %v274_v62  ;;  %v282_v2 = vld [vmem:[%s2346_s26 + $0x410] sm:$0xff]  ;;  %v284_v3 = vld [vmem:[%s2346_s26 + $0x418] sm:$0xff] }
  0x35   : > { %277 = vst [vmem:[%s2354_s27 + $0x1f8] sm:$0xff] %v276_v63  ;;  %279 = vst [vmem:[%s2354_s27 + $0x200] sm:$0xff] %v278_v0  ;;  %v286_v4 = vld [vmem:[%s2346_s26 + $0x420] sm:$0xff]  ;;  %v288_v5 = vld [vmem:[%s2346_s26 + $0x428] sm:$0xff] }
  0x36   : > { %281 = vst [vmem:[%s2354_s27 + $0x208] sm:$0xff] %v280_v1  ;;  %283 = vst [vmem:[%s2354_s27 + $0x210] sm:$0xff] %v282_v2  ;;  %v290_v6 = vld [vmem:[%s2346_s26 + $0x430] sm:$0xff]  ;;  %v292_v7 = vld [vmem:[%s2346_s26 + $0x438] sm:$0xff] }
  0x37   : > { %285 = vst [vmem:[%s2354_s27 + $0x218] sm:$0xff] %v284_v3  ;;  %287 = vst [vmem:[%s2354_s27 + $0x220] sm:$0xff] %v286_v4  ;;  %v294_v8 = vld [vmem:[%s2346_s26 + $0x440] sm:$0xff]  ;;  %v296_v9 = vld [vmem:[%s2346_s26 + $0x448] sm:$0xff] }
  0x38   : > { %289 = vst [vmem:[%s2354_s27 + $0x228] sm:$0xff] %v288_v5  ;;  %291 = vst [vmem:[%s2354_s27 + $0x230] sm:$0xff] %v290_v6  ;;  %v298_v10 = vld [vmem:[%s2346_s26 + $0x450] sm:$0xff]  ;;  %v300_v11 = vld [vmem:[%s2346_s26 + $0x458] sm:$0xff] }
  0x39   : > { %293 = vst [vmem:[%s2354_s27 + $0x238] sm:$0xff] %v292_v7  ;;  %295 = vst [vmem:[%s2354_s27 + $0x240] sm:$0xff] %v294_v8  ;;  %v302_v12 = vld [vmem:[%s2346_s26 + $0x460] sm:$0xff]  ;;  %v304_v13 = vld [vmem:[%s2346_s26 + $0x468] sm:$0xff] }
  0x3a   : > { %297 = vst [vmem:[%s2354_s27 + $0x248] sm:$0xff] %v296_v9  ;;  %299 = vst [vmem:[%s2354_s27 + $0x250] sm:$0xff] %v298_v10  ;;  %v306_v14 = vld [vmem:[%s2346_s26 + $0x470] sm:$0xff]  ;;  %v308_v15 = vld [vmem:[%s2346_s26 + $0x478] sm:$0xff] }
  0x3b   : > { %301 = vst [vmem:[%s2354_s27 + $0x258] sm:$0xff] %v300_v11  ;;  %303 = vst [vmem:[%s2354_s27 + $0x260] sm:$0xff] %v302_v12  ;;  %v310_v16 = vld [vmem:[%s2346_s26 + $0x500] sm:$0xff]  ;;  %v312_v17 = vld [vmem:[%s2346_s26 + $0x508] sm:$0xff] }
  0x3c   : > { %305 = vst [vmem:[%s2354_s27 + $0x268] sm:$0xff] %v304_v13  ;;  %307 = vst [vmem:[%s2354_s27 + $0x270] sm:$0xff] %v306_v14  ;;  %v314_v18 = vld [vmem:[%s2346_s26 + $0x510] sm:$0xff]  ;;  %v316_v19 = vld [vmem:[%s2346_s26 + $0x518] sm:$0xff] }
  0x3d   : > { %309 = vst [vmem:[%s2354_s27 + $0x278] sm:$0xff] %v308_v15  ;;  %311 = vst [vmem:[%s2354_s27 + $0x280] sm:$0xff] %v310_v16  ;;  %v318_v20 = vld [vmem:[%s2346_s26 + $0x520] sm:$0xff]  ;;  %v320_v21 = vld [vmem:[%s2346_s26 + $0x528] sm:$0xff] }
  0x3e   : > { %313 = vst [vmem:[%s2354_s27 + $0x288] sm:$0xff] %v312_v17  ;;  %315 = vst [vmem:[%s2354_s27 + $0x290] sm:$0xff] %v314_v18  ;;  %v322_v22 = vld [vmem:[%s2346_s26 + $0x530] sm:$0xff]  ;;  %v324_v23 = vld [vmem:[%s2346_s26 + $0x538] sm:$0xff] }
  0x3f   : > { %317 = vst [vmem:[%s2354_s27 + $0x298] sm:$0xff] %v316_v19  ;;  %319 = vst [vmem:[%s2354_s27 + $0x2a0] sm:$0xff] %v318_v20  ;;  %v326_v24 = vld [vmem:[%s2346_s26 + $0x540] sm:$0xff]  ;;  %v328_v25 = vld [vmem:[%s2346_s26 + $0x548] sm:$0xff] }
  0x40   : > { %321 = vst [vmem:[%s2354_s27 + $0x2a8] sm:$0xff] %v320_v21  ;;  %323 = vst [vmem:[%s2354_s27 + $0x2b0] sm:$0xff] %v322_v22  ;;  %v330_v26 = vld [vmem:[%s2346_s26 + $0x550] sm:$0xff]  ;;  %v332_v27 = vld [vmem:[%s2346_s26 + $0x558] sm:$0xff] }
  0x41   : > { %325 = vst [vmem:[%s2354_s27 + $0x2b8] sm:$0xff] %v324_v23  ;;  %327 = vst [vmem:[%s2354_s27 + $0x2c0] sm:$0xff] %v326_v24  ;;  %v334_v28 = vld [vmem:[%s2346_s26 + $0x560] sm:$0xff]  ;;  %v336_v29 = vld [vmem:[%s2346_s26 + $0x568] sm:$0xff] }
  0x42   : > { %329 = vst [vmem:[%s2354_s27 + $0x2c8] sm:$0xff] %v328_v25  ;;  %331 = vst [vmem:[%s2354_s27 + $0x2d0] sm:$0xff] %v330_v26  ;;  %v338_v30 = vld [vmem:[%s2346_s26 + $0x570] sm:$0xff]  ;;  %v340_v31 = vld [vmem:[%s2346_s26 + $0x578] sm:$0xff] }
  0x43   : > { %333 = vst [vmem:[%s2354_s27 + $0x2d8] sm:$0xff] %v332_v27  ;;  %335 = vst [vmem:[%s2354_s27 + $0x2e0] sm:$0xff] %v334_v28  ;;  %v342_v32 = vld [vmem:[%s2346_s26 + $0x600] sm:$0xff]  ;;  %v344_v33 = vld [vmem:[%s2346_s26 + $0x608] sm:$0xff] }
  0x44   : > { %337 = vst [vmem:[%s2354_s27 + $0x2e8] sm:$0xff] %v336_v29  ;;  %339 = vst [vmem:[%s2354_s27 + $0x2f0] sm:$0xff] %v338_v30  ;;  %v346_v34 = vld [vmem:[%s2346_s26 + $0x610] sm:$0xff]  ;;  %v348_v35 = vld [vmem:[%s2346_s26 + $0x618] sm:$0xff] }
  0x45   : > { %341 = vst [vmem:[%s2354_s27 + $0x2f8] sm:$0xff] %v340_v31  ;;  %343 = vst [vmem:[%s2354_s27 + $0x300] sm:$0xff] %v342_v32  ;;  %v350_v36 = vld [vmem:[%s2346_s26 + $0x620] sm:$0xff]  ;;  %v352_v37 = vld [vmem:[%s2346_s26 + $0x628] sm:$0xff] }
  0x46   : > { %345 = vst [vmem:[%s2354_s27 + $0x308] sm:$0xff] %v344_v33  ;;  %347 = vst [vmem:[%s2354_s27 + $0x310] sm:$0xff] %v346_v34  ;;  %v354_v38 = vld [vmem:[%s2346_s26 + $0x630] sm:$0xff]  ;;  %v356_v39 = vld [vmem:[%s2346_s26 + $0x638] sm:$0xff] }
  0x47   : > { %349 = vst [vmem:[%s2354_s27 + $0x318] sm:$0xff] %v348_v35  ;;  %351 = vst [vmem:[%s2354_s27 + $0x320] sm:$0xff] %v350_v36  ;;  %v358_v40 = vld [vmem:[%s2346_s26 + $0x640] sm:$0xff]  ;;  %v360_v41 = vld [vmem:[%s2346_s26 + $0x648] sm:$0xff] }
  0x48   : > { %353 = vst [vmem:[%s2354_s27 + $0x328] sm:$0xff] %v352_v37  ;;  %355 = vst [vmem:[%s2354_s27 + $0x330] sm:$0xff] %v354_v38  ;;  %v362_v42 = vld [vmem:[%s2346_s26 + $0x650] sm:$0xff]  ;;  %v364_v43 = vld [vmem:[%s2346_s26 + $0x658] sm:$0xff] }
  0x49   : > { %357 = vst [vmem:[%s2354_s27 + $0x338] sm:$0xff] %v356_v39  ;;  %359 = vst [vmem:[%s2354_s27 + $0x340] sm:$0xff] %v358_v40  ;;  %v366_v44 = vld [vmem:[%s2346_s26 + $0x660] sm:$0xff]  ;;  %v368_v45 = vld [vmem:[%s2346_s26 + $0x668] sm:$0xff] }
  0x4a   : > { %361 = vst [vmem:[%s2354_s27 + $0x348] sm:$0xff] %v360_v41  ;;  %363 = vst [vmem:[%s2354_s27 + $0x350] sm:$0xff] %v362_v42  ;;  %v370_v46 = vld [vmem:[%s2346_s26 + $0x670] sm:$0xff]  ;;  %v372_v47 = vld [vmem:[%s2346_s26 + $0x678] sm:$0xff] }
  0x4b   : > { %365 = vst [vmem:[%s2354_s27 + $0x358] sm:$0xff] %v364_v43  ;;  %367 = vst [vmem:[%s2354_s27 + $0x360] sm:$0xff] %v366_v44  ;;  %v374_v48 = vld [vmem:[%s2346_s26 + $0x700] sm:$0xff]  ;;  %v376_v49 = vld [vmem:[%s2346_s26 + $0x708] sm:$0xff] }
  0x4c   : > { %369 = vst [vmem:[%s2354_s27 + $0x368] sm:$0xff] %v368_v45  ;;  %371 = vst [vmem:[%s2354_s27 + $0x370] sm:$0xff] %v370_v46  ;;  %v378_v50 = vld [vmem:[%s2346_s26 + $0x710] sm:$0xff]  ;;  %v380_v51 = vld [vmem:[%s2346_s26 + $0x718] sm:$0xff] }
  0x4d   : > { %373 = vst [vmem:[%s2354_s27 + $0x378] sm:$0xff] %v372_v47  ;;  %375 = vst [vmem:[%s2354_s27 + $0x380] sm:$0xff] %v374_v48  ;;  %v382_v52 = vld [vmem:[%s2346_s26 + $0x720] sm:$0xff]  ;;  %v384_v53 = vld [vmem:[%s2346_s26 + $0x728] sm:$0xff] }
  0x4e   : > { %377 = vst [vmem:[%s2354_s27 + $0x388] sm:$0xff] %v376_v49  ;;  %379 = vst [vmem:[%s2354_s27 + $0x390] sm:$0xff] %v378_v50  ;;  %v386_v54 = vld [vmem:[%s2346_s26 + $0x730] sm:$0xff]  ;;  %v388_v55 = vld [vmem:[%s2346_s26 + $0x738] sm:$0xff] }
  0x4f   : > { %381 = vst [vmem:[%s2354_s27 + $0x398] sm:$0xff] %v380_v51  ;;  %383 = vst [vmem:[%s2354_s27 + $0x3a0] sm:$0xff] %v382_v52  ;;  %v390_v56 = vld [vmem:[%s2346_s26 + $0x740] sm:$0xff]  ;;  %v392_v57 = vld [vmem:[%s2346_s26 + $0x748] sm:$0xff] }
  0x50   : > { %385 = vst [vmem:[%s2354_s27 + $0x3a8] sm:$0xff] %v384_v53  ;;  %387 = vst [vmem:[%s2354_s27 + $0x3b0] sm:$0xff] %v386_v54  ;;  %v394_v58 = vld [vmem:[%s2346_s26 + $0x750] sm:$0xff]  ;;  %v396_v59 = vld [vmem:[%s2346_s26 + $0x758] sm:$0xff] }
  0x51   : > { %389 = vst [vmem:[%s2354_s27 + $0x3b8] sm:$0xff] %v388_v55  ;;  %391 = vst [vmem:[%s2354_s27 + $0x3c0] sm:$0xff] %v390_v56  ;;  %v398_v60 = vld [vmem:[%s2346_s26 + $0x760] sm:$0xff]  ;;  %v400_v61 = vld [vmem:[%s2346_s26 + $0x768] sm:$0xff] }
  0x52   : > { %393 = vst [vmem:[%s2354_s27 + $0x3c8] sm:$0xff] %v392_v57  ;;  %395 = vst [vmem:[%s2354_s27 + $0x3d0] sm:$0xff] %v394_v58  ;;  %v402_v62 = vld [vmem:[%s2346_s26 + $0x770] sm:$0xff]  ;;  %v404_v63 = vld [vmem:[%s2346_s26 + $0x778] sm:$0xff] }
  0x53   : > { %397 = vst [vmem:[%s2354_s27 + $0x3d8] sm:$0xff] %v396_v59  ;;  %399 = vst [vmem:[%s2354_s27 + $0x3e0] sm:$0xff] %v398_v60  ;;  %v406_v0 = vld [vmem:[%s2346_s26 + $0x800] sm:$0xff]  ;;  %v408_v1 = vld [vmem:[%s2346_s26 + $0x808] sm:$0xff] }
  0x54   : > { %401 = vst [vmem:[%s2354_s27 + $0x3e8] sm:$0xff] %v400_v61  ;;  %403 = vst [vmem:[%s2354_s27 + $0x3f0] sm:$0xff] %v402_v62  ;;  %v410_v2 = vld [vmem:[%s2346_s26 + $0x810] sm:$0xff]  ;;  %v412_v3 = vld [vmem:[%s2346_s26 + $0x818] sm:$0xff] }
  0x55   : > { %405 = vst [vmem:[%s2354_s27 + $0x3f8] sm:$0xff] %v404_v63  ;;  %407 = vst [vmem:[%s2354_s27 + $0x400] sm:$0xff] %v406_v0  ;;  %v414_v4 = vld [vmem:[%s2346_s26 + $0x820] sm:$0xff]  ;;  %v416_v5 = vld [vmem:[%s2346_s26 + $0x828] sm:$0xff] }
  0x56   : > { %409 = vst [vmem:[%s2354_s27 + $0x408] sm:$0xff] %v408_v1  ;;  %411 = vst [vmem:[%s2354_s27 + $0x410] sm:$0xff] %v410_v2  ;;  %v418_v6 = vld [vmem:[%s2346_s26 + $0x830] sm:$0xff]  ;;  %v420_v7 = vld [vmem:[%s2346_s26 + $0x838] sm:$0xff] }
  0x57   : > { %413 = vst [vmem:[%s2354_s27 + $0x418] sm:$0xff] %v412_v3  ;;  %415 = vst [vmem:[%s2354_s27 + $0x420] sm:$0xff] %v414_v4  ;;  %v422_v8 = vld [vmem:[%s2346_s26 + $0x840] sm:$0xff]  ;;  %v424_v9 = vld [vmem:[%s2346_s26 + $0x848] sm:$0xff] }
  0x58   : > { %417 = vst [vmem:[%s2354_s27 + $0x428] sm:$0xff] %v416_v5  ;;  %419 = vst [vmem:[%s2354_s27 + $0x430] sm:$0xff] %v418_v6  ;;  %v426_v10 = vld [vmem:[%s2346_s26 + $0x850] sm:$0xff]  ;;  %v428_v11 = vld [vmem:[%s2346_s26 + $0x858] sm:$0xff] }
  0x59   : > { %421 = vst [vmem:[%s2354_s27 + $0x438] sm:$0xff] %v420_v7  ;;  %423 = vst [vmem:[%s2354_s27 + $0x440] sm:$0xff] %v422_v8  ;;  %v430_v12 = vld [vmem:[%s2346_s26 + $0x860] sm:$0xff]  ;;  %v432_v13 = vld [vmem:[%s2346_s26 + $0x868] sm:$0xff] }
  0x5a   : > { %425 = vst [vmem:[%s2354_s27 + $0x448] sm:$0xff] %v424_v9  ;;  %427 = vst [vmem:[%s2354_s27 + $0x450] sm:$0xff] %v426_v10  ;;  %v434_v14 = vld [vmem:[%s2346_s26 + $0x870] sm:$0xff]  ;;  %v436_v15 = vld [vmem:[%s2346_s26 + $0x878] sm:$0xff] }
  0x5b   : > { %429 = vst [vmem:[%s2354_s27 + $0x458] sm:$0xff] %v428_v11  ;;  %431 = vst [vmem:[%s2354_s27 + $0x460] sm:$0xff] %v430_v12  ;;  %v438_v16 = vld [vmem:[%s2346_s26 + $0x900] sm:$0xff]  ;;  %v440_v17 = vld [vmem:[%s2346_s26 + $0x908] sm:$0xff] }
  0x5c   : > { %433 = vst [vmem:[%s2354_s27 + $0x468] sm:$0xff] %v432_v13  ;;  %435 = vst [vmem:[%s2354_s27 + $0x470] sm:$0xff] %v434_v14  ;;  %v442_v18 = vld [vmem:[%s2346_s26 + $0x910] sm:$0xff]  ;;  %v444_v19 = vld [vmem:[%s2346_s26 + $0x918] sm:$0xff] }
  0x5d   : > { %437 = vst [vmem:[%s2354_s27 + $0x478] sm:$0xff] %v436_v15  ;;  %439 = vst [vmem:[%s2354_s27 + $0x480] sm:$0xff] %v438_v16  ;;  %v446_v20 = vld [vmem:[%s2346_s26 + $0x920] sm:$0xff]  ;;  %v448_v21 = vld [vmem:[%s2346_s26 + $0x928] sm:$0xff] }
  0x5e   : > { %441 = vst [vmem:[%s2354_s27 + $0x488] sm:$0xff] %v440_v17  ;;  %443 = vst [vmem:[%s2354_s27 + $0x490] sm:$0xff] %v442_v18  ;;  %v450_v22 = vld [vmem:[%s2346_s26 + $0x930] sm:$0xff]  ;;  %v452_v23 = vld [vmem:[%s2346_s26 + $0x938] sm:$0xff] }
  0x5f   : > { %445 = vst [vmem:[%s2354_s27 + $0x498] sm:$0xff] %v444_v19  ;;  %447 = vst [vmem:[%s2354_s27 + $0x4a0] sm:$0xff] %v446_v20  ;;  %v454_v24 = vld [vmem:[%s2346_s26 + $0x940] sm:$0xff]  ;;  %v456_v25 = vld [vmem:[%s2346_s26 + $0x948] sm:$0xff] }
  0x60   : > { %449 = vst [vmem:[%s2354_s27 + $0x4a8] sm:$0xff] %v448_v21  ;;  %451 = vst [vmem:[%s2354_s27 + $0x4b0] sm:$0xff] %v450_v22  ;;  %v458_v26 = vld [vmem:[%s2346_s26 + $0x950] sm:$0xff]  ;;  %v460_v27 = vld [vmem:[%s2346_s26 + $0x958] sm:$0xff] }
  0x61   : > { %453 = vst [vmem:[%s2354_s27 + $0x4b8] sm:$0xff] %v452_v23  ;;  %455 = vst [vmem:[%s2354_s27 + $0x4c0] sm:$0xff] %v454_v24  ;;  %v462_v28 = vld [vmem:[%s2346_s26 + $0x960] sm:$0xff]  ;;  %v464_v29 = vld [vmem:[%s2346_s26 + $0x968] sm:$0xff] }
  0x62   : > { %457 = vst [vmem:[%s2354_s27 + $0x4c8] sm:$0xff] %v456_v25  ;;  %459 = vst [vmem:[%s2354_s27 + $0x4d0] sm:$0xff] %v458_v26  ;;  %v466_v30 = vld [vmem:[%s2346_s26 + $0x970] sm:$0xff]  ;;  %v468_v31 = vld [vmem:[%s2346_s26 + $0x978] sm:$0xff] }
  0x63   : > { %461 = vst [vmem:[%s2354_s27 + $0x4d8] sm:$0xff] %v460_v27  ;;  %463 = vst [vmem:[%s2354_s27 + $0x4e0] sm:$0xff] %v462_v28  ;;  %v470_v32 = vld [vmem:[%s2346_s26 + $0xa00] sm:$0xff]  ;;  %v472_v33 = vld [vmem:[%s2346_s26 + $0xa08] sm:$0xff] }
  0x64   : > { %465 = vst [vmem:[%s2354_s27 + $0x4e8] sm:$0xff] %v464_v29  ;;  %467 = vst [vmem:[%s2354_s27 + $0x4f0] sm:$0xff] %v466_v30  ;;  %v474_v34 = vld [vmem:[%s2346_s26 + $0xa10] sm:$0xff]  ;;  %v476_v35 = vld [vmem:[%s2346_s26 + $0xa18] sm:$0xff] }
  0x65   : > { %469 = vst [vmem:[%s2354_s27 + $0x4f8] sm:$0xff] %v468_v31  ;;  %471 = vst [vmem:[%s2354_s27 + $0x500] sm:$0xff] %v470_v32  ;;  %v478_v36 = vld [vmem:[%s2346_s26 + $0xa20] sm:$0xff]  ;;  %v480_v37 = vld [vmem:[%s2346_s26 + $0xa28] sm:$0xff] }
  0x66   : > { %473 = vst [vmem:[%s2354_s27 + $0x508] sm:$0xff] %v472_v33  ;;  %475 = vst [vmem:[%s2354_s27 + $0x510] sm:$0xff] %v474_v34  ;;  %v482_v38 = vld [vmem:[%s2346_s26 + $0xa30] sm:$0xff]  ;;  %v484_v39 = vld [vmem:[%s2346_s26 + $0xa38] sm:$0xff] }
  0x67   : > { %477 = vst [vmem:[%s2354_s27 + $0x518] sm:$0xff] %v476_v35  ;;  %479 = vst [vmem:[%s2354_s27 + $0x520] sm:$0xff] %v478_v36  ;;  %v486_v40 = vld [vmem:[%s2346_s26 + $0xa40] sm:$0xff]  ;;  %v488_v41 = vld [vmem:[%s2346_s26 + $0xa48] sm:$0xff] }
  0x68   : > { %481 = vst [vmem:[%s2354_s27 + $0x528] sm:$0xff] %v480_v37  ;;  %483 = vst [vmem:[%s2354_s27 + $0x530] sm:$0xff] %v482_v38  ;;  %v490_v42 = vld [vmem:[%s2346_s26 + $0xa50] sm:$0xff]  ;;  %v492_v43 = vld [vmem:[%s2346_s26 + $0xa58] sm:$0xff] }
  0x69   : > { %485 = vst [vmem:[%s2354_s27 + $0x538] sm:$0xff] %v484_v39  ;;  %487 = vst [vmem:[%s2354_s27 + $0x540] sm:$0xff] %v486_v40  ;;  %v494_v44 = vld [vmem:[%s2346_s26 + $0xa60] sm:$0xff]  ;;  %v496_v45 = vld [vmem:[%s2346_s26 + $0xa68] sm:$0xff] }
  0x6a   : > { %489 = vst [vmem:[%s2354_s27 + $0x548] sm:$0xff] %v488_v41  ;;  %491 = vst [vmem:[%s2354_s27 + $0x550] sm:$0xff] %v490_v42  ;;  %v498_v46 = vld [vmem:[%s2346_s26 + $0xa70] sm:$0xff]  ;;  %v500_v47 = vld [vmem:[%s2346_s26 + $0xa78] sm:$0xff] }
  0x6b   : > { %493 = vst [vmem:[%s2354_s27 + $0x558] sm:$0xff] %v492_v43  ;;  %495 = vst [vmem:[%s2354_s27 + $0x560] sm:$0xff] %v494_v44  ;;  %v502_v48 = vld [vmem:[%s2346_s26 + $0xb00] sm:$0xff]  ;;  %v504_v49 = vld [vmem:[%s2346_s26 + $0xb08] sm:$0xff] }
  0x6c   : > { %497 = vst [vmem:[%s2354_s27 + $0x568] sm:$0xff] %v496_v45  ;;  %499 = vst [vmem:[%s2354_s27 + $0x570] sm:$0xff] %v498_v46  ;;  %v506_v50 = vld [vmem:[%s2346_s26 + $0xb10] sm:$0xff]  ;;  %v508_v51 = vld [vmem:[%s2346_s26 + $0xb18] sm:$0xff] }
  0x6d   : > { %501 = vst [vmem:[%s2354_s27 + $0x578] sm:$0xff] %v500_v47  ;;  %503 = vst [vmem:[%s2354_s27 + $0x580] sm:$0xff] %v502_v48  ;;  %v510_v52 = vld [vmem:[%s2346_s26 + $0xb20] sm:$0xff]  ;;  %v512_v53 = vld [vmem:[%s2346_s26 + $0xb28] sm:$0xff] }
  0x6e   : > { %505 = vst [vmem:[%s2354_s27 + $0x588] sm:$0xff] %v504_v49  ;;  %507 = vst [vmem:[%s2354_s27 + $0x590] sm:$0xff] %v506_v50  ;;  %v514_v54 = vld [vmem:[%s2346_s26 + $0xb30] sm:$0xff]  ;;  %v516_v55 = vld [vmem:[%s2346_s26 + $0xb38] sm:$0xff] }
  0x6f   : > { %509 = vst [vmem:[%s2354_s27 + $0x598] sm:$0xff] %v508_v51  ;;  %511 = vst [vmem:[%s2354_s27 + $0x5a0] sm:$0xff] %v510_v52  ;;  %v518_v56 = vld [vmem:[%s2346_s26 + $0xb40] sm:$0xff]  ;;  %v520_v57 = vld [vmem:[%s2346_s26 + $0xb48] sm:$0xff] }
  0x70   : > { %513 = vst [vmem:[%s2354_s27 + $0x5a8] sm:$0xff] %v512_v53  ;;  %515 = vst [vmem:[%s2354_s27 + $0x5b0] sm:$0xff] %v514_v54  ;;  %v522_v58 = vld [vmem:[%s2346_s26 + $0xb50] sm:$0xff]  ;;  %v524_v59 = vld [vmem:[%s2346_s26 + $0xb58] sm:$0xff] }
  0x71   : > { %517 = vst [vmem:[%s2354_s27 + $0x5b8] sm:$0xff] %v516_v55  ;;  %519 = vst [vmem:[%s2354_s27 + $0x5c0] sm:$0xff] %v518_v56  ;;  %v526_v60 = vld [vmem:[%s2346_s26 + $0xb60] sm:$0xff]  ;;  %v528_v61 = vld [vmem:[%s2346_s26 + $0xb68] sm:$0xff] }
  0x72   : > { %521 = vst [vmem:[%s2354_s27 + $0x5c8] sm:$0xff] %v520_v57  ;;  %523 = vst [vmem:[%s2354_s27 + $0x5d0] sm:$0xff] %v522_v58  ;;  %v530_v62 = vld [vmem:[%s2346_s26 + $0xb70] sm:$0xff]  ;;  %v532_v63 = vld [vmem:[%s2346_s26 + $0xb78] sm:$0xff] }
  0x73   : > { %525 = vst [vmem:[%s2354_s27 + $0x5d8] sm:$0xff] %v524_v59  ;;  %527 = vst [vmem:[%s2354_s27 + $0x5e0] sm:$0xff] %v526_v60  ;;  %v534_v0 = vld [vmem:[%s2346_s26 + $0xc00] sm:$0xff]  ;;  %v536_v1 = vld [vmem:[%s2346_s26 + $0xc08] sm:$0xff] }
  0x74   : > { %529 = vst [vmem:[%s2354_s27 + $0x5e8] sm:$0xff] %v528_v61  ;;  %531 = vst [vmem:[%s2354_s27 + $0x5f0] sm:$0xff] %v530_v62  ;;  %v538_v2 = vld [vmem:[%s2346_s26 + $0xc10] sm:$0xff]  ;;  %v540_v3 = vld [vmem:[%s2346_s26 + $0xc18] sm:$0xff] }
  0x75   : > { %533 = vst [vmem:[%s2354_s27 + $0x5f8] sm:$0xff] %v532_v63  ;;  %535 = vst [vmem:[%s2354_s27 + $0x600] sm:$0xff] %v534_v0  ;;  %v542_v4 = vld [vmem:[%s2346_s26 + $0xc20] sm:$0xff]  ;;  %v544_v5 = vld [vmem:[%s2346_s26 + $0xc28] sm:$0xff] }
  0x76   : > { %537 = vst [vmem:[%s2354_s27 + $0x608] sm:$0xff] %v536_v1  ;;  %539 = vst [vmem:[%s2354_s27 + $0x610] sm:$0xff] %v538_v2  ;;  %v546_v6 = vld [vmem:[%s2346_s26 + $0xc30] sm:$0xff]  ;;  %v548_v7 = vld [vmem:[%s2346_s26 + $0xc38] sm:$0xff] }
  0x77   : > { %541 = vst [vmem:[%s2354_s27 + $0x618] sm:$0xff] %v540_v3  ;;  %543 = vst [vmem:[%s2354_s27 + $0x620] sm:$0xff] %v542_v4  ;;  %v550_v8 = vld [vmem:[%s2346_s26 + $0xc40] sm:$0xff]  ;;  %v552_v9 = vld [vmem:[%s2346_s26 + $0xc48] sm:$0xff] }
  0x78   : > { %545 = vst [vmem:[%s2354_s27 + $0x628] sm:$0xff] %v544_v5  ;;  %547 = vst [vmem:[%s2354_s27 + $0x630] sm:$0xff] %v546_v6  ;;  %v554_v10 = vld [vmem:[%s2346_s26 + $0xc50] sm:$0xff]  ;;  %v556_v11 = vld [vmem:[%s2346_s26 + $0xc58] sm:$0xff] }
  0x79   : > { %549 = vst [vmem:[%s2354_s27 + $0x638] sm:$0xff] %v548_v7  ;;  %551 = vst [vmem:[%s2354_s27 + $0x640] sm:$0xff] %v550_v8  ;;  %v558_v12 = vld [vmem:[%s2346_s26 + $0xc60] sm:$0xff]  ;;  %v560_v13 = vld [vmem:[%s2346_s26 + $0xc68] sm:$0xff] }
  0x7a   : > { %553 = vst [vmem:[%s2354_s27 + $0x648] sm:$0xff] %v552_v9  ;;  %555 = vst [vmem:[%s2354_s27 + $0x650] sm:$0xff] %v554_v10  ;;  %v562_v14 = vld [vmem:[%s2346_s26 + $0xc70] sm:$0xff]  ;;  %v564_v15 = vld [vmem:[%s2346_s26 + $0xc78] sm:$0xff] }
  0x7b   : > { %557 = vst [vmem:[%s2354_s27 + $0x658] sm:$0xff] %v556_v11  ;;  %559 = vst [vmem:[%s2354_s27 + $0x660] sm:$0xff] %v558_v12  ;;  %v566_v16 = vld [vmem:[%s2346_s26 + $0xd00] sm:$0xff]  ;;  %v568_v17 = vld [vmem:[%s2346_s26 + $0xd08] sm:$0xff] }
  0x7c   : > { %561 = vst [vmem:[%s2354_s27 + $0x668] sm:$0xff] %v560_v13  ;;  %563 = vst [vmem:[%s2354_s27 + $0x670] sm:$0xff] %v562_v14  ;;  %v570_v18 = vld [vmem:[%s2346_s26 + $0xd10] sm:$0xff]  ;;  %v572_v19 = vld [vmem:[%s2346_s26 + $0xd18] sm:$0xff] }
  0x7d   : > { %565 = vst [vmem:[%s2354_s27 + $0x678] sm:$0xff] %v564_v15  ;;  %567 = vst [vmem:[%s2354_s27 + $0x680] sm:$0xff] %v566_v16  ;;  %v574_v20 = vld [vmem:[%s2346_s26 + $0xd20] sm:$0xff]  ;;  %v576_v21 = vld [vmem:[%s2346_s26 + $0xd28] sm:$0xff] }
  0x7e   : > { %569 = vst [vmem:[%s2354_s27 + $0x688] sm:$0xff] %v568_v17  ;;  %571 = vst [vmem:[%s2354_s27 + $0x690] sm:$0xff] %v570_v18  ;;  %v578_v22 = vld [vmem:[%s2346_s26 + $0xd30] sm:$0xff]  ;;  %v580_v23 = vld [vmem:[%s2346_s26 + $0xd38] sm:$0xff] }
  0x7f   : > { %573 = vst [vmem:[%s2354_s27 + $0x698] sm:$0xff] %v572_v19  ;;  %575 = vst [vmem:[%s2354_s27 + $0x6a0] sm:$0xff] %v574_v20  ;;  %v582_v24 = vld [vmem:[%s2346_s26 + $0xd40] sm:$0xff]  ;;  %v584_v25 = vld [vmem:[%s2346_s26 + $0xd48] sm:$0xff] }
  0x80   : > { %577 = vst [vmem:[%s2354_s27 + $0x6a8] sm:$0xff] %v576_v21  ;;  %579 = vst [vmem:[%s2354_s27 + $0x6b0] sm:$0xff] %v578_v22  ;;  %v586_v26 = vld [vmem:[%s2346_s26 + $0xd50] sm:$0xff]  ;;  %v588_v27 = vld [vmem:[%s2346_s26 + $0xd58] sm:$0xff] }
  0x81   : > { %581 = vst [vmem:[%s2354_s27 + $0x6b8] sm:$0xff] %v580_v23  ;;  %583 = vst [vmem:[%s2354_s27 + $0x6c0] sm:$0xff] %v582_v24  ;;  %v590_v28 = vld [vmem:[%s2346_s26 + $0xd60] sm:$0xff]  ;;  %v592_v29 = vld [vmem:[%s2346_s26 + $0xd68] sm:$0xff] }
  0x82   : > { %585 = vst [vmem:[%s2354_s27 + $0x6c8] sm:$0xff] %v584_v25  ;;  %587 = vst [vmem:[%s2354_s27 + $0x6d0] sm:$0xff] %v586_v26  ;;  %v594_v30 = vld [vmem:[%s2346_s26 + $0xd70] sm:$0xff]  ;;  %v596_v31 = vld [vmem:[%s2346_s26 + $0xd78] sm:$0xff] }
  0x83   : > { %589 = vst [vmem:[%s2354_s27 + $0x6d8] sm:$0xff] %v588_v27  ;;  %591 = vst [vmem:[%s2354_s27 + $0x6e0] sm:$0xff] %v590_v28  ;;  %v598_v32 = vld [vmem:[%s2346_s26 + $0xe00] sm:$0xff]  ;;  %v600_v33 = vld [vmem:[%s2346_s26 + $0xe08] sm:$0xff] }
  0x84   : > { %593 = vst [vmem:[%s2354_s27 + $0x6e8] sm:$0xff] %v592_v29  ;;  %595 = vst [vmem:[%s2354_s27 + $0x6f0] sm:$0xff] %v594_v30  ;;  %v602_v34 = vld [vmem:[%s2346_s26 + $0xe10] sm:$0xff]  ;;  %v604_v35 = vld [vmem:[%s2346_s26 + $0xe18] sm:$0xff] }
  0x85   : > { %597 = vst [vmem:[%s2354_s27 + $0x6f8] sm:$0xff] %v596_v31  ;;  %599 = vst [vmem:[%s2354_s27 + $0x700] sm:$0xff] %v598_v32  ;;  %v606_v36 = vld [vmem:[%s2346_s26 + $0xe20] sm:$0xff]  ;;  %v608_v37 = vld [vmem:[%s2346_s26 + $0xe28] sm:$0xff] }
  0x86   : > { %601 = vst [vmem:[%s2354_s27 + $0x708] sm:$0xff] %v600_v33  ;;  %603 = vst [vmem:[%s2354_s27 + $0x710] sm:$0xff] %v602_v34  ;;  %v610_v38 = vld [vmem:[%s2346_s26 + $0xe30] sm:$0xff]  ;;  %v612_v39 = vld [vmem:[%s2346_s26 + $0xe38] sm:$0xff] }
  0x87   : > { %605 = vst [vmem:[%s2354_s27 + $0x718] sm:$0xff] %v604_v35  ;;  %607 = vst [vmem:[%s2354_s27 + $0x720] sm:$0xff] %v606_v36  ;;  %v614_v40 = vld [vmem:[%s2346_s26 + $0xe40] sm:$0xff]  ;;  %v616_v41 = vld [vmem:[%s2346_s26 + $0xe48] sm:$0xff] }
  0x88   : > { %609 = vst [vmem:[%s2354_s27 + $0x728] sm:$0xff] %v608_v37  ;;  %611 = vst [vmem:[%s2354_s27 + $0x730] sm:$0xff] %v610_v38  ;;  %v618_v42 = vld [vmem:[%s2346_s26 + $0xe50] sm:$0xff]  ;;  %v620_v43 = vld [vmem:[%s2346_s26 + $0xe58] sm:$0xff] }
  0x89   : > { %613 = vst [vmem:[%s2354_s27 + $0x738] sm:$0xff] %v612_v39  ;;  %615 = vst [vmem:[%s2354_s27 + $0x740] sm:$0xff] %v614_v40  ;;  %v622_v44 = vld [vmem:[%s2346_s26 + $0xe60] sm:$0xff]  ;;  %v624_v45 = vld [vmem:[%s2346_s26 + $0xe68] sm:$0xff] }
  0x8a   : > { %617 = vst [vmem:[%s2354_s27 + $0x748] sm:$0xff] %v616_v41  ;;  %619 = vst [vmem:[%s2354_s27 + $0x750] sm:$0xff] %v618_v42  ;;  %v626_v46 = vld [vmem:[%s2346_s26 + $0xe70] sm:$0xff]  ;;  %v628_v47 = vld [vmem:[%s2346_s26 + $0xe78] sm:$0xff] }
  0x8b   : > { %621 = vst [vmem:[%s2354_s27 + $0x758] sm:$0xff] %v620_v43  ;;  %623 = vst [vmem:[%s2354_s27 + $0x760] sm:$0xff] %v622_v44  ;;  %v630_v48 = vld [vmem:[%s2346_s26 + $0xf00] sm:$0xff]  ;;  %v632_v49 = vld [vmem:[%s2346_s26 + $0xf08] sm:$0xff] }
  0x8c   : > { %625 = vst [vmem:[%s2354_s27 + $0x768] sm:$0xff] %v624_v45  ;;  %627 = vst [vmem:[%s2354_s27 + $0x770] sm:$0xff] %v626_v46  ;;  %v634_v50 = vld [vmem:[%s2346_s26 + $0xf10] sm:$0xff]  ;;  %v636_v51 = vld [vmem:[%s2346_s26 + $0xf18] sm:$0xff] }
  0x8d   : > { %629 = vst [vmem:[%s2354_s27 + $0x778] sm:$0xff] %v628_v47  ;;  %631 = vst [vmem:[%s2354_s27 + $0x780] sm:$0xff] %v630_v48  ;;  %v638_v52 = vld [vmem:[%s2346_s26 + $0xf20] sm:$0xff]  ;;  %v640_v53 = vld [vmem:[%s2346_s26 + $0xf28] sm:$0xff] }
  0x8e   : > { %633 = vst [vmem:[%s2354_s27 + $0x788] sm:$0xff] %v632_v49  ;;  %635 = vst [vmem:[%s2354_s27 + $0x790] sm:$0xff] %v634_v50  ;;  %v642_v54 = vld [vmem:[%s2346_s26 + $0xf30] sm:$0xff]  ;;  %v644_v55 = vld [vmem:[%s2346_s26 + $0xf38] sm:$0xff] }
  0x8f   : > { %637 = vst [vmem:[%s2354_s27 + $0x798] sm:$0xff] %v636_v51  ;;  %639 = vst [vmem:[%s2354_s27 + $0x7a0] sm:$0xff] %v638_v52  ;;  %v646_v56 = vld [vmem:[%s2346_s26 + $0xf40] sm:$0xff]  ;;  %v648_v57 = vld [vmem:[%s2346_s26 + $0xf48] sm:$0xff] }
  0x90   : > { %641 = vst [vmem:[%s2354_s27 + $0x7a8] sm:$0xff] %v640_v53  ;;  %643 = vst [vmem:[%s2354_s27 + $0x7b0] sm:$0xff] %v642_v54  ;;  %v650_v58 = vld [vmem:[%s2346_s26 + $0xf50] sm:$0xff]  ;;  %v652_v59 = vld [vmem:[%s2346_s26 + $0xf58] sm:$0xff] }
  0x91   : > { %645 = vst [vmem:[%s2354_s27 + $0x7b8] sm:$0xff] %v644_v55  ;;  %647 = vst [vmem:[%s2354_s27 + $0x7c0] sm:$0xff] %v646_v56  ;;  %v654_v60 = vld [vmem:[%s2346_s26 + $0xf60] sm:$0xff]  ;;  %v656_v61 = vld [vmem:[%s2346_s26 + $0xf68] sm:$0xff] }
  0x92   : > { %649 = vst [vmem:[%s2354_s27 + $0x7c8] sm:$0xff] %v648_v57  ;;  %651 = vst [vmem:[%s2354_s27 + $0x7d0] sm:$0xff] %v650_v58  ;;  %v658_v62 = vld [vmem:[%s2346_s26 + $0xf70] sm:$0xff]  ;;  %v660_v63 = vld [vmem:[%s2346_s26 + $0xf78] sm:$0xff] }
  0x93   : > { %653 = vst [vmem:[%s2354_s27 + $0x7d8] sm:$0xff] %v652_v59  ;;  %655 = vst [vmem:[%s2354_s27 + $0x7e0] sm:$0xff] %v654_v60  ;;  %v662_v0 = vld [vmem:[%s2346_s26 + $0x1000] sm:$0xff]  ;;  %v664_v1 = vld [vmem:[%s2346_s26 + $0x1008] sm:$0xff] }
  0x94   : > { %657 = vst [vmem:[%s2354_s27 + $0x7e8] sm:$0xff] %v656_v61  ;;  %659 = vst [vmem:[%s2354_s27 + $0x7f0] sm:$0xff] %v658_v62  ;;  %v666_v2 = vld [vmem:[%s2346_s26 + $0x1010] sm:$0xff]  ;;  %v668_v3 = vld [vmem:[%s2346_s26 + $0x1018] sm:$0xff] }
  0x95   : > { %661 = vst [vmem:[%s2354_s27 + $0x7f8] sm:$0xff] %v660_v63  ;;  %663 = vst [vmem:[%s2354_s27 + $0x800] sm:$0xff] %v662_v0  ;;  %v670_v4 = vld [vmem:[%s2346_s26 + $0x1020] sm:$0xff]  ;;  %v672_v5 = vld [vmem:[%s2346_s26 + $0x1028] sm:$0xff] }
  0x96   : > { %665 = vst [vmem:[%s2354_s27 + $0x808] sm:$0xff] %v664_v1  ;;  %667 = vst [vmem:[%s2354_s27 + $0x810] sm:$0xff] %v666_v2  ;;  %v674_v6 = vld [vmem:[%s2346_s26 + $0x1030] sm:$0xff]  ;;  %v676_v7 = vld [vmem:[%s2346_s26 + $0x1038] sm:$0xff] }
  0x97   : > { %669 = vst [vmem:[%s2354_s27 + $0x818] sm:$0xff] %v668_v3  ;;  %671 = vst [vmem:[%s2354_s27 + $0x820] sm:$0xff] %v670_v4  ;;  %v678_v8 = vld [vmem:[%s2346_s26 + $0x1040] sm:$0xff]  ;;  %v680_v9 = vld [vmem:[%s2346_s26 + $0x1048] sm:$0xff] }
  0x98   : > { %673 = vst [vmem:[%s2354_s27 + $0x828] sm:$0xff] %v672_v5  ;;  %675 = vst [vmem:[%s2354_s27 + $0x830] sm:$0xff] %v674_v6  ;;  %v682_v10 = vld [vmem:[%s2346_s26 + $0x1050] sm:$0xff]  ;;  %v684_v11 = vld [vmem:[%s2346_s26 + $0x1058] sm:$0xff] }
  0x99   : > { %677 = vst [vmem:[%s2354_s27 + $0x838] sm:$0xff] %v676_v7  ;;  %679 = vst [vmem:[%s2354_s27 + $0x840] sm:$0xff] %v678_v8  ;;  %v686_v12 = vld [vmem:[%s2346_s26 + $0x1060] sm:$0xff]  ;;  %v688_v13 = vld [vmem:[%s2346_s26 + $0x1068] sm:$0xff] }
  0x9a   : > { %681 = vst [vmem:[%s2354_s27 + $0x848] sm:$0xff] %v680_v9  ;;  %683 = vst [vmem:[%s2354_s27 + $0x850] sm:$0xff] %v682_v10  ;;  %v690_v14 = vld [vmem:[%s2346_s26 + $0x1070] sm:$0xff]  ;;  %v692_v15 = vld [vmem:[%s2346_s26 + $0x1078] sm:$0xff] }
  0x9b   : > { %685 = vst [vmem:[%s2354_s27 + $0x858] sm:$0xff] %v684_v11  ;;  %687 = vst [vmem:[%s2354_s27 + $0x860] sm:$0xff] %v686_v12  ;;  %v694_v16 = vld [vmem:[%s2346_s26 + $0x1100] sm:$0xff]  ;;  %v696_v17 = vld [vmem:[%s2346_s26 + $0x1108] sm:$0xff] }
  0x9c   : > { %689 = vst [vmem:[%s2354_s27 + $0x868] sm:$0xff] %v688_v13  ;;  %691 = vst [vmem:[%s2354_s27 + $0x870] sm:$0xff] %v690_v14  ;;  %v698_v18 = vld [vmem:[%s2346_s26 + $0x1110] sm:$0xff]  ;;  %v700_v19 = vld [vmem:[%s2346_s26 + $0x1118] sm:$0xff] }
  0x9d   : > { %693 = vst [vmem:[%s2354_s27 + $0x878] sm:$0xff] %v692_v15  ;;  %695 = vst [vmem:[%s2354_s27 + $0x880] sm:$0xff] %v694_v16  ;;  %v702_v20 = vld [vmem:[%s2346_s26 + $0x1120] sm:$0xff]  ;;  %v704_v21 = vld [vmem:[%s2346_s26 + $0x1128] sm:$0xff] }
  0x9e   : > { %697 = vst [vmem:[%s2354_s27 + $0x888] sm:$0xff] %v696_v17  ;;  %699 = vst [vmem:[%s2354_s27 + $0x890] sm:$0xff] %v698_v18  ;;  %v706_v22 = vld [vmem:[%s2346_s26 + $0x1130] sm:$0xff]  ;;  %v708_v23 = vld [vmem:[%s2346_s26 + $0x1138] sm:$0xff] }
  0x9f   : > { %701 = vst [vmem:[%s2354_s27 + $0x898] sm:$0xff] %v700_v19  ;;  %703 = vst [vmem:[%s2354_s27 + $0x8a0] sm:$0xff] %v702_v20  ;;  %v710_v24 = vld [vmem:[%s2346_s26 + $0x1140] sm:$0xff]  ;;  %v712_v25 = vld [vmem:[%s2346_s26 + $0x1148] sm:$0xff] }
  0xa0   : > { %705 = vst [vmem:[%s2354_s27 + $0x8a8] sm:$0xff] %v704_v21  ;;  %707 = vst [vmem:[%s2354_s27 + $0x8b0] sm:$0xff] %v706_v22  ;;  %v714_v26 = vld [vmem:[%s2346_s26 + $0x1150] sm:$0xff]  ;;  %v716_v27 = vld [vmem:[%s2346_s26 + $0x1158] sm:$0xff] }
  0xa1   : > { %709 = vst [vmem:[%s2354_s27 + $0x8b8] sm:$0xff] %v708_v23  ;;  %711 = vst [vmem:[%s2354_s27 + $0x8c0] sm:$0xff] %v710_v24  ;;  %v718_v28 = vld [vmem:[%s2346_s26 + $0x1160] sm:$0xff]  ;;  %v720_v29 = vld [vmem:[%s2346_s26 + $0x1168] sm:$0xff] }
  0xa2   : > { %713 = vst [vmem:[%s2354_s27 + $0x8c8] sm:$0xff] %v712_v25  ;;  %715 = vst [vmem:[%s2354_s27 + $0x8d0] sm:$0xff] %v714_v26  ;;  %v722_v30 = vld [vmem:[%s2346_s26 + $0x1170] sm:$0xff]  ;;  %v724_v31 = vld [vmem:[%s2346_s26 + $0x1178] sm:$0xff] }
  0xa3   : > { %717 = vst [vmem:[%s2354_s27 + $0x8d8] sm:$0xff] %v716_v27  ;;  %719 = vst [vmem:[%s2354_s27 + $0x8e0] sm:$0xff] %v718_v28  ;;  %v726_v32 = vld [vmem:[%s2346_s26 + $0x1200] sm:$0xff]  ;;  %v728_v33 = vld [vmem:[%s2346_s26 + $0x1208] sm:$0xff] }
  0xa4   : > { %721 = vst [vmem:[%s2354_s27 + $0x8e8] sm:$0xff] %v720_v29  ;;  %723 = vst [vmem:[%s2354_s27 + $0x8f0] sm:$0xff] %v722_v30  ;;  %v730_v34 = vld [vmem:[%s2346_s26 + $0x1210] sm:$0xff]  ;;  %v732_v35 = vld [vmem:[%s2346_s26 + $0x1218] sm:$0xff] }
  0xa5   : > { %725 = vst [vmem:[%s2354_s27 + $0x8f8] sm:$0xff] %v724_v31  ;;  %727 = vst [vmem:[%s2354_s27 + $0x900] sm:$0xff] %v726_v32  ;;  %v734_v36 = vld [vmem:[%s2346_s26 + $0x1220] sm:$0xff]  ;;  %v736_v37 = vld [vmem:[%s2346_s26 + $0x1228] sm:$0xff] }
  0xa6   : > { %729 = vst [vmem:[%s2354_s27 + $0x908] sm:$0xff] %v728_v33  ;;  %731 = vst [vmem:[%s2354_s27 + $0x910] sm:$0xff] %v730_v34  ;;  %v738_v38 = vld [vmem:[%s2346_s26 + $0x1230] sm:$0xff]  ;;  %v740_v39 = vld [vmem:[%s2346_s26 + $0x1238] sm:$0xff] }
  0xa7   : > { %733 = vst [vmem:[%s2354_s27 + $0x918] sm:$0xff] %v732_v35  ;;  %735 = vst [vmem:[%s2354_s27 + $0x920] sm:$0xff] %v734_v36  ;;  %v742_v40 = vld [vmem:[%s2346_s26 + $0x1240] sm:$0xff]  ;;  %v744_v41 = vld [vmem:[%s2346_s26 + $0x1248] sm:$0xff] }
  0xa8   : > { %737 = vst [vmem:[%s2354_s27 + $0x928] sm:$0xff] %v736_v37  ;;  %739 = vst [vmem:[%s2354_s27 + $0x930] sm:$0xff] %v738_v38  ;;  %v746_v42 = vld [vmem:[%s2346_s26 + $0x1250] sm:$0xff]  ;;  %v748_v43 = vld [vmem:[%s2346_s26 + $0x1258] sm:$0xff] }
  0xa9   : > { %741 = vst [vmem:[%s2354_s27 + $0x938] sm:$0xff] %v740_v39  ;;  %743 = vst [vmem:[%s2354_s27 + $0x940] sm:$0xff] %v742_v40  ;;  %v750_v44 = vld [vmem:[%s2346_s26 + $0x1260] sm:$0xff]  ;;  %v752_v45 = vld [vmem:[%s2346_s26 + $0x1268] sm:$0xff] }
  0xaa   : > { %745 = vst [vmem:[%s2354_s27 + $0x948] sm:$0xff] %v744_v41  ;;  %747 = vst [vmem:[%s2354_s27 + $0x950] sm:$0xff] %v746_v42  ;;  %v754_v46 = vld [vmem:[%s2346_s26 + $0x1270] sm:$0xff]  ;;  %v756_v47 = vld [vmem:[%s2346_s26 + $0x1278] sm:$0xff] }
  0xab   : > { %749 = vst [vmem:[%s2354_s27 + $0x958] sm:$0xff] %v748_v43  ;;  %751 = vst [vmem:[%s2354_s27 + $0x960] sm:$0xff] %v750_v44 }
  0xac   : > { %753 = vst [vmem:[%s2354_s27 + $0x968] sm:$0xff] %v752_v45  ;;  %755 = vst [vmem:[%s2354_s27 + $0x970] sm:$0xff] %v754_v46 }
  0xad   : > { %757 = vst [vmem:[%s2354_s27 + $0x978] sm:$0xff] %v756_v47 }
  0xae PF: > { %p1919_p7 = scmp.ge.s32.totalorder %s2283_s14, 1  ;;  %p762_p8 = scmp.lt.s32.totalorder %s2283_s14, 3 }
  0xb0   : > { %p763_p9 = pnand %p1919_p7, %p762_p8 }
  0xb1   : > { %s769_s28 = sand.u32 (!%p763_p9), 1, %s2275_s12   ;;  %v2964_v48 = vld [vmem:[%s3499_s0 + $0x8] sm:$0xff] (!%p763_p9)  ;;  %vm1113_vm0 = vcmask (!%p763_p9), 195584   ;;  %v2285_v49 = vmov (!%p763_p9), 0   ;;  %v1101_v50 = vld [vmem:[%s3501_s2] sm:$0xff] (!%p763_p9) }
  0xb2   : > { %766 = sbr.rel (%p763_p9) target bundleno = 570 (0x23a), region = 51  ;;  %1921 = vmatprep.mubr.msk.f32.mxu0 (!%p763_p9), %vm1113_vm0, %v2964_v48  ;;  %1923 = vmatprep.mubr.msk.f32.mxu1 (!%p763_p9), %vm1113_vm0, %v2964_v48  ;;  %s1920_s25 = sshll.u32 (!%p763_p9), %s769_s28, 8 }
  0xb3   : > { %s2233_s4 = smul.u32 (!%p763_p9), 2432, %s769_s28  ;;  %2259 = vset.pattern.permute.xlu0 (!%p763_p9), %v2285_v49  ;;  %s3351_s26 = scalar_lea.vmem (!%p763_p9), [#allocation3], %s1920_s25 }
  0xb4   : > { %1105 = vperm.xlu0 (!%p763_p9), %2259, %v1101_v50  }
  0xb5   : > { %s2975_s7 = scalar_lea.vmem (!%p763_p9), [#allocation2], %s2233_s4 }
  0xb6   : > { %v798_v51 = vld [vmem:[%s2975_s7 + $0x8] sm:$0xff] (!%p763_p9)  ;;  %v800_v53 = vld [vmem:[%s2975_s7 + $0x18] sm:$0xff] (!%p763_p9)  ;;  %v797_v56 = vld [vmem:[%s2975_s7] sm:$0xff] (!%p763_p9) }
  0xb7   : > { %v814_v52 = vld [vmem:[%s2975_s7 + $0x88] sm:$0xff] (!%p763_p9)  ;;  %v816_v55 = vld [vmem:[%s2975_s7 + $0x98] sm:$0xff] (!%p763_p9)  ;;  %v813_v57 = vld [vmem:[%s2975_s7 + $0x80] sm:$0xff] (!%p763_p9) }
  0xb8   : > { %v1944_v54 = vpack.c.bf16 (!%p763_p9), %v814_v52, %v798_v51  ;;  %v1980_v58 = vpack.c.bf16 (!%p763_p9), %v816_v55, %v800_v53  ;;  %v1946_v59 = vpack.c.bf16 (!%p763_p9), %v813_v57, %v797_v56  ;;  %v799_v60 = vld [vmem:[%s2975_s7 + $0x10] sm:$0xff] (!%p763_p9)  ;;  %v830_v62 = vld [vmem:[%s2975_s7 + $0x108] sm:$0xff] (!%p763_p9)  ;;  %v832_v1 = vld [vmem:[%s2975_s7 + $0x118] sm:$0xff] (!%p763_p9) }
  0xb9   : > { %v815_v61 = vld [vmem:[%s2975_s7 + $0x90] sm:$0xff]  ;;  %v846_v0 = vld [vmem:[%s2975_s7 + $0x188] sm:$0xff]  ;;  %v848_v2 = vld [vmem:[%s2975_s7 + $0x198] sm:$0xff]  ;;  %s1943_s12 = sshll.u32 (%p2336_p5), %s1913_s15, 7 }
  0xba   : > { %1945 = vmatprep.subr.bf16.mxu0 %v1944_v54  ;;  %v1982_v63 = vpack.c.bf16 %v815_v61, %v799_v60  ;;  %1981 = vmatprep.subr.bf16.mxu1 %v1980_v58  ;;  %v1948_v3 = vpack.c.bf16 %v846_v0, %v830_v62  ;;  %v1984_v4 = vpack.c.bf16 %v848_v2, %v832_v1  ;;  %v829_v5 = vld [vmem:[%s2975_s7 + $0x100] sm:$0xff]  ;;  %v831_v7 = vld [vmem:[%s2975_s7 + $0x110] sm:$0xff]  ;;  %v862_v10 = vld [vmem:[%s2975_s7 + $0x208] sm:$0xff]  ;;  %s3426_s20 = scalar_lea.vmem (%p2336_p5), %s3502_s3, %s1943_s12 }
  0xbb   : > { %1947 = vmatpush1.bf16.msra.mxu0 %v1946_v59  ;;  %v845_v6 = vld [vmem:[%s2975_s7 + $0x180] sm:$0xff]  ;;  %v847_v9 = vld [vmem:[%s2975_s7 + $0x190] sm:$0xff]  ;;  %v878_v11 = vld [vmem:[%s2975_s7 + $0x288] sm:$0xff] }
  0xbc   : > { %1983 = vmatpush1.bf16.msra.mxu1 %v1982_v63  ;;  %v1950_v8 = vpack.c.bf16 %v845_v6, %v829_v5  ;;  %1949 = vmatprep.subr.bf16.mxu0 %v1948_v3  ;;  %v1986_v12 = vpack.c.bf16 %v847_v9, %v831_v7  ;;  %v1952_v13 = vpack.c.bf16 %v878_v11, %v862_v10  ;;  %v864_v14 = vld [vmem:[%s2975_s7 + $0x218] sm:$0xff]  ;;  %v861_v16 = vld [vmem:[%s2975_s7 + $0x200] sm:$0xff]  ;;  %v863_v19 = vld [vmem:[%s2975_s7 + $0x210] sm:$0xff] }
  0xbd   : > { %1985 = vmatprep.subr.bf16.mxu1 %v1984_v4  ;;  %v880_v15 = vld [vmem:[%s2975_s7 + $0x298] sm:$0xff]  ;;  %v877_v18 = vld [vmem:[%s2975_s7 + $0x280] sm:$0xff]  ;;  %v879_v20 = vld [vmem:[%s2975_s7 + $0x290] sm:$0xff] }
  0xbe   : > { %v1988_v17 = vpack.c.bf16 %v880_v15, %v864_v14  ;;  %v1954_v21 = vpack.c.bf16 %v877_v18, %v861_v16  ;;  %v894_v22 = vld [vmem:[%s2975_s7 + $0x308] sm:$0xff]  ;;  %v896_v24 = vld [vmem:[%s2975_s7 + $0x318] sm:$0xff]  ;;  %v1990_v25 = vpack.c.bf16 %v879_v20, %v863_v19  ;;  %v893_v28 = vld [vmem:[%s2975_s7 + $0x300] sm:$0xff] }
  0xbf   : > { %1951 = vmatpush1.bf16.msra.mxu0 %v1950_v8  ;;  %v910_v23 = vld [vmem:[%s2975_s7 + $0x388] sm:$0xff]  ;;  %v912_v27 = vld [vmem:[%s2975_s7 + $0x398] sm:$0xff]  ;;  %v909_v29 = vld [vmem:[%s2975_s7 + $0x380] sm:$0xff] }
  0xc0   : > { %1987 = vmatpush1.bf16.msra.mxu1 %v1986_v12  ;;  %1953 = vmatprep.subr.bf16.mxu0 %v1952_v13  ;;  %v1956_v26 = vpack.c.bf16 %v910_v23, %v894_v22  ;;  %v1992_v30 = vpack.c.bf16 %v912_v27, %v896_v24  ;;  %v895_v31 = vld [vmem:[%s2975_s7 + $0x310] sm:$0xff]  ;;  %v926_v33 = vld [vmem:[%s2975_s7 + $0x408] sm:$0xff]  ;;  %v928_v35 = vld [vmem:[%s2975_s7 + $0x418] sm:$0xff]  ;;  %v1958_v37 = vpack.c.bf16 %v909_v29, %v893_v28 }
  0xc1   : > { %1989 = vmatprep.subr.bf16.mxu1 %v1988_v17  ;;  %v911_v32 = vld [vmem:[%s2975_s7 + $0x390] sm:$0xff]  ;;  %v942_v34 = vld [vmem:[%s2975_s7 + $0x488] sm:$0xff]  ;;  %v944_v36 = vld [vmem:[%s2975_s7 + $0x498] sm:$0xff] }
  0xc2   : > { %v1994_v38 = vpack.c.bf16 %v911_v32, %v895_v31  ;;  %v1960_v39 = vpack.c.bf16 %v942_v34, %v926_v33  ;;  %v925_v40 = vld [vmem:[%s2975_s7 + $0x400] sm:$0xff]  ;;  %v927_v42 = vld [vmem:[%s2975_s7 + $0x410] sm:$0xff]  ;;  %v1996_v43 = vpack.c.bf16 %v944_v36, %v928_v35  ;;  %v958_v45 = vld [vmem:[%s2975_s7 + $0x508] sm:$0xff] }
  0xc3   : > { %1955 = vmatpush1.bf16.msra.mxu0 %v1954_v21  ;;  %v941_v41 = vld [vmem:[%s2975_s7 + $0x480] sm:$0xff]  ;;  %v943_v44 = vld [vmem:[%s2975_s7 + $0x490] sm:$0xff]  ;;  %v974_v46 = vld [vmem:[%s2975_s7 + $0x588] sm:$0xff] }
  0xc4   : > { %1991 = vmatpush1.bf16.msra.mxu1 %v1990_v25  ;;  %1957 = vmatprep.subr.bf16.mxu0 %v1956_v26  ;;  %v960_v47 = vld [vmem:[%s2975_s7 + $0x518] sm:$0xff]  ;;  %v1962_v50 = vpack.c.bf16 %v941_v41, %v925_v40  ;;  %v1998_v51 = vpack.c.bf16 %v943_v44, %v927_v42  ;;  %v1964_v52 = vpack.c.bf16 %v974_v46, %v958_v45  ;;  %v957_v53 = vld [vmem:[%s2975_s7 + $0x500] sm:$0xff]  ;;  %v959_v55 = vld [vmem:[%s2975_s7 + $0x510] sm:$0xff] }
  0xc5   : > { %1993 = vmatprep.subr.bf16.mxu1 %v1992_v30  ;;  %v976_v49 = vld [vmem:[%s2975_s7 + $0x598] sm:$0xff]  ;;  %v973_v54 = vld [vmem:[%s2975_s7 + $0x580] sm:$0xff]  ;;  %v975_v57 = vld [vmem:[%s2975_s7 + $0x590] sm:$0xff] }
  0xc6   : > { %v2000_v56 = vpack.c.bf16 %v976_v49, %v960_v47  ;;  %v990_v58 = vld [vmem:[%s2975_s7 + $0x608] sm:$0xff]  ;;  %v992_v60 = vld [vmem:[%s2975_s7 + $0x618] sm:$0xff]  ;;  %v1966_v62 = vpack.c.bf16 %v973_v54, %v957_v53  ;;  %v2002_v63 = vpack.c.bf16 %v975_v57, %v959_v55  ;;  %v989_v1 = vld [vmem:[%s2975_s7 + $0x600] sm:$0xff] }
  0xc7   : > { %1959 = vmatpush1.bf16.msra.mxu0 %v1958_v37  ;;  %v1006_v59 = vld [vmem:[%s2975_s7 + $0x688] sm:$0xff]  ;;  %v1008_v61 = vld [vmem:[%s2975_s7 + $0x698] sm:$0xff]  ;;  %v1005_v2 = vld [vmem:[%s2975_s7 + $0x680] sm:$0xff] }
  0xc8   : > { %1995 = vmatpush1.bf16.msra.mxu1 %v1994_v38  ;;  %1961 = vmatprep.subr.bf16.mxu0 %v1960_v39  ;;  %v1968_v0 = vpack.c.bf16 %v1006_v59, %v990_v58  ;;  %v991_v3 = vld [vmem:[%s2975_s7 + $0x610] sm:$0xff]  ;;  %v2004_v4 = vpack.c.bf16 %v1008_v61, %v992_v60  ;;  %v1022_v6 = vld [vmem:[%s2975_s7 + $0x708] sm:$0xff]  ;;  %v1024_v8 = vld [vmem:[%s2975_s7 + $0x718] sm:$0xff]  ;;  %v1970_v10 = vpack.c.bf16 %v1005_v2, %v989_v1 }
  0xc9   : > { %1997 = vmatprep.subr.bf16.mxu1 %v1996_v43  ;;  %v1007_v5 = vld [vmem:[%s2975_s7 + $0x690] sm:$0xff]  ;;  %v1038_v7 = vld [vmem:[%s2975_s7 + $0x788] sm:$0xff]  ;;  %v1040_v9 = vld [vmem:[%s2975_s7 + $0x798] sm:$0xff] }
  0xca   : > { %v2006_v11 = vpack.c.bf16 %v1007_v5, %v991_v3  ;;  %v1972_v12 = vpack.c.bf16 %v1038_v7, %v1022_v6  ;;  %v1021_v13 = vld [vmem:[%s2975_s7 + $0x700] sm:$0xff]  ;;  %v1023_v15 = vld [vmem:[%s2975_s7 + $0x710] sm:$0xff]  ;;  %v2008_v16 = vpack.c.bf16 %v1040_v9, %v1024_v8  ;;  %v1054_v18 = vld [vmem:[%s2975_s7 + $0x808] sm:$0xff] }
  0xcb   : > { %1963 = vmatpush1.bf16.msra.mxu0 %v1962_v50  ;;  %v1037_v14 = vld [vmem:[%s2975_s7 + $0x780] sm:$0xff]  ;;  %v1039_v17 = vld [vmem:[%s2975_s7 + $0x790] sm:$0xff]  ;;  %v1070_v19 = vld [vmem:[%s2975_s7 + $0x888] sm:$0xff] }
  0xcc   : > { %1999 = vmatpush1.bf16.msra.mxu1 %v1998_v51  ;;  %1965 = vmatprep.subr.bf16.mxu0 %v1964_v52  ;;  %v1056_v20 = vld [vmem:[%s2975_s7 + $0x818] sm:$0xff]  ;;  %v1974_v22 = vpack.c.bf16 %v1037_v14, %v1021_v13  ;;  %v2010_v23 = vpack.c.bf16 %v1039_v17, %v1023_v15  ;;  %v1976_v24 = vpack.c.bf16 %v1070_v19, %v1054_v18  ;;  %v1053_v25 = vld [vmem:[%s2975_s7 + $0x800] sm:$0xff]  ;;  %v1055_v28 = vld [vmem:[%s2975_s7 + $0x810] sm:$0xff] }
  0xcd   : > { %2001 = vmatprep.subr.bf16.mxu1 %v2000_v56  ;;  %v1072_v21 = vld [vmem:[%s2975_s7 + $0x898] sm:$0xff]  ;;  %v1069_v26 = vld [vmem:[%s2975_s7 + $0x880] sm:$0xff]  ;;  %v1071_v29 = vld [vmem:[%s2975_s7 + $0x890] sm:$0xff] }
  0xce   : > { %v2012_v27 = vpack.c.bf16 %v1072_v21, %v1056_v20  ;;  %v1978_v30 = vpack.c.bf16 %v1069_v26, %v1053_v25  ;;  %v2014_v31 = vpack.c.bf16 %v1071_v29, %v1055_v28  ;;  %v1086_v32 = vld [vmem:[%s2975_s7 + $0x908] sm:$0xff]  ;;  %v1088_v33 = vld [vmem:[%s2975_s7 + $0x918] sm:$0xff]  ;;  %v1085_v35 = vld [vmem:[%s2975_s7 + $0x900] sm:$0xff] }
  0xcf   : > { %1967 = vmatpush1.bf16.msra.mxu0 %v1966_v62  ;;  %v802_v34 = vld [vmem:[%s2975_s7 + $0x28] sm:$0xff]  ;;  %v804_v37 = vld [vmem:[%s2975_s7 + $0x38] sm:$0xff]  ;;  %v3059_v39 = vld [vmem:[%s3499_s0] sm:$0xff] }
  0xd0   : > { %2003 = vmatpush1.bf16.msra.mxu1 %v2002_v63  ;;  %1969 = vmatprep.subr.bf16.mxu0 %v1968_v0  ;;  %v818_v36 = vld [vmem:[%s2975_s7 + $0xa8] sm:$0xff]  ;;  %v820_v38 = vld [vmem:[%s2975_s7 + $0xb8] sm:$0xff]  ;;  %v801_v40 = vld [vmem:[%s2975_s7 + $0x20] sm:$0xff] }
  0xd1   : > { %2005 = vmatprep.subr.bf16.mxu1 %v2004_v4  ;;  %v817_v41 = vld [vmem:[%s2975_s7 + $0xa0] sm:$0xff]  ;;  %v803_v42 = vld [vmem:[%s2975_s7 + $0x30] sm:$0xff]  ;;  %v834_v44 = vld [vmem:[%s2975_s7 + $0x128] sm:$0xff]  ;;  %v2016_v47 = vpack.c.bf16 %v818_v36, %v802_v34  ;;  %v2052_v51 = vpack.c.bf16 %v820_v38, %v804_v37 }
  0xd2   : > { %v819_v43 = vld [vmem:[%s2975_s7 + $0xb0] sm:$0xff]  ;;  %v850_v45 = vld [vmem:[%s2975_s7 + $0x1a8] sm:$0xff]  ;;  %v836_v49 = vld [vmem:[%s2975_s7 + $0x138] sm:$0xff]  ;;  %v2018_v52 = vpack.c.bf16 %v817_v41, %v801_v40 }
  0xd3   : > { %1971 = vmatpush1.bf16.msra.mxu0 %v1970_v10  ;;  %v1087_v46 = vld [vmem:[%s2975_s7 + $0x910] sm:$0xff]  ;;  %v852_v50 = vld [vmem:[%s2975_s7 + $0x1b8] sm:$0xff]  ;;  %v2054_v53 = vpack.c.bf16 %v819_v43, %v803_v42  ;;  %v2020_v54 = vpack.c.bf16 %v850_v45, %v834_v44  ;;  %v833_v55 = vld [vmem:[%s2975_s7 + $0x120] sm:$0xff] }
  0xd4   : > { %2007 = vmatpush1.bf16.msra.mxu1 %v2006_v11  ;;  %1973 = vmatprep.subr.bf16.mxu0 %v1972_v12  ;;  %v849_v56 = vld [vmem:[%s2975_s7 + $0x1a0] sm:$0xff]  ;;  %v835_v57 = vld [vmem:[%s2975_s7 + $0x130] sm:$0xff]  ;;  %v2056_v58 = vpack.c.bf16 %v852_v50, %v836_v49  ;;  %v866_v60 = vld [vmem:[%s2975_s7 + $0x228] sm:$0xff] }
  0xd5   : > { %2009 = vmatprep.subr.bf16.mxu1 %v2008_v16  ;;  %v851_v59 = vld [vmem:[%s2975_s7 + $0x1b0] sm:$0xff]  ;;  %v882_v61 = vld [vmem:[%s2975_s7 + $0x2a8] sm:$0xff]  ;;  %v868_v62 = vld [vmem:[%s2975_s7 + $0x238] sm:$0xff]  ;;  %v2022_v1 = vpack.c.bf16 %v849_v56, %v833_v55 }
  0xd6   : > { %v884_v63 = vld [vmem:[%s2975_s7 + $0x2b8] sm:$0xff]  ;;  %v3088_v2 = vld [vmem:[%s3499_s0 + $0x10] sm:$0xff]  ;;  %v2058_v3 = vpack.c.bf16 %v851_v59, %v835_v57  ;;  %v2024_v4 = vpack.c.bf16 %v882_v61, %v866_v60  ;;  %v865_v5 = vld [vmem:[%s2975_s7 + $0x220] sm:$0xff] }
  0xd7   : > { %1975 = vmatpush1.bf16.msra.mxu0 %v1974_v22  ;;  %v3083_v0 = vld [vmem:[%s3499_s0 + $0x18] sm:$0xff]  ;;  %v881_v6 = vld [vmem:[%s2975_s7 + $0x2a0] sm:$0xff]  ;;  %v867_v7 = vld [vmem:[%s2975_s7 + $0x230] sm:$0xff]  ;;  %v2060_v8 = vpack.c.bf16 %v884_v63, %v868_v62 }
  0xd8   : > { %2011 = vmatpush1.bf16.msra.mxu1 %v2010_v23  ;;  %1977 = vmatprep.subr.bf16.mxu0 %v1976_v24  ;;  %v883_v9 = vld [vmem:[%s2975_s7 + $0x2b0] sm:$0xff]  ;;  %v898_v10 = vld [vmem:[%s2975_s7 + $0x328] sm:$0xff]  ;;  %v900_v12 = vld [vmem:[%s2975_s7 + $0x338] sm:$0xff]  ;;  %v2026_v14 = vpack.c.bf16 %v881_v6, %v865_v5 }
  0xd9   : > { %2013 = vmatprep.subr.bf16.mxu1 %v2012_v27  ;;  %v914_v11 = vld [vmem:[%s2975_s7 + $0x3a8] sm:$0xff]  ;;  %v916_v13 = vld [vmem:[%s2975_s7 + $0x3b8] sm:$0xff]  ;;  %v2062_v15 = vpack.c.bf16 %v883_v9, %v867_v7  ;;  %v897_v17 = vld [vmem:[%s2975_s7 + $0x320] sm:$0xff] }
  0xda   : > { %v2028_v16 = vpack.c.bf16 %v914_v11, %v898_v10  ;;  %v913_v18 = vld [vmem:[%s2975_s7 + $0x3a0] sm:$0xff]  ;;  %v899_v19 = vld [vmem:[%s2975_s7 + $0x330] sm:$0xff]  ;;  %v2064_v20 = vpack.c.bf16 %v916_v13, %v900_v12  ;;  %v930_v22 = vld [vmem:[%s2975_s7 + $0x428] sm:$0xff] }
  0xdb   : > { %1979 = vmatpush1.bf16.msra.mxu0 %v1978_v30  ;;  %v915_v21 = vld [vmem:[%s2975_s7 + $0x3b0] sm:$0xff]  ;;  %v946_v23 = vld [vmem:[%s2975_s7 + $0x4a8] sm:$0xff]  ;;  %v932_v24 = vld [vmem:[%s2975_s7 + $0x438] sm:$0xff]  ;;  %v2030_v26 = vpack.c.bf16 %v913_v18, %v897_v17 }
  0xdc   : > { %2015 = vmatpush1.bf16.msra.mxu1 %v2014_v31  ;;  %1156 = vmatprep.subr.mxu0 %v1086_v32  ;;  %v948_v25 = vld [vmem:[%s2975_s7 + $0x4b8] sm:$0xff]  ;;  %v2066_v27 = vpack.c.bf16 %v915_v21, %v899_v19  ;;  %v2032_v28 = vpack.c.bf16 %v946_v23, %v930_v22  ;;  %v929_v29 = vld [vmem:[%s2975_s7 + $0x420] sm:$0xff]  ;;  %v931_v31 = vld [vmem:[%s2975_s7 + $0x430] sm:$0xff] }
  0xdd   : > { %1233 = vmatprep.subr.mxu1 %v1088_v33  ;;  %v945_v30 = vld [vmem:[%s2975_s7 + $0x4a0] sm:$0xff]  ;;  %v2068_v32 = vpack.c.bf16 %v948_v25, %v932_v24  ;;  %v947_v33 = vld [vmem:[%s2975_s7 + $0x4b0] sm:$0xff]  ;;  %v962_v34 = vld [vmem:[%s2975_s7 + $0x528] sm:$0xff] }
  0xde   : > { %v964_v36 = vld [vmem:[%s2975_s7 + $0x538] sm:$0xff]  ;;  %v2034_v38 = vpack.c.bf16 %v945_v30, %v929_v29  ;;  %v2070_v40 = vpack.c.bf16 %v947_v33, %v931_v31  ;;  %v961_v42 = vld [vmem:[%s2975_s7 + $0x520] sm:$0xff]  ;;  %v963_v44 = vld [vmem:[%s2975_s7 + $0x530] sm:$0xff] }
  0xdf   : > { %1157 = vmatpush1.msra.mxu0 %v1085_v35  ;;  %v978_v35 = vld [vmem:[%s2975_s7 + $0x5a8] sm:$0xff]  ;;  %v980_v37 = vld [vmem:[%s2975_s7 + $0x5b8] sm:$0xff]  ;;  %v977_v43 = vld [vmem:[%s2975_s7 + $0x5a0] sm:$0xff] }
  0xe0   : > { %1234 = vmatpush1.msra.mxu1 %v1087_v46  ;;  %1185 = vmatmul.mubr.f32.vlgmr.msra.gmra.mrb[0].mxu0 %v3059_v39  ;;  %v2036_v41 = vpack.c.bf16 %v978_v35, %v962_v34  ;;  %v2072_v45 = vpack.c.bf16 %v980_v37, %v964_v36  ;;  %v979_v46 = vld [vmem:[%s2975_s7 + $0x5b0] sm:$0xff]  ;;  %v1010_v49 = vld [vmem:[%s2975_s7 + $0x6a8] sm:$0xff]  ;;  %v996_v50 = vld [vmem:[%s2975_s7 + $0x638] sm:$0xff] }
  0xe1   : > { %1262 = vmatmul.mubr.f32.vlgmr.msra.gmra.mrb[0].mxu1 %v3059_v39  ;;  %2017 = vmatprep.subr.bf16.mxu0 %v2016_v47  ;;  %v994_v47 = vld [vmem:[%s2975_s7 + $0x628] sm:$0xff]  ;;  %v993_v55 = vld [vmem:[%s2975_s7 + $0x620] sm:$0xff]  ;;  %v995_v57 = vld [vmem:[%s2975_s7 + $0x630] sm:$0xff] }
  0xe2   : > { %2053 = vmatprep.subr.bf16.mxu1 %v2052_v51  ;;  %2019 = vmatpush1.bf16.msra.mxu0 %v2018_v52  ;;  %v1012_v51 = vld [vmem:[%s2975_s7 + $0x6b8] sm:$0xff]  ;;  %v2038_v52 = vpack.c.bf16 %v977_v43, %v961_v42  ;;  %v1009_v56 = vld [vmem:[%s2975_s7 + $0x6a0] sm:$0xff]  ;;  %v1011_v59 = vld [vmem:[%s2975_s7 + $0x6b0] sm:$0xff] }
  0xe3   : > { %2055 = vmatpush1.bf16.msra.mxu1 %v2054_v53  ;;  %2021 = vmatprep.subr.bf16.mxu0 %v2020_v54  ;;  %v2074_v53 = vpack.c.bf16 %v979_v46, %v963_v44  ;;  %v2040_v54 = vpack.c.bf16 %v1010_v49, %v994_v47  ;;  %v1026_v60 = vld [vmem:[%s2975_s7 + $0x728] sm:$0xff]  ;;  %v1028_v62 = vld [vmem:[%s2975_s7 + $0x738] sm:$0xff]  ;;  %v1025_v5 = vld [vmem:[%s2975_s7 + $0x720] sm:$0xff] }
  0xe4   : > { %2057 = vmatprep.subr.bf16.mxu1 %v2056_v58  ;;  %1922 = vmatprep.mubr.msk.f32.mxu0 %vm1113_vm0, %v3083_v0  ;;  %v2076_v58 = vpack.c.bf16 %v1012_v51, %v996_v50  ;;  %v1042_v61 = vld [vmem:[%s2975_s7 + $0x7a8] sm:$0xff]  ;;  %v1044_v63 = vld [vmem:[%s2975_s7 + $0x7b8] sm:$0xff]  ;;  %v1041_v6 = vld [vmem:[%s2975_s7 + $0x7a0] sm:$0xff] }
  0xe5   : > { %1924 = vmatprep.mubr.msk.f32.mxu1 %vm1113_vm0, %v3083_v0  ;;  %1191 = vmatmul.mubr.f32.gmra.mrb[2].mxu0 %v3088_v2  ;;  %v1027_v7 = vld [vmem:[%s2975_s7 + $0x730] sm:$0xff]  ;;  %v1058_v10 = vld [vmem:[%s2975_s7 + $0x828] sm:$0xff]  ;;  %v1060_v12 = vld [vmem:[%s2975_s7 + $0x838] sm:$0xff] }
  0xe6   : > { %2023 = vmatpush1.bf16.msra.mxu0 %v2022_v1  ;;  %1268 = vmatmul.mubr.f32.gmra.mrb[2].mxu1 %v3088_v2  ;;  %v2042_v1 = vpack.c.bf16 %v1009_v56, %v993_v55  ;;  %v1043_v9 = vld [vmem:[%s2975_s7 + $0x7b0] sm:$0xff]  ;;  %v1074_v11 = vld [vmem:[%s2975_s7 + $0x8a8] sm:$0xff]  ;;  %v1076_v13 = vld [vmem:[%s2975_s7 + $0x8b8] sm:$0xff] }
  0xe7   : > { %2059 = vmatpush1.bf16.msra.mxu1 %v2058_v3  ;;  %2025 = vmatprep.subr.bf16.mxu0 %v2024_v4  ;;  %v2078_v3 = vpack.c.bf16 %v1011_v59, %v995_v57  ;;  %v2044_v4 = vpack.c.bf16 %v1042_v61, %v1026_v60  ;;  %v1057_v17 = vld [vmem:[%s2975_s7 + $0x820] sm:$0xff]  ;;  %v2084_v19 = vpack.c.bf16 %v1076_v13, %v1060_v12  ;;  %v1075_v21 = vld [vmem:[%s2975_s7 + $0x8b0] sm:$0xff]  ;;  %v1090_v24 = vld [vmem:[%s2975_s7 + $0x928] sm:$0xff] }
  0xe8   : > { %2061 = vmatprep.subr.bf16.mxu1 %v2060_v8  ;;  %1925 = vmatprep.mubr.msk.f32.mxu0 %vm1113_vm0, %v2964_v48  ;;  %v2080_v8 = vpack.c.bf16 %v1044_v63, %v1028_v62  ;;  %v1073_v18 = vld [vmem:[%s2975_s7 + $0x8a0] sm:$0xff]  ;;  %v1092_v25 = vld [vmem:[%s2975_s7 + $0x938] sm:$0xff]  ;;  %v807_v33 = vld [vmem:[%s2975_s7 + $0x50] sm:$0xff] }
  0xe9   : > { %1927 = vmatprep.mubr.msk.f32.mxu1 %vm1113_vm0, %v2964_v48  ;;  %v2050_v22 = vpack.c.bf16 %v1073_v18, %v1057_v17  ;;  %v808_v29 = vld [vmem:[%s2975_s7 + $0x58] sm:$0xff]  ;;  %v805_v31 = vld [vmem:[%s2975_s7 + $0x40] sm:$0xff]  ;;  %v823_v34 = vld [vmem:[%s2975_s7 + $0xd0] sm:$0xff] }
  0xea   : > { %2027 = vmatpush1.bf16.msra.mxu0 %v2026_v14  ;;  %v2046_v14 = vpack.c.bf16 %v1041_v6, %v1025_v5  ;;  %v824_v30 = vld [vmem:[%s2975_s7 + $0xd8] sm:$0xff]  ;;  %v838_v35 = vld [vmem:[%s2975_s7 + $0x148] sm:$0xff]  ;;  %v1091_v37 = vld [vmem:[%s2975_s7 + $0x930] sm:$0xff]  ;;  %v2126_v44 = vpack.c.bf16 %v823_v34, %v807_v33 }
  0xeb   : > { %2063 = vmatpush1.bf16.msra.mxu1 %v2062_v15  ;;  %2029 = vmatprep.subr.bf16.mxu0 %v2028_v16  ;;  %v2082_v15 = vpack.c.bf16 %v1043_v9, %v1027_v7  ;;  %v2048_v16 = vpack.c.bf16 %v1074_v11, %v1058_v10  ;;  %v854_v36 = vld [vmem:[%s2975_s7 + $0x1c8] sm:$0xff]  ;;  %v2124_v42 = vpack.c.bf16 %v824_v30, %v808_v29  ;;  %v837_v46 = vld [vmem:[%s2975_s7 + $0x140] sm:$0xff]  ;;  %v839_v49 = vld [vmem:[%s2975_s7 + $0x150] sm:$0xff] }
  0xec   : > { %2065 = vmatprep.subr.bf16.mxu1 %v2064_v20  ;;  %v1059_v20 = vld [vmem:[%s2975_s7 + $0x830] sm:$0xff]  ;;  %v853_v47 = vld [vmem:[%s2975_s7 + $0x1c0] sm:$0xff]  ;;  %v888_v55 = vld [vmem:[%s2975_s7 + $0x2d8] sm:$0xff] }
  0xed   : > { %v2086_v23 = vpack.c.bf16 %v1075_v21, %v1059_v20  ;;  %v855_v51 = vld [vmem:[%s2975_s7 + $0x1d0] sm:$0xff]  ;;  %v2094_v56 = vpack.c.bf16 %v853_v47, %v837_v46  ;;  %v869_v59 = vld [vmem:[%s2975_s7 + $0x240] sm:$0xff]  ;;  %v920_v5 = vld [vmem:[%s2975_s7 + $0x3d8] sm:$0xff] }
  0xee   : > { %2031 = vmatpush1.bf16.msra.mxu0 %v2030_v26  ;;  %v806_v26 = vld [vmem:[%s2975_s7 + $0x48] sm:$0xff]  ;;  %v2130_v57 = vpack.c.bf16 %v855_v51, %v839_v49  ;;  %v885_v60 = vld [vmem:[%s2975_s7 + $0x2c0] sm:$0xff]  ;;  %v871_v61 = vld [vmem:[%s2975_s7 + $0x250] sm:$0xff] }
  0xef   : > { %2067 = vmatpush1.bf16.msra.mxu1 %v2066_v27  ;;  %2033 = vmatprep.subr.bf16.mxu0 %v2032_v28  ;;  %v1089_v27 = vld [vmem:[%s2975_s7 + $0x920] sm:$0xff]  ;;  %v822_v28 = vld [vmem:[%s2975_s7 + $0xc8] sm:$0xff]  ;;  %v887_v63 = vld [vmem:[%s2975_s7 + $0x2d0] sm:$0xff]  ;;  %v2098_v6 = vpack.c.bf16 %v885_v60, %v869_v59 }
  0xf0   : > { %2069 = vmatprep.subr.bf16.mxu1 %v2068_v32  ;;  %v821_v32 = vld [vmem:[%s2975_s7 + $0xc0] sm:$0xff]  ;;  %v2134_v7 = vpack.c.bf16 %v887_v63, %v871_v61  ;;  %v903_v11 = vld [vmem:[%s2975_s7 + $0x350] sm:$0xff]  ;;  %v952_v17 = vld [vmem:[%s2975_s7 + $0x4d8] sm:$0xff] }
  0xf1   : > { %v2090_v43 = vpack.c.bf16 %v821_v32, %v805_v31  ;;  %v901_v9 = vld [vmem:[%s2975_s7 + $0x340] sm:$0xff]  ;;  %v919_v13 = vld [vmem:[%s2975_s7 + $0x3d0] sm:$0xff]  ;;  %v1030_v51 = vld [vmem:[%s2975_s7 + $0x748] sm:$0xff] }
  0xf2   : > { %2035 = vmatpush1.bf16.msra.mxu0 %v2034_v38  ;;  %v2088_v38 = vpack.c.bf16 %v822_v28, %v806_v26  ;;  %v917_v10 = vld [vmem:[%s2975_s7 + $0x3c0] sm:$0xff]  ;;  %v966_v26 = vld [vmem:[%s2975_s7 + $0x548] sm:$0xff]  ;;  %v984_v28 = vld [vmem:[%s2975_s7 + $0x5d8] sm:$0xff] }
  0xf3   : > { %2071 = vmatpush1.bf16.msra.mxu1 %v2070_v40  ;;  %2037 = vmatprep.subr.bf16.mxu0 %v2036_v41  ;;  %v840_v40 = vld [vmem:[%s2975_s7 + $0x158] sm:$0xff]  ;;  %v2102_v18 = vpack.c.bf16 %v917_v10, %v901_v9  ;;  %v933_v21 = vld [vmem:[%s2975_s7 + $0x440] sm:$0xff]  ;;  %v967_v34 = vld [vmem:[%s2975_s7 + $0x550] sm:$0xff] }
  0xf4   : > { %2073 = vmatprep.subr.bf16.mxu1 %v2072_v45  ;;  %v856_v41 = vld [vmem:[%s2975_s7 + $0x1d8] sm:$0xff]  ;;  %v2092_v45 = vpack.c.bf16 %v854_v36, %v838_v35  ;;  %v965_v32 = vld [vmem:[%s2975_s7 + $0x540] sm:$0xff]  ;;  %v983_v36 = vld [vmem:[%s2975_s7 + $0x5d0] sm:$0xff] }
  0xf5   : > { %v2128_v50 = vpack.c.bf16 %v856_v41, %v840_v40  ;;  %v981_v33 = vld [vmem:[%s2975_s7 + $0x5c0] sm:$0xff]  ;;  %v1000_v40 = vld [vmem:[%s2975_s7 + $0x658] sm:$0xff]  ;;  %v999_v47 = vld [vmem:[%s2975_s7 + $0x650] sm:$0xff] }
  0xf6   : > { %2039 = vmatpush1.bf16.msra.mxu0 %v2038_v52  ;;  %v870_v52 = vld [vmem:[%s2975_s7 + $0x248] sm:$0xff]  ;;  %v1016_v41 = vld [vmem:[%s2975_s7 + $0x6d8] sm:$0xff]  ;;  %v1013_v46 = vld [vmem:[%s2975_s7 + $0x6c0] sm:$0xff] }
  0xf7   : > { %2075 = vmatpush1.bf16.msra.mxu1 %v2074_v53  ;;  %2041 = vmatprep.subr.bf16.mxu0 %v2040_v54  ;;  %v886_v53 = vld [vmem:[%s2975_s7 + $0x2c8] sm:$0xff]  ;;  %v872_v54 = vld [vmem:[%s2975_s7 + $0x258] sm:$0xff]  ;;  %v2148_v49 = vpack.c.bf16 %v1016_v41, %v1000_v40  ;;  %v1029_v59 = vld [vmem:[%s2975_s7 + $0x740] sm:$0xff] }
  0xf8   : > { %2077 = vmatprep.subr.bf16.mxu1 %v2076_v58  ;;  %v2096_v58 = vpack.c.bf16 %v886_v53, %v870_v52  ;;  %v2132_v62 = vpack.c.bf16 %v888_v55, %v872_v54  ;;  %v1046_v52 = vld [vmem:[%s2975_s7 + $0x7c8] sm:$0xff]  ;;  %v1032_v53 = vld [vmem:[%s2975_s7 + $0x758] sm:$0xff]  ;;  %v1045_v60 = vld [vmem:[%s2975_s7 + $0x7c0] sm:$0xff] }
  0xf9   : > { %v1048_v54 = vld [vmem:[%s2975_s7 + $0x7d8] sm:$0xff]  ;;  %v1102_v55 = vld [vmem:[%s3501_s2 + $0x8] sm:$0xff]  ;;  %v1031_v61 = vld [vmem:[%s2975_s7 + $0x750] sm:$0xff] }
  0xfa   : > { %2043 = vmatpush1.bf16.msra.mxu0 %v2042_v1  ;;  %v902_v1 = vld [vmem:[%s2975_s7 + $0x348] sm:$0xff]  ;;  %1110 = vperm.xlu0 %2259, %v1102_v55   ;;  %v1047_v63 = vld [vmem:[%s2975_s7 + $0x7d0] sm:$0xff]  ;;  %v1061_v9 = vld [vmem:[%s2975_s7 + $0x840] sm:$0xff] }
  0xfb   : > { %2079 = vmatpush1.bf16.msra.mxu1 %v2078_v3  ;;  %2045 = vmatprep.subr.bf16.mxu0 %v2044_v4  ;;  %v918_v3 = vld [vmem:[%s2975_s7 + $0x3c8] sm:$0xff]  ;;  %v904_v4 = vld [vmem:[%s2975_s7 + $0x358] sm:$0xff]  ;;  %v1077_v10 = vld [vmem:[%s2975_s7 + $0x8c0] sm:$0xff] }
  0xfc   : > { %2081 = vmatprep.subr.bf16.mxu1 %v2080_v8  ;;  %v2100_v8 = vpack.c.bf16 %v918_v3, %v902_v1  ;;  %v2136_v12 = vpack.c.bf16 %v920_v5, %v904_v4  ;;  %v1062_v1 = vld [vmem:[%s2975_s7 + $0x848] sm:$0xff]  ;;  %v1064_v4 = vld [vmem:[%s2975_s7 + $0x858] sm:$0xff]  ;;  %v859_v41 = vld [vmem:[%s2975_s7 + $0x1f0] sm:$0xff] }
  0xfd   : > { %v1078_v3 = vld [vmem:[%s2975_s7 + $0x8c8] sm:$0xff]  ;;  %v1080_v5 = vld [vmem:[%s2975_s7 + $0x8d8] sm:$0xff] }
  0xfe   : > { %2047 = vmatpush1.bf16.msra.mxu0 %v2046_v14  ;;  %v934_v14 = vld [vmem:[%s2975_s7 + $0x448] sm:$0xff] }
  0xff   : > { %2083 = vmatpush1.bf16.msra.mxu1 %v2082_v15  ;;  %2049 = vmatprep.subr.bf16.mxu0 %v2048_v16  ;;  %v950_v15 = vld [vmem:[%s2975_s7 + $0x4c8] sm:$0xff]  ;;  %v936_v16 = vld [vmem:[%s2975_s7 + $0x458] sm:$0xff] }
 0x100   : > { %2085 = vmatprep.subr.bf16.mxu1 %v2084_v19  ;;  %v2138_v19 = vpack.c.bf16 %v919_v13, %v903_v11  ;;  %v2104_v20 = vpack.c.bf16 %v950_v15, %v934_v14  ;;  %v2156_v11 = vpack.c.bf16 %v1080_v5, %v1064_v4  ;;  %v1079_v13 = vld [vmem:[%s2975_s7 + $0x8d0] sm:$0xff]  ;;  %v2122_v14 = vpack.c.bf16 %v1077_v10, %v1061_v9  ;;  %v906_v55 = vld [vmem:[%s2975_s7 + $0x368] sm:$0xff]  ;;  %v956_v9 = vld [vmem:[%s2975_s7 + $0x4f8] sm:$0xff] }
 0x101   : > { %v923_v4 = vld [vmem:[%s2975_s7 + $0x3f0] sm:$0xff]  ;;  %v938_v5 = vld [vmem:[%s2975_s7 + $0x468] sm:$0xff] }
 0x102   : > { %2051 = vmatpush1.bf16.msra.mxu0 %v2050_v22  ;;  %v949_v22 = vld [vmem:[%s2975_s7 + $0x4c0] sm:$0xff] }
 0x103   : > { %2087 = vmatpush1.bf16.msra.mxu1 %v2086_v23  ;;  %1310 = vmatprep.subr.mxu0 %v1090_v24  ;;  %v935_v23 = vld [vmem:[%s2975_s7 + $0x450] sm:$0xff]  ;;  %v2140_v24 = vpack.c.bf16 %v952_v17, %v936_v16  ;;  %v2106_v29 = vpack.c.bf16 %v949_v22, %v933_v21  ;;  %v1094_v16 = vld [vmem:[%s2975_s7 + $0x948] sm:$0xff]  ;;  %v1096_v17 = vld [vmem:[%s2975_s7 + $0x958] sm:$0xff] }
 0x104   : > { %1387 = vmatprep.subr.mxu1 %v1092_v25  ;;  %v951_v25 = vld [vmem:[%s2975_s7 + $0x4d0] sm:$0xff]  ;;  %v812_v21 = vld [vmem:[%s2975_s7 + $0x78] sm:$0xff] }
 0x105   : > { %v2142_v30 = vpack.c.bf16 %v951_v25, %v935_v23  ;;  %v828_v22 = vld [vmem:[%s2975_s7 + $0xf8] sm:$0xff]  ;;  %v809_v23 = vld [vmem:[%s2975_s7 + $0x60] sm:$0xff]  ;;  %v811_v25 = vld [vmem:[%s2975_s7 + $0x70] sm:$0xff] }
 0x106   : > { %1311 = vmatpush1.msra.mxu0 %v1089_v27  ;;  %v968_v27 = vld [vmem:[%s2975_s7 + $0x558] sm:$0xff] }
 0x107   : > { %1388 = vmatpush1.msra.mxu1 %v1091_v37  ;;  %1339 = vmatmul.mubr.f32.vlgmr.msra.gmra.mrb[4].mxu0 %v3059_v39  ;;  %v2144_v35 = vpack.c.bf16 %v984_v28, %v968_v27  ;;  %v998_v37 = vld [vmem:[%s2975_s7 + $0x648] sm:$0xff]  ;;  %v1095_v28 = vld [vmem:[%s2975_s7 + $0x950] sm:$0xff] }
 0x108   : > { %1416 = vmatmul.mubr.f32.vlgmr.msra.gmra.mrb[4].mxu1 %v3059_v39  ;;  %2089 = vmatprep.subr.bf16.mxu0 %v2088_v38  ;;  %v1014_v38 = vld [vmem:[%s2975_s7 + $0x6c8] sm:$0xff] }
 0x109   : > { %2125 = vmatprep.subr.bf16.mxu1 %v2124_v42  ;;  %2091 = vmatpush1.bf16.msra.mxu0 %v2090_v43  ;;  %v2110_v42 = vpack.c.bf16 %v981_v33, %v965_v32  ;;  %v2146_v43 = vpack.c.bf16 %v983_v36, %v967_v34  ;;  %v858_v27 = vld [vmem:[%s2975_s7 + $0x1e8] sm:$0xff]  ;;  %v2196_v32 = vpack.c.bf16 %v828_v22, %v812_v21  ;;  %v841_v36 = vld [vmem:[%s2975_s7 + $0x160] sm:$0xff]  ;;  %v988_v21 = vld [vmem:[%s2975_s7 + $0x5f8] sm:$0xff] }
 0x10a   : > { %2127 = vmatpush1.bf16.msra.mxu1 %v2126_v44  ;;  %2093 = vmatprep.subr.bf16.mxu0 %v2092_v45  ;;  %v2112_v44 = vpack.c.bf16 %v1014_v38, %v998_v37  ;;  %v997_v45 = vld [vmem:[%s2975_s7 + $0x640] sm:$0xff]  ;;  %v843_v38 = vld [vmem:[%s2975_s7 + $0x170] sm:$0xff] }
 0x10b   : > { %2129 = vmatprep.subr.bf16.mxu1 %v2128_v50  ;;  %1926 = vmatprep.mubr.msk.f32.mxu0 %vm1113_vm0, %v3083_v0  ;;  %v1015_v50 = vld [vmem:[%s2975_s7 + $0x6d0] sm:$0xff]  ;;  %v857_v37 = vld [vmem:[%s2975_s7 + $0x1e0] sm:$0xff] }
 0x10c   : > { %1928 = vmatprep.mubr.msk.f32.mxu1 %vm1113_vm0, %v3083_v0  ;;  %1345 = vmatmul.mubr.f32.gmra.mrb[6].mxu0 %v3088_v2 }
 0x10d   : > { %2095 = vmatpush1.bf16.msra.mxu0 %v2094_v56  ;;  %1422 = vmatmul.mubr.f32.gmra.mrb[6].mxu1 %v3088_v2  ;;  %v2114_v56 = vpack.c.bf16 %v1013_v46, %v997_v45  ;;  %v892_v45 = vld [vmem:[%s2975_s7 + $0x2f8] sm:$0xff]  ;;  %v2166_v46 = vpack.c.bf16 %v857_v37, %v841_v36  ;;  %v1001_v36 = vld [vmem:[%s2975_s7 + $0x660] sm:$0xff] }
 0x10e   : > { %2131 = vmatpush1.bf16.msra.mxu1 %v2130_v57  ;;  %2097 = vmatprep.subr.bf16.mxu0 %v2096_v58  ;;  %v2150_v57 = vpack.c.bf16 %v1015_v50, %v999_v47  ;;  %v2116_v58 = vpack.c.bf16 %v1046_v52, %v1030_v51  ;;  %v2202_v47 = vpack.c.bf16 %v859_v41, %v843_v38  ;;  %v873_v50 = vld [vmem:[%s2975_s7 + $0x260] sm:$0xff]  ;;  %v875_v52 = vld [vmem:[%s2975_s7 + $0x270] sm:$0xff] }
 0x10f   : > { %2133 = vmatprep.subr.bf16.mxu1 %v2132_v62  ;;  %1929 = vmatprep.mubr.msk.f32.mxu0 %vm1113_vm0, %v2964_v48  ;;  %v2152_v62 = vpack.c.bf16 %v1048_v54, %v1032_v53  ;;  %v889_v51 = vld [vmem:[%s2975_s7 + $0x2e0] sm:$0xff]  ;;  %v891_v54 = vld [vmem:[%s2975_s7 + $0x2f0] sm:$0xff] }
 0x110   : > { %1931 = vmatprep.mubr.msk.f32.mxu1 %vm1113_vm0, %v2964_v48  ;;  %v982_v48 = vld [vmem:[%s2975_s7 + $0x5c8] sm:$0xff]  ;;  %v1017_v37 = vld [vmem:[%s2975_s7 + $0x6e0] sm:$0xff]  ;;  %v1003_v38 = vld [vmem:[%s2975_s7 + $0x670] sm:$0xff] }
 0x111   : > { %2099 = vmatpush1.bf16.msra.mxu0 %v2098_v6  ;;  %v2108_v31 = vpack.c.bf16 %v982_v48, %v966_v26  ;;  %v2118_v6 = vpack.c.bf16 %v1045_v60, %v1029_v59  ;;  %v827_v26 = vld [vmem:[%s2975_s7 + $0xf0] sm:$0xff]  ;;  %v842_v48 = vld [vmem:[%s2975_s7 + $0x168] sm:$0xff]  ;;  %v2170_v59 = vpack.c.bf16 %v889_v51, %v873_v50  ;;  %v2206_v60 = vpack.c.bf16 %v891_v54, %v875_v52  ;;  %v1033_v50 = vld [vmem:[%s2975_s7 + $0x760] sm:$0xff] }
 0x112   : > { %2135 = vmatpush1.bf16.msra.mxu1 %v2134_v7  ;;  %2101 = vmatprep.subr.bf16.mxu0 %v2100_v8  ;;  %v2154_v7 = vpack.c.bf16 %v1047_v63, %v1031_v61  ;;  %v2120_v8 = vpack.c.bf16 %v1078_v3, %v1062_v1  ;;  %v2198_v34 = vpack.c.bf16 %v827_v26, %v811_v25  ;;  %v921_v63 = vld [vmem:[%s2975_s7 + $0x3e0] sm:$0xff]  ;;  %v907_v1 = vld [vmem:[%s2975_s7 + $0x370] sm:$0xff] }
 0x113   : > { %2137 = vmatprep.subr.bf16.mxu1 %v2136_v12  ;;  %v1063_v12 = vld [vmem:[%s2975_s7 + $0x850] sm:$0xff]  ;;  %v969_v25 = vld [vmem:[%s2975_s7 + $0x560] sm:$0xff] }
 0x114   : > { %v2158_v15 = vpack.c.bf16 %v1079_v13, %v1063_v12  ;;  %v937_v13 = vld [vmem:[%s2975_s7 + $0x460] sm:$0xff]  ;;  %v1019_v41 = vld [vmem:[%s2975_s7 + $0x6f0] sm:$0xff] }
 0x115   : > { %2103 = vmatpush1.bf16.msra.mxu0 %v2102_v18  ;;  %v810_v18 = vld [vmem:[%s2975_s7 + $0x68] sm:$0xff]  ;;  %v985_v26 = vld [vmem:[%s2975_s7 + $0x5e0] sm:$0xff]  ;;  %v1035_v52 = vld [vmem:[%s2975_s7 + $0x770] sm:$0xff] }
 0x116   : > { %2139 = vmatpush1.bf16.msra.mxu1 %v2138_v19  ;;  %2105 = vmatprep.subr.bf16.mxu0 %v2104_v20  ;;  %v1093_v19 = vld [vmem:[%s2975_s7 + $0x940] sm:$0xff]  ;;  %v826_v20 = vld [vmem:[%s2975_s7 + $0xe8] sm:$0xff]  ;;  %v1051_v54 = vld [vmem:[%s2975_s7 + $0x7f0] sm:$0xff] }
 0x117   : > { %2141 = vmatprep.subr.bf16.mxu1 %v2140_v24  ;;  %v825_v24 = vld [vmem:[%s2975_s7 + $0xe0] sm:$0xff] }
 0x118   : > { %v2162_v33 = vpack.c.bf16 %v825_v24, %v809_v23  ;;  %v1049_v51 = vld [vmem:[%s2975_s7 + $0x7e0] sm:$0xff] }
 0x119   : > { %2107 = vmatpush1.bf16.msra.mxu0 %v2106_v29  ;;  %v2160_v29 = vpack.c.bf16 %v826_v20, %v810_v18  ;;  %v970_v18 = vld [vmem:[%s2975_s7 + $0x568] sm:$0xff]  ;;  %v972_v20 = vld [vmem:[%s2975_s7 + $0x578] sm:$0xff] }
 0x11a   : > { %2143 = vmatpush1.bf16.msra.mxu1 %v2142_v30  ;;  %2109 = vmatprep.subr.bf16.mxu0 %v2108_v31  ;;  %v844_v30 = vld [vmem:[%s2975_s7 + $0x178] sm:$0xff] }
 0x11b   : > { %2145 = vmatprep.subr.bf16.mxu1 %v2144_v35  ;;  %v860_v31 = vld [vmem:[%s2975_s7 + $0x1f8] sm:$0xff]  ;;  %v2164_v35 = vpack.c.bf16 %v858_v27, %v842_v48  ;;  %v971_v48 = vld [vmem:[%s2975_s7 + $0x570] sm:$0xff]  ;;  %v2216_v27 = vpack.c.bf16 %v988_v21, %v972_v20 }
 0x11c   : > { %v2200_v40 = vpack.c.bf16 %v860_v31, %v844_v30  ;;  %v1018_v30 = vld [vmem:[%s2975_s7 + $0x6e8] sm:$0xff]  ;;  %v1004_v31 = vld [vmem:[%s2975_s7 + $0x678] sm:$0xff] }
 0x11d   : > { %2111 = vmatpush1.bf16.msra.mxu0 %v2110_v42  ;;  %v874_v42 = vld [vmem:[%s2975_s7 + $0x268] sm:$0xff] }
 0x11e   : > { %2147 = vmatpush1.bf16.msra.mxu1 %v2146_v43  ;;  %2113 = vmatprep.subr.bf16.mxu0 %v2112_v44  ;;  %v890_v43 = vld [vmem:[%s2975_s7 + $0x2e8] sm:$0xff]  ;;  %v876_v44 = vld [vmem:[%s2975_s7 + $0x278] sm:$0xff] }
 0x11f   : > { %2149 = vmatprep.subr.bf16.mxu1 %v2148_v49  ;;  %v2168_v49 = vpack.c.bf16 %v890_v43, %v874_v42  ;;  %v2204_v53 = vpack.c.bf16 %v892_v45, %v876_v44  ;;  %v1034_v42 = vld [vmem:[%s2975_s7 + $0x768] sm:$0xff]  ;;  %v1036_v44 = vld [vmem:[%s2975_s7 + $0x778] sm:$0xff] }
 0x120   : > { %v1050_v43 = vld [vmem:[%s2975_s7 + $0x7e8] sm:$0xff]  ;;  %v1052_v45 = vld [vmem:[%s2975_s7 + $0x7f8] sm:$0xff] }
 0x121   : > { %2115 = vmatpush1.bf16.msra.mxu0 %v2114_v56  ;;  %v922_v56 = vld [vmem:[%s2975_s7 + $0x3e8] sm:$0xff] }
 0x122   : > { %2151 = vmatpush1.bf16.msra.mxu1 %v2150_v57  ;;  %2117 = vmatprep.subr.bf16.mxu0 %v2116_v58  ;;  %v908_v57 = vld [vmem:[%s2975_s7 + $0x378] sm:$0xff]  ;;  %v2172_v61 = vpack.c.bf16 %v922_v56, %v906_v55  ;;  %v1066_v55 = vld [vmem:[%s2975_s7 + $0x868] sm:$0xff] }
 0x123   : > { %2153 = vmatprep.subr.bf16.mxu1 %v2152_v62  ;;  %v924_v58 = vld [vmem:[%s2975_s7 + $0x3f8] sm:$0xff]  ;;  %v905_v62 = vld [vmem:[%s2975_s7 + $0x360] sm:$0xff]  ;;  %v1082_v56 = vld [vmem:[%s2975_s7 + $0x8e8] sm:$0xff] }
 0x124   : > { %v2208_v3 = vpack.c.bf16 %v924_v58, %v908_v57  ;;  %v2174_v10 = vpack.c.bf16 %v921_v63, %v905_v62  ;;  %v1068_v57 = vld [vmem:[%s2975_s7 + $0x878] sm:$0xff]  ;;  %v1065_v62 = vld [vmem:[%s2975_s7 + $0x860] sm:$0xff] }
 0x125   : > { %2119 = vmatpush1.bf16.msra.mxu0 %v2118_v6  ;;  %v954_v6 = vld [vmem:[%s2975_s7 + $0x4e8] sm:$0xff]  ;;  %v1084_v58 = vld [vmem:[%s2975_s7 + $0x8f8] sm:$0xff]  ;;  %v1081_v63 = vld [vmem:[%s2975_s7 + $0x8e0] sm:$0xff] }
 0x126   : > { %2155 = vmatpush1.bf16.msra.mxu1 %v2154_v7  ;;  %2121 = vmatprep.subr.bf16.mxu0 %v2120_v8  ;;  %v2260_v7 = vld [vmem:[%s3499_s0 + $0x8] sm:$0xff]  ;;  %v940_v8 = vld [vmem:[%s2975_s7 + $0x478] sm:$0xff]  ;;  %v2176_v12 = vpack.c.bf16 %v954_v6, %v938_v5  ;;  %v2194_v5 = vpack.c.bf16 %v1081_v63, %v1065_v62 }
 0x127   : > { %2157 = vmatprep.subr.bf16.mxu1 %v2156_v11  ;;  %v2210_v11 = vpack.c.bf16 %v923_v4, %v907_v1  ;;  %v2228_v1 = vpack.c.bf16 %v1084_v58, %v1068_v57  ;;  %v1083_v4 = vld [vmem:[%s2975_s7 + $0x8f0] sm:$0xff] }
 0x129   : > { %2123 = vmatpush1.bf16.msra.mxu0 %v2122_v14  ;;  %v953_v14 = vld [vmem:[%s2975_s7 + $0x4e0] sm:$0xff] }
 0x12a   : > { %2159 = vmatpush1.bf16.msra.mxu1 %v2158_v15  ;;  %1464 = vmatprep.subr.mxu0 %v1094_v16  ;;  %v939_v15 = vld [vmem:[%s2975_s7 + $0x470] sm:$0xff]  ;;  %v2212_v16 = vpack.c.bf16 %v956_v9, %v940_v8  ;;  %v2178_v22 = vpack.c.bf16 %v953_v14, %v937_v13  ;;  %v1100_v8 = vld [vmem:[%s2975_s7 + $0x978] sm:$0xff]  ;;  %v1097_v9 = vld [vmem:[%s2975_s7 + $0x960] sm:$0xff] }
 0x12b   : > { %1541 = vmatprep.subr.mxu1 %v1096_v17  ;;  %v955_v17 = vld [vmem:[%s2975_s7 + $0x4f0] sm:$0xff] }
 0x12c   : > { %v2214_v23 = vpack.c.bf16 %v955_v17, %v939_v15 }
 0x12d   : > { %1465 = vmatpush1.msra.mxu0 %v1093_v19  ;;  %v986_v19 = vld [vmem:[%s2975_s7 + $0x5e8] sm:$0xff] }
 0x12e   : > { %1542 = vmatpush1.msra.mxu1 %v1095_v28  ;;  %1493 = vmatmul.mubr.f32.vlgmr.msra.gmra.mrb[8].mxu0 %v3059_v39  ;;  %v2180_v24 = vpack.c.bf16 %v986_v19, %v970_v18  ;;  %v987_v28 = vld [vmem:[%s2975_s7 + $0x5f0] sm:$0xff] }
 0x12f   : > { %1570 = vmatmul.mubr.f32.vlgmr.msra.gmra.mrb[8].mxu1 %v3059_v39  ;;  %2161 = vmatprep.subr.bf16.mxu0 %v2160_v29  ;;  %v1002_v29 = vld [vmem:[%s2975_s7 + $0x668] sm:$0xff] }
 0x130   : > { %2197 = vmatprep.subr.bf16.mxu1 %v2196_v32  ;;  %2163 = vmatpush1.bf16.msra.mxu0 %v2162_v33  ;;  %v1020_v32 = vld [vmem:[%s2975_s7 + $0x6f8] sm:$0xff]  ;;  %v2182_v33 = vpack.c.bf16 %v985_v26, %v969_v25 }
 0x131   : > { %2199 = vmatpush1.bf16.msra.mxu1 %v2198_v34  ;;  %2165 = vmatprep.subr.bf16.mxu0 %v2164_v35  ;;  %v2218_v34 = vpack.c.bf16 %v987_v28, %v971_v48  ;;  %v2184_v35 = vpack.c.bf16 %v1018_v30, %v1002_v29 }
 0x132   : > { %2201 = vmatprep.subr.bf16.mxu1 %v2200_v40  ;;  %1930 = vmatprep.mubr.msk.f32.mxu0 %vm1113_vm0, %v3083_v0  ;;  %v2220_v40 = vpack.c.bf16 %v1020_v32, %v1004_v31 }
 0x133   : > { %1932 = vmatprep.mubr.msk.f32.mxu1 %vm1113_vm0, %v3083_v0  ;;  %1499 = vmatmul.mubr.f32.gmra.mrb[10].mxu0 %v3088_v2 }
 0x134   : > { %2167 = vmatpush1.bf16.msra.mxu0 %v2166_v46  ;;  %1576 = vmatmul.mubr.f32.gmra.mrb[10].mxu1 %v3088_v2  ;;  %v2186_v46 = vpack.c.bf16 %v1017_v37, %v1001_v36 }
 0x135   : > { %2203 = vmatpush1.bf16.msra.mxu1 %v2202_v47  ;;  %2169 = vmatprep.subr.bf16.mxu0 %v2168_v49  ;;  %v2222_v47 = vpack.c.bf16 %v1019_v41, %v1003_v38  ;;  %v2188_v49 = vpack.c.bf16 %v1050_v43, %v1034_v42 }
 0x136   : > { %2205 = vmatprep.subr.bf16.mxu1 %v2204_v53  ;;  %1933 = vmatprep.mubr.msk.f32.mxu0 %vm1113_vm0, %v2260_v7  ;;  %v2224_v53 = vpack.c.bf16 %v1052_v45, %v1036_v44 }
 0x137   : > { %1935 = vmatprep.mubr.msk.f32.mxu1 %vm1113_vm0, %v2260_v7  ;;  %v1098_v7 = vld [vmem:[%s2975_s7 + $0x968] sm:$0xff] }
 0x138   : > { %2171 = vmatpush1.bf16.msra.mxu0 %v2170_v59  ;;  %v2190_v59 = vpack.c.bf16 %v1049_v51, %v1033_v50 }
 0x139   : > { %2207 = vmatpush1.bf16.msra.mxu1 %v2206_v60  ;;  %2173 = vmatprep.subr.bf16.mxu0 %v2172_v61  ;;  %v2226_v60 = vpack.c.bf16 %v1051_v54, %v1035_v52  ;;  %v2192_v61 = vpack.c.bf16 %v1082_v56, %v1066_v55 }
 0x13a   : > { %2209 = vmatprep.subr.bf16.mxu1 %v2208_v3  ;;  %v1067_v3 = vld [vmem:[%s2975_s7 + $0x870] sm:$0xff] }
 0x13b   : > { %v2230_v6 = vpack.c.bf16 %v1083_v4, %v1067_v3 }
 0x13c   : > { %2175 = vmatpush1.bf16.msra.mxu0 %v2174_v10  ;;  %v1099_v10 = vld [vmem:[%s2975_s7 + $0x970] sm:$0xff] }
 0x13d   : > { %2211 = vmatpush1.bf16.msra.mxu1 %v2210_v11  ;;  %2177 = vmatprep.subr.bf16.mxu0 %v2176_v12  ;;  %v3346_v11 = vpop.permute.xlu0 %1105 }
 0x13e   : > { %2213 = vmatprep.subr.bf16.mxu1 %v2212_v16 }
 0x140   : > { %2179 = vmatpush1.bf16.msra.mxu0 %v2178_v22 }
 0x141   : > { %2215 = vmatpush1.bf16.msra.mxu1 %v2214_v23  ;;  %2181 = vmatprep.subr.bf16.mxu0 %v2180_v24 }
 0x142   : > { %2217 = vmatprep.subr.bf16.mxu1 %v2216_v27 }
 0x144   : > { %2183 = vmatpush1.bf16.msra.mxu0 %v2182_v33 }
 0x145   : > { %2219 = vmatpush1.bf16.msra.mxu1 %v2218_v34  ;;  %2185 = vmatprep.subr.bf16.mxu0 %v2184_v35 }
 0x146   : > { %2221 = vmatprep.subr.bf16.mxu1 %v2220_v40 }
 0x148   : > { %2187 = vmatpush1.bf16.msra.mxu0 %v2186_v46 }
 0x149   : > { %2223 = vmatpush1.bf16.msra.mxu1 %v2222_v47  ;;  %2189 = vmatprep.subr.bf16.mxu0 %v2188_v49 }
 0x14a   : > { %2225 = vmatprep.subr.bf16.mxu1 %v2224_v53 }
 0x14c   : > { %2191 = vmatpush1.bf16.msra.mxu0 %v2190_v59 }
 0x14d   : > { %2227 = vmatpush1.bf16.msra.mxu1 %v2226_v60  ;;  %2193 = vmatprep.subr.bf16.mxu0 %v2192_v61 }
 0x14e   : > { %2229 = vmatprep.subr.bf16.mxu1 %v2228_v1 }
 0x150   : > { %2195 = vmatpush1.bf16.msra.mxu0 %v2194_v5 }
 0x151   : > { %2231 = vmatpush1.bf16.msra.mxu1 %v2230_v6  ;;  %1618 = vmatprep.subr.mxu0 %v1098_v7 }
 0x152   : > { %1695 = vmatprep.subr.mxu1 %v1100_v8 }
 0x154   : > { %1619 = vmatpush1.msra.mxu0 %v1097_v9 }
 0x155   : > { %1696 = vmatpush1.msra.mxu1 %v1099_v10  ;;  %1647 = vmatmul.mubr.f32.vlgmr.msra.gmra.mrb[12].mxu0 %v3059_v39 }
 0x156   : > { %1724 = vmatmul.mubr.f32.vlgmr.msra.gmra.mrb[12].mxu1 %v3059_v39  ;;  %1934 = vmatprep.mubr.msk.f32.mxu0 %vm1113_vm0, %v3083_v0 }
 0x157   : > { %1936 = vmatprep.mubr.msk.f32.mxu1 %vm1113_vm0, %v3083_v0 }
 0x159   : > { %1653 = vmatmul.mubr.f32.gmra.mrb[14].mxu0 %v3088_v2 }
 0x15a   : > { %1730 = vmatmul.mubr.f32.gmra.mrb[14].mxu1 %v3088_v2 }
 0x179   : > { %v3355_v2 = vpop.permute.xlu0 %1110 }
 0x1b3   : > { %v1186_v12 = vpop.f32.mrb[0].mxu0 }
 0x1b4   : > { %v1263_v13 = vpop.f32.mrb[0].mxu1  ;;  %v1187_v14 = vadd.f32 %v1186_v12, %v3346_v11  ;;  %v1188_v15 = vpop.f32.mrb[1].mxu0 }
 0x1b5   : > { %v1264_v39 = vadd.f32 %v1263_v13, %v3346_v11  ;;  %v1189_v16 = vadd.f32 %v1188_v15, %v3346_v11  ;;  %v1265_v17 = vpop.f32.mrb[1].mxu1 }
 0x1b6   : > { %1736 = vst [vmem:[%s3351_s26] sm:$0xff] %v1187_v14  ;;  %v1266_v0 = vadd.f32 %v1265_v17, %v3346_v11 }
 0x1b7   : > { %1738 = vst [vmem:[%s3351_s26 + $0x10] sm:$0xff] %v1264_v39  ;;  %1737 = vst [vmem:[%s3351_s26 + $0x8] sm:$0xff] %v1189_v16 }
 0x1b8   : > { %1739 = vst [vmem:[%s3351_s26 + $0x18] sm:$0xff] %v1266_v0  ;;  %v1192_v18 = vpop.f32.mrb[2].mxu0 }
 0x1b9   : > { %v1269_v19 = vpop.f32.mrb[2].mxu1  ;;  %v1193_v20 = vadd.f32 %v1192_v18, %v3355_v2  ;;  %v1194_v21 = vpop.f32.mrb[3].mxu0 }
 0x1ba   : > { %v1270_v22 = vadd.f32 %v1269_v19, %v3355_v2  ;;  %v1195_v23 = vadd.f32 %v1194_v21, %v3355_v2  ;;  %v1271_v24 = vpop.f32.mrb[3].mxu1 }
 0x1bb   : > { %1752 = vst [vmem:[%s3351_s26 + $0x80] sm:$0xff] %v1193_v20  ;;  %v1272_v25 = vadd.f32 %v1271_v24, %v3355_v2 }
 0x1bc   : > { %1754 = vst [vmem:[%s3351_s26 + $0x90] sm:$0xff] %v1270_v22  ;;  %1753 = vst [vmem:[%s3351_s26 + $0x88] sm:$0xff] %v1195_v23 }
 0x1bd   : > { %1755 = vst [vmem:[%s3351_s26 + $0x98] sm:$0xff] %v1272_v25 }
 0x1be   : > { %v1792_v14 = vld [vmem:[%s3351_s26 + $0x8] sm:$0xff] (%p2336_p5)  ;;  %v1794_v15 = vld [vmem:[%s3351_s26 + $0x10] sm:$0xff] (%p2336_p5) }
 0x1bf   : > { %v1796_v39 = vld [vmem:[%s3351_s26 + $0x18] sm:$0xff] (%p2336_p5)  ;;  %1793 = vst [vmem:[%s3426_s20 + $0x8] sm:$0xff] (%p2336_p5), %v1792_v14  ;;  %1795 = vst [vmem:[%s3426_s20 + $0x10] sm:$0xff] (%p2336_p5), %v1794_v15 }
 0x1c0   : > { %1797 = vst [vmem:[%s3426_s20 + $0x18] sm:$0xff] (%p2336_p5), %v1796_v39 }
 0x1da   : > { %v1340_v26 = vpop.f32.mrb[4].mxu0 }
 0x1db   : > { %v1341_v48 = vadd.f32 %v1340_v26, %v3346_v11  ;;  %v1417_v27 = vpop.f32.mrb[4].mxu1  ;;  %v1342_v28 = vpop.f32.mrb[5].mxu0  ;;  %v1822_v26 = vld [vmem:[%s3351_s26 + $0x80] sm:$0xff] (%p2336_p5) }
 0x1dc   : > { %v1418_v29 = vadd.f32 %v1417_v27, %v3346_v11  ;;  %v1343_v30 = vadd.f32 %v1342_v28, %v3346_v11  ;;  %v1419_v31 = vpop.f32.mrb[5].mxu1  ;;  %1823 = vst [vmem:[%s3426_s20 + $0x100] sm:$0xff] (%p2336_p5), %v1822_v26  ;;  %v1826_v27 = vld [vmem:[%s3351_s26 + $0x90] sm:$0xff] (%p2336_p5)  ;;  %v1828_v28 = vld [vmem:[%s3351_s26 + $0x98] sm:$0xff] (%p2336_p5) }
 0x1dd   : > { %1740 = vst [vmem:[%s3351_s26 + $0x20] sm:$0xff] %v1341_v48  ;;  %v1420_v32 = vadd.f32 %v1419_v31, %v3346_v11  ;;  %v1824_v48 = vld [vmem:[%s3351_s26 + $0x88] sm:$0xff] (%p2336_p5)  ;;  %1827 = vst [vmem:[%s3426_s20 + $0x110] sm:$0xff] (%p2336_p5), %v1826_v27 }
 0x1de   : > { %1742 = vst [vmem:[%s3351_s26 + $0x30] sm:$0xff] %v1418_v29  ;;  %1741 = vst [vmem:[%s3351_s26 + $0x28] sm:$0xff] %v1343_v30 }
 0x1df   : > { %1743 = vst [vmem:[%s3351_s26 + $0x38] sm:$0xff] %v1420_v32  ;;  %v1346_v33 = vpop.f32.mrb[6].mxu0  ;;  %1825 = vst [vmem:[%s3426_s20 + $0x108] sm:$0xff] (%p2336_p5), %v1824_v48 }
 0x1e0   : > { %v1347_v34 = vadd.f32 %v1346_v33, %v3355_v2  ;;  %v1423_v35 = vpop.f32.mrb[6].mxu1  ;;  %v1348_v36 = vpop.f32.mrb[7].mxu0  ;;  %1829 = vst [vmem:[%s3426_s20 + $0x118] sm:$0xff] (%p2336_p5), %v1828_v28 }
 0x1e1   : > { %v1424_v37 = vadd.f32 %v1423_v35, %v3355_v2  ;;  %v1349_v38 = vadd.f32 %v1348_v36, %v3355_v2  ;;  %v1425_v40 = vpop.f32.mrb[7].mxu1 }
 0x1e2   : > { %1756 = vst [vmem:[%s3351_s26 + $0xa0] sm:$0xff] %v1347_v34  ;;  %v1426_v41 = vadd.f32 %v1425_v40, %v3355_v2 }
 0x1e3   : > { %1758 = vst [vmem:[%s3351_s26 + $0xb0] sm:$0xff] %v1424_v37  ;;  %1757 = vst [vmem:[%s3351_s26 + $0xa8] sm:$0xff] %v1349_v38 }
 0x1e4   : > { %1759 = vst [vmem:[%s3351_s26 + $0xb8] sm:$0xff] %v1426_v41  ;;  %v1798_v16 = vld [vmem:[%s3351_s26 + $0x20] sm:$0xff] (%p2336_p5) }
 0x1e5   : > { %v1800_v17 = vld [vmem:[%s3351_s26 + $0x28] sm:$0xff] (%p2336_p5)  ;;  %1799 = vst [vmem:[%s3426_s20 + $0x20] sm:$0xff] (%p2336_p5), %v1798_v16  ;;  %v1802_v0 = vld [vmem:[%s3351_s26 + $0x30] sm:$0xff] (%p2336_p5) }
 0x1e6   : > { %1801 = vst [vmem:[%s3426_s20 + $0x28] sm:$0xff] (%p2336_p5), %v1800_v17  ;;  %1803 = vst [vmem:[%s3426_s20 + $0x30] sm:$0xff] (%p2336_p5), %v1802_v0 }
 0x1e9   : > { %v1830_v29 = vld [vmem:[%s3351_s26 + $0xa0] sm:$0xff] (%p2336_p5) }
 0x1ea   : > { %1831 = vst [vmem:[%s3426_s20 + $0x120] sm:$0xff] (%p2336_p5), %v1830_v29  ;;  %v1832_v30 = vld [vmem:[%s3351_s26 + $0xa8] sm:$0xff] (%p2336_p5)  ;;  %v1834_v31 = vld [vmem:[%s3351_s26 + $0xb0] sm:$0xff] (%p2336_p5) }
 0x1eb   : > { %v1836_v32 = vld [vmem:[%s3351_s26 + $0xb8] sm:$0xff] (%p2336_p5)  ;;  %1833 = vst [vmem:[%s3426_s20 + $0x128] sm:$0xff] (%p2336_p5), %v1832_v30  ;;  %1835 = vst [vmem:[%s3426_s20 + $0x130] sm:$0xff] (%p2336_p5), %v1834_v31 }
 0x1ec   : > { %1837 = vst [vmem:[%s3426_s20 + $0x138] sm:$0xff] (%p2336_p5), %v1836_v32 }
 0x201   : > { %v1494_v42 = vpop.f32.mrb[8].mxu0 }
 0x202   : > { %v1495_v43 = vadd.f32 %v1494_v42, %v3346_v11  ;;  %v1571_v44 = vpop.f32.mrb[8].mxu1  ;;  %v1496_v45 = vpop.f32.mrb[9].mxu0 }
 0x203   : > { %v1572_v46 = vadd.f32 %v1571_v44, %v3346_v11  ;;  %v1497_v47 = vadd.f32 %v1496_v45, %v3346_v11  ;;  %v1573_v49 = vpop.f32.mrb[9].mxu1 }
 0x204   : > { %1744 = vst [vmem:[%s3351_s26 + $0x40] sm:$0xff] %v1495_v43  ;;  %v1574_v50 = vadd.f32 %v1573_v49, %v3346_v11 }
 0x205   : > { %1746 = vst [vmem:[%s3351_s26 + $0x50] sm:$0xff] %v1572_v46  ;;  %1745 = vst [vmem:[%s3351_s26 + $0x48] sm:$0xff] %v1497_v47 }
 0x206   : > { %1747 = vst [vmem:[%s3351_s26 + $0x58] sm:$0xff] %v1574_v50  ;;  %v1500_v51 = vpop.f32.mrb[10].mxu0 }
 0x207   : > { %v1501_v52 = vadd.f32 %v1500_v51, %v3355_v2  ;;  %v1577_v53 = vpop.f32.mrb[10].mxu1  ;;  %v1502_v54 = vpop.f32.mrb[11].mxu0 }
 0x208   : > { %v1578_v55 = vadd.f32 %v1577_v53, %v3355_v2  ;;  %v1503_v56 = vadd.f32 %v1502_v54, %v3355_v2  ;;  %v1579_v57 = vpop.f32.mrb[11].mxu1 }
 0x209   : > { %1760 = vst [vmem:[%s3351_s26 + $0xc0] sm:$0xff] %v1501_v52  ;;  %v1580_v58 = vadd.f32 %v1579_v57, %v3355_v2 }
 0x20a   : > { %1762 = vst [vmem:[%s3351_s26 + $0xd0] sm:$0xff] %v1578_v55  ;;  %1761 = vst [vmem:[%s3351_s26 + $0xc8] sm:$0xff] %v1503_v56 }
 0x20b   : > { %1763 = vst [vmem:[%s3351_s26 + $0xd8] sm:$0xff] %v1580_v58  ;;  %v1806_v18 = vld [vmem:[%s3351_s26 + $0x40] sm:$0xff] (%p2336_p5) }
 0x20c   : > { %1807 = vst [vmem:[%s3426_s20 + $0x40] sm:$0xff] (%p2336_p5), %v1806_v18  ;;  %v1808_v19 = vld [vmem:[%s3351_s26 + $0x48] sm:$0xff] (%p2336_p5)  ;;  %v1810_v20 = vld [vmem:[%s3351_s26 + $0x50] sm:$0xff] (%p2336_p5) }
 0x20d   : > { %v1812_v21 = vld [vmem:[%s3351_s26 + $0x58] sm:$0xff] (%p2336_p5)  ;;  %1809 = vst [vmem:[%s3426_s20 + $0x48] sm:$0xff] (%p2336_p5), %v1808_v19  ;;  %1811 = vst [vmem:[%s3426_s20 + $0x50] sm:$0xff] (%p2336_p5), %v1810_v20 }
 0x20e   : > { %1813 = vst [vmem:[%s3426_s20 + $0x58] sm:$0xff] (%p2336_p5), %v1812_v21 }
 0x210   : > { %v1838_v33 = vld [vmem:[%s3351_s26 + $0xc0] sm:$0xff] (%p2336_p5) }
 0x211   : > { %v1840_v34 = vld [vmem:[%s3351_s26 + $0xc8] sm:$0xff] (%p2336_p5)  ;;  %v1842_v35 = vld [vmem:[%s3351_s26 + $0xd0] sm:$0xff] (%p2336_p5)  ;;  %1839 = vst [vmem:[%s3426_s20 + $0x140] sm:$0xff] (%p2336_p5), %v1838_v33 }
 0x212   : > { %1841 = vst [vmem:[%s3426_s20 + $0x148] sm:$0xff] (%p2336_p5), %v1840_v34  ;;  %1843 = vst [vmem:[%s3426_s20 + $0x150] sm:$0xff] (%p2336_p5), %v1842_v35  ;;  %v1844_v36 = vld [vmem:[%s3351_s26 + $0xd8] sm:$0xff] (%p2336_p5) }
 0x213   : > { %1845 = vst [vmem:[%s3426_s20 + $0x158] sm:$0xff] (%p2336_p5), %v1844_v36 }
 0x228   : > { %v1648_v59 = vpop.f32.mrb[12].mxu0 }
 0x229   : > { %v1649_v60 = vadd.f32 %v1648_v59, %v3346_v11  ;;  %v1725_v61 = vpop.f32.mrb[12].mxu1  ;;  %v1650_v62 = vpop.f32.mrb[13].mxu0 }
 0x22a   : > { %v1726_v63 = vadd.f32 %v1725_v61, %v3346_v11  ;;  %v1651_v1 = vadd.f32 %v1650_v62, %v3346_v11  ;;  %v1727_v3 = vpop.f32.mrb[13].mxu1 }
 0x22b   : > { %1748 = vst [vmem:[%s3351_s26 + $0x60] sm:$0xff] %v1649_v60  ;;  %v1728_v4 = vadd.f32 %v1727_v3, %v3346_v11  ;;  %1774 = sbr.rel (!%p2336_p5) target bundleno = 570 (0x23a), region = 59  ;;  %v1790_v11 = vld [vmem:[%s3351_s26] sm:$0xff] (%p2336_p5) }
 0x22c   : > { %1750 = vst [vmem:[%s3351_s26 + $0x70] sm:$0xff] %v1726_v63  ;;  %1749 = vst [vmem:[%s3351_s26 + $0x68] sm:$0xff] %v1651_v1  ;;  %v1654_v5 = vpop.f32.mrb[14].mxu0 }
 0x22d   : > { %1751 = vst [vmem:[%s3351_s26 + $0x78] sm:$0xff] %v1728_v4  ;;  %v1655_v6 = vadd.f32 %v1654_v5, %v3355_v2  ;;  %v1731_v7 = vpop.f32.mrb[14].mxu1  ;;  %v1656_v8 = vpop.f32.mrb[15].mxu0  ;;  %1791 = vst [vmem:[%s3426_s20] sm:$0xff] (%p2336_p5), %v1790_v11 }
 0x22e   : > { %v1732_v9 = vadd.f32 %v1731_v7, %v3355_v2  ;;  %v1657_v10 = vadd.f32 %v1656_v8, %v3355_v2  ;;  %v1733_v12 = vpop.f32.mrb[15].mxu1 }
 0x22f   : > { %1764 = vst [vmem:[%s3351_s26 + $0xe0] sm:$0xff] %v1655_v6  ;;  %v1734_v13 = vadd.f32 %v1733_v12, %v3355_v2  ;;  %v1804_v2 = vld [vmem:[%s3351_s26 + $0x38] sm:$0xff] (%p2336_p5) }
 0x230   : > { %1766 = vst [vmem:[%s3351_s26 + $0xf0] sm:$0xff] %v1732_v9  ;;  %1765 = vst [vmem:[%s3351_s26 + $0xe8] sm:$0xff] %v1657_v10 }
 0x231   : > { %1767 = vst [vmem:[%s3351_s26 + $0xf8] sm:$0xff] %v1734_v13  ;;  %1805 = vst [vmem:[%s3426_s20 + $0x38] sm:$0xff] (%p2336_p5), %v1804_v2 }
 0x232   : > { %v1814_v22 = vld [vmem:[%s3351_s26 + $0x60] sm:$0xff] }
 0x233   : > { %v1816_v23 = vld [vmem:[%s3351_s26 + $0x68] sm:$0xff]  ;;  %v1818_v24 = vld [vmem:[%s3351_s26 + $0x70] sm:$0xff]  ;;  %1815 = vst [vmem:[%s3426_s20 + $0x60] sm:$0xff] %v1814_v22 }
 0x234   : > { %1817 = vst [vmem:[%s3426_s20 + $0x68] sm:$0xff] %v1816_v23  ;;  %1819 = vst [vmem:[%s3426_s20 + $0x70] sm:$0xff] %v1818_v24  ;;  %v1820_v25 = vld [vmem:[%s3351_s26 + $0x78] sm:$0xff] }
 0x235   : > { %1821 = vst [vmem:[%s3426_s20 + $0x78] sm:$0xff] %v1820_v25 }
 0x236   : > { %v1846_v37 = vld [vmem:[%s3351_s26 + $0xe0] sm:$0xff] }
 0x237   : > { %v1848_v38 = vld [vmem:[%s3351_s26 + $0xe8] sm:$0xff]  ;;  %1847 = vst [vmem:[%s3426_s20 + $0x160] sm:$0xff] %v1846_v37  ;;  %v1850_v40 = vld [vmem:[%s3351_s26 + $0xf0] sm:$0xff] }
 0x238   : > { %1849 = vst [vmem:[%s3426_s20 + $0x168] sm:$0xff] %v1848_v38  ;;  %v1852_v41 = vld [vmem:[%s3351_s26 + $0xf8] sm:$0xff]  ;;  %1851 = vst [vmem:[%s3426_s20 + $0x170] sm:$0xff] %v1850_v40 }
 0x239   : > { %1853 = vst [vmem:[%s3426_s20 + $0x178] sm:$0xff] %v1852_v41 }
 0x23a PF: > { %p10_p10 = scmp.ge.s32.totalorder %s2323_s16, 4   ;;  %s3504_s12 = smov %s2279_s13 }
 0x23b   : > { %s3505_s13 = smov %s2334_s19  ;;  %s3506_s14 = smov %s2323_s16 }
 0x23c   :  { %12 = sbr.rel (!%p10_p10) target bundleno = 2 (0x2), region = 113 }

// kernel: model_forward.6
= control target key start
LH: loop header
LB: loop body
LE: loop exit
PB: predicated region body
PF: predicated region fallthrough
CT: control target
= control target key end

     0   :  { %vm752_vm0 = vcmask 130048   ;;  %s5804_s1 = inlined_call_operand.vmem [shape: f32[784,896], index: 1, kind: input, shape index: {}]   ;;  %s5805_s0 = inlined_call_operand.vmem [shape: f32[32,784], index: 0, kind: input, shape index: {}]   ;;  %s5806_s2 = inlined_call_operand.vmem [shape: f32[32,1], index: 2, kind: input, shape index: {}]   ;;  %s5807_s3 = inlined_call_operand.vmem [shape: f32[32,896], index: 3, kind: output, shape index: {}]  }
   0x1   :  { %v43_v0 = vld [vmem:[%s5804_s1 + $0x8] sm:$0xff]  ;;  %v50_v1 = vld [vmem:[%s5804_s1 + $0x40] sm:$0xff]  ;;  %v49_v6 = vld [vmem:[%s5804_s1 + $0x38] sm:$0xff] }
   0x2   :  { %v267_v2 = vld [vmem:[%s5804_s1 + $0x708] sm:$0xff]  ;;  %v2369_v3 = vpack.c.bf16 %v50_v1, %v43_v0  ;;  %v274_v4 = vld [vmem:[%s5804_s1 + $0x740] sm:$0xff]  ;;  %v273_v10 = vld [vmem:[%s5804_s1 + $0x738] sm:$0xff] }
   0x3   :  { %v42_v5 = vld [vmem:[%s5804_s1] sm:$0xff]  ;;  %v2433_v7 = vpack.c.bf16 %v274_v4, %v267_v2  ;;  %v57_v11 = vld [vmem:[%s5804_s1 + $0x78] sm:$0xff]  ;;  %v64_v13 = vld [vmem:[%s5804_s1 + $0xb0] sm:$0xff] }
   0x4   :  { %v2371_v8 = vpack.c.bf16 %v49_v6, %v42_v5  ;;  %v266_v9 = vld [vmem:[%s5804_s1 + $0x700] sm:$0xff]  ;;  %2370 = vmatprep.subr.bf16.mxu1 %v2369_v3  ;;  %v281_v14 = vld [vmem:[%s5804_s1 + $0x778] sm:$0xff]  ;;  %v288_v15 = vld [vmem:[%s5804_s1 + $0x7b0] sm:$0xff]  ;;  %v2373_v16 = vpack.c.bf16 %v64_v13, %v57_v11 }
   0x5   :  { %v2435_v12 = vpack.c.bf16 %v273_v10, %v266_v9  ;;  %2434 = vmatprep.subr.bf16.mxu0 %v2433_v7  ;;  %v2437_v17 = vpack.c.bf16 %v288_v15, %v281_v14  ;;  %v56_v18 = vld [vmem:[%s5804_s1 + $0x70] sm:$0xff]  ;;  %v63_v19 = vld [vmem:[%s5804_s1 + $0xa8] sm:$0xff]  ;;  %v78_v24 = vld [vmem:[%s5804_s1 + $0x120] sm:$0xff] }
   0x6   :  { %2372 = vmatpush1.bf16.msra.mxu1 %v2371_v8  ;;  %v280_v20 = vld [vmem:[%s5804_s1 + $0x770] sm:$0xff]  ;;  %v2375_v21 = vpack.c.bf16 %v63_v19, %v56_v18  ;;  %v287_v22 = vld [vmem:[%s5804_s1 + $0x7a8] sm:$0xff]  ;;  %v302_v28 = vld [vmem:[%s5804_s1 + $0x820] sm:$0xff] }
   0x7   :  { %2436 = vmatpush1.bf16.msra.mxu0 %v2435_v12  ;;  %v71_v23 = vld [vmem:[%s5804_s1 + $0xe8] sm:$0xff]  ;;  %2374 = vmatprep.subr.bf16.mxu1 %v2373_v16  ;;  %v2439_v25 = vpack.c.bf16 %v287_v22, %v280_v20  ;;  %v70_v29 = vld [vmem:[%s5804_s1 + $0xe0] sm:$0xff]  ;;  %v77_v31 = vld [vmem:[%s5804_s1 + $0x118] sm:$0xff] }
   0x8   :  { %2438 = vmatprep.subr.bf16.mxu0 %v2437_v17  ;;  %v2377_v26 = vpack.c.bf16 %v78_v24, %v71_v23  ;;  %v295_v27 = vld [vmem:[%s5804_s1 + $0x7e8] sm:$0xff]  ;;  %v294_v32 = vld [vmem:[%s5804_s1 + $0x7e0] sm:$0xff]  ;;  %v301_v33 = vld [vmem:[%s5804_s1 + $0x818] sm:$0xff]  ;;  %v2379_v34 = vpack.c.bf16 %v77_v31, %v70_v29 }
   0x9   :  { %v2441_v30 = vpack.c.bf16 %v302_v28, %v295_v27  ;;  %v85_v35 = vld [vmem:[%s5804_s1 + $0x158] sm:$0xff]  ;;  %v92_v36 = vld [vmem:[%s5804_s1 + $0x190] sm:$0xff]  ;;  %v2443_v38 = vpack.c.bf16 %v301_v33, %v294_v32  ;;  %v91_v42 = vld [vmem:[%s5804_s1 + $0x188] sm:$0xff] }
   0xa   :  { %2376 = vmatpush1.bf16.msra.mxu1 %v2375_v21  ;;  %v309_v37 = vld [vmem:[%s5804_s1 + $0x858] sm:$0xff]  ;;  %v2381_v39 = vpack.c.bf16 %v92_v36, %v85_v35  ;;  %v316_v40 = vld [vmem:[%s5804_s1 + $0x890] sm:$0xff]  ;;  %v315_v45 = vld [vmem:[%s5804_s1 + $0x888] sm:$0xff] }
   0xb   :  { %2440 = vmatpush1.bf16.msra.mxu0 %v2439_v25  ;;  %2378 = vmatprep.subr.bf16.mxu1 %v2377_v26  ;;  %v84_v41 = vld [vmem:[%s5804_s1 + $0x150] sm:$0xff]  ;;  %v2445_v43 = vpack.c.bf16 %v316_v40, %v309_v37  ;;  %v99_v46 = vld [vmem:[%s5804_s1 + $0x1c8] sm:$0xff]  ;;  %v106_v47 = vld [vmem:[%s5804_s1 + $0x200] sm:$0xff] }
   0xc   :  { %2442 = vmatprep.subr.bf16.mxu0 %v2441_v30  ;;  %v308_v44 = vld [vmem:[%s5804_s1 + $0x850] sm:$0xff]  ;;  %v323_v48 = vld [vmem:[%s5804_s1 + $0x8c8] sm:$0xff]  ;;  %v330_v49 = vld [vmem:[%s5804_s1 + $0x900] sm:$0xff]  ;;  %v2383_v50 = vpack.c.bf16 %v91_v42, %v84_v41  ;;  %v2385_v52 = vpack.c.bf16 %v106_v47, %v99_v46 }
   0xd   :  { %v2447_v51 = vpack.c.bf16 %v315_v45, %v308_v44  ;;  %v98_v53 = vld [vmem:[%s5804_s1 + $0x1c0] sm:$0xff]  ;;  %v105_v54 = vld [vmem:[%s5804_s1 + $0x1f8] sm:$0xff]  ;;  %v2449_v56 = vpack.c.bf16 %v330_v49, %v323_v48  ;;  %v120_v59 = vld [vmem:[%s5804_s1 + $0x270] sm:$0xff]  ;;  %v3187_v44 = vmov 0  }
   0xe   :  { %2380 = vmatpush1.bf16.msra.mxu1 %v2379_v34  ;;  %v322_v55 = vld [vmem:[%s5804_s1 + $0x8c0] sm:$0xff]  ;;  %v329_v57 = vld [vmem:[%s5804_s1 + $0x8f8] sm:$0xff]  ;;  %v344_v61 = vld [vmem:[%s5804_s1 + $0x970] sm:$0xff]  ;;  %v2387_v62 = vpack.c.bf16 %v105_v54, %v98_v53  ;;  %3155 = vset.pattern.permute.xlu0 %v3187_v44 }
   0xf   :  { %2444 = vmatpush1.bf16.msra.mxu0 %v2443_v38  ;;  %2382 = vmatprep.subr.bf16.mxu1 %v2381_v39  ;;  %v113_v58 = vld [vmem:[%s5804_s1 + $0x238] sm:$0xff]  ;;  %v2451_v63 = vpack.c.bf16 %v329_v57, %v322_v55  ;;  %v112_v1 = vld [vmem:[%s5804_s1 + $0x230] sm:$0xff]  ;;  %v119_v2 = vld [vmem:[%s5804_s1 + $0x268] sm:$0xff] }
  0x10   :  { %2446 = vmatprep.subr.bf16.mxu0 %v2445_v43  ;;  %v337_v60 = vld [vmem:[%s5804_s1 + $0x938] sm:$0xff]  ;;  %v2389_v0 = vpack.c.bf16 %v120_v59, %v113_v58  ;;  %v336_v3 = vld [vmem:[%s5804_s1 + $0x930] sm:$0xff]  ;;  %v343_v5 = vld [vmem:[%s5804_s1 + $0x968] sm:$0xff]  ;;  %v2391_v10 = vpack.c.bf16 %v119_v2, %v112_v1  ;;  %3156 = vset.pattern.permute.xlu1 %v3187_v44 }
  0x11   :  { %v2453_v4 = vpack.c.bf16 %v344_v61, %v337_v60  ;;  %v127_v6 = vld [vmem:[%s5804_s1 + $0x2a8] sm:$0xff]  ;;  %v134_v7 = vld [vmem:[%s5804_s1 + $0x2e0] sm:$0xff]  ;;  %v2455_v11 = vpack.c.bf16 %v343_v5, %v336_v3  ;;  %v133_v14 = vld [vmem:[%s5804_s1 + $0x2d8] sm:$0xff] }
  0x12   :  { %2384 = vmatpush1.bf16.msra.mxu1 %v2383_v50  ;;  %v351_v8 = vld [vmem:[%s5804_s1 + $0x9a8] sm:$0xff]  ;;  %v358_v9 = vld [vmem:[%s5804_s1 + $0x9e0] sm:$0xff]  ;;  %v2393_v12 = vpack.c.bf16 %v134_v7, %v127_v6  ;;  %v357_v17 = vld [vmem:[%s5804_s1 + $0x9d8] sm:$0xff] }
  0x13   :  { %2448 = vmatpush1.bf16.msra.mxu0 %v2447_v51  ;;  %2386 = vmatprep.subr.bf16.mxu1 %v2385_v52  ;;  %v126_v13 = vld [vmem:[%s5804_s1 + $0x2a0] sm:$0xff]  ;;  %v2457_v16 = vpack.c.bf16 %v358_v9, %v351_v8  ;;  %v141_v18 = vld [vmem:[%s5804_s1 + $0x318] sm:$0xff]  ;;  %v148_v19 = vld [vmem:[%s5804_s1 + $0x350] sm:$0xff] }
  0x14   :  { %2450 = vmatprep.subr.bf16.mxu0 %v2449_v56  ;;  %v350_v15 = vld [vmem:[%s5804_s1 + $0x9a0] sm:$0xff]  ;;  %v365_v20 = vld [vmem:[%s5804_s1 + $0xa18] sm:$0xff]  ;;  %v372_v21 = vld [vmem:[%s5804_s1 + $0xa50] sm:$0xff]  ;;  %v2395_v22 = vpack.c.bf16 %v133_v14, %v126_v13  ;;  %v2397_v24 = vpack.c.bf16 %v148_v19, %v141_v18 }
  0x15   :  { %v2459_v23 = vpack.c.bf16 %v357_v17, %v350_v15  ;;  %v140_v25 = vld [vmem:[%s5804_s1 + $0x310] sm:$0xff]  ;;  %v147_v26 = vld [vmem:[%s5804_s1 + $0x348] sm:$0xff]  ;;  %v2461_v28 = vpack.c.bf16 %v372_v21, %v365_v20  ;;  %v162_v31 = vld [vmem:[%s5804_s1 + $0x3c0] sm:$0xff] }
  0x16   :  { %2388 = vmatpush1.bf16.msra.mxu1 %v2387_v62  ;;  %v364_v27 = vld [vmem:[%s5804_s1 + $0xa10] sm:$0xff]  ;;  %v371_v29 = vld [vmem:[%s5804_s1 + $0xa48] sm:$0xff]  ;;  %v386_v33 = vld [vmem:[%s5804_s1 + $0xac0] sm:$0xff]  ;;  %v2399_v34 = vpack.c.bf16 %v147_v26, %v140_v25 }
  0x17   :  { %2452 = vmatpush1.bf16.msra.mxu0 %v2451_v63  ;;  %2390 = vmatprep.subr.bf16.mxu1 %v2389_v0  ;;  %v155_v30 = vld [vmem:[%s5804_s1 + $0x388] sm:$0xff]  ;;  %v2463_v35 = vpack.c.bf16 %v371_v29, %v364_v27  ;;  %v154_v37 = vld [vmem:[%s5804_s1 + $0x380] sm:$0xff]  ;;  %v161_v38 = vld [vmem:[%s5804_s1 + $0x3b8] sm:$0xff] }
  0x18   :  { %2454 = vmatprep.subr.bf16.mxu0 %v2453_v4  ;;  %v379_v32 = vld [vmem:[%s5804_s1 + $0xa88] sm:$0xff]  ;;  %v2401_v36 = vpack.c.bf16 %v162_v31, %v155_v30  ;;  %v378_v39 = vld [vmem:[%s5804_s1 + $0xa80] sm:$0xff]  ;;  %v385_v41 = vld [vmem:[%s5804_s1 + $0xab8] sm:$0xff]  ;;  %v2403_v47 = vpack.c.bf16 %v161_v38, %v154_v37 }
  0x19   :  { %v2465_v40 = vpack.c.bf16 %v386_v33, %v379_v32  ;;  %v169_v42 = vld [vmem:[%s5804_s1 + $0x3f8] sm:$0xff]  ;;  %v176_v43 = vld [vmem:[%s5804_s1 + $0x430] sm:$0xff]  ;;  %v2467_v48 = vpack.c.bf16 %v385_v41, %v378_v39  ;;  %v175_v51 = vld [vmem:[%s5804_s1 + $0x428] sm:$0xff] }
  0x1a   :  { %2392 = vmatpush1.bf16.msra.mxu1 %v2391_v10  ;;  %v393_v45 = vld [vmem:[%s5804_s1 + $0xaf8] sm:$0xff]  ;;  %v400_v46 = vld [vmem:[%s5804_s1 + $0xb30] sm:$0xff]  ;;  %v2405_v49 = vpack.c.bf16 %v176_v43, %v169_v42  ;;  %v399_v54 = vld [vmem:[%s5804_s1 + $0xb28] sm:$0xff] }
  0x1b   :  { %2456 = vmatpush1.bf16.msra.mxu0 %v2455_v11  ;;  %2394 = vmatprep.subr.bf16.mxu1 %v2393_v12  ;;  %v168_v50 = vld [vmem:[%s5804_s1 + $0x3f0] sm:$0xff]  ;;  %v2469_v53 = vpack.c.bf16 %v400_v46, %v393_v45  ;;  %v183_v55 = vld [vmem:[%s5804_s1 + $0x468] sm:$0xff]  ;;  %v190_v56 = vld [vmem:[%s5804_s1 + $0x4a0] sm:$0xff] }
  0x1c   :  { %2458 = vmatprep.subr.bf16.mxu0 %v2457_v16  ;;  %v392_v52 = vld [vmem:[%s5804_s1 + $0xaf0] sm:$0xff]  ;;  %v407_v57 = vld [vmem:[%s5804_s1 + $0xb68] sm:$0xff]  ;;  %v414_v58 = vld [vmem:[%s5804_s1 + $0xba0] sm:$0xff]  ;;  %v2407_v59 = vpack.c.bf16 %v175_v51, %v168_v50  ;;  %v2409_v61 = vpack.c.bf16 %v190_v56, %v183_v55 }
  0x1d   :  { %v2471_v60 = vpack.c.bf16 %v399_v54, %v392_v52  ;;  %v182_v62 = vld [vmem:[%s5804_s1 + $0x460] sm:$0xff]  ;;  %v189_v63 = vld [vmem:[%s5804_s1 + $0x498] sm:$0xff]  ;;  %v2473_v1 = vpack.c.bf16 %v414_v58, %v407_v57  ;;  %v204_v4 = vld [vmem:[%s5804_s1 + $0x510] sm:$0xff] }
  0x1e   :  { %2396 = vmatpush1.bf16.msra.mxu1 %v2395_v22  ;;  %v406_v0 = vld [vmem:[%s5804_s1 + $0xb60] sm:$0xff]  ;;  %v413_v2 = vld [vmem:[%s5804_s1 + $0xb98] sm:$0xff]  ;;  %v428_v6 = vld [vmem:[%s5804_s1 + $0xc10] sm:$0xff]  ;;  %v2411_v7 = vpack.c.bf16 %v189_v63, %v182_v62 }
  0x1f   :  { %2460 = vmatpush1.bf16.msra.mxu0 %v2459_v23  ;;  %2398 = vmatprep.subr.bf16.mxu1 %v2397_v24  ;;  %v197_v3 = vld [vmem:[%s5804_s1 + $0x4d8] sm:$0xff]  ;;  %v196_v8 = vld [vmem:[%s5804_s1 + $0x4d0] sm:$0xff]  ;;  %v2475_v9 = vpack.c.bf16 %v413_v2, %v406_v0  ;;  %v203_v11 = vld [vmem:[%s5804_s1 + $0x508] sm:$0xff] }
  0x20   :  { %2462 = vmatprep.subr.bf16.mxu0 %v2461_v28  ;;  %v421_v5 = vld [vmem:[%s5804_s1 + $0xbd8] sm:$0xff]  ;;  %v2413_v10 = vpack.c.bf16 %v204_v4, %v197_v3  ;;  %v420_v12 = vld [vmem:[%s5804_s1 + $0xbd0] sm:$0xff]  ;;  %v427_v13 = vld [vmem:[%s5804_s1 + $0xc08] sm:$0xff]  ;;  %v2415_v21 = vpack.c.bf16 %v203_v11, %v196_v8 }
  0x21   :  { %v2477_v14 = vpack.c.bf16 %v428_v6, %v421_v5  ;;  %v211_v15 = vld [vmem:[%s5804_s1 + $0x548] sm:$0xff]  ;;  %v218_v16 = vld [vmem:[%s5804_s1 + $0x580] sm:$0xff]  ;;  %v3518_v20 = vld [vmem:[%s5805_s0 + $0x18] sm:$0xff]  ;;  %v2479_v22 = vpack.c.bf16 %v427_v13, %v420_v12 }
  0x22   :  { %2400 = vmatpush1.bf16.msra.mxu1 %v2399_v34  ;;  %v3506_v17 = vld [vmem:[%s5805_s0 + $0x8] sm:$0xff]  ;;  %v442_v19 = vld [vmem:[%s5804_s1 + $0xc80] sm:$0xff]  ;;  %918 = vmatprep.mubr.f32.mxu0 %v3518_v20  ;;  %v2417_v23 = vpack.c.bf16 %v218_v16, %v211_v15  ;;  %v217_v25 = vld [vmem:[%s5804_s1 + $0x578] sm:$0xff] }
  0x23   :  { %2464 = vmatpush1.bf16.msra.mxu0 %v2463_v35  ;;  %2402 = vmatprep.subr.bf16.mxu1 %v2401_v36  ;;  %v435_v18 = vld [vmem:[%s5804_s1 + $0xc48] sm:$0xff]  ;;  %v210_v24 = vld [vmem:[%s5804_s1 + $0x540] sm:$0xff]  ;;  %v441_v28 = vld [vmem:[%s5804_s1 + $0xc78] sm:$0xff] }
  0x24   :  { %2466 = vmatprep.subr.bf16.mxu0 %v2465_v40  ;;  %829 = vmatprep.mubr.f32.mxu1 %v3506_v17  ;;  %v434_v26 = vld [vmem:[%s5804_s1 + $0xc40] sm:$0xff]  ;;  %v2481_v27 = vpack.c.bf16 %v442_v19, %v435_v18  ;;  %v225_v29 = vld [vmem:[%s5804_s1 + $0x5b8] sm:$0xff]  ;;  %v232_v30 = vld [vmem:[%s5804_s1 + $0x5f0] sm:$0xff]  ;;  %v2419_v33 = vpack.c.bf16 %v217_v25, %v210_v24 }
  0x25   :  { %v449_v31 = vld [vmem:[%s5804_s1 + $0xcb8] sm:$0xff]  ;;  %v456_v32 = vld [vmem:[%s5804_s1 + $0xcf0] sm:$0xff]  ;;  %v2483_v34 = vpack.c.bf16 %v441_v28, %v434_v26  ;;  %v2421_v35 = vpack.c.bf16 %v232_v30, %v225_v29  ;;  %v231_v37 = vld [vmem:[%s5804_s1 + $0x5e8] sm:$0xff] }
  0x26   :  { %2404 = vmatpush1.bf16.msra.mxu1 %v2403_v47  ;;  %v224_v36 = vld [vmem:[%s5804_s1 + $0x5b0] sm:$0xff]  ;;  %v2485_v39 = vpack.c.bf16 %v456_v32, %v449_v31  ;;  %v455_v40 = vld [vmem:[%s5804_s1 + $0xce8] sm:$0xff]  ;;  %v246_v42 = vld [vmem:[%s5804_s1 + $0x660] sm:$0xff] }
  0x27   :  { %2468 = vmatpush1.bf16.msra.mxu0 %v2467_v48  ;;  %2406 = vmatprep.subr.bf16.mxu1 %v2405_v49  ;;  %v448_v38 = vld [vmem:[%s5804_s1 + $0xcb0] sm:$0xff]  ;;  %v239_v41 = vld [vmem:[%s5804_s1 + $0x628] sm:$0xff]  ;;  %v470_v44 = vld [vmem:[%s5804_s1 + $0xd60] sm:$0xff]  ;;  %v2423_v45 = vpack.c.bf16 %v231_v37, %v224_v36 }
  0x28   :  { %2470 = vmatprep.subr.bf16.mxu0 %v2469_v53  ;;  %v463_v43 = vld [vmem:[%s5804_s1 + $0xd28] sm:$0xff]  ;;  %v2487_v46 = vpack.c.bf16 %v455_v40, %v448_v38  ;;  %v2425_v47 = vpack.c.bf16 %v246_v42, %v239_v41  ;;  %v238_v48 = vld [vmem:[%s5804_s1 + $0x620] sm:$0xff]  ;;  %v245_v49 = vld [vmem:[%s5804_s1 + $0x658] sm:$0xff] }
  0x29   :  { %v462_v50 = vld [vmem:[%s5804_s1 + $0xd20] sm:$0xff]  ;;  %v2489_v51 = vpack.c.bf16 %v470_v44, %v463_v43  ;;  %v469_v52 = vld [vmem:[%s5804_s1 + $0xd58] sm:$0xff]  ;;  %v260_v54 = vld [vmem:[%s5804_s1 + $0x6d0] sm:$0xff]  ;;  %v2427_v57 = vpack.c.bf16 %v245_v49, %v238_v48 }
  0x2a   :  { %2408 = vmatpush1.bf16.msra.mxu1 %v2407_v59  ;;  %v253_v53 = vld [vmem:[%s5804_s1 + $0x698] sm:$0xff]  ;;  %v484_v56 = vld [vmem:[%s5804_s1 + $0xdd0] sm:$0xff]  ;;  %v2491_v58 = vpack.c.bf16 %v469_v52, %v462_v50  ;;  %v483_v0 = vld [vmem:[%s5804_s1 + $0xdc8] sm:$0xff] }
  0x2b   :  { %2472 = vmatpush1.bf16.msra.mxu0 %v2471_v60  ;;  %2410 = vmatprep.subr.bf16.mxu1 %v2409_v61  ;;  %v477_v55 = vld [vmem:[%s5804_s1 + $0xd98] sm:$0xff]  ;;  %v2429_v59 = vpack.c.bf16 %v260_v54, %v253_v53  ;;  %v252_v60 = vld [vmem:[%s5804_s1 + $0x690] sm:$0xff]  ;;  %v259_v61 = vld [vmem:[%s5804_s1 + $0x6c8] sm:$0xff] }
  0x2c   :  { %2474 = vmatprep.subr.bf16.mxu0 %v2473_v1  ;;  %v476_v62 = vld [vmem:[%s5804_s1 + $0xd90] sm:$0xff]  ;;  %v2493_v63 = vpack.c.bf16 %v484_v56, %v477_v55  ;;  %v45_v1 = vld [vmem:[%s5804_s1 + $0x18] sm:$0xff]  ;;  %v491_v3 = vld [vmem:[%s5804_s1 + $0xe08] sm:$0xff]  ;;  %v2431_v5 = vpack.c.bf16 %v259_v61, %v252_v60 }
  0x2d   :  { %v52_v2 = vld [vmem:[%s5804_s1 + $0x50] sm:$0xff]  ;;  %v498_v4 = vld [vmem:[%s5804_s1 + $0xe40] sm:$0xff]  ;;  %v2495_v6 = vpack.c.bf16 %v483_v0, %v476_v62  ;;  %v497_v12 = vld [vmem:[%s5804_s1 + $0xe38] sm:$0xff] }
  0x2e   :  { %2412 = vmatpush1.bf16.msra.mxu1 %v2411_v7  ;;  %v2565_v7 = vpack.c.bf16 %v52_v2, %v45_v1  ;;  %v490_v8 = vld [vmem:[%s5804_s1 + $0xe00] sm:$0xff]  ;;  %v2497_v11 = vpack.c.bf16 %v498_v4, %v491_v3  ;;  %v59_v13 = vld [vmem:[%s5804_s1 + $0x88] sm:$0xff]  ;;  %v505_v15 = vld [vmem:[%s5804_s1 + $0xe78] sm:$0xff] }
  0x2f   :  { %2476 = vmatpush1.bf16.msra.mxu0 %v2475_v9  ;;  %2414 = vmatprep.subr.bf16.mxu1 %v2413_v10  ;;  %v44_v9 = vld [vmem:[%s5804_s1 + $0x10] sm:$0xff]  ;;  %v51_v10 = vld [vmem:[%s5804_s1 + $0x48] sm:$0xff]  ;;  %v3644_v18 = vld [vmem:[%s5805_s0] sm:$0xff] }
  0x30   :  { %2478 = vmatprep.subr.bf16.mxu0 %v2477_v14  ;;  %v66_v14 = vld [vmem:[%s5804_s1 + $0xc0] sm:$0xff]  ;;  %v512_v16 = vld [vmem:[%s5804_s1 + $0xeb0] sm:$0xff]  ;;  %v65_v26 = vld [vmem:[%s5804_s1 + $0xb8] sm:$0xff] }
  0x31   :  { %v16_v19 = vld [vmem:[%s5805_s0 + $0x10] sm:$0xff]  ;;  %v58_v25 = vld [vmem:[%s5804_s1 + $0x80] sm:$0xff]  ;;  %v511_v28 = vld [vmem:[%s5804_s1 + $0xea8] sm:$0xff] }
  0x32   :  { %2416 = vmatpush1.bf16.msra.mxu1 %v2415_v21  ;;  %v2567_v21 = vpack.c.bf16 %v51_v10, %v44_v9  ;;  %v504_v24 = vld [vmem:[%s5804_s1 + $0xe70] sm:$0xff]  ;;  %v73_v29 = vld [vmem:[%s5804_s1 + $0xf8] sm:$0xff]  ;;  %v519_v31 = vld [vmem:[%s5804_s1 + $0xee8] sm:$0xff] }
  0x33   :  { %2480 = vmatpush1.bf16.msra.mxu0 %v2479_v22  ;;  %2418 = vmatprep.subr.bf16.mxu1 %v2417_v23  ;;  %v2499_v22 = vpack.c.bf16 %v497_v12, %v490_v8  ;;  %v2569_v23 = vpack.c.bf16 %v66_v14, %v59_v13  ;;  %v80_v30 = vld [vmem:[%s5804_s1 + $0x130] sm:$0xff]  ;;  %v526_v32 = vld [vmem:[%s5804_s1 + $0xf20] sm:$0xff]  ;;  %v79_v38 = vld [vmem:[%s5804_s1 + $0x128] sm:$0xff] }
  0x34   :  { %2482 = vmatprep.subr.bf16.mxu0 %v2481_v27  ;;  %v2501_v27 = vpack.c.bf16 %v512_v16, %v505_v15  ;;  %v518_v36 = vld [vmem:[%s5804_s1 + $0xee0] sm:$0xff]  ;;  %v72_v37 = vld [vmem:[%s5804_s1 + $0xf0] sm:$0xff]  ;;  %v525_v40 = vld [vmem:[%s5804_s1 + $0xf18] sm:$0xff] }
  0x35   :  { %v87_v41 = vld [vmem:[%s5804_s1 + $0x168] sm:$0xff]  ;;  %v94_v42 = vld [vmem:[%s5804_s1 + $0x1a0] sm:$0xff]  ;;  %v533_v43 = vld [vmem:[%s5804_s1 + $0xf58] sm:$0xff] }
  0x36   :  { %2420 = vmatpush1.bf16.msra.mxu1 %v2419_v33  ;;  %v2571_v33 = vpack.c.bf16 %v65_v26, %v58_v25  ;;  %v540_v44 = vld [vmem:[%s5804_s1 + $0xf90] sm:$0xff]  ;;  %v86_v49 = vld [vmem:[%s5804_s1 + $0x160] sm:$0xff]  ;;  %v93_v50 = vld [vmem:[%s5804_s1 + $0x198] sm:$0xff] }
  0x37   :  { %2484 = vmatpush1.bf16.msra.mxu0 %v2483_v34  ;;  %2422 = vmatprep.subr.bf16.mxu1 %v2421_v35  ;;  %v2503_v34 = vpack.c.bf16 %v511_v28, %v504_v24  ;;  %v2573_v35 = vpack.c.bf16 %v80_v30, %v73_v29  ;;  %v532_v48 = vld [vmem:[%s5804_s1 + $0xf50] sm:$0xff]  ;;  %v539_v52 = vld [vmem:[%s5804_s1 + $0xf88] sm:$0xff]  ;;  %v101_v53 = vld [vmem:[%s5804_s1 + $0x1d8] sm:$0xff] }
  0x38   :  { %2486 = vmatprep.subr.bf16.mxu0 %v2485_v39  ;;  %v2505_v39 = vpack.c.bf16 %v526_v32, %v519_v31  ;;  %v108_v54 = vld [vmem:[%s5804_s1 + $0x210] sm:$0xff]  ;;  %v547_v55 = vld [vmem:[%s5804_s1 + $0xfc8] sm:$0xff]  ;;  %v554_v56 = vld [vmem:[%s5804_s1 + $0x1000] sm:$0xff]  ;;  %v2511_v60 = vpack.c.bf16 %v539_v52, %v532_v48 }
  0x39   :  { %v2581_v61 = vpack.c.bf16 %v108_v54, %v101_v53  ;;  %v100_v62 = vld [vmem:[%s5804_s1 + $0x1d0] sm:$0xff]  ;;  %v561_v0 = vld [vmem:[%s5804_s1 + $0x1038] sm:$0xff]  ;;  %v2513_v1 = vpack.c.bf16 %v554_v56, %v547_v55  ;;  %v115_v2 = vld [vmem:[%s5804_s1 + $0x248] sm:$0xff] }
  0x3a   :  { %2424 = vmatpush1.bf16.msra.mxu1 %v2423_v45  ;;  %v2575_v45 = vpack.c.bf16 %v79_v38, %v72_v37  ;;  %v122_v3 = vld [vmem:[%s5804_s1 + $0x280] sm:$0xff]  ;;  %v3746_v4 = vld [vmem:[%s5805_s0 + $0x50] sm:$0xff]  ;;  %v567_v10 = vld [vmem:[%s5804_s1 + $0x1068] sm:$0xff] }
  0x3b   :  { %2488 = vmatpush1.bf16.msra.mxu0 %v2487_v46  ;;  %2426 = vmatprep.subr.bf16.mxu1 %v2425_v47  ;;  %v2507_v46 = vpack.c.bf16 %v525_v40, %v518_v36  ;;  %v2577_v47 = vpack.c.bf16 %v94_v42, %v87_v41  ;;  %v560_v9 = vld [vmem:[%s5804_s1 + $0x1030] sm:$0xff]  ;;  %v2585_v13 = vpack.c.bf16 %v122_v3, %v115_v2  ;;  %v121_v14 = vld [vmem:[%s5804_s1 + $0x278] sm:$0xff]  ;;  %v575_v15 = vld [vmem:[%s5804_s1 + $0x10a8] sm:$0xff] }
  0x3c   :  { %2490 = vmatprep.subr.bf16.mxu0 %v2489_v51  ;;  %v2509_v51 = vpack.c.bf16 %v540_v44, %v533_v43  ;;  %v3779_v16 = vld [vmem:[%s5805_s0 + $0x38] sm:$0xff]  ;;  %v582_v24 = vld [vmem:[%s5804_s1 + $0x10e0] sm:$0xff]  ;;  %v128_v30 = vld [vmem:[%s5804_s1 + $0x2b0] sm:$0xff]  ;;  %v2519_v31 = vpack.c.bf16 %v567_v10, %v560_v9 }
  0x3d   :  { %v3800_v25 = vld [vmem:[%s5805_s0 + $0x78] sm:$0xff]  ;;  %v3805_v26 = vld [vmem:[%s5805_s0 + $0x80] sm:$0xff]  ;;  %v2521_v36 = vpack.c.bf16 %v582_v24, %v575_v15  ;;  %v143_v37 = vld [vmem:[%s5804_s1 + $0x328] sm:$0xff] }
  0x3e   :  { %2428 = vmatpush1.bf16.msra.mxu1 %v2427_v57  ;;  %v2579_v57 = vpack.c.bf16 %v93_v50, %v86_v49  ;;  %v574_v28 = vld [vmem:[%s5804_s1 + $0x10a0] sm:$0xff]  ;;  %v581_v29 = vld [vmem:[%s5804_s1 + $0x10d8] sm:$0xff]  ;;  %v596_v40 = vld [vmem:[%s5804_s1 + $0x1150] sm:$0xff] }
  0x3f   :  { %2492 = vmatpush1.bf16.msra.mxu0 %v2491_v58  ;;  %2430 = vmatprep.subr.bf16.mxu1 %v2429_v59  ;;  %v546_v58 = vld [vmem:[%s5804_s1 + $0xfc0] sm:$0xff]  ;;  %v553_v59 = vld [vmem:[%s5804_s1 + $0xff8] sm:$0xff]  ;;  %v3848_v41 = vld [vmem:[%s5805_s0 + $0xb0] sm:$0xff] }
  0x40   :  { %2494 = vmatprep.subr.bf16.mxu0 %v2493_v63  ;;  %v107_v63 = vld [vmem:[%s5804_s1 + $0x208] sm:$0xff]  ;;  %v2515_v12 = vpack.c.bf16 %v553_v59, %v546_v58  ;;  %v150_v38 = vld [vmem:[%s5804_s1 + $0x360] sm:$0xff]  ;;  %v3853_v42 = vld [vmem:[%s5805_s0 + $0xb8] sm:$0xff] }
  0x41   :  { %v2583_v8 = vpack.c.bf16 %v107_v63, %v100_v62  ;;  %v588_v44 = vld [vmem:[%s5804_s1 + $0x1110] sm:$0xff]  ;;  %v142_v48 = vld [vmem:[%s5804_s1 + $0x320] sm:$0xff]  ;;  %v149_v49 = vld [vmem:[%s5804_s1 + $0x358] sm:$0xff] }
  0x42   :  { %2432 = vmatpush1.bf16.msra.mxu1 %v2431_v5  ;;  %v568_v5 = vld [vmem:[%s5804_s1 + $0x1070] sm:$0xff]  ;;  %v3871_v50 = vld [vmem:[%s5805_s0 + $0xa8] sm:$0xff]  ;;  %v157_v52 = vld [vmem:[%s5804_s1 + $0x398] sm:$0xff] }
  0x43   :  { %2496 = vmatpush1.bf16.msra.mxu0 %v2495_v6  ;;  %2566 = vmatprep.subr.bf16.mxu1 %v2565_v7  ;;  %v3755_v6 = vld [vmem:[%s5805_s0 + $0x40] sm:$0xff]  ;;  %v23_v7 = vld [vmem:[%s5805_s0 + $0x48] sm:$0xff]  ;;  %v164_v53 = vld [vmem:[%s5804_s1 + $0x3d0] sm:$0xff] }
  0x44   :  { %2498 = vmatprep.subr.bf16.mxu0 %v2497_v11  ;;  %v114_v11 = vld [vmem:[%s5804_s1 + $0x240] sm:$0xff]  ;;  %v3883_v54 = vld [vmem:[%s5805_s0 + $0x28] sm:$0xff]  ;;  %v2597_v59 = vpack.c.bf16 %v164_v53, %v157_v52  ;;  %v617_v2 = vld [vmem:[%s5804_s1 + $0x11f8] sm:$0xff] }
  0x45   :  { %830 = vmatmul.mubr.f32.vlgmr.msra.gmra.mrb[0].mxu1 %v3644_v18  ;;  %v603_v55 = vld [vmem:[%s5804_s1 + $0x1188] sm:$0xff]  ;;  %v610_v56 = vld [vmem:[%s5804_s1 + $0x11c0] sm:$0xff]  ;;  %v624_v3 = vld [vmem:[%s5804_s1 + $0x1230] sm:$0xff] }
  0x46   :  { %919 = vmatmul.mubr.f32.vlgmr.msra.gmra.mrb[0].mxu0 %v16_v19  ;;  %2568 = vmatpush1.bf16.msra.mxu1 %v2567_v21  ;;  %v2517_v19 = vpack.c.bf16 %v568_v5, %v561_v0  ;;  %v129_v21 = vld [vmem:[%s5804_s1 + $0x2b8] sm:$0xff]  ;;  %v163_v62 = vld [vmem:[%s5804_s1 + $0x3c8] sm:$0xff]  ;;  %v2529_v63 = vpack.c.bf16 %v610_v56, %v603_v55  ;;  %v616_v9 = vld [vmem:[%s5804_s1 + $0x11f0] sm:$0xff] }
  0x47   :  { %2500 = vmatpush1.bf16.msra.mxu0 %v2499_v22  ;;  %2570 = vmatprep.subr.bf16.mxu1 %v2569_v23  ;;  %v136_v22 = vld [vmem:[%s5804_s1 + $0x2f0] sm:$0xff]  ;;  %v3790_v23 = vld [vmem:[%s5805_s0 + $0x88] sm:$0xff]  ;;  %v170_v10 = vld [vmem:[%s5804_s1 + $0x400] sm:$0xff] }
  0x48   :  { %2502 = vmatprep.subr.bf16.mxu0 %v2501_v27  ;;  %924 = vmatprep.mubr.f32.mxu0 %v3746_v4  ;;  %v2587_v27 = vpack.c.bf16 %v121_v14, %v114_v11  ;;  %v2589_v32 = vpack.c.bf16 %v136_v22, %v129_v21  ;;  %v171_v0 = vld [vmem:[%s5804_s1 + $0x408] sm:$0xff]  ;;  %v177_v11 = vld [vmem:[%s5804_s1 + $0x438] sm:$0xff]  ;;  %v192_v15 = vld [vmem:[%s5804_s1 + $0x4b0] sm:$0xff] }
  0x49   :  { %835 = vmatprep.mubr.f32.mxu1 %v3755_v6  ;;  %v185_v14 = vld [vmem:[%s5804_s1 + $0x478] sm:$0xff]  ;;  %v638_v21 = vld [vmem:[%s5804_s1 + $0x12a0] sm:$0xff]  ;;  %v2603_v22 = vpack.c.bf16 %v177_v11, %v170_v10  ;;  %v659_v53 = vld [vmem:[%s5804_s1 + $0x1348] sm:$0xff] }
  0x4a   :  { %2572 = vmatpush1.bf16.msra.mxu1 %v2571_v33  ;;  %925 = vmatmul.mubr.f32.gmra.mrb[2].mxu0 %v23_v7  ;;  %v135_v33 = vld [vmem:[%s5804_s1 + $0x2e8] sm:$0xff]  ;;  %v728_v52 = vld [vmem:[%s5806_s2] sm:$0xff]  ;;  %v233_v10 = vld [vmem:[%s5804_s1 + $0x5f8] sm:$0xff] }
  0x4b   :  { %2504 = vmatpush1.bf16.msra.mxu0 %v2503_v34  ;;  %2574 = vmatprep.subr.bf16.mxu1 %v2573_v35  ;;  %v589_v34 = vld [vmem:[%s5804_s1 + $0x1118] sm:$0xff]  ;;  %v3826_v35 = vld [vmem:[%s5805_s0 + $0x70] sm:$0xff]  ;;  %v2591_v43 = vpack.c.bf16 %v135_v33, %v128_v30  ;;  %v191_v30 = vld [vmem:[%s5804_s1 + $0x4a8] sm:$0xff] }
  0x4c   :  { %2506 = vmatprep.subr.bf16.mxu0 %v2505_v39  ;;  %836 = vmatmul.mubr.f32.gmra.mrb[2].mxu1 %v3779_v16  ;;  %v3838_v39 = vld [vmem:[%s5805_s0 + $0xc0] sm:$0xff]  ;;  %v199_v33 = vld [vmem:[%s5804_s1 + $0x4e8] sm:$0xff] }
  0x4d   :  { %930 = vmatprep.mubr.f32.mxu0 %v3790_v23  ;;  %841 = vmatprep.mubr.f32.mxu1 %v3800_v25  ;;  %v666_v55 = vld [vmem:[%s5804_s1 + $0x1380] sm:$0xff] }
  0x4e   :  { %2576 = vmatpush1.bf16.msra.mxu1 %v2575_v45  ;;  %931 = vmatmul.mubr.f32.gmra.mrb[4].mxu0 %v3805_v26  ;;  %v595_v45 = vld [vmem:[%s5804_s1 + $0x1148] sm:$0xff] }
  0x4f   :  { %2508 = vmatpush1.bf16.msra.mxu0 %v2507_v46  ;;  %2578 = vmatprep.subr.bf16.mxu1 %v2577_v47  ;;  %v2523_v46 = vpack.c.bf16 %v581_v29, %v574_v28  ;;  %v2593_v47 = vpack.c.bf16 %v150_v38, %v143_v37  ;;  %v2527_v58 = vpack.c.bf16 %v595_v45, %v588_v44  ;;  %v630_v28 = vld [vmem:[%s5804_s1 + $0x1260] sm:$0xff]  ;;  %v184_v29 = vld [vmem:[%s5804_s1 + $0x470] sm:$0xff]  ;;  %v651_v45 = vld [vmem:[%s5804_s1 + $0x1308] sm:$0xff] }
  0x50   :  { %2510 = vmatprep.subr.bf16.mxu0 %v2509_v51  ;;  %842 = vmatmul.mubr.f32.gmra.mrb[4].mxu1 %v3826_v35  ;;  %v2525_v51 = vpack.c.bf16 %v596_v40, %v589_v34  ;;  %v206_v34 = vld [vmem:[%s5804_s1 + $0x520] sm:$0xff]  ;;  %v652_v37 = vld [vmem:[%s5804_s1 + $0x1310] sm:$0xff]  ;;  %v2607_v38 = vpack.c.bf16 %v191_v30, %v184_v29  ;;  %v247_v29 = vld [vmem:[%s5804_s1 + $0x668] sm:$0xff] }
  0x51   :  { %936 = vmatprep.mubr.f32.mxu0 %v3838_v39  ;;  %847 = vmatprep.mubr.f32.mxu1 %v3848_v41  ;;  %v644_v40 = vld [vmem:[%s5804_s1 + $0x12d0] sm:$0xff]  ;;  %v2609_v44 = vpack.c.bf16 %v206_v34, %v199_v33  ;;  %v262_v33 = vld [vmem:[%s5804_s1 + $0x6e0] sm:$0xff]  ;;  %v701_v34 = vld [vmem:[%s5804_s1 + $0x1498] sm:$0xff] }
  0x52   :  { %2580 = vmatpush1.bf16.msra.mxu1 %v2579_v57  ;;  %937 = vmatmul.mubr.f32.gmra.mrb[6].mxu0 %v3853_v42  ;;  %v2595_v57 = vpack.c.bf16 %v149_v49, %v142_v48  ;;  %v213_v49 = vld [vmem:[%s5804_s1 + $0x558] sm:$0xff] }
  0x53   :  { %2512 = vmatpush1.bf16.msra.mxu0 %v2511_v60  ;;  %2582 = vmatprep.subr.bf16.mxu1 %v2581_v61  ;;  %v602_v60 = vld [vmem:[%s5804_s1 + $0x1180] sm:$0xff]  ;;  %v156_v61 = vld [vmem:[%s5804_s1 + $0x390] sm:$0xff] }
  0x54   :  { %2514 = vmatprep.subr.bf16.mxu0 %v2513_v1  ;;  %848 = vmatmul.mubr.f32.gmra.mrb[6].mxu1 %v3871_v50  ;;  %v178_v1 = vld [vmem:[%s5804_s1 + $0x440] sm:$0xff]  ;;  %v2599_v5 = vpack.c.bf16 %v163_v62, %v156_v61  ;;  %v219_v61 = vld [vmem:[%s5804_s1 + $0x588] sm:$0xff]  ;;  %v2545_v62 = vpack.c.bf16 %v666_v55, %v659_v53 }
  0x55   :  { %1007 = vmatprep.mubr.f32.mxu0 %v3883_v54  ;;  %1185 = vmatprep.mubr.f32.mxu1 %v3506_v17  ;;  %v609_v17 = vld [vmem:[%s5804_s1 + $0x11b8] sm:$0xff] }
  0x56   :  { %2584 = vmatpush1.bf16.msra.mxu1 %v2583_v8  ;;  %v2531_v7 = vpack.c.bf16 %v609_v17, %v602_v60  ;;  %v2601_v8 = vpack.c.bf16 %v178_v1, %v171_v0  ;;  %734 = vperm.xlu0 %3155, %v728_v52   ;;  %v212_v60 = vld [vmem:[%s5804_s1 + $0x550] sm:$0xff]  ;;  %v227_v17 = vld [vmem:[%s5804_s1 + $0x5c8] sm:$0xff]  ;;  %v234_v0 = vld [vmem:[%s5804_s1 + $0x600] sm:$0xff] }
  0x57   :  { %2516 = vmatpush1.bf16.msra.mxu0 %v2515_v12  ;;  %2586 = vmatprep.subr.bf16.mxu1 %v2585_v13  ;;  %v2533_v12 = vpack.c.bf16 %v624_v3, %v617_v2  ;;  %v623_v13 = vld [vmem:[%s5804_s1 + $0x1228] sm:$0xff]  ;;  %v673_v1 = vld [vmem:[%s5804_s1 + $0x13b8] sm:$0xff]  ;;  %v680_v2 = vld [vmem:[%s5804_s1 + $0x13f0] sm:$0xff]  ;;  %v2615_v3 = vpack.c.bf16 %v219_v61, %v212_v60 }
  0x58   :  { %2518 = vmatprep.subr.bf16.mxu0 %v2517_v19  ;;  %v631_v19 = vld [vmem:[%s5804_s1 + $0x1268] sm:$0xff]  ;;  %v2535_v24 = vpack.c.bf16 %v623_v13, %v616_v9  ;;  %v226_v9 = vld [vmem:[%s5804_s1 + $0x5c0] sm:$0xff]  ;;  %v2549_v11 = vpack.c.bf16 %v680_v2, %v673_v1  ;;  %v241_v13 = vld [vmem:[%s5804_s1 + $0x638] sm:$0xff] }
  0x59   :  { %v722_v52 = vld [vmem:[%s5804_s1 + $0x1540] sm:$0xff]  ;;  %v721_v61 = vld [vmem:[%s5804_s1 + $0x1538] sm:$0xff] }
  0x5a   :  { %2588 = vmatpush1.bf16.msra.mxu1 %v2587_v27  ;;  %v2605_v27 = vpack.c.bf16 %v192_v15, %v185_v14  ;;  %v248_v14 = vld [vmem:[%s5804_s1 + $0x670] sm:$0xff]  ;;  %v687_v15 = vld [vmem:[%s5804_s1 + $0x1428] sm:$0xff]  ;;  %v714_v60 = vld [vmem:[%s5804_s1 + $0x1500] sm:$0xff] }
  0x5b   :  { %2520 = vmatpush1.bf16.msra.mxu0 %v2519_v31  ;;  %2590 = vmatprep.subr.bf16.mxu1 %v2589_v32  ;;  %v2537_v31 = vpack.c.bf16 %v638_v21, %v631_v19  ;;  %v637_v32 = vld [vmem:[%s5804_s1 + $0x1298] sm:$0xff]  ;;  %v694_v19 = vld [vmem:[%s5804_s1 + $0x1460] sm:$0xff]  ;;  %v2619_v21 = vpack.c.bf16 %v233_v10, %v226_v9 }
  0x5c   :  { %2522 = vmatprep.subr.bf16.mxu0 %v2521_v36  ;;  %v645_v36 = vld [vmem:[%s5804_s1 + $0x12d8] sm:$0xff]  ;;  %v2553_v30 = vpack.c.bf16 %v694_v19, %v687_v15  ;;  %v18_v2 = vld [vmem:[%s5805_s0 + $0x20] sm:$0xff]  ;;  %v296_v19 = vld [vmem:[%s5804_s1 + $0x7f0] sm:$0xff] }
  0x5d   :  { %v2541_v48 = vpack.c.bf16 %v652_v37, %v645_v36  ;;  %v708_v36 = vld [vmem:[%s5804_s1 + $0x14d0] sm:$0xff]  ;;  %v297_v10 = vld [vmem:[%s5804_s1 + $0x7f8] sm:$0xff] }
  0x5e   :  { %2592 = vmatpush1.bf16.msra.mxu1 %v2591_v43  ;;  %v2539_v43 = vpack.c.bf16 %v637_v32, %v630_v28  ;;  %v240_v28 = vld [vmem:[%s5804_s1 + $0x630] sm:$0xff]  ;;  %v255_v32 = vld [vmem:[%s5804_s1 + $0x6a8] sm:$0xff] }
  0x5f   :  { %2524 = vmatpush1.bf16.msra.mxu0 %v2523_v46  ;;  %2594 = vmatprep.subr.bf16.mxu1 %v2593_v47  ;;  %v198_v46 = vld [vmem:[%s5804_s1 + $0x4e0] sm:$0xff]  ;;  %v205_v47 = vld [vmem:[%s5804_s1 + $0x518] sm:$0xff]  ;;  %v2623_v37 = vpack.c.bf16 %v247_v29, %v240_v28  ;;  %v32_v28 = vld [vmem:[%s5805_s0 + $0x90] sm:$0xff] }
  0x60   :  { %2526 = vmatprep.subr.bf16.mxu0 %v2525_v51  ;;  %v220_v51 = vld [vmem:[%s5804_s1 + $0x590] sm:$0xff]  ;;  %v2611_v56 = vpack.c.bf16 %v205_v47, %v198_v46  ;;  %v2557_v46 = vpack.c.bf16 %v708_v36, %v701_v34  ;;  %v707_v47 = vld [vmem:[%s5804_s1 + $0x14c8] sm:$0xff] }
  0x61   :  { %v39_v34 = vld [vmem:[%s5805_s0 + $0xc8] sm:$0xff] }
  0x62   :  { %2596 = vmatpush1.bf16.msra.mxu1 %v2595_v57  ;;  %v2543_v57 = vpack.c.bf16 %v651_v45, %v644_v40  ;;  %v2625_v40 = vpack.c.bf16 %v262_v33, %v255_v32  ;;  %v261_v45 = vld [vmem:[%s5804_s1 + $0x6d8] sm:$0xff]  ;;  %v332_v33 = vld [vmem:[%s5804_s1 + $0x910] sm:$0xff] }
  0x63   :  { %2528 = vmatpush1.bf16.msra.mxu0 %v2527_v58  ;;  %2598 = vmatprep.subr.bf16.mxu1 %v2597_v59  ;;  %v2613_v58 = vpack.c.bf16 %v220_v51, %v213_v49  ;;  %v658_v59 = vld [vmem:[%s5804_s1 + $0x1340] sm:$0xff]  ;;  %v276_v49 = vld [vmem:[%s5804_s1 + $0x750] sm:$0xff]  ;;  %v715_v51 = vld [vmem:[%s5804_s1 + $0x1508] sm:$0xff] }
  0x64   :  { %2530 = vmatprep.subr.bf16.mxu0 %v2529_v63  ;;  %v665_v63 = vld [vmem:[%s5804_s1 + $0x1378] sm:$0xff] }
  0x65   :  { %v325_v32 = vld [vmem:[%s5804_s1 + $0x8d8] sm:$0xff] }
  0x66   :  { %2600 = vmatpush1.bf16.msra.mxu1 %v2599_v5  ;;  %v2547_v5 = vpack.c.bf16 %v665_v63, %v658_v59  ;;  %v2561_v59 = vpack.c.bf16 %v722_v52, %v715_v51  ;;  %v290_v63 = vld [vmem:[%s5804_s1 + $0x7c0] sm:$0xff]  ;;  %v4210_v51 = vld [vmem:[%s5805_s0 + $0x30] sm:$0xff] }
  0x67   :  { %2532 = vmatpush1.bf16.msra.mxu0 %v2531_v7  ;;  %2602 = vmatprep.subr.bf16.mxu1 %v2601_v8  ;;  %v2617_v7 = vpack.c.bf16 %v234_v0, %v227_v17  ;;  %v672_v8 = vld [vmem:[%s5804_s1 + $0x13b0] sm:$0xff]  ;;  %v717_v17 = vld [vmem:[%s5804_s1 + $0x1518] sm:$0xff] }
  0x68   :  { %2534 = vmatprep.subr.bf16.mxu0 %v2533_v12  ;;  %v679_v12 = vld [vmem:[%s5804_s1 + $0x13e8] sm:$0xff]  ;;  %v724_v0 = vld [vmem:[%s5804_s1 + $0x1550] sm:$0xff] }
  0x6a   :  { %2604 = vmatpush1.bf16.msra.mxu1 %v2603_v22  ;;  %v2551_v22 = vpack.c.bf16 %v679_v12, %v672_v8  ;;  %v26_v8 = vld [vmem:[%s5805_s0 + $0x60] sm:$0xff]  ;;  %v2757_v12 = vpack.c.bf16 %v724_v0, %v717_v17 }
  0x6b   :  { %2536 = vmatpush1.bf16.msra.mxu0 %v2535_v24  ;;  %2606 = vmatprep.subr.bf16.mxu1 %v2605_v27  ;;  %v2621_v24 = vpack.c.bf16 %v248_v14, %v241_v13  ;;  %v686_v27 = vld [vmem:[%s5804_s1 + $0x1420] sm:$0xff]  ;;  %v25_v14 = vld [vmem:[%s5805_s0 + $0x58] sm:$0xff] }
  0x6c   :  { %2538 = vmatprep.subr.bf16.mxu0 %v2537_v31  ;;  %v693_v31 = vld [vmem:[%s5804_s1 + $0x1458] sm:$0xff]  ;;  %v374_v17 = vld [vmem:[%s5804_s1 + $0xa60] sm:$0xff] }
  0x6e   :  { %2608 = vmatpush1.bf16.msra.mxu1 %v2607_v38  ;;  %v2555_v38 = vpack.c.bf16 %v693_v31, %v686_v27  ;;  %v317_v31 = vld [vmem:[%s5804_s1 + $0x898] sm:$0xff] }
  0x6f   :  { %2540 = vmatpush1.bf16.msra.mxu0 %v2539_v43  ;;  %2610 = vmatprep.subr.bf16.mxu1 %v2609_v44  ;;  %v700_v43 = vld [vmem:[%s5804_s1 + $0x1490] sm:$0xff]  ;;  %v254_v44 = vld [vmem:[%s5804_s1 + $0x6a0] sm:$0xff] }
  0x70   :  { %2542 = vmatprep.subr.bf16.mxu0 %v2541_v48  ;;  %v269_v48 = vld [vmem:[%s5804_s1 + $0x718] sm:$0xff]  ;;  %v2627_v53 = vpack.c.bf16 %v261_v45, %v254_v44  ;;  %v2559_v55 = vpack.c.bf16 %v707_v47, %v700_v43  ;;  %v723_v43 = vld [vmem:[%s5804_s1 + $0x1548] sm:$0xff]  ;;  %v346_v45 = vld [vmem:[%s5804_s1 + $0x980] sm:$0xff] }
  0x71   :  { %v339_v44 = vld [vmem:[%s5804_s1 + $0x948] sm:$0xff]  ;;  %v54_v47 = vld [vmem:[%s5804_s1 + $0x60] sm:$0xff] }
  0x72   :  { %2612 = vmatpush1.bf16.msra.mxu1 %v2611_v56  ;;  %v2629_v56 = vpack.c.bf16 %v276_v49, %v269_v48  ;;  %v3188_v49 = vmov 0.0  }
  0x73   :  { %2544 = vmatpush1.bf16.msra.mxu0 %v2543_v57  ;;  %2614 = vmatprep.subr.bf16.mxu1 %v2613_v58  ;;  %v268_v57 = vld [vmem:[%s5804_s1 + $0x710] sm:$0xff]  ;;  %v275_v58 = vld [vmem:[%s5804_s1 + $0x748] sm:$0xff] }
  0x74   :  { %2546 = vmatprep.subr.bf16.mxu0 %v2545_v62  ;;  %v283_v62 = vld [vmem:[%s5804_s1 + $0x788] sm:$0xff]  ;;  %v2631_v1 = vpack.c.bf16 %v275_v58, %v268_v57  ;;  %v360_v57 = vld [vmem:[%s5804_s1 + $0x9f0] sm:$0xff] }
  0x75   :  { %v2633_v9 = vpack.c.bf16 %v290_v63, %v283_v62  ;;  %v359_v62 = vld [vmem:[%s5804_s1 + $0x9e8] sm:$0xff] }
  0x76   :  { %2616 = vmatpush1.bf16.msra.mxu1 %v2615_v3  ;;  %v2563_v3 = vpack.c.bf16 %v721_v61, %v714_v60  ;;  %v731_v60 = vld [vmem:[%s5806_s2 + $0x18] sm:$0xff]  ;;  %v4235_v61 = vld [vmem:[%s5805_s0 + $0x68] sm:$0xff] }
  0x77   :  { %2548 = vmatpush1.bf16.msra.mxu0 %v2547_v5  ;;  %2618 = vmatprep.subr.bf16.mxu1 %v2617_v7  ;;  %v282_v5 = vld [vmem:[%s5804_s1 + $0x780] sm:$0xff]  ;;  %v289_v7 = vld [vmem:[%s5804_s1 + $0x7b8] sm:$0xff]  ;;  %v367_v63 = vld [vmem:[%s5804_s1 + $0xa28] sm:$0xff] }
  0x78   :  { %2550 = vmatprep.subr.bf16.mxu0 %v2549_v11  ;;  %v304_v11 = vld [vmem:[%s5804_s1 + $0x830] sm:$0xff]  ;;  %v2635_v13 = vpack.c.bf16 %v289_v7, %v282_v5  ;;  %v373_v5 = vld [vmem:[%s5804_s1 + $0xa58] sm:$0xff] }
  0x79   :  { %v2637_v15 = vpack.c.bf16 %v304_v11, %v297_v10  ;;  %v381_v7 = vld [vmem:[%s5804_s1 + $0xa98] sm:$0xff] }
  0x7a   :  { %2620 = vmatpush1.bf16.msra.mxu1 %v2619_v21  ;;  %v303_v21 = vld [vmem:[%s5804_s1 + $0x828] sm:$0xff] }
  0x7b   :  { %2552 = vmatpush1.bf16.msra.mxu0 %v2551_v22  ;;  %2622 = vmatprep.subr.bf16.mxu1 %v2621_v24  ;;  %v311_v22 = vld [vmem:[%s5804_s1 + $0x868] sm:$0xff]  ;;  %v318_v24 = vld [vmem:[%s5804_s1 + $0x8a0] sm:$0xff]  ;;  %v2639_v27 = vpack.c.bf16 %v303_v21, %v296_v19 }
  0x7c   :  { %2554 = vmatprep.subr.bf16.mxu0 %v2553_v30  ;;  %v2641_v29 = vpack.c.bf16 %v318_v24, %v311_v22  ;;  %v310_v30 = vld [vmem:[%s5804_s1 + $0x860] sm:$0xff]  ;;  %v395_v19 = vld [vmem:[%s5804_s1 + $0xb08] sm:$0xff]  ;;  %v68_v22 = vld [vmem:[%s5804_s1 + $0xd0] sm:$0xff] }
  0x7d   :  { %v2643_v36 = vpack.c.bf16 %v317_v31, %v310_v30  ;;  %v402_v21 = vld [vmem:[%s5804_s1 + $0xb40] sm:$0xff]  ;;  %v401_v31 = vld [vmem:[%s5804_s1 + $0xb38] sm:$0xff] }
  0x7e   :  { %2624 = vmatpush1.bf16.msra.mxu1 %v2623_v37  ;;  %v2645_v37 = vpack.c.bf16 %v332_v33, %v325_v32  ;;  %v394_v30 = vld [vmem:[%s5804_s1 + $0xb00] sm:$0xff]  ;;  %v67_v32 = vld [vmem:[%s5804_s1 + $0xc8] sm:$0xff]  ;;  %v409_v33 = vld [vmem:[%s5804_s1 + $0xb78] sm:$0xff] }
  0x7f   :  { %2556 = vmatpush1.bf16.msra.mxu0 %v2555_v38  ;;  %2626 = vmatprep.subr.bf16.mxu1 %v2625_v40  ;;  %v324_v38 = vld [vmem:[%s5804_s1 + $0x8d0] sm:$0xff] }
  0x80   :  { %2558 = vmatprep.subr.bf16.mxu0 %v2557_v46  ;;  %v716_v40 = vld [vmem:[%s5804_s1 + $0x1510] sm:$0xff]  ;;  %v47_v46 = vld [vmem:[%s5804_s1 + $0x28] sm:$0xff] }
  0x81   :  { %v2759_v52 = vpack.c.bf16 %v723_v43, %v716_v40  ;;  %v2761_v58 = vpack.c.bf16 %v54_v47, %v47_v46  ;;  %v74_v40 = vld [vmem:[%s5804_s1 + $0x100] sm:$0xff]  ;;  %v408_v43 = vld [vmem:[%s5804_s1 + $0xb70] sm:$0xff]  ;;  %v81_v46 = vld [vmem:[%s5804_s1 + $0x138] sm:$0xff] }
  0x82   :  { %2628 = vmatpush1.bf16.msra.mxu1 %v2627_v53  ;;  %v345_v53 = vld [vmem:[%s5804_s1 + $0x978] sm:$0xff]  ;;  %v423_v47 = vld [vmem:[%s5804_s1 + $0xbe8] sm:$0xff] }
  0x83   :  { %2560 = vmatpush1.bf16.msra.mxu0 %v2559_v55  ;;  %2630 = vmatprep.subr.bf16.mxu1 %v2629_v56  ;;  %v2649_v55 = vpack.c.bf16 %v346_v45, %v339_v44  ;;  %v353_v56 = vld [vmem:[%s5804_s1 + $0x9b8] sm:$0xff]  ;;  %v415_v44 = vld [vmem:[%s5804_s1 + $0xba8] sm:$0xff] }
  0x84   :  { %2562 = vmatprep.subr.bf16.mxu0 %v2561_v59 }
  0x85   :  { %1186 = vmatmul.mubr.f32.vlgmr.msra.gmra.mrb[8].mxu1 %v3644_v18  ;;  %v33_v18 = vld [vmem:[%s5805_s0 + $0x98] sm:$0xff] }
  0x86   :  { %1008 = vmatmul.mubr.f32.vlgmr.msra.gmra.mrb[0].mxu0 %v18_v2  ;;  %2632 = vmatpush1.bf16.msra.mxu1 %v2631_v1  ;;  %v4255_v1 = vld [vmem:[%s5805_s0 + $0xa0] sm:$0xff]  ;;  %v2657_v2 = vpack.c.bf16 %v374_v17, %v367_v63 }
  0x87   :  { %2564 = vmatpush1.bf16.msra.mxu0 %v2563_v3  ;;  %1013 = vmatprep.mubr.f32.mxu0 %v26_v8  ;;  %v366_v3 = vld [vmem:[%s5804_s1 + $0xa20] sm:$0xff]  ;;  %v388_v8 = vld [vmem:[%s5804_s1 + $0xad0] sm:$0xff] }
  0x88   :  { %2634 = vmatprep.subr.bf16.mxu1 %v2633_v9  ;;  %2758 = vmatprep.subr.bf16.mxu0 %v2757_v12  ;;  %v4274_v9 = vld [vmem:[%s5805_s0 + $0xd8] sm:$0xff]  ;;  %v2659_v10 = vpack.c.bf16 %v373_v5, %v366_v3  ;;  %v2661_v11 = vpack.c.bf16 %v388_v8, %v381_v7  ;;  %v46_v12 = vld [vmem:[%s5804_s1 + $0x20] sm:$0xff]  ;;  %v443_v3 = vld [vmem:[%s5804_s1 + $0xc88] sm:$0xff] }
  0x89   :  { %1191 = vmatprep.mubr.f32.mxu1 %v3755_v6  ;;  %v40_v6 = vld [vmem:[%s5805_s0 + $0xd0] sm:$0xff]  ;;  %v451_v7 = vld [vmem:[%s5804_s1 + $0xcc8] sm:$0xff]  ;;  %v458_v8 = vld [vmem:[%s5804_s1 + $0xd00] sm:$0xff] }
  0x8a   :  { %1014 = vmatmul.mubr.f32.gmra.mrb[2].mxu0 %v25_v14  ;;  %2636 = vmatpush1.bf16.msra.mxu1 %v2635_v13  ;;  %v380_v13 = vld [vmem:[%s5804_s1 + $0xa90] sm:$0xff]  ;;  %v387_v14 = vld [vmem:[%s5804_s1 + $0xac8] sm:$0xff] }
  0x8b   :  { %1019 = vmatprep.mubr.f32.mxu0 %v33_v18  ;;  %2638 = vmatprep.subr.bf16.mxu1 %v2637_v15  ;;  %v53_v15 = vld [vmem:[%s5804_s1 + $0x58] sm:$0xff]  ;;  %v2663_v24 = vpack.c.bf16 %v387_v14, %v380_v13  ;;  %v2681_v14 = vpack.c.bf16 %v458_v8, %v451_v7  ;;  %v506_v7 = vld [vmem:[%s5804_s1 + $0xe80] sm:$0xff] }
  0x8c   :  { %1192 = vmatmul.mubr.f32.gmra.mrb[10].mxu1 %v3779_v16  ;;  %v331_v16 = vld [vmem:[%s5804_s1 + $0x908] sm:$0xff]  ;;  %v61_v18 = vld [vmem:[%s5804_s1 + $0x98] sm:$0xff] }
  0x8d   :  { %1197 = vmatprep.mubr.f32.mxu1 %v3800_v25  ;;  %v729_v25 = vld [vmem:[%s5806_s2 + $0x8] sm:$0xff]  ;;  %v2647_v48 = vpack.c.bf16 %v331_v16, %v324_v38  ;;  %v2667_v38 = vpack.c.bf16 %v401_v31, %v394_v30  ;;  %v513_v8 = vld [vmem:[%s5804_s1 + $0xeb8] sm:$0xff] }
  0x8e   :  { %1020 = vmatmul.mubr.f32.gmra.mrb[4].mxu0 %v32_v28  ;;  %2640 = vmatpush1.bf16.msra.mxu1 %v2639_v27  ;;  %v2763_v27 = vpack.c.bf16 %v53_v15, %v46_v12  ;;  %v2665_v28 = vpack.c.bf16 %v402_v21, %v395_v19  ;;  %v116_v15 = vld [vmem:[%s5804_s1 + $0x250] sm:$0xff]  ;;  %v450_v19 = vld [vmem:[%s5804_s1 + $0xcc0] sm:$0xff]  ;;  %v457_v21 = vld [vmem:[%s5804_s1 + $0xcf8] sm:$0xff] }
  0x8f   :  { %1025 = vmatprep.mubr.f32.mxu0 %v40_v6  ;;  %2642 = vmatprep.subr.bf16.mxu1 %v2641_v29  ;;  %v60_v29 = vld [vmem:[%s5804_s1 + $0x90] sm:$0xff]  ;;  %v2765_v6 = vpack.c.bf16 %v68_v22, %v61_v18  ;;  %v465_v22 = vld [vmem:[%s5804_s1 + $0xd38] sm:$0xff]  ;;  %v2683_v30 = vpack.c.bf16 %v457_v21, %v450_v19  ;;  %v194_v19 = vld [vmem:[%s5804_s1 + $0x4c0] sm:$0xff]  ;;  %v2699_v21 = vpack.c.bf16 %v513_v8, %v506_v7 }
  0x90   :  { %1198 = vmatmul.mubr.f32.gmra.mrb[12].mxu1 %v3826_v35  ;;  %739 = vperm.xlu0 %3155, %v729_v25   ;;  %v730_v35 = vld [vmem:[%s5806_s2 + $0x10] sm:$0xff]  ;;  %v2767_v16 = vpack.c.bf16 %v67_v32, %v60_v29  ;;  %v138_v29 = vld [vmem:[%s5804_s1 + $0x300] sm:$0xff]  ;;  %v583_v8 = vld [vmem:[%s5804_s1 + $0x10e8] sm:$0xff] }
  0x91   :  { %1203 = vmatprep.mubr.f32.mxu1 %v3848_v41  ;;  %v338_v41 = vld [vmem:[%s5804_s1 + $0x940] sm:$0xff]  ;;  %744 = vperm.xlu1 %3156, %v730_v35   ;;  %v89_v35 = vld [vmem:[%s5804_s1 + $0x178] sm:$0xff]  ;;  %v576_v7 = vld [vmem:[%s5804_s1 + $0x10b0] sm:$0xff] }
  0x92   :  { %1026 = vmatmul.mubr.f32.gmra.mrb[6].mxu0 %v39_v34  ;;  %2644 = vmatpush1.bf16.msra.mxu1 %v2643_v36  ;;  %v2651_v59 = vpack.c.bf16 %v345_v53, %v338_v41  ;;  %v416_v34 = vld [vmem:[%s5804_s1 + $0xbb0] sm:$0xff]  ;;  %v75_v36 = vld [vmem:[%s5804_s1 + $0x108] sm:$0xff]  ;;  %v2771_v41 = vpack.c.bf16 %v81_v46, %v74_v40  ;;  %v130_v32 = vld [vmem:[%s5804_s1 + $0x2c0] sm:$0xff] }
  0x93   :  { %1096 = vmatprep.mubr.f32.mxu0 %v3188_v49  ;;  %2646 = vmatprep.subr.bf16.mxu1 %v2645_v37  ;;  %v82_v37 = vld [vmem:[%s5804_s1 + $0x140] sm:$0xff]  ;;  %v2669_v25 = vpack.c.bf16 %v416_v34, %v409_v33  ;;  %v464_v33 = vld [vmem:[%s5804_s1 + $0xd30] sm:$0xff]  ;;  %v471_v34 = vld [vmem:[%s5804_s1 + $0xd68] sm:$0xff] }
  0x94   :  { %1204 = vmatmul.mubr.f32.gmra.mrb[14].mxu1 %v3871_v50  ;;  %v2653_v50 = vpack.c.bf16 %v360_v57, %v353_v56  ;;  %v2769_v45 = vpack.c.bf16 %v82_v37, %v75_v36  ;;  %v422_v56 = vld [vmem:[%s5804_s1 + $0xbe0] sm:$0xff]  ;;  %v429_v57 = vld [vmem:[%s5804_s1 + $0xc18] sm:$0xff]  ;;  %v152_v40 = vld [vmem:[%s5804_s1 + $0x370] sm:$0xff] }
  0x95   :  { %1274 = vmatprep.mubr.f32.mxu1 %v3518_v20  ;;  %v352_v20 = vld [vmem:[%s5804_s1 + $0x9b0] sm:$0xff]  ;;  %749 = vperm.xlu1 %3156, %v731_v60   ;;  %v437_v60 = vld [vmem:[%s5804_s1 + $0xc58] sm:$0xff] }
  0x96   :  { %2205 = vmatmul.mubr.msk.f32.vlgmr.msra.gmra.mrb[0].mxu0 %vm752_vm0, %v4210_v51  ;;  %2648 = vmatpush1.bf16.msra.mxu1 %v2647_v48  ;;  %v2655_v0 = vpack.c.bf16 %v359_v62, %v352_v20  ;;  %v430_v48 = vld [vmem:[%s5804_s1 + $0xc20] sm:$0xff]  ;;  %v2675_v62 = vpack.c.bf16 %v429_v57, %v422_v56  ;;  %v137_v37 = vld [vmem:[%s5804_s1 + $0x2f8] sm:$0xff]  ;;  %v144_v46 = vld [vmem:[%s5804_s1 + $0x330] sm:$0xff] }
  0x97   :  { %2760 = vmatpush1.bf16.msra.mxu0 %v2759_v52  ;;  %1102 = vmatprep.mubr.f32.mxu0 %v3188_v49  ;;  %v2671_v52 = vpack.c.bf16 %v415_v44, %v408_v43  ;;  %v2673_v53 = vpack.c.bf16 %v430_v48, %v423_v47  ;;  %v110_v20 = vld [vmem:[%s5804_s1 + $0x220] sm:$0xff]  ;;  %v2687_v43 = vpack.c.bf16 %v471_v34, %v464_v33  ;;  %v485_v48 = vld [vmem:[%s5804_s1 + $0xdd8] sm:$0xff]  ;;  %v4571_v33 = vld [vmem:[%s5805_s0 + $0x48] sm:$0xff] }
  0x98   :  { %2650 = vmatprep.subr.bf16.mxu1 %v2649_v55  ;;  %2762 = vmatprep.subr.bf16.mxu0 %v2761_v58  ;;  %v88_v55 = vld [vmem:[%s5804_s1 + $0x170] sm:$0xff]  ;;  %v2787_v44 = vpack.c.bf16 %v137_v37, %v130_v32  ;;  %v478_v47 = vld [vmem:[%s5804_s1 + $0xda0] sm:$0xff] }
  0x99   :  { %v2691_v56 = vpack.c.bf16 %v485_v48, %v478_v47  ;;  %v208_v32 = vld [vmem:[%s5804_s1 + $0x530] sm:$0xff] }
  0x9a   :  { %2206 = vmatmul.mubr.msk.f32.gmra.mrb[2].mxu0 %vm752_vm0, %v4235_v61  ;;  %2652 = vmatpush1.bf16.msra.mxu1 %v2651_v59  ;;  %v95_v59 = vld [vmem:[%s5804_s1 + $0x1a8] sm:$0xff] }
  0x9b   :  { %1108 = vmatprep.mubr.f32.mxu0 %v3188_v49  ;;  %2654 = vmatprep.subr.bf16.mxu1 %v2653_v50  ;;  %v103_v50 = vld [vmem:[%s5804_s1 + $0x1e8] sm:$0xff]  ;;  %v2775_v63 = vpack.c.bf16 %v95_v59, %v88_v55  ;;  %v166_v55 = vld [vmem:[%s5804_s1 + $0x3e0] sm:$0xff] }
  0x9c   :  { %v2777_v5 = vpack.c.bf16 %v110_v20, %v103_v50  ;;  %v158_v59 = vld [vmem:[%s5804_s1 + $0x3a0] sm:$0xff]  ;;  %v165_v20 = vld [vmem:[%s5804_s1 + $0x3d8] sm:$0xff] }
  0x9e   :  { %2207 = vmatmul.mubr.msk.f32.gmra.mrb[4].mxu0 %vm752_vm0, %v4255_v1  ;;  %2656 = vmatpush1.bf16.msra.mxu1 %v2655_v0  ;;  %v102_v0 = vld [vmem:[%s5804_s1 + $0x1e0] sm:$0xff] }
  0x9f   :  { %1114 = vmatprep.mubr.f32.mxu0 %v3188_v49  ;;  %2658 = vmatprep.subr.bf16.mxu1 %v2657_v2  ;;  %v436_v2 = vld [vmem:[%s5804_s1 + $0xc50] sm:$0xff] }
  0xa0   :  { %v2679_v12 = vpack.c.bf16 %v443_v3, %v436_v2  ;;  %v2795_v3 = vpack.c.bf16 %v165_v20, %v158_v59 }
  0xa2   :  { %2208 = vmatmul.mubr.msk.f32.gmra.mrb[6].mxu0 %vm752_vm0, %v4274_v9  ;;  %2660 = vmatpush1.bf16.msra.mxu1 %v2659_v10  ;;  %v117_v10 = vld [vmem:[%s5804_s1 + $0x258] sm:$0xff] }
  0xa3   :  { %1452 = vmatprep.mubr.f32.mxu0 %v3188_v49  ;;  %2662 = vmatprep.subr.bf16.mxu1 %v2661_v11  ;;  %v124_v11 = vld [vmem:[%s5804_s1 + $0x290] sm:$0xff] }
  0xa4   :  { %v2781_v18 = vpack.c.bf16 %v124_v11, %v117_v10  ;;  %v179_v11 = vld [vmem:[%s5804_s1 + $0x448] sm:$0xff] }
  0xa6   :  { %2209 = vmatmul.mubr.msk.f32.vlgmr.msra.gmra.mrb[8].mxu0 %vm752_vm0, %v4210_v51  ;;  %2664 = vmatpush1.bf16.msra.mxu1 %v2663_v24  ;;  %v96_v51 = vld [vmem:[%s5804_s1 + $0x1b0] sm:$0xff] }
  0xa7   :  { %2764 = vmatpush1.bf16.msra.mxu0 %v2763_v27  ;;  %2666 = vmatprep.subr.bf16.mxu1 %v2665_v28  ;;  %v2773_v58 = vpack.c.bf16 %v96_v51, %v89_v35  ;;  %v472_v24 = vld [vmem:[%s5804_s1 + $0xd70] sm:$0xff]  ;;  %v4432_v27 = vld [vmem:[%s5805_s0 + $0x8] sm:$0xff] }
  0xa8   :  { %2766 = vmatprep.subr.bf16.mxu0 %v2765_v6  ;;  %1458 = vmatprep.mubr.f32.mxu0 %v3188_v49  ;;  %v131_v28 = vld [vmem:[%s5804_s1 + $0x2c8] sm:$0xff]  ;;  %v2685_v6 = vpack.c.bf16 %v472_v24, %v465_v22  ;;  %v186_v22 = vld [vmem:[%s5804_s1 + $0x480] sm:$0xff]  ;;  %v520_v24 = vld [vmem:[%s5804_s1 + $0xef0] sm:$0xff] }
  0xa9   :  { %v2785_v36 = vpack.c.bf16 %v138_v29, %v131_v28  ;;  %v151_v51 = vld [vmem:[%s5804_s1 + $0x368] sm:$0xff] }
  0xaa   :  { %2668 = vmatpush1.bf16.msra.mxu1 %v2667_v38  ;;  %2210 = vmatmul.mubr.msk.f32.gmra.mrb[10].mxu0 %vm752_vm0, %v4235_v61  ;;  %v444_v61 = vld [vmem:[%s5804_s1 + $0xc90] sm:$0xff]  ;;  %v479_v38 = vld [vmem:[%s5804_s1 + $0xda8] sm:$0xff]  ;;  %v2791_v57 = vpack.c.bf16 %v151_v51, %v144_v46  ;;  %v222_v46 = vld [vmem:[%s5804_s1 + $0x5a0] sm:$0xff] }
  0xab   :  { %2768 = vmatpush1.bf16.msra.mxu0 %v2767_v16  ;;  %2670 = vmatprep.subr.bf16.mxu1 %v2669_v25  ;;  %v2677_v17 = vpack.c.bf16 %v444_v61, %v437_v60  ;;  %v486_v16 = vld [vmem:[%s5804_s1 + $0xde0] sm:$0xff]  ;;  %v145_v25 = vld [vmem:[%s5804_s1 + $0x338] sm:$0xff]  ;;  %v492_v60 = vld [vmem:[%s5804_s1 + $0xe10] sm:$0xff] }
  0xac   :  { %2770 = vmatprep.subr.bf16.mxu0 %v2769_v45  ;;  %1464 = vmatprep.mubr.f32.mxu0 %v3188_v49  ;;  %v2689_v45 = vpack.c.bf16 %v486_v16, %v479_v38  ;;  %v2789_v35 = vpack.c.bf16 %v152_v40, %v145_v25  ;;  %v499_v61 = vld [vmem:[%s5804_s1 + $0xe48] sm:$0xff]  ;;  %v200_v38 = vld [vmem:[%s5804_s1 + $0x4f0] sm:$0xff]  ;;  %v534_v16 = vld [vmem:[%s5804_s1 + $0xf60] sm:$0xff] }
  0xad   :  { %v2695_v2 = vpack.c.bf16 %v499_v61, %v492_v60  ;;  %v527_v28 = vld [vmem:[%s5804_s1 + $0xf28] sm:$0xff]  ;;  %v541_v25 = vld [vmem:[%s5804_s1 + $0xf98] sm:$0xff]  ;;  %v214_v51 = vld [vmem:[%s5804_s1 + $0x560] sm:$0xff] }
  0xae   :  { %2672 = vmatpush1.bf16.msra.mxu1 %v2671_v52  ;;  %2211 = vmatmul.mubr.msk.f32.gmra.mrb[12].mxu0 %vm752_vm0, %v4255_v1  ;;  %v109_v1 = vld [vmem:[%s5804_s1 + $0x218] sm:$0xff]  ;;  %v2703_v34 = vpack.c.bf16 %v527_v28, %v520_v24  ;;  %v2707_v47 = vpack.c.bf16 %v541_v25, %v534_v16  ;;  %v228_v61 = vld [vmem:[%s5804_s1 + $0x5d0] sm:$0xff]  ;;  %v590_v24 = vld [vmem:[%s5804_s1 + $0x1120] sm:$0xff] }
  0xaf   :  { %2772 = vmatpush1.bf16.msra.mxu0 %v2771_v41  ;;  %2674 = vmatprep.subr.bf16.mxu1 %v2673_v53  ;;  %v2779_v13 = vpack.c.bf16 %v109_v1, %v102_v0  ;;  %v493_v52 = vld [vmem:[%s5804_s1 + $0xe18] sm:$0xff]  ;;  %v500_v41 = vld [vmem:[%s5804_s1 + $0xe50] sm:$0xff]  ;;  %v159_v53 = vld [vmem:[%s5804_s1 + $0x3a8] sm:$0xff] }
  0xb0   :  { %2774 = vmatprep.subr.bf16.mxu0 %v2773_v58  ;;  %1470 = vmatprep.mubr.f32.mxu0 %v3188_v49  ;;  %v2693_v58 = vpack.c.bf16 %v500_v41, %v493_v52  ;;  %v2793_v50 = vpack.c.bf16 %v166_v55, %v159_v53  ;;  %v180_v0 = vld [vmem:[%s5804_s1 + $0x450] sm:$0xff]  ;;  %v563_v53 = vld [vmem:[%s5804_s1 + $0x1048] sm:$0xff]  ;;  %v570_v55 = vld [vmem:[%s5804_s1 + $0x1080] sm:$0xff] }
  0xb1   :  { %v172_v1 = vld [vmem:[%s5804_s1 + $0x410] sm:$0xff]  ;;  %v2713_v60 = vpack.c.bf16 %v570_v55, %v563_v53  ;;  %v597_v28 = vld [vmem:[%s5804_s1 + $0x1158] sm:$0xff]  ;;  %v611_v25 = vld [vmem:[%s5804_s1 + $0x11c8] sm:$0xff] }
  0xb2   :  { %2676 = vmatpush1.bf16.msra.mxu1 %v2675_v62  ;;  %2212 = vmatmul.mubr.msk.f32.gmra.mrb[14].mxu0 %vm752_vm0, %v4274_v9  ;;  %v123_v9 = vld [vmem:[%s5804_s1 + $0x288] sm:$0xff]  ;;  %v548_v52 = vld [vmem:[%s5804_s1 + $0xfd0] sm:$0xff]  ;;  %v633_v53 = vld [vmem:[%s5804_s1 + $0x1278] sm:$0xff] }
  0xb3   :  { %2776 = vmatpush1.bf16.msra.mxu0 %v2775_v63  ;;  %2678 = vmatprep.subr.bf16.mxu1 %v2677_v17  ;;  %v2783_v31 = vpack.c.bf16 %v123_v9, %v116_v15  ;;  %v507_v62 = vld [vmem:[%s5804_s1 + $0xe88] sm:$0xff]  ;;  %v514_v63 = vld [vmem:[%s5804_s1 + $0xec0] sm:$0xff]  ;;  %v173_v17 = vld [vmem:[%s5804_s1 + $0x418] sm:$0xff] }
  0xb4   :  { %2778 = vmatprep.subr.bf16.mxu0 %v2777_v5  ;;  %1541 = vmatprep.mubr.f32.mxu0 %v4432_v27  ;;  %v2697_v5 = vpack.c.bf16 %v514_v63, %v507_v62  ;;  %v2797_v10 = vpack.c.bf16 %v180_v0, %v173_v17  ;;  %v187_v15 = vld [vmem:[%s5804_s1 + $0x488] sm:$0xff]  ;;  %v577_v62 = vld [vmem:[%s5804_s1 + $0x10b8] sm:$0xff]  ;;  %v584_v63 = vld [vmem:[%s5804_s1 + $0x10f0] sm:$0xff] }
  0xb5   :  { %v2801_v29 = vpack.c.bf16 %v194_v19, %v187_v15  ;;  %v243_v17 = vld [vmem:[%s5804_s1 + $0x648] sm:$0xff]  ;;  %v250_v0 = vld [vmem:[%s5804_s1 + $0x680] sm:$0xff]  ;;  %v257_v15 = vld [vmem:[%s5804_s1 + $0x6b8] sm:$0xff] }
  0xb6   :  { %2680 = vmatpush1.bf16.msra.mxu1 %v2679_v12  ;;  %v521_v12 = vld [vmem:[%s5804_s1 + $0xef8] sm:$0xff]  ;;  %v264_v19 = vld [vmem:[%s5804_s1 + $0x6f0] sm:$0xff] }
  0xb7   :  { %2780 = vmatpush1.bf16.msra.mxu0 %v2779_v13  ;;  %2682 = vmatprep.subr.bf16.mxu1 %v2681_v14  ;;  %v528_v13 = vld [vmem:[%s5804_s1 + $0xf30] sm:$0xff] }
  0xb8   :  { %2782 = vmatprep.subr.bf16.mxu0 %v2781_v18  ;;  %v4534_v14 = vld [vmem:[%s5805_s0 + $0x10] sm:$0xff]  ;;  %v2799_v18 = vpack.c.bf16 %v179_v11, %v172_v1  ;;  %v2701_v9 = vpack.c.bf16 %v528_v13, %v521_v12  ;;  %v242_v1 = vld [vmem:[%s5804_s1 + $0x640] sm:$0xff]  ;;  %v249_v11 = vld [vmem:[%s5804_s1 + $0x678] sm:$0xff] }
  0xb9   :  { %v591_v12 = vld [vmem:[%s5804_s1 + $0x1128] sm:$0xff]  ;;  %v598_v13 = vld [vmem:[%s5804_s1 + $0x1160] sm:$0xff]  ;;  %v604_v16 = vld [vmem:[%s5804_s1 + $0x1190] sm:$0xff] }
  0xba   :  { %2684 = vmatpush1.bf16.msra.mxu1 %v2683_v30  ;;  %v535_v30 = vld [vmem:[%s5804_s1 + $0xf68] sm:$0xff]  ;;  %v640_v55 = vld [vmem:[%s5804_s1 + $0x12b0] sm:$0xff] }
  0xbb   :  { %2784 = vmatpush1.bf16.msra.mxu0 %v2783_v31  ;;  %2686 = vmatprep.subr.bf16.mxu1 %v2685_v6  ;;  %v542_v31 = vld [vmem:[%s5804_s1 + $0xfa0] sm:$0xff]  ;;  %v201_v6 = vld [vmem:[%s5804_s1 + $0x4f8] sm:$0xff] }
  0xbc   :  { %2786 = vmatprep.subr.bf16.mxu0 %v2785_v36  ;;  %v2705_v37 = vpack.c.bf16 %v542_v31, %v535_v30  ;;  %v2805_v40 = vpack.c.bf16 %v208_v32, %v201_v6  ;;  %v605_v30 = vld [vmem:[%s5804_s1 + $0x1198] sm:$0xff]  ;;  %v612_v31 = vld [vmem:[%s5804_s1 + $0x11d0] sm:$0xff]  ;;  %v271_v6 = vld [vmem:[%s5804_s1 + $0x728] sm:$0xff] }
  0xbd   :  { %v278_v32 = vld [vmem:[%s5804_s1 + $0x760] sm:$0xff] }
  0xbe   :  { %2688 = vmatpush1.bf16.msra.mxu1 %v2687_v43  ;;  %v549_v43 = vld [vmem:[%s5804_s1 + $0xfd8] sm:$0xff] }
  0xbf   :  { %2788 = vmatpush1.bf16.msra.mxu0 %v2787_v44  ;;  %2690 = vmatprep.subr.bf16.mxu1 %v2689_v45  ;;  %v556_v44 = vld [vmem:[%s5804_s1 + $0x1010] sm:$0xff]  ;;  %v215_v45 = vld [vmem:[%s5804_s1 + $0x568] sm:$0xff] }
  0xc0   :  { %2790 = vmatprep.subr.bf16.mxu0 %v2789_v35  ;;  %v2709_v35 = vpack.c.bf16 %v556_v44, %v549_v43  ;;  %v2809_v41 = vpack.c.bf16 %v222_v46, %v215_v45  ;;  %v619_v43 = vld [vmem:[%s5804_s1 + $0x1208] sm:$0xff]  ;;  %v626_v44 = vld [vmem:[%s5804_s1 + $0x1240] sm:$0xff]  ;;  %v285_v45 = vld [vmem:[%s5804_s1 + $0x798] sm:$0xff] }
  0xc1   :  { %v292_v46 = vld [vmem:[%s5804_s1 + $0x7d0] sm:$0xff] }
  0xc2   :  { %2692 = vmatpush1.bf16.msra.mxu1 %v2691_v56  ;;  %v229_v56 = vld [vmem:[%s5804_s1 + $0x5d8] sm:$0xff] }
  0xc3   :  { %2792 = vmatpush1.bf16.msra.mxu0 %v2791_v57  ;;  %2694 = vmatprep.subr.bf16.mxu1 %v2693_v58  ;;  %v236_v57 = vld [vmem:[%s5804_s1 + $0x610] sm:$0xff] }
  0xc4   :  { %2794 = vmatprep.subr.bf16.mxu0 %v2793_v50  ;;  %v562_v50 = vld [vmem:[%s5804_s1 + $0x1040] sm:$0xff]  ;;  %v2813_v20 = vpack.c.bf16 %v236_v57, %v229_v56  ;;  %v299_v56 = vld [vmem:[%s5804_s1 + $0x808] sm:$0xff] }
  0xc5   :  { %1275 = vmatmul.mubr.f32.vlgmr.msra.gmra.mrb[8].mxu1 %v4534_v14  ;;  %v306_v57 = vld [vmem:[%s5804_s1 + $0x840] sm:$0xff] }
  0xc6   :  { %2696 = vmatpush1.bf16.msra.mxu1 %v2695_v2  ;;  %1280 = vmatprep.mubr.f32.mxu1 %v3746_v4  ;;  %v193_v4 = vld [vmem:[%s5804_s1 + $0x4b8] sm:$0xff] }
  0xc7   :  { %2796 = vmatpush1.bf16.msra.mxu0 %v2795_v3  ;;  %2698 = vmatprep.subr.bf16.mxu1 %v2697_v5  ;;  %v2803_v36 = vpack.c.bf16 %v193_v4, %v186_v22  ;;  %v2717_v5 = vpack.c.bf16 %v584_v63, %v577_v62  ;;  %v256_v22 = vld [vmem:[%s5804_s1 + $0x6b0] sm:$0xff]  ;;  %v263_v4 = vld [vmem:[%s5804_s1 + $0x6e8] sm:$0xff]  ;;  %v305_v62 = vld [vmem:[%s5804_s1 + $0x838] sm:$0xff] }
  0xc8   :  { %2798 = vmatprep.subr.bf16.mxu0 %v2797_v10  ;;  %v2817_v10 = vpack.c.bf16 %v250_v0, %v243_v17  ;;  %v647_v63 = vld [vmem:[%s5804_s1 + $0x12e8] sm:$0xff]  ;;  %v654_v17 = vld [vmem:[%s5804_s1 + $0x1320] sm:$0xff] }
  0xc9   :  { %1281 = vmatmul.mubr.f32.gmra.mrb[10].mxu1 %v4571_v33  ;;  %v4774_v0 = vld [vmem:[%s5805_s0 + $0x40] sm:$0xff] }
  0xca   :  { %2700 = vmatpush1.bf16.msra.mxu1 %v2699_v21  ;;  %1286 = vmatprep.mubr.f32.mxu1 %v3790_v23  ;;  %v207_v23 = vld [vmem:[%s5804_s1 + $0x528] sm:$0xff]  ;;  %v2719_v21 = vpack.c.bf16 %v583_v8, %v576_v7  ;;  %v2737_v8 = vpack.c.bf16 %v654_v17, %v647_v63 }
  0xcb   :  { %2800 = vmatpush1.bf16.msra.mxu0 %v2799_v18  ;;  %2702 = vmatprep.subr.bf16.mxu1 %v2701_v9  ;;  %v2807_v48 = vpack.c.bf16 %v207_v23, %v200_v38  ;;  %v2819_v18 = vpack.c.bf16 %v249_v11, %v242_v1  ;;  %v2721_v9 = vpack.c.bf16 %v598_v13, %v591_v12  ;;  %v270_v38 = vld [vmem:[%s5804_s1 + $0x720] sm:$0xff]  ;;  %v277_v23 = vld [vmem:[%s5804_s1 + $0x758] sm:$0xff] }
  0xcc   :  { %2802 = vmatprep.subr.bf16.mxu0 %v2801_v29  ;;  %v2821_v29 = vpack.c.bf16 %v264_v19, %v257_v15  ;;  %v4786_v1 = vld [vmem:[%s5805_s0 + $0x38] sm:$0xff]  ;;  %v646_v11 = vld [vmem:[%s5804_s1 + $0x12e0] sm:$0xff]  ;;  %v319_v15 = vld [vmem:[%s5804_s1 + $0x8a8] sm:$0xff] }
  0xcd   :  { %1287 = vmatmul.mubr.f32.gmra.mrb[12].mxu1 %v3805_v26  ;;  %v555_v26 = vld [vmem:[%s5804_s1 + $0x1008] sm:$0xff]  ;;  %v653_v12 = vld [vmem:[%s5804_s1 + $0x1318] sm:$0xff] }
  0xce   :  { %2704 = vmatpush1.bf16.msra.mxu1 %v2703_v34  ;;  %1292 = vmatprep.mubr.f32.mxu1 %v3838_v39  ;;  %v221_v39 = vld [vmem:[%s5804_s1 + $0x598] sm:$0xff]  ;;  %v2711_v58 = vpack.c.bf16 %v555_v26, %v548_v52  ;;  %v2723_v34 = vpack.c.bf16 %v597_v28, %v590_v24  ;;  %v618_v52 = vld [vmem:[%s5804_s1 + $0x1200] sm:$0xff]  ;;  %v2739_v24 = vpack.c.bf16 %v653_v12, %v646_v11  ;;  %v4822_v28 = vld [vmem:[%s5805_s0 + $0x70] sm:$0xff] }
  0xcf   :  { %2804 = vmatpush1.bf16.msra.mxu0 %v2803_v36  ;;  %2706 = vmatprep.subr.bf16.mxu1 %v2705_v37  ;;  %v2811_v59 = vpack.c.bf16 %v221_v39, %v214_v51  ;;  %v2823_v36 = vpack.c.bf16 %v263_v4, %v256_v22  ;;  %v2725_v37 = vpack.c.bf16 %v612_v31, %v605_v30  ;;  %v284_v51 = vld [vmem:[%s5804_s1 + $0x790] sm:$0xff]  ;;  %v625_v26 = vld [vmem:[%s5804_s1 + $0x1238] sm:$0xff]  ;;  %v291_v39 = vld [vmem:[%s5804_s1 + $0x7c8] sm:$0xff] }
  0xd0   :  { %2806 = vmatprep.subr.bf16.mxu0 %v2805_v40  ;;  %v2825_v40 = vpack.c.bf16 %v278_v32, %v271_v6  ;;  %v661_v19 = vld [vmem:[%s5804_s1 + $0x1358] sm:$0xff]  ;;  %v334_v22 = vld [vmem:[%s5804_s1 + $0x920] sm:$0xff]  ;;  %v660_v31 = vld [vmem:[%s5804_s1 + $0x1350] sm:$0xff] }
  0xd1   :  { %1293 = vmatmul.mubr.f32.gmra.mrb[14].mxu1 %v3853_v42  ;;  %v569_v42 = vld [vmem:[%s5804_s1 + $0x1078] sm:$0xff]  ;;  %v326_v30 = vld [vmem:[%s5804_s1 + $0x8e0] sm:$0xff]  ;;  %v667_v6 = vld [vmem:[%s5804_s1 + $0x1388] sm:$0xff] }
  0xd2   :  { %2708 = vmatpush1.bf16.msra.mxu1 %v2707_v47  ;;  %1363 = vmatprep.mubr.f32.mxu1 %v3883_v54  ;;  %v235_v54 = vld [vmem:[%s5804_s1 + $0x608] sm:$0xff]  ;;  %v2715_v2 = vpack.c.bf16 %v569_v42, %v562_v50  ;;  %v2727_v47 = vpack.c.bf16 %v611_v25, %v604_v16  ;;  %v298_v50 = vld [vmem:[%s5804_s1 + $0x800] sm:$0xff]  ;;  %v632_v42 = vld [vmem:[%s5804_s1 + $0x1270] sm:$0xff] }
  0xd3   :  { %2808 = vmatpush1.bf16.msra.mxu0 %v2807_v48  ;;  %2710 = vmatprep.subr.bf16.mxu1 %v2709_v35  ;;  %v2815_v3 = vpack.c.bf16 %v235_v54, %v228_v61  ;;  %v2827_v48 = vpack.c.bf16 %v277_v23, %v270_v38  ;;  %v2729_v35 = vpack.c.bf16 %v626_v44, %v619_v43  ;;  %v4846_v38 = vld [vmem:[%s5805_s0 + $0xb0] sm:$0xff]  ;;  %v341_v16 = vld [vmem:[%s5804_s1 + $0x958] sm:$0xff]  ;;  %v4858_v23 = vld [vmem:[%s5805_s0 + $0xa8] sm:$0xff] }
  0xd4   :  { %2810 = vmatprep.subr.bf16.mxu0 %v2809_v41  ;;  %v2829_v41 = vpack.c.bf16 %v292_v46, %v285_v45  ;;  %v2733_v61 = vpack.c.bf16 %v640_v55, %v633_v53  ;;  %v2833_v54 = vpack.c.bf16 %v306_v57, %v299_v56  ;;  %v2835_v7 = vpack.c.bf16 %v305_v62, %v298_v50  ;;  %v348_v25 = vld [vmem:[%s5804_s1 + $0x990] sm:$0xff]  ;;  %v674_v46 = vld [vmem:[%s5804_s1 + $0x13c0] sm:$0xff]  ;;  %v361_v50 = vld [vmem:[%s5804_s1 + $0x9f8] sm:$0xff] }
  0xd5   :  { %v340_v45 = vld [vmem:[%s5804_s1 + $0x950] sm:$0xff]  ;;  %v354_v57 = vld [vmem:[%s5804_s1 + $0x9c0] sm:$0xff]  ;;  %v167_v12 = vld [vmem:[%s5804_s1 + $0x3e8] sm:$0xff] }
  0xd6   :  { %2712 = vmatpush1.bf16.msra.mxu1 %v2711_v58  ;;  %v4750_v58 = vld [vmem:[%s5805_s0] sm:$0xff]  ;;  %v376_v62 = vld [vmem:[%s5804_s1 + $0xa70] sm:$0xff]  ;;  %v2851_v17 = vpack.c.bf16 %v361_v50, %v354_v57  ;;  %v83_v57 = vld [vmem:[%s5804_s1 + $0x148] sm:$0xff] }
  0xd7   :  { %2812 = vmatpush1.bf16.msra.mxu0 %v2811_v59  ;;  %2714 = vmatprep.subr.bf16.mxu1 %v2713_v60  ;;  %v2731_v59 = vpack.c.bf16 %v625_v26, %v618_v52  ;;  %v2831_v60 = vpack.c.bf16 %v291_v39, %v284_v51  ;;  %v689_v51 = vld [vmem:[%s5804_s1 + $0x1438] sm:$0xff]  ;;  %v696_v52 = vld [vmem:[%s5804_s1 + $0x1470] sm:$0xff]  ;;  %v362_v39 = vld [vmem:[%s5804_s1 + $0xa00] sm:$0xff] }
  0xd8   :  { %2814 = vmatprep.subr.bf16.mxu0 %v2813_v20  ;;  %v639_v20 = vld [vmem:[%s5804_s1 + $0x12a8] sm:$0xff]  ;;  %v4882_v26 = vld [vmem:[%s5805_s0 + $0x18] sm:$0xff]  ;;  %v2749_v56 = vpack.c.bf16 %v696_v52, %v689_v51  ;;  %v160_v11 = vld [vmem:[%s5804_s1 + $0x3b0] sm:$0xff] }
  0xd9   :  { %v418_v51 = vld [vmem:[%s5804_s1 + $0xbc0] sm:$0xff]  ;;  %v209_v50 = vld [vmem:[%s5804_s1 + $0x538] sm:$0xff] }
  0xda   :  { %2716 = vmatpush1.bf16.msra.mxu1 %v2715_v2  ;;  %v313_v2 = vld [vmem:[%s5804_s1 + $0x878] sm:$0xff]  ;;  %v4996_v52 = vld [vmem:[%s5805_s0 + $0x60] sm:$0xff] }
  0xdb   :  { %2816 = vmatpush1.bf16.msra.mxu0 %v2815_v3  ;;  %2718 = vmatprep.subr.bf16.mxu1 %v2717_v5  ;;  %v320_v3 = vld [vmem:[%s5804_s1 + $0x8b0] sm:$0xff]  ;;  %v2735_v5 = vpack.c.bf16 %v639_v20, %v632_v42  ;;  %v703_v42 = vld [vmem:[%s5804_s1 + $0x14a8] sm:$0xff]  ;;  %v710_v20 = vld [vmem:[%s5804_s1 + $0x14e0] sm:$0xff] }
  0xdc   :  { %2818 = vmatprep.subr.bf16.mxu0 %v2817_v10  ;;  %v312_v10 = vld [vmem:[%s5804_s1 + $0x870] sm:$0xff]  ;;  %v2837_v13 = vpack.c.bf16 %v320_v3, %v313_v2  ;;  %v2753_v2 = vpack.c.bf16 %v710_v20, %v703_v42  ;;  %v5020_v42 = vld [vmem:[%s5805_s0 + $0x58] sm:$0xff] }
  0xdd   :  { %v368_v3 = vld [vmem:[%s5804_s1 + $0xa30] sm:$0xff]  ;;  %v425_v20 = vld [vmem:[%s5804_s1 + $0xbf8] sm:$0xff] }
  0xde   :  { %2720 = vmatpush1.bf16.msra.mxu1 %v2719_v21  ;;  %v668_v21 = vld [vmem:[%s5804_s1 + $0x1390] sm:$0xff] }
  0xdf   :  { %2820 = vmatpush1.bf16.msra.mxu0 %v2819_v18  ;;  %2722 = vmatprep.subr.bf16.mxu1 %v2721_v9  ;;  %v4810_v18 = vld [vmem:[%s5805_s0 + $0x78] sm:$0xff]  ;;  %v327_v9 = vld [vmem:[%s5804_s1 + $0x8e8] sm:$0xff]  ;;  %v2741_v4 = vpack.c.bf16 %v668_v21, %v661_v19 }
  0xe0   :  { %2822 = vmatprep.subr.bf16.mxu0 %v2821_v29  ;;  %v2839_v29 = vpack.c.bf16 %v319_v15, %v312_v10  ;;  %v2841_v32 = vpack.c.bf16 %v334_v22, %v327_v9  ;;  %v375_v10 = vld [vmem:[%s5804_s1 + $0xa68] sm:$0xff]  ;;  %v390_v15 = vld [vmem:[%s5804_s1 + $0xae0] sm:$0xff]  ;;  %v2957_v22 = vpack.c.bf16 %v167_v12, %v160_v11  ;;  %v216_v11 = vld [vmem:[%s5804_s1 + $0x570] sm:$0xff] }
  0xe1   :  { %v2855_v21 = vpack.c.bf16 %v375_v10, %v368_v3  ;;  %v382_v9 = vld [vmem:[%s5804_s1 + $0xaa0] sm:$0xff]  ;;  %v431_v10 = vld [vmem:[%s5804_s1 + $0xc28] sm:$0xff] }
  0xe2   :  { %2724 = vmatpush1.bf16.msra.mxu1 %v2723_v34  ;;  %v333_v34 = vld [vmem:[%s5804_s1 + $0x918] sm:$0xff]  ;;  %v223_v12 = vld [vmem:[%s5804_s1 + $0x5a8] sm:$0xff] }
  0xe3   :  { %2824 = vmatpush1.bf16.msra.mxu0 %v2823_v36  ;;  %2726 = vmatprep.subr.bf16.mxu1 %v2725_v37  ;;  %v675_v36 = vld [vmem:[%s5804_s1 + $0x13c8] sm:$0xff]  ;;  %v682_v37 = vld [vmem:[%s5804_s1 + $0x1400] sm:$0xff]  ;;  %v2843_v43 = vpack.c.bf16 %v333_v34, %v326_v30  ;;  %v389_v30 = vld [vmem:[%s5804_s1 + $0xad8] sm:$0xff] }
  0xe4   :  { %2826 = vmatprep.subr.bf16.mxu0 %v2825_v40  ;;  %v2743_v40 = vpack.c.bf16 %v667_v6, %v660_v31  ;;  %v2745_v44 = vpack.c.bf16 %v682_v37, %v675_v36  ;;  %v174_v31 = vld [vmem:[%s5804_s1 + $0x420] sm:$0xff]  ;;  %v181_v6 = vld [vmem:[%s5804_s1 + $0x458] sm:$0xff]  ;;  %v404_v34 = vld [vmem:[%s5804_s1 + $0xb50] sm:$0xff]  ;;  %v2859_v37 = vpack.c.bf16 %v389_v30, %v382_v9 }
  0xe5   :  { %v111_v30 = vld [vmem:[%s5804_s1 + $0x228] sm:$0xff] }
  0xe6   :  { %1542 = vmatmul.mubr.f32.vlgmr.msra.gmra.mrb[16].mxu0 %v4750_v58  ;;  %2728 = vmatpush1.bf16.msra.mxu1 %v2727_v47  ;;  %v681_v47 = vld [vmem:[%s5804_s1 + $0x13f8] sm:$0xff] }
  0xe7   :  { %2828 = vmatpush1.bf16.msra.mxu0 %v2827_v48  ;;  %2730 = vmatprep.subr.bf16.mxu1 %v2729_v35  ;;  %v2845_v48 = vpack.c.bf16 %v348_v25, %v341_v16  ;;  %v347_v35 = vld [vmem:[%s5804_s1 + $0x988] sm:$0xff]  ;;  %v2747_v53 = vpack.c.bf16 %v681_v47, %v674_v46  ;;  %v396_v16 = vld [vmem:[%s5804_s1 + $0xb10] sm:$0xff]  ;;  %v2961_v25 = vpack.c.bf16 %v181_v6, %v174_v31  ;;  %v445_v6 = vld [vmem:[%s5804_s1 + $0xc98] sm:$0xff] }
  0xe8   :  { %2830 = vmatprep.subr.bf16.mxu0 %v2829_v41  ;;  %1547 = vmatprep.mubr.f32.mxu0 %v4774_v0  ;;  %v355_v41 = vld [vmem:[%s5804_s1 + $0x9c8] sm:$0xff]  ;;  %v2847_v55 = vpack.c.bf16 %v347_v35, %v340_v45  ;;  %v188_v46 = vld [vmem:[%s5804_s1 + $0x490] sm:$0xff] }
  0xe9   :  { %v403_v45 = vld [vmem:[%s5804_s1 + $0xb48] sm:$0xff] }
  0xea   :  { %2732 = vmatpush1.bf16.msra.mxu1 %v2731_v59  ;;  %1548 = vmatmul.mubr.f32.gmra.mrb[18].mxu0 %v4786_v1  ;;  %v688_v59 = vld [vmem:[%s5804_s1 + $0x1430] sm:$0xff]  ;;  %v195_v47 = vld [vmem:[%s5804_s1 + $0x4c8] sm:$0xff] }
  0xeb   :  { %2832 = vmatpush1.bf16.msra.mxu0 %v2831_v60  ;;  %2734 = vmatprep.subr.bf16.mxu1 %v2733_v61  ;;  %v695_v60 = vld [vmem:[%s5804_s1 + $0x1468] sm:$0xff]  ;;  %v2849_v61 = vpack.c.bf16 %v362_v39, %v355_v41  ;;  %v2863_v39 = vpack.c.bf16 %v403_v45, %v396_v16  ;;  %v460_v16 = vld [vmem:[%s5804_s1 + $0xd10] sm:$0xff]  ;;  %v118_v45 = vld [vmem:[%s5804_s1 + $0x260] sm:$0xff] }
  0xec   :  { %2834 = vmatprep.subr.bf16.mxu0 %v2833_v54  ;;  %1553 = vmatprep.mubr.f32.mxu0 %v4810_v18  ;;  %v369_v54 = vld [vmem:[%s5804_s1 + $0xa38] sm:$0xff]  ;;  %v2751_v63 = vpack.c.bf16 %v695_v60, %v688_v59  ;;  %v411_v35 = vld [vmem:[%s5804_s1 + $0xb88] sm:$0xff] }
  0xed   :  { %v2865_v59 = vpack.c.bf16 %v418_v51, %v411_v35  ;;  %v417_v60 = vld [vmem:[%s5804_s1 + $0xbb8] sm:$0xff]  ;;  %v244_v35 = vld [vmem:[%s5804_s1 + $0x650] sm:$0xff]  ;;  %v251_v51 = vld [vmem:[%s5804_s1 + $0x688] sm:$0xff] }
  0xee   :  { %2736 = vmatpush1.bf16.msra.mxu1 %v2735_v5  ;;  %1554 = vmatmul.mubr.f32.gmra.mrb[20].mxu0 %v4822_v28  ;;  %v702_v5 = vld [vmem:[%s5804_s1 + $0x14a0] sm:$0xff] }
  0xef   :  { %2836 = vmatpush1.bf16.msra.mxu0 %v2835_v7  ;;  %2738 = vmatprep.subr.bf16.mxu1 %v2737_v8  ;;  %v709_v7 = vld [vmem:[%s5804_s1 + $0x14d8] sm:$0xff]  ;;  %v2853_v8 = vpack.c.bf16 %v376_v62, %v369_v54  ;;  %v432_v54 = vld [vmem:[%s5804_s1 + $0xc30] sm:$0xff] }
  0xf0   :  { %2838 = vmatprep.subr.bf16.mxu0 %v2837_v13  ;;  %1559 = vmatprep.mubr.f32.mxu0 %v4846_v38  ;;  %v383_v13 = vld [vmem:[%s5804_s1 + $0xaa8] sm:$0xff]  ;;  %v2755_v19 = vpack.c.bf16 %v709_v7, %v702_v5  ;;  %v5032_v62 = vld [vmem:[%s5805_s0 + $0x98] sm:$0xff]  ;;  %v90_v5 = vld [vmem:[%s5804_s1 + $0x180] sm:$0xff] }
  0xf1   :  { %v97_v7 = vld [vmem:[%s5804_s1 + $0x1b8] sm:$0xff] }
  0xf2   :  { %2740 = vmatpush1.bf16.msra.mxu1 %v2739_v24  ;;  %1560 = vmatmul.mubr.f32.gmra.mrb[22].mxu0 %v4858_v23  ;;  %v48_v24 = vld [vmem:[%s5804_s1 + $0x30] sm:$0xff]  ;;  %v2971_v9 = vpack.c.bf16 %v97_v7, %v90_v5 }
  0xf3   :  { %2840 = vmatpush1.bf16.msra.mxu0 %v2839_v29  ;;  %2742 = vmatprep.subr.bf16.mxu1 %v2741_v4  ;;  %v55_v29 = vld [vmem:[%s5804_s1 + $0x68] sm:$0xff]  ;;  %v2857_v4 = vpack.c.bf16 %v390_v15, %v383_v13  ;;  %v5056_v13 = vld [vmem:[%s5805_s0 + $0x90] sm:$0xff] }
  0xf4   :  { %2842 = vmatprep.subr.bf16.mxu0 %v2841_v32  ;;  %1630 = vmatprep.mubr.f32.mxu0 %v4882_v26  ;;  %v397_v32 = vld [vmem:[%s5804_s1 + $0xb18] sm:$0xff]  ;;  %v2959_v36 = vpack.c.bf16 %v55_v29, %v48_v24  ;;  %v439_v15 = vld [vmem:[%s5804_s1 + $0xc68] sm:$0xff]  ;;  %v438_v24 = vld [vmem:[%s5804_s1 + $0xc60] sm:$0xff]  ;;  %v2973_v29 = vpack.c.bf16 %v223_v12, %v216_v11 }
  0xf5   :  { %v146_v11 = vld [vmem:[%s5804_s1 + $0x340] sm:$0xff]  ;;  %v153_v12 = vld [vmem:[%s5804_s1 + $0x378] sm:$0xff] }
  0xf6   :  { %2744 = vmatpush1.bf16.msra.mxu1 %v2743_v40  ;;  %v62_v40 = vld [vmem:[%s5804_s1 + $0xa0] sm:$0xff] }
  0xf7   :  { %2844 = vmatpush1.bf16.msra.mxu0 %v2843_v43  ;;  %2746 = vmatprep.subr.bf16.mxu1 %v2745_v44  ;;  %v69_v43 = vld [vmem:[%s5804_s1 + $0xd8] sm:$0xff]  ;;  %v2861_v44 = vpack.c.bf16 %v404_v34, %v397_v32  ;;  %v230_v32 = vld [vmem:[%s5804_s1 + $0x5e0] sm:$0xff] }
  0xf8   :  { %2846 = vmatprep.subr.bf16.mxu0 %v2845_v48  ;;  %v4984_v48 = vld [vmem:[%s5805_s0 + $0x20] sm:$0xff]  ;;  %v2963_v41 = vpack.c.bf16 %v69_v43, %v62_v40  ;;  %v237_v34 = vld [vmem:[%s5804_s1 + $0x618] sm:$0xff]  ;;  %v2875_v40 = vpack.c.bf16 %v445_v6, %v438_v24  ;;  %v452_v43 = vld [vmem:[%s5804_s1 + $0xcd0] sm:$0xff] }
  0xf9   :  { %v495_v24 = vld [vmem:[%s5804_s1 + $0xe28] sm:$0xff] }
  0xfa   :  { %2748 = vmatpush1.bf16.msra.mxu1 %v2747_v53  ;;  %v410_v53 = vld [vmem:[%s5804_s1 + $0xb80] sm:$0xff] }
  0xfb   :  { %2848 = vmatpush1.bf16.msra.mxu0 %v2847_v55  ;;  %2750 = vmatprep.subr.bf16.mxu1 %v2749_v56  ;;  %v2965_v55 = vpack.c.bf16 %v195_v47, %v188_v46  ;;  %v76_v56 = vld [vmem:[%s5804_s1 + $0x110] sm:$0xff]  ;;  %v125_v46 = vld [vmem:[%s5804_s1 + $0x298] sm:$0xff] }
  0xfc   :  { %2850 = vmatprep.subr.bf16.mxu0 %v2849_v61  ;;  %v202_v61 = vld [vmem:[%s5804_s1 + $0x500] sm:$0xff] }
  0xfd   :  { %v2969_v3 = vpack.c.bf16 %v209_v50, %v202_v61  ;;  %v473_v50 = vld [vmem:[%s5804_s1 + $0xd78] sm:$0xff] }
  0xfe   :  { %2752 = vmatpush1.bf16.msra.mxu1 %v2751_v63  ;;  %v2967_v63 = vpack.c.bf16 %v83_v57, %v76_v56  ;;  %v466_v56 = vld [vmem:[%s5804_s1 + $0xd40] sm:$0xff]  ;;  %v2981_v57 = vpack.c.bf16 %v251_v51, %v244_v35  ;;  %v293_v51 = vld [vmem:[%s5804_s1 + $0x7d8] sm:$0xff] }
  0xff   :  { %2852 = vmatpush1.bf16.msra.mxu0 %v2851_v17  ;;  %2754 = vmatprep.subr.bf16.mxu1 %v2753_v2  ;;  %v2867_v17 = vpack.c.bf16 %v417_v60, %v410_v53  ;;  %v424_v2 = vld [vmem:[%s5804_s1 + $0xbf0] sm:$0xff]  ;;  %v2979_v53 = vpack.c.bf16 %v125_v46, %v118_v45  ;;  %v139_v60 = vld [vmem:[%s5804_s1 + $0x308] sm:$0xff]  ;;  %v2883_v7 = vpack.c.bf16 %v473_v50, %v466_v56  ;;  %v286_v35 = vld [vmem:[%s5804_s1 + $0x7a0] sm:$0xff] }
 0x100   :  { %2854 = vmatprep.subr.bf16.mxu0 %v2853_v8  ;;  %v2869_v8 = vpack.c.bf16 %v432_v54, %v425_v20  ;;  %v258_v54 = vld [vmem:[%s5804_s1 + $0x6c0] sm:$0xff]  ;;  %v523_v56 = vld [vmem:[%s5804_s1 + $0xf08] sm:$0xff]  ;;  %v300_v50 = vld [vmem:[%s5804_s1 + $0x810] sm:$0xff] }
 0x102   :  { %2756 = vmatpush1.bf16.msra.mxu1 %v2755_v19  ;;  %v446_v19 = vld [vmem:[%s5804_s1 + $0xca0] sm:$0xff] }
 0x103   :  { %2856 = vmatpush1.bf16.msra.mxu0 %v2855_v21  ;;  %2958 = vmatprep.subr.bf16.mxu1 %v2957_v22  ;;  %v5068_v21 = vld [vmem:[%s5805_s0 + $0xd0] sm:$0xff]  ;;  %v2871_v22 = vpack.c.bf16 %v431_v10, %v424_v2  ;;  %v2873_v31 = vpack.c.bf16 %v446_v19, %v439_v15  ;;  %v481_v2 = vld [vmem:[%s5804_s1 + $0xdb8] sm:$0xff]  ;;  %v487_v19 = vld [vmem:[%s5804_s1 + $0xde8] sm:$0xff] }
 0x104   :  { %2858 = vmatprep.subr.bf16.mxu0 %v2857_v4  ;;  %v104_v4 = vld [vmem:[%s5804_s1 + $0x1f0] sm:$0xff] }
 0x105   :  { %1364 = vmatmul.mubr.f32.vlgmr.msra.gmra.mrb[8].mxu1 %v4984_v48 }
 0x106   :  { %2960 = vmatpush3.bf16.msra.mxu1 %v2959_v36  ;;  %1369 = vmatprep.mubr.f32.mxu1 %v4996_v52  ;;  %v5092_v36 = vld [vmem:[%s5805_s0 + $0xc8] sm:$0xff] }
 0x107   :  { %2860 = vmatpush1.bf16.msra.mxu0 %v2859_v37  ;;  %2962 = vmatprep.subr.bf16.mxu1 %v2961_v25  ;;  %v453_v37 = vld [vmem:[%s5804_s1 + $0xcd8] sm:$0xff]  ;;  %v2975_v25 = vpack.c.bf16 %v111_v30, %v104_v4  ;;  %v2987_v4 = vpack.c.bf16 %v153_v12, %v146_v11  ;;  %v5261_v11 = vld [vmem:[%s5805_s0 + $0x50] sm:$0xff] }
 0x108   :  { %2862 = vmatprep.subr.bf16.mxu0 %v2861_v44  ;;  %v2977_v44 = vpack.c.bf16 %v237_v34, %v230_v32  ;;  %v2877_v47 = vpack.c.bf16 %v460_v16, %v453_v37  ;;  %v272_v32 = vld [vmem:[%s5804_s1 + $0x730] sm:$0xff]  ;;  %v279_v34 = vld [vmem:[%s5804_s1 + $0x768] sm:$0xff]  ;;  %v501_v16 = vld [vmem:[%s5804_s1 + $0xe58] sm:$0xff] }
 0x109   :  { %1370 = vmatmul.mubr.f32.gmra.mrb[10].mxu1 %v5020_v42  ;;  %v2991_v45 = vpack.c.bf16 %v279_v34, %v272_v32  ;;  %v5298_v32 = vld [vmem:[%s5805_s0 + $0x88] sm:$0xff] }
 0x10a   :  { %2964 = vmatpush3.bf16.msra.mxu1 %v2963_v41  ;;  %1375 = vmatprep.mubr.f32.mxu1 %v5032_v62  ;;  %v467_v41 = vld [vmem:[%s5804_s1 + $0xd48] sm:$0xff] }
 0x10b   :  { %2864 = vmatpush1.bf16.msra.mxu0 %v2863_v39  ;;  %2966 = vmatprep.subr.bf16.mxu1 %v2965_v55  ;;  %v474_v39 = vld [vmem:[%s5804_s1 + $0xd80] sm:$0xff] }
 0x10c   :  { %2866 = vmatprep.subr.bf16.mxu0 %v2865_v59  ;;  %v132_v59 = vld [vmem:[%s5804_s1 + $0x2d0] sm:$0xff]  ;;  %v2881_v61 = vpack.c.bf16 %v474_v39, %v467_v41  ;;  %v515_v39 = vld [vmem:[%s5804_s1 + $0xec8] sm:$0xff] }
 0x10d   :  { %1376 = vmatmul.mubr.f32.gmra.mrb[12].mxu1 %v5056_v13  ;;  %v2983_v5 = vpack.c.bf16 %v139_v60, %v132_v59  ;;  %v2995_v59 = vpack.c.bf16 %v293_v51, %v286_v35  ;;  %v5340_v51 = vld [vmem:[%s5805_s0 + $0xc0] sm:$0xff] }
 0x10e   :  { %2968 = vmatpush3.bf16.msra.mxu1 %v2967_v63  ;;  %1381 = vmatprep.mubr.f32.mxu1 %v5068_v21  ;;  %v265_v63 = vld [vmem:[%s5804_s1 + $0x6f8] sm:$0xff] }
 0x10f   :  { %2868 = vmatpush1.bf16.msra.mxu0 %v2867_v17  ;;  %2970 = vmatprep.subr.bf16.mxu1 %v2969_v3  ;;  %v488_v3 = vld [vmem:[%s5804_s1 + $0xdf0] sm:$0xff]  ;;  %v2985_v10 = vpack.c.bf16 %v265_v63, %v258_v54  ;;  %v307_v54 = vld [vmem:[%s5804_s1 + $0x848] sm:$0xff]  ;;  %v529_v63 = vld [vmem:[%s5804_s1 + $0xf38] sm:$0xff] }
 0x110   :  { %2870 = vmatprep.subr.bf16.mxu0 %v2869_v8  ;;  %v480_v8 = vld [vmem:[%s5804_s1 + $0xdb0] sm:$0xff]  ;;  %v2885_v15 = vpack.c.bf16 %v488_v3, %v481_v2  ;;  %v426_v2 = vld [vmem:[%s5804_s1 + $0xc00] sm:$0xff]  ;;  %v433_v3 = vld [vmem:[%s5804_s1 + $0xc38] sm:$0xff] }
 0x111   :  { %1382 = vmatmul.mubr.f32.gmra.mrb[14].mxu1 %v5092_v36  ;;  %v2887_v30 = vpack.c.bf16 %v487_v19, %v480_v8  ;;  %v544_v8 = vld [vmem:[%s5804_s1 + $0xfb0] sm:$0xff]  ;;  %v314_v19 = vld [vmem:[%s5804_s1 + $0x880] sm:$0xff] }
 0x112   :  { %2972 = vmatpush3.bf16.msra.mxu1 %v2971_v9  ;;  %1897 = vmatprep.mubr.f32.mxu1 %v4432_v27  ;;  %v459_v27 = vld [vmem:[%s5804_s1 + $0xd08] sm:$0xff]  ;;  %v384_v9 = vld [vmem:[%s5804_s1 + $0xab0] sm:$0xff] }
 0x113   :  { %2872 = vmatpush1.bf16.msra.mxu0 %v2871_v22  ;;  %2974 = vmatprep.subr.bf16.mxu1 %v2973_v29  ;;  %v2879_v55 = vpack.c.bf16 %v459_v27, %v452_v43  ;;  %v391_v22 = vld [vmem:[%s5804_s1 + $0xae8] sm:$0xff]  ;;  %v502_v29 = vld [vmem:[%s5804_s1 + $0xe60] sm:$0xff]  ;;  %v509_v43 = vld [vmem:[%s5804_s1 + $0xe98] sm:$0xff] }
 0x114   :  { %2874 = vmatprep.subr.bf16.mxu0 %v2873_v31  ;;  %v494_v31 = vld [vmem:[%s5804_s1 + $0xe20] sm:$0xff]  ;;  %v2989_v6 = vpack.c.bf16 %v391_v22, %v384_v9  ;;  %v2889_v37 = vpack.c.bf16 %v502_v29, %v495_v24  ;;  %v321_v9 = vld [vmem:[%s5804_s1 + $0x8b8] sm:$0xff]  ;;  %v440_v24 = vld [vmem:[%s5804_s1 + $0xc70] sm:$0xff] }
 0x115   :  { %v2891_v46 = vpack.c.bf16 %v501_v16, %v494_v31  ;;  %v447_v29 = vld [vmem:[%s5804_s1 + $0xca8] sm:$0xff]  ;;  %v558_v31 = vld [vmem:[%s5804_s1 + $0x1020] sm:$0xff]  ;;  %v328_v16 = vld [vmem:[%s5804_s1 + $0x8f0] sm:$0xff] }
 0x116   :  { %2976 = vmatpush3.bf16.msra.mxu1 %v2975_v25  ;;  %v398_v25 = vld [vmem:[%s5804_s1 + $0xb20] sm:$0xff] }
 0x117   :  { %2876 = vmatpush1.bf16.msra.mxu0 %v2875_v40  ;;  %2978 = vmatprep.subr.bf16.mxu1 %v2977_v44  ;;  %v405_v40 = vld [vmem:[%s5804_s1 + $0xb58] sm:$0xff]  ;;  %v516_v44 = vld [vmem:[%s5804_s1 + $0xed0] sm:$0xff] }
 0x118   :  { %2878 = vmatprep.subr.bf16.mxu0 %v2877_v47  ;;  %v5138_v20 = vpop.f32.mrb[0].mxu1  ;;  %v508_v47 = vld [vmem:[%s5804_s1 + $0xe90] sm:$0xff]  ;;  %v2993_v27 = vpack.c.bf16 %v405_v40, %v398_v25  ;;  %v2893_v41 = vpack.c.bf16 %v516_v44, %v509_v43  ;;  %v335_v25 = vld [vmem:[%s5804_s1 + $0x928] sm:$0xff]  ;;  %v454_v43 = vld [vmem:[%s5804_s1 + $0xce0] sm:$0xff] }
 0x119   :  { %v5146_v17 = vpop.f32.mrb[1].mxu1  ;;  %v2895_v60 = vpack.c.bf16 %v515_v39, %v508_v47  ;;  %v461_v44 = vld [vmem:[%s5804_s1 + $0xd18] sm:$0xff] }
 0x11a   :  { %2980 = vmatpush3.bf16.msra.mxu1 %v2979_v53  ;;  %v412_v53 = vld [vmem:[%s5804_s1 + $0xb90] sm:$0xff]  ;;  %v565_v47 = vld [vmem:[%s5804_s1 + $0x1058] sm:$0xff] }
 0x11b   :  { %2880 = vmatpush1.bf16.msra.mxu0 %v2879_v55  ;;  %2982 = vmatprep.subr.bf16.mxu1 %v2981_v57  ;;  %v419_v55 = vld [vmem:[%s5804_s1 + $0xbc8] sm:$0xff]  ;;  %v530_v57 = vld [vmem:[%s5804_s1 + $0xf40] sm:$0xff] }
 0x11c   :  { %2882 = vmatprep.subr.bf16.mxu0 %v2881_v61  ;;  %v522_v61 = vld [vmem:[%s5804_s1 + $0xf00] sm:$0xff] }
 0x11d   :  { %v2899_v12 = vpack.c.bf16 %v529_v63, %v522_v61  ;;  %v5365_v61 = vld [vmem:[%s5805_s0 + $0xb8] sm:$0xff] }
 0x11e   :  { %2984 = vmatpush3.bf16.msra.mxu1 %v2983_v5 }
 0x11f   :  { %2884 = vmatpush1.bf16.msra.mxu0 %v2883_v7  ;;  %2986 = vmatprep.subr.bf16.mxu1 %v2985_v10  ;;  %v5247_v5 = vpop.f32.mrb[2].mxu1  ;;  %v537_v7 = vld [vmem:[%s5804_s1 + $0xf78] sm:$0xff] }
 0x120   :  { %2886 = vmatprep.subr.bf16.mxu0 %v2885_v15  ;;  %v5256_v10 = vpop.f32.mrb[3].mxu1  ;;  %v3001_v15 = vpack.c.bf16 %v433_v3, %v426_v2  ;;  %v2901_v22 = vpack.c.bf16 %v544_v8, %v537_v7  ;;  %v578_v2 = vld [vmem:[%s5804_s1 + $0x10c0] sm:$0xff]  ;;  %v356_v7 = vld [vmem:[%s5804_s1 + $0x9d0] sm:$0xff]  ;;  %v363_v8 = vld [vmem:[%s5804_s1 + $0xa08] sm:$0xff] }
 0x122   :  { %2988 = vmatpush3.bf16.msra.mxu1 %v2987_v4 }
 0x123   :  { %2888 = vmatpush1.bf16.msra.mxu0 %v2887_v30  ;;  %2990 = vmatprep.subr.bf16.mxu1 %v2989_v6  ;;  %v5283_v4 = vpop.f32.mrb[4].mxu1  ;;  %v551_v30 = vld [vmem:[%s5804_s1 + $0xfe8] sm:$0xff] }
 0x124   :  { %2890 = vmatprep.subr.bf16.mxu0 %v2889_v37  ;;  %v5293_v6 = vpop.f32.mrb[5].mxu1  ;;  %v3005_v37 = vpack.c.bf16 %v447_v29, %v440_v24  ;;  %v2905_v40 = vpack.c.bf16 %v558_v31, %v551_v30  ;;  %v592_v24 = vld [vmem:[%s5804_s1 + $0x1130] sm:$0xff]  ;;  %v370_v30 = vld [vmem:[%s5804_s1 + $0xa40] sm:$0xff]  ;;  %v377_v31 = vld [vmem:[%s5804_s1 + $0xa78] sm:$0xff] }
 0x125   :  { %1898 = vmatmul.mubr.f32.vlgmr.msra.gmra.mrb[16].mxu1 %v4750_v58  ;;  %v2997_v58 = vpack.c.bf16 %v419_v55, %v412_v53  ;;  %v3009_v53 = vpack.c.bf16 %v461_v44, %v454_v43  ;;  %v342_v55 = vld [vmem:[%s5804_s1 + $0x960] sm:$0xff] }
 0x126   :  { %1631 = vmatmul.mubr.f32.vlgmr.msra.gmra.mrb[16].mxu0 %v4534_v14  ;;  %2992 = vmatpush3.bf16.msra.mxu1 %v2991_v45  ;;  %v2897_v14 = vpack.c.bf16 %v530_v57, %v523_v56  ;;  %v349_v56 = vld [vmem:[%s5804_s1 + $0x998] sm:$0xff]  ;;  %v606_v43 = vld [vmem:[%s5804_s1 + $0x11a0] sm:$0xff] }
 0x127   :  { %2892 = vmatpush1.bf16.msra.mxu0 %v2891_v46  ;;  %2994 = vmatprep.subr.bf16.mxu1 %v2993_v27  ;;  %v5320_v45 = vpop.f32.mrb[6].mxu1  ;;  %v5325_v46 = vld [vmem:[%s5805_s0 + $0x80] sm:$0xff]  ;;  %v572_v27 = vld [vmem:[%s5804_s1 + $0x1090] sm:$0xff] }
 0x128   :  { %2894 = vmatprep.subr.bf16.mxu0 %v2893_v41  ;;  %1902 = vmatprep.mubr.f32.mxu1 %v4774_v0  ;;  %v2999_v0 = vpack.c.bf16 %v307_v54, %v300_v50  ;;  %v5335_v35 = vpop.f32.mrb[7].mxu1  ;;  %v3007_v41 = vpack.c.bf16 %v335_v25, %v328_v16  ;;  %v2909_v57 = vpack.c.bf16 %v572_v27, %v565_v47  ;;  %v586_v50 = vld [vmem:[%s5804_s1 + $0x1100] sm:$0xff]  ;;  %v5377_v54 = vld [vmem:[%s5805_s0 + $0x28] sm:$0xff]  ;;  %v496_v47 = vld [vmem:[%s5804_s1 + $0xe30] sm:$0xff] }
 0x129   :  { %1903 = vmatmul.mubr.f32.gmra.mrb[18].mxu1 %v4786_v1  ;;  %1636 = vmatprep.mubr.f32.mxu0 %v5261_v11  ;;  %v536_v1 = vld [vmem:[%s5804_s1 + $0xf70] sm:$0xff]  ;;  %v607_v16 = vld [vmem:[%s5804_s1 + $0x11a8] sm:$0xff]  ;;  %v614_v25 = vld [vmem:[%s5804_s1 + $0x11e0] sm:$0xff] }
 0x12a   :  { %2996 = vmatpush3.bf16.msra.mxu1 %v2995_v59  ;;  %1907 = vmatprep.mubr.f32.mxu1 %v4810_v18  ;;  %v543_v18 = vld [vmem:[%s5804_s1 + $0xfa8] sm:$0xff]  ;;  %v468_v59 = vld [vmem:[%s5804_s1 + $0xd50] sm:$0xff] }
 0x12b   :  { %2896 = vmatpush1.bf16.msra.mxu0 %v2895_v60  ;;  %2998 = vmatprep.subr.bf16.mxu1 %v2997_v58  ;;  %v2903_v34 = vpack.c.bf16 %v543_v18, %v536_v1  ;;  %v475_v60 = vld [vmem:[%s5804_s1 + $0xd88] sm:$0xff]  ;;  %v482_v1 = vld [vmem:[%s5804_s1 + $0xdc0] sm:$0xff] }
 0x12c   :  { %2898 = vmatprep.subr.bf16.mxu0 %v2897_v14  ;;  %1637 = vmatmul.mubr.f32.gmra.mrb[18].mxu0 %v4571_v33  ;;  %v3003_v33 = vpack.c.bf16 %v321_v9, %v314_v19  ;;  %v579_v58 = vld [vmem:[%s5804_s1 + $0x10c8] sm:$0xff]  ;;  %v3011_v14 = vpack.c.bf16 %v349_v56, %v342_v55  ;;  %v3013_v3 = vpack.c.bf16 %v475_v60, %v468_v59  ;;  %v593_v19 = vld [vmem:[%s5804_s1 + $0x1138] sm:$0xff]  ;;  %v600_v9 = vld [vmem:[%s5804_s1 + $0x1170] sm:$0xff] }
 0x12d   :  { %1908 = vmatmul.mubr.f32.gmra.mrb[20].mxu1 %v4822_v28  ;;  %1642 = vmatprep.mubr.f32.mxu0 %v5298_v32  ;;  %v550_v28 = vld [vmem:[%s5804_s1 + $0xfe0] sm:$0xff]  ;;  %v503_v27 = vld [vmem:[%s5804_s1 + $0xe68] sm:$0xff]  ;;  %v621_v55 = vld [vmem:[%s5804_s1 + $0x1218] sm:$0xff] }
 0x12e   :  { %3000 = vmatpush3.bf16.msra.mxu1 %v2999_v0  ;;  %1912 = vmatprep.mubr.f32.mxu1 %v4846_v38  ;;  %v557_v38 = vld [vmem:[%s5804_s1 + $0x1018] sm:$0xff]  ;;  %v2913_v0 = vpack.c.bf16 %v586_v50, %v579_v58  ;;  %v628_v56 = vld [vmem:[%s5804_s1 + $0x1250] sm:$0xff]  ;;  %v510_v58 = vld [vmem:[%s5804_s1 + $0xea0] sm:$0xff] }
 0x12f   :  { %2900 = vmatpush1.bf16.msra.mxu0 %v2899_v12  ;;  %3002 = vmatprep.subr.bf16.mxu1 %v3001_v15  ;;  %v2907_v39 = vpack.c.bf16 %v557_v38, %v550_v28  ;;  %v585_v12 = vld [vmem:[%s5804_s1 + $0x10f8] sm:$0xff]  ;;  %v608_v28 = vld [vmem:[%s5804_s1 + $0x11b0] sm:$0xff] }
 0x130   :  { %2902 = vmatprep.subr.bf16.mxu0 %v2901_v22  ;;  %1643 = vmatmul.mubr.f32.gmra.mrb[20].mxu0 %v5325_v46  ;;  %v489_v15 = vld [vmem:[%s5804_s1 + $0xdf8] sm:$0xff]  ;;  %v3015_v22 = vpack.c.bf16 %v363_v8, %v356_v7  ;;  %v2915_v18 = vpack.c.bf16 %v585_v12, %v578_v2  ;;  %v620_v59 = vld [vmem:[%s5804_s1 + $0x1210] sm:$0xff]  ;;  %v635_v8 = vld [vmem:[%s5804_s1 + $0x1288] sm:$0xff] }
 0x131   :  { %1913 = vmatmul.mubr.f32.gmra.mrb[22].mxu1 %v4858_v23  ;;  %1648 = vmatprep.mubr.f32.mxu0 %v5340_v51  ;;  %v564_v23 = vld [vmem:[%s5804_s1 + $0x1050] sm:$0xff]  ;;  %v3017_v29 = vpack.c.bf16 %v489_v15, %v482_v1  ;;  %v517_v50 = vld [vmem:[%s5804_s1 + $0xed8] sm:$0xff]  ;;  %v634_v15 = vld [vmem:[%s5804_s1 + $0x1280] sm:$0xff] }
 0x132   :  { %3004 = vmatpush3.bf16.msra.mxu1 %v3003_v33  ;;  %1982 = vmatprep.mubr.f32.mxu1 %v4882_v26  ;;  %v571_v26 = vld [vmem:[%s5804_s1 + $0x1088] sm:$0xff]  ;;  %v2917_v33 = vpack.c.bf16 %v600_v9, %v593_v19  ;;  %v636_v2 = vld [vmem:[%s5804_s1 + $0x1290] sm:$0xff]  ;;  %v3027_v12 = vpack.c.bf16 %v517_v50, %v510_v58 }
 0x133   :  { %2904 = vmatpush1.bf16.msra.mxu0 %v2903_v34  ;;  %3006 = vmatprep.subr.bf16.mxu1 %v3005_v37  ;;  %v2911_v63 = vpack.c.bf16 %v571_v26, %v564_v23  ;;  %v599_v34 = vld [vmem:[%s5804_s1 + $0x1168] sm:$0xff]  ;;  %v622_v23 = vld [vmem:[%s5804_s1 + $0x1220] sm:$0xff]  ;;  %v3181_v7 = vld [vmem:[%s5805_s0 + $0x10] sm:$0xff] }
 0x134   :  { %2906 = vmatprep.subr.bf16.mxu0 %v2905_v40  ;;  %1649 = vmatmul.mubr.f32.gmra.mrb[22].mxu0 %v5365_v61  ;;  %v615_v37 = vld [vmem:[%s5804_s1 + $0x11e8] sm:$0xff]  ;;  %v3019_v40 = vpack.c.bf16 %v377_v31, %v370_v30  ;;  %v2919_v38 = vpack.c.bf16 %v599_v34, %v592_v24  ;;  %v524_v9 = vld [vmem:[%s5804_s1 + $0xf10] sm:$0xff]  ;;  %v650_v24 = vld [vmem:[%s5804_s1 + $0x1300] sm:$0xff] }
 0x135   :  { %1719 = vmatprep.mubr.f32.mxu0 %v5377_v54  ;;  %v3021_v44 = vpack.c.bf16 %v615_v37, %v608_v28  ;;  %v3182_v30 = vld [vmem:[%s5805_s0 + $0x48] sm:$0xff]  ;;  %v649_v31 = vld [vmem:[%s5804_s1 + $0x12f8] sm:$0xff]  ;;  %v648_v37 = vld [vmem:[%s5804_s1 + $0x12f0] sm:$0xff] }
 0x136   :  { %3008 = vmatpush3.bf16.msra.mxu1 %v3007_v41  ;;  %v2921_v41 = vpack.c.bf16 %v614_v25, %v607_v16  ;;  %v538_v25 = vld [vmem:[%s5804_s1 + $0xf80] sm:$0xff] }
 0x137   :  { %2908 = vmatpush1.bf16.msra.mxu0 %v2907_v39  ;;  %3010 = vmatprep.subr.bf16.mxu1 %v3009_v53  ;;  %v613_v39 = vld [vmem:[%s5804_s1 + $0x11d8] sm:$0xff] }
 0x138   :  { %2910 = vmatprep.subr.bf16.mxu0 %v2909_v57  ;;  %v629_v53 = vld [vmem:[%s5804_s1 + $0x1258] sm:$0xff]  ;;  %v3023_v57 = vpack.c.bf16 %v503_v27, %v496_v47  ;;  %v2923_v26 = vpack.c.bf16 %v613_v39, %v606_v43  ;;  %v664_v43 = vld [vmem:[%s5804_s1 + $0x1370] sm:$0xff]  ;;  %v663_v47 = vld [vmem:[%s5804_s1 + $0x1368] sm:$0xff] }
 0x139   :  { %v3025_v60 = vpack.c.bf16 %v629_v53, %v622_v23  ;;  %v670_v27 = vld [vmem:[%s5804_s1 + $0x13a0] sm:$0xff]  ;;  %v552_v53 = vld [vmem:[%s5804_s1 + $0xff0] sm:$0xff] }
 0x13a   :  { %3012 = vmatpush3.bf16.msra.mxu1 %v3011_v14  ;;  %v2925_v14 = vpack.c.bf16 %v628_v56, %v621_v55  ;;  %v662_v23 = vld [vmem:[%s5804_s1 + $0x1360] sm:$0xff]  ;;  %v559_v55 = vld [vmem:[%s5804_s1 + $0x1028] sm:$0xff]  ;;  %v2937_v56 = vpack.c.bf16 %v670_v27, %v663_v47 }
 0x13b   :  { %2912 = vmatpush1.bf16.msra.mxu0 %v2911_v63  ;;  %3014 = vmatprep.subr.bf16.mxu1 %v3013_v3  ;;  %v627_v63 = vld [vmem:[%s5804_s1 + $0x1248] sm:$0xff]  ;;  %v3039_v58 = vpack.c.bf16 %v559_v55, %v552_v53  ;;  %v726_v27 = vld [vmem:[%s5804_s1 + $0x1560] sm:$0xff]  ;;  %v725_v55 = vld [vmem:[%s5804_s1 + $0x1558] sm:$0xff] }
 0x13c   :  { %2914 = vmatprep.subr.bf16.mxu0 %v2913_v0  ;;  %v643_v3 = vld [vmem:[%s5804_s1 + $0x12c8] sm:$0xff]  ;;  %v642_v0 = vld [vmem:[%s5804_s1 + $0x12c0] sm:$0xff]  ;;  %v2927_v1 = vpack.c.bf16 %v627_v63, %v620_v59  ;;  %v677_v59 = vld [vmem:[%s5804_s1 + $0x13d8] sm:$0xff] }
 0x13d   :  { %v3029_v19 = vpack.c.bf16 %v643_v3, %v636_v2  ;;  %v566_v63 = vld [vmem:[%s5804_s1 + $0x1060] sm:$0xff]  ;;  %v573_v2 = vld [vmem:[%s5804_s1 + $0x1098] sm:$0xff]  ;;  %v719_v47 = vld [vmem:[%s5804_s1 + $0x1528] sm:$0xff] }
 0x13e   :  { %3016 = vmatpush3.bf16.msra.mxu1 %v3015_v22  ;;  %v531_v22 = vld [vmem:[%s5804_s1 + $0xf48] sm:$0xff]  ;;  %v718_v53 = vld [vmem:[%s5804_s1 + $0x1520] sm:$0xff] }
 0x13f   :  { %2916 = vmatpush1.bf16.msra.mxu0 %v2915_v18  ;;  %3018 = vmatprep.subr.bf16.mxu1 %v3017_v29  ;;  %v2929_v18 = vpack.c.bf16 %v642_v0, %v635_v8  ;;  %v657_v29 = vld [vmem:[%s5804_s1 + $0x1338] sm:$0xff]  ;;  %v3031_v34 = vpack.c.bf16 %v531_v22, %v524_v9  ;;  %v699_v8 = vld [vmem:[%s5804_s1 + $0x1488] sm:$0xff]  ;;  %v580_v22 = vld [vmem:[%s5804_s1 + $0x10d0] sm:$0xff] }
 0x140   :  { %2918 = vmatprep.subr.bf16.mxu0 %v2917_v33  ;;  %v656_v33 = vld [vmem:[%s5804_s1 + $0x1330] sm:$0xff]  ;;  %v3033_v16 = vpack.c.bf16 %v657_v29, %v650_v24  ;;  %v691_v0 = vld [vmem:[%s5804_s1 + $0x1448] sm:$0xff]  ;;  %v697_v24 = vld [vmem:[%s5804_s1 + $0x1478] sm:$0xff] }
 0x141   :  { %v706_v29 = vld [vmem:[%s5804_s1 + $0x14c0] sm:$0xff] }
 0x142   :  { %3020 = vmatpush3.bf16.msra.mxu1 %v3019_v40  ;;  %v545_v40 = vld [vmem:[%s5804_s1 + $0xfb8] sm:$0xff] }
 0x143   :  { %2920 = vmatpush1.bf16.msra.mxu0 %v2919_v38  ;;  %3022 = vmatprep.subr.bf16.mxu1 %v3021_v44  ;;  %v2933_v38 = vpack.c.bf16 %v656_v33, %v649_v31  ;;  %v671_v44 = vld [vmem:[%s5804_s1 + $0x13a8] sm:$0xff]  ;;  %v705_v31 = vld [vmem:[%s5804_s1 + $0x14b8] sm:$0xff]  ;;  %v712_v33 = vld [vmem:[%s5804_s1 + $0x14f0] sm:$0xff] }
 0x144   :  { %2922 = vmatprep.subr.bf16.mxu0 %v2921_v41  ;;  %v3035_v41 = vpack.c.bf16 %v545_v40, %v538_v25  ;;  %v594_v25 = vld [vmem:[%s5804_s1 + $0x1140] sm:$0xff]  ;;  %v601_v40 = vld [vmem:[%s5804_s1 + $0x1178] sm:$0xff] }
 0x145   :  { %1983 = vmatmul.mubr.f32.vlgmr.msra.gmra.mrb[24].mxu1 %v3181_v7  ;;  %v692_v7 = vld [vmem:[%s5804_s1 + $0x1450] sm:$0xff] }
 0x146   :  { %3024 = vmatpush3.bf16.msra.mxu1 %v3023_v57  ;;  %1987 = vmatprep.mubr.f32.mxu1 %v5261_v11  ;;  %v641_v11 = vld [vmem:[%s5804_s1 + $0x12b8] sm:$0xff]  ;;  %v678_v57 = vld [vmem:[%s5804_s1 + $0x13e0] sm:$0xff]  ;;  %v3045_v9 = vpack.c.bf16 %v699_v8, %v692_v7  ;;  %v3184_v7 = vld [vmem:[%s5805_s0 + $0x68] sm:$0xff] }
 0x147   :  { %2924 = vmatpush1.bf16.msra.mxu0 %v2923_v26  ;;  %3026 = vmatprep.subr.bf16.mxu1 %v3025_v60  ;;  %v2931_v28 = vpack.c.bf16 %v641_v11, %v634_v15  ;;  %v685_v26 = vld [vmem:[%s5804_s1 + $0x1418] sm:$0xff]  ;;  %v684_v60 = vld [vmem:[%s5804_s1 + $0x1410] sm:$0xff] }
 0x148   :  { %2926 = vmatprep.subr.bf16.mxu0 %v2925_v14  ;;  %v676_v14 = vld [vmem:[%s5804_s1 + $0x13d0] sm:$0xff]  ;;  %v2941_v3 = vpack.c.bf16 %v684_v60, %v677_v59 }
 0x149   :  { %1988 = vmatmul.mubr.f32.gmra.mrb[26].mxu1 %v3182_v30  ;;  %v713_v30 = vld [vmem:[%s5804_s1 + $0x14f8] sm:$0xff] }
 0x14a   :  { %3028 = vmatpush3.bf16.msra.mxu1 %v3027_v12  ;;  %1992 = vmatprep.mubr.f32.mxu1 %v5298_v32  ;;  %v655_v32 = vld [vmem:[%s5804_s1 + $0x1328] sm:$0xff]  ;;  %v698_v12 = vld [vmem:[%s5804_s1 + $0x1480] sm:$0xff] }
 0x14b   :  { %2928 = vmatpush1.bf16.msra.mxu0 %v2927_v1  ;;  %3030 = vmatprep.subr.bf16.mxu1 %v3029_v19  ;;  %v2935_v39 = vpack.c.bf16 %v655_v32, %v648_v37  ;;  %v3043_v1 = vpack.c.bf16 %v573_v2, %v566_v63  ;;  %v690_v19 = vld [vmem:[%s5804_s1 + $0x1440] sm:$0xff]  ;;  %v2945_v11 = vpack.c.bf16 %v698_v12, %v691_v0  ;;  %v704_v37 = vld [vmem:[%s5804_s1 + $0x14b0] sm:$0xff]  ;;  %v711_v32 = vld [vmem:[%s5804_s1 + $0x14e8] sm:$0xff] }
 0x14c   :  { %2930 = vmatprep.subr.bf16.mxu0 %v2929_v18  ;;  %v587_v18 = vld [vmem:[%s5804_s1 + $0x1108] sm:$0xff] }
 0x14d   :  { %1993 = vmatmul.mubr.f32.gmra.mrb[28].mxu1 %v5325_v46  ;;  %v3037_v46 = vpack.c.bf16 %v671_v44, %v664_v43  ;;  %v720_v43 = vld [vmem:[%s5804_s1 + $0x1530] sm:$0xff]  ;;  %v727_v44 = vld [vmem:[%s5804_s1 + $0x1568] sm:$0xff] }
 0x14e   :  { %3032 = vmatpush3.bf16.msra.mxu1 %v3031_v34  ;;  %1997 = vmatprep.mubr.f32.mxu1 %v5340_v51  ;;  %v669_v51 = vld [vmem:[%s5804_s1 + $0x1398] sm:$0xff]  ;;  %v3047_v34 = vpack.c.bf16 %v587_v18, %v580_v22 }
 0x14f   :  { %2932 = vmatpush1.bf16.msra.mxu0 %v2931_v28  ;;  %3034 = vmatprep.subr.bf16.mxu1 %v3033_v16  ;;  %v2939_v50 = vpack.c.bf16 %v669_v51, %v662_v23  ;;  %v2947_v28 = vpack.c.bf16 %v697_v24, %v690_v19  ;;  %v3049_v16 = vpack.c.bf16 %v713_v30, %v706_v29  ;;  %v5638_v51 = vpop.permute.xlu0 %734 }
 0x150   :  { %2934 = vmatprep.subr.bf16.mxu0 %v2933_v38  ;;  %v2949_v38 = vpack.c.bf16 %v712_v33, %v705_v31  ;;  %v3053_v23 = vpack.c.bf16 %v727_v44, %v720_v43 }
 0x151   :  { %1998 = vmatmul.mubr.f32.gmra.mrb[30].mxu1 %v5365_v61  ;;  %v3041_v61 = vpack.c.bf16 %v685_v26, %v678_v57  ;;  %v832_v57 = vadd.f32 %v5138_v20, %v5638_v51  ;;  %v834_v26 = vadd.f32 %v5146_v17, %v5638_v51 }
 0x152   :  { %3036 = vmatpush3.bf16.msra.mxu1 %v3035_v41  ;;  %2067 = vmatprep.mubr.f32.mxu1 %v5377_v54  ;;  %v683_v54 = vld [vmem:[%s5804_s1 + $0x1408] sm:$0xff]  ;;  %v3051_v41 = vpack.c.bf16 %v601_v40, %v594_v25 }
 0x153   :  { %2936 = vmatpush1.bf16.msra.mxu0 %v2935_v39  ;;  %3038 = vmatprep.subr.bf16.mxu1 %v3037_v46  ;;  %v2943_v15 = vpack.c.bf16 %v683_v54, %v676_v14  ;;  %v2951_v39 = vpack.c.bf16 %v711_v32, %v704_v37  ;;  %v2953_v46 = vpack.c.bf16 %v726_v27, %v719_v47  ;;  %v5648_v59 = vpop.permute.xlu0 %739 }
 0x154   :  { %2938 = vmatprep.subr.bf16.mxu0 %v2937_v56  ;;  %v2955_v56 = vpack.c.bf16 %v725_v55, %v718_v53  ;;  %v838_v20 = vadd.f32 %v5247_v5, %v5648_v59  ;;  %v840_v17 = vadd.f32 %v5256_v10, %v5648_v59 }
 0x156   :  { %3040 = vmatpush3.bf16.msra.mxu1 %v3039_v58 }
 0x157   :  { %2940 = vmatpush1.bf16.msra.mxu0 %v2939_v50  ;;  %3042 = vmatprep.subr.bf16.mxu1 %v3041_v61  ;;  %v5653_v50 = vpop.permute.xlu1 %744 }
 0x158   :  { %2942 = vmatprep.subr.bf16.mxu0 %v2941_v3  ;;  %v844_v5 = vadd.f32 %v5283_v4, %v5653_v50  ;;  %v846_v10 = vadd.f32 %v5293_v6, %v5653_v50  ;;  %v3183_v4 = vld [vmem:[%s5805_s0 + $0x30] sm:$0xff] }
 0x15a   :  { %3044 = vmatpush3.bf16.msra.mxu1 %v3043_v1  ;;  %v3186_v1 = vld [vmem:[%s5805_s0 + $0xd8] sm:$0xff] }
 0x15b   :  { %2944 = vmatpush1.bf16.msra.mxu0 %v2943_v15  ;;  %3046 = vmatprep.subr.bf16.mxu1 %v3045_v9  ;;  %v5677_v63 = vpop.permute.xlu1 %749 }
 0x15c   :  { %2946 = vmatprep.subr.bf16.mxu0 %v2945_v11  ;;  %v850_v3 = vadd.f32 %v5320_v45, %v5677_v63  ;;  %v3185_v45 = vld [vmem:[%s5805_s0 + $0xa0] sm:$0xff] }
 0x15e   :  { %3048 = vmatpush3.bf16.msra.mxu1 %v3047_v34 }
 0x15f   :  { %2948 = vmatpush1.bf16.msra.mxu0 %v2947_v28  ;;  %3050 = vmatprep.subr.bf16.mxu1 %v3049_v16 }
 0x160   :  { %2950 = vmatprep.subr.bf16.mxu0 %v2949_v38 }
 0x162   :  { %3052 = vmatpush3.bf16.msra.mxu1 %v3051_v41 }
 0x163   :  { %2952 = vmatpush1.bf16.msra.mxu0 %v2951_v39  ;;  %3054 = vmatprep.subr.bf16.mxu1 %v3053_v23 }
 0x164   :  { %2954 = vmatprep.subr.bf16.mxu0 %v2953_v46 }
 0x165   :  { %2068 = vmatmul.mubr.f32.vlgmr.msra.gmra.mrb[32].mxu1 %v4984_v48 }
 0x166   :  { %1720 = vmatmul.mubr.f32.vlgmr.msra.gmra.mrb[16].mxu0 %v4984_v48  ;;  %2072 = vmatprep.mubr.f32.mxu1 %v4996_v52 }
 0x167   :  { %2956 = vmatpush1.bf16.msra.mxu0 %v2955_v56  ;;  %1725 = vmatprep.mubr.f32.mxu0 %v4996_v52 }
 0x168   :  { %3056 = vmatpush3.bf16.msra.mxu1 %v3053_v23 }
 0x169   :  { %v1098_v60 = vpop.f32.mrb[0].mxu0  ;;  %2073 = vmatmul.mubr.f32.gmra.mrb[34].mxu1 %v5020_v42 }
 0x16a   :  { %v3058_v58 = vadd.f32 %v1098_v60, %v832_v57  ;;  %1726 = vmatmul.mubr.f32.gmra.mrb[18].mxu0 %v5020_v42  ;;  %v1100_v48 = vpop.f32.mrb[1].mxu0  ;;  %2077 = vmatprep.mubr.f32.mxu1 %v5032_v62 }
 0x16b   :  { %v3060_v52 = vadd.f32 %v1100_v48, %v834_v26  ;;  %1731 = vmatprep.mubr.f32.mxu0 %v5032_v62 }
 0x16c   :  { %2173 = vst [vmem:[%s5807_s3] sm:$0xff] %v3058_v58 }
 0x16d   :  { %2174 = vst [vmem:[%s5807_s3 + $0x8] sm:$0xff] %v3060_v52  ;;  %v1104_v42 = vpop.f32.mrb[2].mxu0  ;;  %2078 = vmatmul.mubr.f32.gmra.mrb[36].mxu1 %v5056_v13 }
 0x16e   :  { %v3062_v14 = vadd.f32 %v1104_v42, %v838_v20  ;;  %1732 = vmatmul.mubr.f32.gmra.mrb[20].mxu0 %v5056_v13  ;;  %v1106_v62 = vpop.f32.mrb[3].mxu0  ;;  %2082 = vmatprep.mubr.f32.mxu1 %v5068_v21 }
 0x16f   :  { %v3064_v61 = vadd.f32 %v1106_v62, %v840_v17  ;;  %1737 = vmatprep.mubr.f32.mxu0 %v5068_v21 }
 0x170   :  { %2180 = vst [vmem:[%s5807_s3 + $0x38] sm:$0xff] %v3062_v14 }
 0x171   :  { %2181 = vst [vmem:[%s5807_s3 + $0x40] sm:$0xff] %v3064_v61  ;;  %v1110_v13 = vpop.f32.mrb[4].mxu0  ;;  %2083 = vmatmul.mubr.f32.gmra.mrb[38].mxu1 %v5092_v36 }
 0x172   :  { %v3066_v21 = vadd.f32 %v1110_v13, %v844_v5  ;;  %1738 = vmatmul.mubr.f32.gmra.mrb[22].mxu0 %v5092_v36  ;;  %v1112_v2 = vpop.f32.mrb[5].mxu0  ;;  %2363 = vmatprep.mubr.msk.f32.mxu1 %vm752_vm0, %v3183_v4  ;;  %v852_v36 = vadd.f32 %v5335_v35, %v5677_v63 }
 0x173   :  { %v3068_v6 = vadd.f32 %v1112_v2, %v846_v10  ;;  %1808 = vmatprep.mubr.f32.mxu0 %v3188_v49 }
 0x174   :  { %2187 = vst [vmem:[%s5807_s3 + $0x70] sm:$0xff] %v3066_v21 }
 0x175   :  { %2188 = vst [vmem:[%s5807_s3 + $0x78] sm:$0xff] %v3068_v6  ;;  %v1116_v54 = vpop.f32.mrb[6].mxu0  ;;  %2364 = vmatmul.mubr.msk.f32.vlgmr.msra.gmra.mrb[40].mxu1 %vm752_vm0, %v3184_v7 }
 0x176   :  { %v3070_v8 = vadd.f32 %v1116_v54, %v850_v3  ;;  %2213 = vmatmul.mubr.msk.f32.vlgmr.msra.gmra.mrb[16].mxu0 %vm752_vm0, %v3183_v4  ;;  %v1118_v0 = vpop.f32.mrb[7].mxu0  ;;  %2366 = vmatprep.mubr.msk.f32.mxu1 %vm752_vm0, %v3185_v45 }
 0x177   :  { %v3072_v35 = vadd.f32 %v1118_v0, %v852_v36  ;;  %1814 = vmatprep.mubr.f32.mxu0 %v3188_v49 }
 0x178   :  { %2194 = vst [vmem:[%s5807_s3 + $0xa8] sm:$0xff] %v3070_v8 }
 0x179   :  { %2195 = vst [vmem:[%s5807_s3 + $0xb0] sm:$0xff] %v3072_v35  ;;  %v1454_v12 = vpop.f32.mrb[8].mxu0  ;;  %2367 = vmatmul.mubr.msk.f32.gmra.mrb[42].mxu1 %vm752_vm0, %v3186_v1 }
 0x17a   :  { %2214 = vmatmul.mubr.msk.f32.gmra.mrb[18].mxu0 %vm752_vm0, %v3184_v7  ;;  %v1456_v15 = vpop.f32.mrb[9].mxu0 }
 0x17b   :  { %1820 = vmatprep.mubr.f32.mxu0 %v3188_v49 }
 0x17d   :  { %v1460_v19 = vpop.f32.mrb[10].mxu0 }
 0x17e   :  { %2215 = vmatmul.mubr.msk.f32.gmra.mrb[20].mxu0 %vm752_vm0, %v3185_v45  ;;  %v1462_v9 = vpop.f32.mrb[11].mxu0 }
 0x17f   :  { %1826 = vmatprep.mubr.f32.mxu0 %v3188_v49 }
 0x181   :  { %v1466_v22 = vpop.f32.mrb[12].mxu0 }
 0x182   :  { %2216 = vmatmul.mubr.msk.f32.gmra.mrb[22].mxu0 %vm752_vm0, %v3186_v1  ;;  %v1468_v18 = vpop.f32.mrb[13].mxu0 }
 0x185   :  { %v1472_v11 = vpop.f32.mrb[14].mxu0 }
 0x186   :  { %v1474_v24 = vpop.f32.mrb[15].mxu0 }
 0x1d8   :  { %v1365_v29 = vpop.f32.mrb[8].mxu1 }
 0x1d9   :  { %v3073_v30 = vadd.f32 %v1365_v29, %v5638_v51  ;;  %v1367_v31 = vpop.f32.mrb[9].mxu1 }
 0x1da   :  { %v3075_v33 = vadd.f32 %v1367_v31, %v5638_v51 }
 0x1db   :  { %v3074_v34 = vadd.f32 %v3073_v30, %v1454_v12 }
 0x1dc   :  { %v3076_v28 = vadd.f32 %v3075_v33, %v1456_v15  ;;  %v1371_v37 = vpop.f32.mrb[10].mxu1 }
 0x1dd   :  { %2175 = vst [vmem:[%s5807_s3 + $0x10] sm:$0xff] %v3074_v34  ;;  %v3077_v49 = vadd.f32 %v1371_v37, %v5648_v59  ;;  %v1373_v16 = vpop.f32.mrb[11].mxu1 }
 0x1de   :  { %2176 = vst [vmem:[%s5807_s3 + $0x18] sm:$0xff] %v3076_v28  ;;  %v3079_v25 = vadd.f32 %v1373_v16, %v5648_v59 }
 0x1df   :  { %v3078_v40 = vadd.f32 %v3077_v49, %v1460_v19 }
 0x1e0   :  { %v3080_v38 = vadd.f32 %v3079_v25, %v1462_v9  ;;  %v1377_v32 = vpop.f32.mrb[12].mxu1 }
 0x1e1   :  { %2182 = vst [vmem:[%s5807_s3 + $0x48] sm:$0xff] %v3078_v40  ;;  %v3081_v43 = vadd.f32 %v1377_v32, %v5653_v50  ;;  %v1379_v44 = vpop.f32.mrb[13].mxu1 }
 0x1e2   :  { %2183 = vst [vmem:[%s5807_s3 + $0x50] sm:$0xff] %v3080_v38  ;;  %v3083_v47 = vadd.f32 %v1379_v44, %v5653_v50 }
 0x1e3   :  { %v3082_v27 = vadd.f32 %v3081_v43, %v1466_v22 }
 0x1e4   :  { %v3084_v41 = vadd.f32 %v3083_v47, %v1468_v18  ;;  %v1383_v39 = vpop.f32.mrb[14].mxu1 }
 0x1e5   :  { %2189 = vst [vmem:[%s5807_s3 + $0x80] sm:$0xff] %v3082_v27  ;;  %v3085_v23 = vadd.f32 %v1383_v39, %v5677_v63  ;;  %v1385_v46 = vpop.f32.mrb[15].mxu1 }
 0x1e6   :  { %2190 = vst [vmem:[%s5807_s3 + $0x88] sm:$0xff] %v3084_v41  ;;  %v3087_v53 = vadd.f32 %v1385_v46, %v5677_v63 }
 0x1e7   :  { %v3086_v55 = vadd.f32 %v3085_v23, %v1472_v11 }
 0x1e8   :  { %v3088_v56 = vadd.f32 %v3087_v53, %v1474_v24 }
 0x1e9   :  { %2196 = vst [vmem:[%s5807_s3 + $0xb8] sm:$0xff] %v3086_v55 }
 0x1ea   :  { %2197 = vst [vmem:[%s5807_s3 + $0xc0] sm:$0xff] %v3088_v56 }
 0x1f8   :  { %v2253_v57 = vpop.f32.mrb[16].mxu1 }
 0x1f9   :  { %v2254_v26 = vpop.f32.mrb[17].mxu1 }
 0x1fa   :  { %v2255_v60 = vadd.f32 %v2254_v26, %v2253_v57 }
 0x1fc   :  { %v2256_v58 = vpop.f32.mrb[18].mxu1  ;;  %v1900_v13 = vadd.f32 %v2255_v60, %v5638_v51 }
 0x1fd   :  { %v2257_v48 = vpop.f32.mrb[19].mxu1 }
 0x1fe   :  { %v2258_v52 = vadd.f32 %v2257_v48, %v2256_v58 }
 0x200   :  { %v2259_v20 = vpop.f32.mrb[20].mxu1  ;;  %v1905_v3 = vadd.f32 %v2258_v52, %v5648_v59 }
 0x201   :  { %v2260_v17 = vpop.f32.mrb[21].mxu1 }
 0x202   :  { %v2261_v42 = vadd.f32 %v2260_v17, %v2259_v20 }
 0x204   :  { %v2262_v14 = vpop.f32.mrb[22].mxu1  ;;  %v1910_v0 = vadd.f32 %v2261_v42, %v5653_v50 }
 0x205   :  { %v2263_v62 = vpop.f32.mrb[23].mxu1 }
 0x206   :  { %v2264_v61 = vadd.f32 %v2263_v62, %v2262_v14 }
 0x208   :  { %v1915_v15 = vadd.f32 %v2264_v61, %v5677_v63 }
 0x218   :  { %v2297_v5 = vpop.f32.mrb[24].mxu1 }
 0x219   :  { %v2298_v10 = vpop.f32.mrb[25].mxu1 }
 0x21a   :  { %v2299_v21 = vadd.f32 %v2298_v10, %v2297_v5 }
 0x21c   :  { %v1985_v2 = vadd.f32 %v2299_v21, %v1900_v13  ;;  %v2300_v4 = vpop.f32.mrb[26].mxu1 }
 0x21d   :  { %v2301_v6 = vpop.f32.mrb[27].mxu1 }
 0x21e   :  { %v2302_v36 = vadd.f32 %v2301_v6, %v2300_v4 }
 0x220   :  { %v1990_v54 = vadd.f32 %v2302_v36, %v1905_v3  ;;  %v2303_v7 = vpop.f32.mrb[28].mxu1 }
 0x221   :  { %v2304_v8 = vpop.f32.mrb[29].mxu1 }
 0x222   :  { %v2305_v45 = vadd.f32 %v2304_v8, %v2303_v7 }
 0x224   :  { %v1995_v35 = vadd.f32 %v2305_v45, %v1910_v0  ;;  %v2306_v12 = vpop.f32.mrb[30].mxu1 }
 0x225   :  { %v2307_v1 = vpop.f32.mrb[31].mxu1 }
 0x226   :  { %v2308_v19 = vadd.f32 %v2307_v1, %v2306_v12 }
 0x228   :  { %v2000_v9 = vadd.f32 %v2308_v19, %v1915_v15 }
 0x238   :  { %v2341_v22 = vpop.f32.mrb[32].mxu1 }
 0x239   :  { %v2342_v18 = vpop.f32.mrb[33].mxu1 }
 0x23a   :  { %v2343_v11 = vadd.f32 %v2342_v18, %v2341_v22 }
 0x23c   :  { %v2344_v24 = vpop.f32.mrb[34].mxu1  ;;  %v2070_v29 = vadd.f32 %v2343_v11, %v1985_v2 }
 0x23d   :  { %v2345_v30 = vpop.f32.mrb[35].mxu1 }
 0x23e   :  { %v2346_v31 = vadd.f32 %v2345_v30, %v2344_v24 }
 0x240   :  { %v2347_v33 = vpop.f32.mrb[36].mxu1  ;;  %v2075_v34 = vadd.f32 %v2346_v31, %v1990_v54 }
 0x241   :  { %v2348_v28 = vpop.f32.mrb[37].mxu1 }
 0x242   :  { %v2349_v37 = vadd.f32 %v2348_v28, %v2347_v33 }
 0x244   :  { %v2350_v49 = vpop.f32.mrb[38].mxu1  ;;  %v2080_v16 = vadd.f32 %v2349_v37, %v1995_v35 }
 0x245   :  { %v2351_v25 = vpop.f32.mrb[39].mxu1 }
 0x246   :  { %v2352_v40 = vadd.f32 %v2351_v25, %v2350_v49 }
 0x248   :  { %v2365_v38 = vpop.f32.mrb[40].mxu1  ;;  %v2085_v32 = vadd.f32 %v2352_v40, %v2000_v9 }
 0x249   :  { %v1810_v43 = vpop.f32.mrb[16].mxu0  ;;  %v2160_v44 = vadd.f32 %v2365_v38, %v2075_v34  ;;  %v2154_v47 = vpop.f32.mrb[41].mxu1 }
 0x24a   :  { %v3089_v27 = vadd.f32 %v1810_v43, %v5638_v51  ;;  %v1812_v41 = vpop.f32.mrb[17].mxu0  ;;  %v2155_v39 = vadd.f32 %v2154_v47, %v2070_v29 }
 0x24b   :  { %v3090_v23 = vadd.f32 %v1812_v41, %v5638_v51  ;;  %2186 = vst [vmem:[%s5807_s3 + $0x68] sm:$0xff] %v2160_v44 }
 0x24c   :  { %2177 = vst [vmem:[%s5807_s3 + $0x20] sm:$0xff] %v3089_v27  ;;  %2179 = vst [vmem:[%s5807_s3 + $0x30] sm:$0xff] %v2155_v39  ;;  %v2368_v46 = vpop.f32.mrb[42].mxu1 }
 0x24d   :  { %2178 = vst [vmem:[%s5807_s3 + $0x28] sm:$0xff] %v3090_v23  ;;  %v1816_v53 = vpop.f32.mrb[18].mxu0  ;;  %v2170_v55 = vadd.f32 %v2368_v46, %v2085_v32  ;;  %v2164_v51 = vpop.f32.mrb[43].mxu1 }
 0x24e   :  { %v3091_v56 = vadd.f32 %v1816_v53, %v5648_v59  ;;  %v1818_v57 = vpop.f32.mrb[19].mxu0  ;;  %v2165_v26 = vadd.f32 %v2164_v51, %v2080_v16 }
 0x24f   :  { %v3092_v60 = vadd.f32 %v1818_v57, %v5648_v59  ;;  %2200 = vst [vmem:[%s5807_s3 + $0xd8] sm:$0xff] %v2170_v55 }
 0x250   :  { %2184 = vst [vmem:[%s5807_s3 + $0x58] sm:$0xff] %v3091_v56  ;;  %2193 = vst [vmem:[%s5807_s3 + $0xa0] sm:$0xff] %v2165_v26 }
 0x251   :  { %2185 = vst [vmem:[%s5807_s3 + $0x60] sm:$0xff] %v3092_v60  ;;  %v1822_v58 = vpop.f32.mrb[20].mxu0 }
 0x252   :  { %v3093_v48 = vadd.f32 %v1822_v58, %v5653_v50  ;;  %v1824_v59 = vpop.f32.mrb[21].mxu0 }
 0x253   :  { %v3094_v52 = vadd.f32 %v1824_v59, %v5653_v50 }
 0x254   :  { %2191 = vst [vmem:[%s5807_s3 + $0x90] sm:$0xff] %v3093_v48 }
 0x255   :  { %2192 = vst [vmem:[%s5807_s3 + $0x98] sm:$0xff] %v3094_v52  ;;  %v1828_v20 = vpop.f32.mrb[22].mxu0 }
 0x256   :  { %v3095_v17 = vadd.f32 %v1828_v20, %v5677_v63  ;;  %v1830_v42 = vpop.f32.mrb[23].mxu0 }
 0x257   :  { %v3096_v14 = vadd.f32 %v1830_v42, %v5677_v63 }
 0x258   :  { %2198 = vst [vmem:[%s5807_s3 + $0xc8] sm:$0xff] %v3095_v17 }
 0x259   :  { %2199 = vst [vmem:[%s5807_s3 + $0xd0] sm:$0xff] %v3096_v14 }

// kernel: model_forward.7
= control target key start
LH: loop header
LB: loop body
LE: loop exit
PB: predicated region body
PF: predicated region fallthrough
CT: control target
= control target key end

     0   :  { %v358_v3 = vmov 0.0   ;;  %v359_v4 = vmov 0   ;;  %vm104_vm0 = vcmask 261120   ;;  %s636_s1 = inlined_call_operand.vmem [shape: f32[288,256], index: 1, kind: input, shape index: {}]   ;;  %s637_s0 = inlined_call_operand.vmem [shape: f32[16,288], index: 0, kind: input, shape index: {}]   ;;  %s638_s2 = inlined_call_operand.vmem [shape: f32[16,1], index: 2, kind: input, shape index: {}]   ;;  %s639_s3 = inlined_call_operand.vmem [shape: f32[16,256], index: 3, kind: output, shape index: {}]  }
   0x1   :  { %v21_v0 = vld [vmem:[%s636_s1 + $0x8] sm:$0xff]  ;;  %v23_v1 = vld [vmem:[%s636_s1 + $0x18] sm:$0xff]  ;;  %v20_v2 = vld [vmem:[%s636_s1] sm:$0xff]  ;;  %252 = vmatprep.mubr.f32.mxu0 %v358_v3  ;;  %357 = vset.pattern.permute.xlu0 %v359_v4 }
   0x2   :  { %v275_v5 = vpack.c.bf16 %v23_v1, %v21_v0  ;;  %v22_v6 = vld [vmem:[%s636_s1 + $0x10] sm:$0xff]  ;;  %v25_v7 = vld [vmem:[%s636_s1 + $0x28] sm:$0xff]  ;;  %v27_v8 = vld [vmem:[%s636_s1 + $0x38] sm:$0xff] }
   0x3   :  { %v277_v9 = vpack.c.bf16 %v22_v6, %v20_v2  ;;  %v279_v10 = vpack.c.bf16 %v27_v8, %v25_v7  ;;  %v24_v11 = vld [vmem:[%s636_s1 + $0x20] sm:$0xff]  ;;  %v26_v12 = vld [vmem:[%s636_s1 + $0x30] sm:$0xff]  ;;  %v29_v13 = vld [vmem:[%s636_s1 + $0x48] sm:$0xff] }
   0x4   :  { %276 = vmatprep.subr.bf16.mxu1 %v275_v5  ;;  %v31_v14 = vld [vmem:[%s636_s1 + $0x58] sm:$0xff]  ;;  %v281_v15 = vpack.c.bf16 %v26_v12, %v24_v11  ;;  %v28_v17 = vld [vmem:[%s636_s1 + $0x40] sm:$0xff]  ;;  %v30_v18 = vld [vmem:[%s636_s1 + $0x50] sm:$0xff] }
   0x5   :  { %278 = vmatpush1.bf16.msra.mxu1 %v277_v9  ;;  %v283_v16 = vpack.c.bf16 %v31_v14, %v29_v13  ;;  %v33_v19 = vld [vmem:[%s636_s1 + $0x68] sm:$0xff]  ;;  %v35_v20 = vld [vmem:[%s636_s1 + $0x78] sm:$0xff]  ;;  %v285_v21 = vpack.c.bf16 %v30_v18, %v28_v17  ;;  %v32_v23 = vld [vmem:[%s636_s1 + $0x60] sm:$0xff] }
   0x6   :  { %280 = vmatprep.subr.bf16.mxu1 %v279_v10  ;;  %v287_v22 = vpack.c.bf16 %v35_v20, %v33_v19  ;;  %v34_v24 = vld [vmem:[%s636_s1 + $0x70] sm:$0xff]  ;;  %v37_v25 = vld [vmem:[%s636_s1 + $0x88] sm:$0xff]  ;;  %v39_v26 = vld [vmem:[%s636_s1 + $0x98] sm:$0xff] }
   0x7   :  { %v289_v27 = vpack.c.bf16 %v34_v24, %v32_v23  ;;  %v291_v28 = vpack.c.bf16 %v39_v26, %v37_v25  ;;  %v36_v29 = vld [vmem:[%s636_s1 + $0x80] sm:$0xff]  ;;  %v38_v30 = vld [vmem:[%s636_s1 + $0x90] sm:$0xff]  ;;  %v41_v31 = vld [vmem:[%s636_s1 + $0xa8] sm:$0xff] }
   0x8   :  { %v43_v32 = vld [vmem:[%s636_s1 + $0xb8] sm:$0xff]  ;;  %v293_v33 = vpack.c.bf16 %v38_v30, %v36_v29  ;;  %v40_v35 = vld [vmem:[%s636_s1 + $0xa0] sm:$0xff]  ;;  %v42_v36 = vld [vmem:[%s636_s1 + $0xb0] sm:$0xff] }
   0x9   :  { %282 = vmatpush1.bf16.msra.mxu1 %v281_v15  ;;  %v295_v34 = vpack.c.bf16 %v43_v32, %v41_v31  ;;  %v45_v37 = vld [vmem:[%s636_s1 + $0xc8] sm:$0xff]  ;;  %v47_v38 = vld [vmem:[%s636_s1 + $0xd8] sm:$0xff]  ;;  %v297_v39 = vpack.c.bf16 %v42_v36, %v40_v35  ;;  %v84_v42 = vld [vmem:[%s636_s1 + $0x200] sm:$0xff] }
   0xa   :  { %284 = vmatprep.subr.bf16.mxu1 %v283_v16  ;;  %v85_v40 = vld [vmem:[%s636_s1 + $0x208] sm:$0xff]  ;;  %v87_v41 = vld [vmem:[%s636_s1 + $0x218] sm:$0xff]  ;;  %v299_v43 = vpack.c.bf16 %v47_v38, %v45_v37  ;;  %v44_v44 = vld [vmem:[%s636_s1 + $0xc0] sm:$0xff] }
   0xb   :  { %v46_v45 = vld [vmem:[%s636_s1 + $0xd0] sm:$0xff]  ;;  %v339_v46 = vpack.c.bf16 %v87_v41, %v85_v40  ;;  %v49_v48 = vld [vmem:[%s636_s1 + $0xe8] sm:$0xff]  ;;  %v51_v49 = vld [vmem:[%s636_s1 + $0xf8] sm:$0xff] }
   0xc   :  { %v86_v47 = vld [vmem:[%s636_s1 + $0x210] sm:$0xff]  ;;  %v89_v51 = vld [vmem:[%s636_s1 + $0x228] sm:$0xff]  ;;  %v91_v52 = vld [vmem:[%s636_s1 + $0x238] sm:$0xff]  ;;  %v301_v55 = vpack.c.bf16 %v46_v45, %v44_v44  ;;  %v303_v59 = vpack.c.bf16 %v51_v49, %v49_v48 }
   0xd   :  { %286 = vmatpush1.bf16.msra.mxu1 %v285_v21  ;;  %v341_v50 = vpack.c.bf16 %v86_v47, %v84_v42  ;;  %340 = vmatprep.subr.bf16.mxu0 %v339_v46  ;;  %v88_v53 = vld [vmem:[%s636_s1 + $0x220] sm:$0xff]  ;;  %v90_v54 = vld [vmem:[%s636_s1 + $0x230] sm:$0xff]  ;;  %v343_v56 = vpack.c.bf16 %v91_v52, %v89_v51  ;;  %v15_v58 = vld [vmem:[%s637_s0 + $0x8] sm:$0xff] }
   0xe   :  { %288 = vmatprep.subr.bf16.mxu1 %v287_v22  ;;  %v345_v57 = vpack.c.bf16 %v90_v54, %v88_v53  ;;  %v48_v60 = vld [vmem:[%s636_s1 + $0xe0] sm:$0xff]  ;;  %v50_v61 = vld [vmem:[%s636_s1 + $0xf0] sm:$0xff]  ;;  %175 = vmatprep.mubr.f32.mxu1 %v15_v58  ;;  %v53_v62 = vld [vmem:[%s636_s1 + $0x108] sm:$0xff] }
   0xf   :  { %342 = vmatpush1.bf16.msra.mxu0 %v341_v50  ;;  %v55_v63 = vld [vmem:[%s636_s1 + $0x118] sm:$0xff]  ;;  %v92_v0 = vld [vmem:[%s638_s2] sm:$0xff]  ;;  %v305_v1 = vpack.c.bf16 %v50_v61, %v48_v60  ;;  %v16_v2 = vld [vmem:[%s637_s0 + $0x10] sm:$0xff] }
  0x10   :  { %344 = vmatprep.subr.bf16.mxu0 %v343_v56  ;;  %96 = vperm.xlu0 %357, %v92_v0   ;;  %v93_v4 = vld [vmem:[%s638_s2 + $0x8] sm:$0xff]  ;;  %v307_v5 = vpack.c.bf16 %v55_v63, %v53_v62  ;;  %v52_v6 = vld [vmem:[%s636_s1 + $0x100] sm:$0xff]  ;;  %v54_v7 = vld [vmem:[%s636_s1 + $0x110] sm:$0xff] }
  0x11   :  { %290 = vmatpush1.bf16.msra.mxu1 %v289_v27  ;;  %v57_v8 = vld [vmem:[%s636_s1 + $0x128] sm:$0xff]  ;;  %v59_v9 = vld [vmem:[%s636_s1 + $0x138] sm:$0xff]  ;;  %v309_v10 = vpack.c.bf16 %v54_v7, %v52_v6  ;;  %v56_v13 = vld [vmem:[%s636_s1 + $0x120] sm:$0xff] }
  0x12   :  { %292 = vmatprep.subr.bf16.mxu1 %v291_v28  ;;  %v19_v11 = vld [vmem:[%s637_s0 + $0x28] sm:$0xff]  ;;  %v311_v12 = vpack.c.bf16 %v59_v9, %v57_v8  ;;  %v58_v14 = vld [vmem:[%s636_s1 + $0x130] sm:$0xff]  ;;  %v60_v18 = vld [vmem:[%s636_s1 + $0x140] sm:$0xff] }
  0x13   :  { %346 = vmatpush1.bf16.msra.mxu0 %v345_v57  ;;  %v61_v15 = vld [vmem:[%s636_s1 + $0x148] sm:$0xff]  ;;  %v313_v16 = vpack.c.bf16 %v58_v14, %v56_v13  ;;  %v62_v19 = vld [vmem:[%s636_s1 + $0x150] sm:$0xff]  ;;  %v67_v21 = vld [vmem:[%s636_s1 + $0x178] sm:$0xff] }
  0x14   :  { %101 = vperm.xlu0 %357, %v93_v4   ;;  %v65_v20 = vld [vmem:[%s636_s1 + $0x168] sm:$0xff]  ;;  %v317_v22 = vpack.c.bf16 %v62_v19, %v60_v18  ;;  %v64_v24 = vld [vmem:[%s636_s1 + $0x160] sm:$0xff]  ;;  %v66_v25 = vld [vmem:[%s636_s1 + $0x170] sm:$0xff] }
  0x15   :  { %294 = vmatpush1.bf16.msra.mxu1 %v293_v33  ;;  %v319_v23 = vpack.c.bf16 %v67_v21, %v65_v20  ;;  %v69_v26 = vld [vmem:[%s636_s1 + $0x188] sm:$0xff]  ;;  %v71_v27 = vld [vmem:[%s636_s1 + $0x198] sm:$0xff]  ;;  %v321_v28 = vpack.c.bf16 %v66_v25, %v64_v24  ;;  %v68_v30 = vld [vmem:[%s636_s1 + $0x180] sm:$0xff] }
  0x16   :  { %296 = vmatprep.subr.bf16.mxu1 %v295_v34  ;;  %273 = vmatmul.mubr.msk.f32.vlgmr.msra.gmra.mrb[0].mxu0 %vm104_vm0, %v16_v2  ;;  %v323_v29 = vpack.c.bf16 %v71_v27, %v69_v26  ;;  %v70_v31 = vld [vmem:[%s636_s1 + $0x190] sm:$0xff]  ;;  %v73_v32 = vld [vmem:[%s636_s1 + $0x1a8] sm:$0xff]  ;;  %v75_v33 = vld [vmem:[%s636_s1 + $0x1b8] sm:$0xff] }
  0x17   :  { %258 = vmatprep.mubr.f32.mxu0 %v358_v3  ;;  %v63_v3 = vld [vmem:[%s636_s1 + $0x158] sm:$0xff]  ;;  %v325_v34 = vpack.c.bf16 %v70_v31, %v68_v30  ;;  %v327_v35 = vpack.c.bf16 %v75_v33, %v73_v32  ;;  %v72_v36 = vld [vmem:[%s636_s1 + $0x1a0] sm:$0xff]  ;;  %v74_v37 = vld [vmem:[%s636_s1 + $0x1b0] sm:$0xff] }
  0x18   :  { %v315_v17 = vpack.c.bf16 %v63_v3, %v61_v15  ;;  %v77_v38 = vld [vmem:[%s636_s1 + $0x1c8] sm:$0xff]  ;;  %v329_v40 = vpack.c.bf16 %v74_v37, %v72_v36  ;;  %v76_v42 = vld [vmem:[%s636_s1 + $0x1c0] sm:$0xff]  ;;  %v83_v45 = vld [vmem:[%s636_s1 + $0x1f8] sm:$0xff] }
  0x19   :  { %298 = vmatpush1.bf16.msra.mxu1 %v297_v39  ;;  %v79_v39 = vld [vmem:[%s636_s1 + $0x1d8] sm:$0xff]  ;;  %v81_v44 = vld [vmem:[%s636_s1 + $0x1e8] sm:$0xff]  ;;  %v80_v48 = vld [vmem:[%s636_s1 + $0x1e0] sm:$0xff] }
  0x1a   :  { %300 = vmatprep.subr.bf16.mxu1 %v299_v43  ;;  %274 = vmatmul.mubr.msk.f32.gmra.mrb[2].mxu0 %vm104_vm0, %v19_v11  ;;  %v331_v41 = vpack.c.bf16 %v79_v39, %v77_v38  ;;  %v78_v43 = vld [vmem:[%s636_s1 + $0x1d0] sm:$0xff]  ;;  %v335_v47 = vpack.c.bf16 %v83_v45, %v81_v44  ;;  %v14_v51 = vld [vmem:[%s637_s0] sm:$0xff]  ;;  %v17_v53 = vld [vmem:[%s637_s0 + $0x18] sm:$0xff] }
  0x1b   :  { %v333_v46 = vpack.c.bf16 %v78_v43, %v76_v42  ;;  %v82_v49 = vld [vmem:[%s636_s1 + $0x1f0] sm:$0xff]  ;;  %v18_v52 = vld [vmem:[%s637_s0 + $0x20] sm:$0xff] }
  0x1c   :  { %v337_v50 = vpack.c.bf16 %v82_v49, %v80_v48 }
  0x1d   :  { %302 = vmatpush1.bf16.msra.mxu1 %v301_v55 }
  0x1e   :  { %304 = vmatprep.subr.bf16.mxu1 %v303_v59 }
  0x21   :  { %306 = vmatpush1.bf16.msra.mxu1 %v305_v1 }
  0x22   :  { %308 = vmatprep.subr.bf16.mxu1 %v307_v5 }
  0x25   :  { %310 = vmatpush1.bf16.msra.mxu1 %v309_v10 }
  0x26   :  { %312 = vmatprep.subr.bf16.mxu1 %v311_v12 }
  0x29   :  { %314 = vmatpush1.bf16.msra.mxu1 %v313_v16 }
  0x2a   :  { %316 = vmatprep.subr.bf16.mxu1 %v315_v17 }
  0x2d   :  { %318 = vmatpush1.bf16.msra.mxu1 %v317_v22 }
  0x2e   :  { %320 = vmatprep.subr.bf16.mxu1 %v319_v23 }
  0x31   :  { %322 = vmatpush1.bf16.msra.mxu1 %v321_v28 }
  0x32   :  { %324 = vmatprep.subr.bf16.mxu1 %v323_v29 }
  0x35   :  { %326 = vmatpush1.bf16.msra.mxu1 %v325_v34 }
  0x36   :  { %328 = vmatprep.subr.bf16.mxu1 %v327_v35 }
  0x39   :  { %330 = vmatpush1.bf16.msra.mxu1 %v329_v40 }
  0x3a   :  { %332 = vmatprep.subr.bf16.mxu1 %v331_v41 }
  0x3d   :  { %334 = vmatpush1.bf16.msra.mxu1 %v333_v46 }
  0x3e   :  { %336 = vmatprep.subr.bf16.mxu1 %v335_v47 }
  0x41   :  { %338 = vmatpush1.bf16.msra.mxu1 %v337_v50 }
  0x44   :  { %176 = vmatmul.mubr.f32.vlgmr.msra.gmra.mrb[0].mxu1 %v14_v51 }
  0x45   :  { %181 = vmatprep.mubr.f32.mxu1 %v18_v52 }
  0x48   :  { %182 = vmatmul.mubr.f32.gmra.mrb[2].mxu1 %v17_v53 }
  0x8f   :  { %v97_v58 = vpop.permute.xlu0 %96 }
  0x93   :  { %v102_v0 = vpop.permute.xlu0 %101 }
  0xe9   :  { %v254_v54 = vpop.f32.mrb[0].mxu0 }
  0xea   :  { %v256_v55 = vpop.f32.mrb[1].mxu0 }
  0xed   :  { %v260_v56 = vpop.f32.mrb[2].mxu0 }
  0xee   :  { %v262_v57 = vpop.f32.mrb[3].mxu0 }
 0x117   :  { %v177_v59 = vpop.f32.mrb[0].mxu1 }
 0x118   :  { %v178_v60 = vadd.f32 %v177_v59, %v97_v58  ;;  %v179_v61 = vpop.f32.mrb[1].mxu1 }
 0x119   :  { %v180_v62 = vadd.f32 %v179_v61, %v97_v58 }
 0x11a   :  { %v255_v63 = vadd.f32 %v254_v54, %v178_v60 }
 0x11b   :  { %v257_v1 = vadd.f32 %v256_v55, %v180_v62  ;;  %v183_v2 = vpop.f32.mrb[2].mxu1 }
 0x11c   :  { %265 = vst [vmem:[%s639_s3] sm:$0xff] %v255_v63  ;;  %v184_v4 = vadd.f32 %v183_v2, %v102_v0  ;;  %v185_v5 = vpop.f32.mrb[3].mxu1 }
 0x11d   :  { %266 = vst [vmem:[%s639_s3 + $0x8] sm:$0xff] %v257_v1  ;;  %v186_v6 = vadd.f32 %v185_v5, %v102_v0 }
 0x11e   :  { %v261_v7 = vadd.f32 %v260_v56, %v184_v4 }
 0x11f   :  { %v263_v8 = vadd.f32 %v262_v57, %v186_v6 }
 0x120   :  { %267 = vst [vmem:[%s639_s3 + $0x10] sm:$0xff] %v261_v7 }
 0x121   :  { %268 = vst [vmem:[%s639_s3 + $0x18] sm:$0xff] %v263_v8 }

// kernel: model_forward.8
= control target key start
LH: loop header
LB: loop body
LE: loop exit
PB: predicated region body
PF: predicated region fallthrough
CT: control target
= control target key end

     0   :  { %v223_v0 = vmov 0.0|0.0   ;;  %v224_v6 = vmov 0   ;;  %vm64_vm0 = vcmask 130048   ;;  %s369_s1 = inlined_call_operand.vmem [shape: f32[144,128], index: 1, kind: input, shape index: {}]   ;;  %s370_s0 = inlined_call_operand.vmem [shape: f32[32,144], index: 0, kind: input, shape index: {}]   ;;  %s371_s2 = inlined_call_operand.vmem [shape: f32[32,1], index: 2, kind: input, shape index: {}]   ;;  %s372_s3 = inlined_call_operand.vmem [shape: f32[32,128], index: 3, kind: output, shape index: {}]  }
   0x1   :  { %174 = vmatprep.subr.bf16.mxu0 %v223_v0  ;;  %201 = vmatprep.subr.bf16.mxu1 %v223_v0  ;;  %v22_v1 = vld [vmem:[%s369_s1] sm:$0xff]  ;;  %v23_v2 = vld [vmem:[%s369_s1 + $0x8] sm:$0xff]  ;;  %v24_v3 = vld [vmem:[%s369_s1 + $0x10] sm:$0xff] }
   0x2   :  { %v175_v4 = vpack.c.bf16 %v23_v2, %v22_v1  ;;  %v25_v5 = vld [vmem:[%s369_s1 + $0x18] sm:$0xff]  ;;  %222 = vset.pattern.permute.xlu1 %v224_v6  ;;  %221 = vset.pattern.permute.xlu0 %v224_v6  ;;  %v26_v8 = vld [vmem:[%s369_s1 + $0x20] sm:$0xff]  ;;  %v27_v9 = vld [vmem:[%s369_s1 + $0x28] sm:$0xff] }
   0x3   :  { %v178_v7 = vpack.c.bf16 %v25_v5, %v24_v3  ;;  %v15_v10 = vld [vmem:[%s370_s0 + $0x8] sm:$0xff]  ;;  %v181_v12 = vpack.c.bf16 %v27_v9, %v26_v8  ;;  %v28_v13 = vld [vmem:[%s369_s1 + $0x30] sm:$0xff]  ;;  %v29_v14 = vld [vmem:[%s369_s1 + $0x38] sm:$0xff] }
   0x4   :  { %176 = vmatpush1.bf16.msra.mxu0 %v175_v4  ;;  %210 = vmatpush1.bf16.msra.mxu1 %v175_v4  ;;  %v19_v11 = vld [vmem:[%s370_s0 + $0x28] sm:$0xff]  ;;  %v42_v15 = vld [vmem:[%s371_s2 + $0x10] sm:$0xff]  ;;  %v40_v16 = vld [vmem:[%s371_s2] sm:$0xff]  ;;  %v184_v17 = vpack.c.bf16 %v29_v14, %v28_v13 }
   0x5   :  { %177 = vmatprep.subr.bf16.mxu0 %v223_v0  ;;  %202 = vmatprep.subr.bf16.mxu1 %v223_v0  ;;  %v43_v18 = vld [vmem:[%s371_s2 + $0x18] sm:$0xff]  ;;  %v41_v19 = vld [vmem:[%s371_s2 + $0x8] sm:$0xff]  ;;  %v30_v20 = vld [vmem:[%s369_s1 + $0x40] sm:$0xff] }
   0x6   :  { %170 = vmatprep.mubr.msk.f32.mxu0 %vm64_vm0, %v15_v10  ;;  %172 = vmatprep.mubr.msk.f32.mxu1 %vm64_vm0, %v19_v11  ;;  %v31_v21 = vld [vmem:[%s369_s1 + $0x48] sm:$0xff]  ;;  %v32_v23 = vld [vmem:[%s369_s1 + $0x50] sm:$0xff]  ;;  %v33_v24 = vld [vmem:[%s369_s1 + $0x58] sm:$0xff] }
   0x7   :  { %56 = vperm.xlu1 %222, %v42_v15   ;;  %46 = vperm.xlu0 %221, %v40_v16   ;;  %v187_v22 = vpack.c.bf16 %v31_v21, %v30_v20  ;;  %v190_v25 = vpack.c.bf16 %v33_v24, %v32_v23  ;;  %v34_v26 = vld [vmem:[%s369_s1 + $0x60] sm:$0xff]  ;;  %v35_v27 = vld [vmem:[%s369_s1 + $0x68] sm:$0xff]  ;;  %v36_v29 = vld [vmem:[%s369_s1 + $0x70] sm:$0xff] }
   0x8   :  { %179 = vmatpush1.bf16.msra.mxu0 %v178_v7  ;;  %211 = vmatpush1.bf16.msra.mxu1 %v178_v7  ;;  %v193_v28 = vpack.c.bf16 %v35_v27, %v34_v26  ;;  %v37_v30 = vld [vmem:[%s369_s1 + $0x78] sm:$0xff]  ;;  %v38_v32 = vld [vmem:[%s369_s1 + $0x80] sm:$0xff]  ;;  %v39_v33 = vld [vmem:[%s369_s1 + $0x88] sm:$0xff] }
   0x9   :  { %180 = vmatprep.subr.bf16.mxu0 %v223_v0  ;;  %203 = vmatprep.subr.bf16.mxu1 %v223_v0  ;;  %v196_v31 = vpack.c.bf16 %v37_v30, %v36_v29  ;;  %v199_v34 = vpack.c.bf16 %v39_v33, %v38_v32  ;;  %v14_v35 = vld [vmem:[%s370_s0] sm:$0xff]  ;;  %v17_v37 = vld [vmem:[%s370_s0 + $0x18] sm:$0xff]  ;;  %v16_v39 = vld [vmem:[%s370_s0 + $0x10] sm:$0xff] }
   0xa   :  { %v18_v36 = vld [vmem:[%s370_s0 + $0x20] sm:$0xff]  ;;  %v21_v38 = vld [vmem:[%s370_s0 + $0x38] sm:$0xff]  ;;  %v20_v40 = vld [vmem:[%s370_s0 + $0x30] sm:$0xff] }
   0xb   :  { %61 = vperm.xlu1 %222, %v43_v18   ;;  %51 = vperm.xlu0 %221, %v41_v19  }
   0xc   :  { %182 = vmatpush1.bf16.msra.mxu0 %v181_v12  ;;  %212 = vmatpush1.bf16.msra.mxu1 %v181_v12 }
   0xd   :  { %183 = vmatprep.subr.bf16.mxu0 %v223_v0  ;;  %204 = vmatprep.subr.bf16.mxu1 %v223_v0 }
  0x10   :  { %185 = vmatpush1.bf16.msra.mxu0 %v184_v17  ;;  %213 = vmatpush1.bf16.msra.mxu1 %v184_v17 }
  0x11   :  { %186 = vmatprep.subr.bf16.mxu0 %v223_v0  ;;  %205 = vmatprep.subr.bf16.mxu1 %v223_v0 }
  0x14   :  { %188 = vmatpush1.bf16.msra.mxu0 %v187_v22  ;;  %214 = vmatpush1.bf16.msra.mxu1 %v187_v22 }
  0x15   :  { %189 = vmatprep.subr.bf16.mxu0 %v223_v0  ;;  %206 = vmatprep.subr.bf16.mxu1 %v223_v0 }
  0x18   :  { %191 = vmatpush1.bf16.msra.mxu0 %v190_v25  ;;  %215 = vmatpush1.bf16.msra.mxu1 %v190_v25 }
  0x19   :  { %192 = vmatprep.subr.bf16.mxu0 %v223_v0  ;;  %207 = vmatprep.subr.bf16.mxu1 %v223_v0 }
  0x1c   :  { %194 = vmatpush1.bf16.msra.mxu0 %v193_v28  ;;  %216 = vmatpush1.bf16.msra.mxu1 %v193_v28 }
  0x1d   :  { %195 = vmatprep.subr.bf16.mxu0 %v223_v0  ;;  %208 = vmatprep.subr.bf16.mxu1 %v223_v0 }
  0x20   :  { %197 = vmatpush1.bf16.msra.mxu0 %v196_v31  ;;  %217 = vmatpush1.bf16.msra.mxu1 %v196_v31 }
  0x21   :  { %198 = vmatprep.subr.bf16.mxu0 %v223_v0  ;;  %209 = vmatprep.subr.bf16.mxu1 %v223_v0 }
  0x24   :  { %200 = vmatpush1.bf16.msra.mxu0 %v199_v34  ;;  %218 = vmatpush1.bf16.msra.mxu1 %v199_v34 }
  0x27   :  { %142 = vmatmul.mubr.f32.vlgmr.msra.gmra.mrb[0].mxu0 %v14_v35  ;;  %152 = vmatmul.mubr.f32.vlgmr.msra.gmra.mrb[0].mxu1 %v18_v36 }
  0x28   :  { %171 = vmatprep.mubr.msk.f32.mxu0 %vm64_vm0, %v17_v37  ;;  %173 = vmatprep.mubr.msk.f32.mxu1 %vm64_vm0, %v21_v38 }
  0x2b   :  { %147 = vmatmul.mubr.f32.gmra.mrb[2].mxu0 %v16_v39  ;;  %157 = vmatmul.mubr.f32.gmra.mrb[2].mxu1 %v20_v40 }
  0x86   :  { %v57_v41 = vpop.permute.xlu1 %56  ;;  %v47_v42 = vpop.permute.xlu0 %46 }
  0x8a   :  { %v62_v49 = vpop.permute.xlu1 %61  ;;  %v52_v50 = vpop.permute.xlu0 %51 }
  0xfa   :  { %v143_v43 = vpop.f32.mrb[0].mxu0  ;;  %v153_v44 = vpop.f32.mrb[0].mxu1 }
  0xfb   :  { %v144_v45 = vadd.f32 %v143_v43, %v47_v42  ;;  %v154_v46 = vadd.f32 %v153_v44, %v57_v41  ;;  %v145_v47 = vpop.f32.mrb[1].mxu0  ;;  %v155_v48 = vpop.f32.mrb[1].mxu1 }
  0xfd   :  { %162 = vst [vmem:[%s372_s3] sm:$0xff] %v144_v45  ;;  %164 = vst [vmem:[%s372_s3 + $0x10] sm:$0xff] %v154_v46 }
  0xfe   :  { %v148_v51 = vpop.f32.mrb[2].mxu0  ;;  %v158_v52 = vpop.f32.mrb[2].mxu1 }
  0xff   :  { %v149_v53 = vadd.f32 %v148_v51, %v52_v50  ;;  %v159_v54 = vadd.f32 %v158_v52, %v62_v49  ;;  %v150_v55 = vpop.f32.mrb[3].mxu0  ;;  %v160_v56 = vpop.f32.mrb[3].mxu1 }
 0x101   :  { %163 = vst [vmem:[%s372_s3 + $0x8] sm:$0xff] %v149_v53  ;;  %165 = vst [vmem:[%s372_s3 + $0x18] sm:$0xff] %v159_v54 }

// kernel: model_forward.9
= control target key start
LH: loop header
LB: loop body
LE: loop exit
PB: predicated region body
PF: predicated region fallthrough
CT: control target
= control target key end

     0   :  { %v1399_v3 = vmov 0   ;;  %vm286_vm0 = vcmask 261120   ;;  %s2188_s1 = inlined_call_operand.vmem [shape: f32[1568,128], index: 1, kind: input, shape index: {}]   ;;  %s2189_s0 = inlined_call_operand.vmem [shape: f32[32,1568], index: 0, kind: input, shape index: {}]   ;;  %s2190_s2 = inlined_call_operand.vmem [shape: f32[32,1], index: 2, kind: input, shape index: {}]   ;;  %s2191_s3 = inlined_call_operand.vmem [shape: f32[32,128], index: 3, kind: output, shape index: {}]  }
   0x1   :  { %v82_v0 = vld [vmem:[%s2188_s1 + $0x80] sm:$0xff]  ;;  %v83_v1 = vld [vmem:[%s2188_s1 + $0x88] sm:$0xff]  ;;  %1397 = vset.pattern.permute.xlu0 %v1399_v3  ;;  %1398 = vset.pattern.permute.xlu1 %v1399_v3  ;;  %v84_v12 = vld [vmem:[%s2188_s1 + $0x90] sm:$0xff] }
   0x2   :  { %v114_v2 = vld [vmem:[%s2188_s1 + $0x180] sm:$0xff]  ;;  %v1192_v4 = vpack.c.bf16 %v83_v1, %v82_v0  ;;  %v115_v5 = vld [vmem:[%s2188_s1 + $0x188] sm:$0xff]  ;;  %v85_v14 = vld [vmem:[%s2188_s1 + $0x98] sm:$0xff] }
   0x3   :  { %v66_v6 = vld [vmem:[%s2188_s1] sm:$0xff]  ;;  %v67_v7 = vld [vmem:[%s2188_s1 + $0x8] sm:$0xff]  ;;  %v1224_v8 = vpack.c.bf16 %v115_v5, %v114_v2  ;;  %v116_v15 = vld [vmem:[%s2188_s1 + $0x190] sm:$0xff]  ;;  %v1196_v17 = vpack.c.bf16 %v85_v14, %v84_v12 }
   0x4   :  { %v1194_v9 = vpack.c.bf16 %v67_v7, %v66_v6  ;;  %v98_v10 = vld [vmem:[%s2188_s1 + $0x100] sm:$0xff]  ;;  %v99_v11 = vld [vmem:[%s2188_s1 + $0x108] sm:$0xff]  ;;  %1193 = vmatprep.subr.bf16.mxu0 %v1192_v4  ;;  %v117_v16 = vld [vmem:[%s2188_s1 + $0x198] sm:$0xff] }
   0x5   :  { %v1226_v13 = vpack.c.bf16 %v99_v11, %v98_v10  ;;  %1225 = vmatprep.subr.bf16.mxu1 %v1224_v8  ;;  %v1228_v18 = vpack.c.bf16 %v117_v16, %v116_v15  ;;  %v68_v19 = vld [vmem:[%s2188_s1 + $0x10] sm:$0xff]  ;;  %v69_v20 = vld [vmem:[%s2188_s1 + $0x18] sm:$0xff]  ;;  %v86_v24 = vld [vmem:[%s2188_s1 + $0xa0] sm:$0xff] }
   0x6   :  { %1195 = vmatpush3.bf16.msra.mxu0 %v1194_v9  ;;  %v100_v21 = vld [vmem:[%s2188_s1 + $0x110] sm:$0xff]  ;;  %v1198_v22 = vpack.c.bf16 %v69_v20, %v68_v19  ;;  %v101_v23 = vld [vmem:[%s2188_s1 + $0x118] sm:$0xff]  ;;  %v87_v25 = vld [vmem:[%s2188_s1 + $0xa8] sm:$0xff] }
   0x7   :  { %1227 = vmatpush3.bf16.msra.mxu1 %v1226_v13  ;;  %1197 = vmatprep.subr.bf16.mxu0 %v1196_v17  ;;  %v1230_v26 = vpack.c.bf16 %v101_v23, %v100_v21  ;;  %v1200_v27 = vpack.c.bf16 %v87_v25, %v86_v24  ;;  %v118_v28 = vld [vmem:[%s2188_s1 + $0x1a0] sm:$0xff]  ;;  %v119_v29 = vld [vmem:[%s2188_s1 + $0x1a8] sm:$0xff]  ;;  %v88_v36 = vld [vmem:[%s2188_s1 + $0xb0] sm:$0xff] }
   0x8   :  { %1229 = vmatprep.subr.bf16.mxu1 %v1228_v18  ;;  %v70_v30 = vld [vmem:[%s2188_s1 + $0x20] sm:$0xff]  ;;  %v1232_v31 = vpack.c.bf16 %v119_v29, %v118_v28  ;;  %v71_v32 = vld [vmem:[%s2188_s1 + $0x28] sm:$0xff]  ;;  %v89_v37 = vld [vmem:[%s2188_s1 + $0xb8] sm:$0xff] }
   0x9   :  { %v102_v33 = vld [vmem:[%s2188_s1 + $0x120] sm:$0xff]  ;;  %v103_v34 = vld [vmem:[%s2188_s1 + $0x128] sm:$0xff]  ;;  %v1202_v35 = vpack.c.bf16 %v71_v32, %v70_v30  ;;  %v120_v38 = vld [vmem:[%s2188_s1 + $0x1b0] sm:$0xff]  ;;  %v1204_v40 = vpack.c.bf16 %v89_v37, %v88_v36 }
   0xa   :  { %1199 = vmatpush3.bf16.msra.mxu0 %v1198_v22  ;;  %v1234_v39 = vpack.c.bf16 %v103_v34, %v102_v33  ;;  %v121_v41 = vld [vmem:[%s2188_s1 + $0x1b8] sm:$0xff]  ;;  %v72_v42 = vld [vmem:[%s2188_s1 + $0x30] sm:$0xff]  ;;  %v90_v47 = vld [vmem:[%s2188_s1 + $0xc0] sm:$0xff] }
   0xb   :  { %1231 = vmatpush3.bf16.msra.mxu1 %v1230_v26  ;;  %1201 = vmatprep.subr.bf16.mxu0 %v1200_v27  ;;  %v73_v43 = vld [vmem:[%s2188_s1 + $0x38] sm:$0xff]  ;;  %v1236_v44 = vpack.c.bf16 %v121_v41, %v120_v38  ;;  %v104_v45 = vld [vmem:[%s2188_s1 + $0x130] sm:$0xff]  ;;  %v91_v48 = vld [vmem:[%s2188_s1 + $0xc8] sm:$0xff] }
   0xc   :  { %1233 = vmatprep.subr.bf16.mxu1 %v1232_v31  ;;  %v105_v46 = vld [vmem:[%s2188_s1 + $0x138] sm:$0xff]  ;;  %v122_v49 = vld [vmem:[%s2188_s1 + $0x1c0] sm:$0xff]  ;;  %v123_v50 = vld [vmem:[%s2188_s1 + $0x1c8] sm:$0xff]  ;;  %v1206_v51 = vpack.c.bf16 %v73_v43, %v72_v42  ;;  %v1208_v53 = vpack.c.bf16 %v91_v48, %v90_v47 }
   0xd   :  { %v1238_v52 = vpack.c.bf16 %v105_v46, %v104_v45  ;;  %v74_v54 = vld [vmem:[%s2188_s1 + $0x40] sm:$0xff]  ;;  %v75_v55 = vld [vmem:[%s2188_s1 + $0x48] sm:$0xff]  ;;  %v1240_v57 = vpack.c.bf16 %v123_v50, %v122_v49  ;;  %v92_v59 = vld [vmem:[%s2188_s1 + $0xd0] sm:$0xff] }
   0xe   :  { %1203 = vmatpush3.bf16.msra.mxu0 %v1202_v35  ;;  %v106_v56 = vld [vmem:[%s2188_s1 + $0x140] sm:$0xff]  ;;  %v107_v58 = vld [vmem:[%s2188_s1 + $0x148] sm:$0xff]  ;;  %v93_v60 = vld [vmem:[%s2188_s1 + $0xd8] sm:$0xff]  ;;  %v1210_v63 = vpack.c.bf16 %v75_v55, %v74_v54 }
   0xf   :  { %1235 = vmatpush3.bf16.msra.mxu1 %v1234_v39  ;;  %1205 = vmatprep.subr.bf16.mxu0 %v1204_v40  ;;  %v124_v61 = vld [vmem:[%s2188_s1 + $0x1d0] sm:$0xff]  ;;  %v125_v62 = vld [vmem:[%s2188_s1 + $0x1d8] sm:$0xff]  ;;  %v1242_v0 = vpack.c.bf16 %v107_v58, %v106_v56  ;;  %v1212_v1 = vpack.c.bf16 %v93_v60, %v92_v59  ;;  %v94_v7 = vld [vmem:[%s2188_s1 + $0xe0] sm:$0xff] }
  0x10   :  { %1237 = vmatprep.subr.bf16.mxu1 %v1236_v44  ;;  %v76_v2 = vld [vmem:[%s2188_s1 + $0x50] sm:$0xff]  ;;  %v77_v3 = vld [vmem:[%s2188_s1 + $0x58] sm:$0xff]  ;;  %v1244_v5 = vpack.c.bf16 %v125_v62, %v124_v61  ;;  %v95_v8 = vld [vmem:[%s2188_s1 + $0xe8] sm:$0xff] }
  0x11   :  { %v108_v4 = vld [vmem:[%s2188_s1 + $0x150] sm:$0xff]  ;;  %v109_v6 = vld [vmem:[%s2188_s1 + $0x158] sm:$0xff]  ;;  %v126_v9 = vld [vmem:[%s2188_s1 + $0x1e0] sm:$0xff]  ;;  %v1214_v11 = vpack.c.bf16 %v77_v3, %v76_v2  ;;  %v1216_v15 = vpack.c.bf16 %v95_v8, %v94_v7 }
  0x12   :  { %1207 = vmatpush3.bf16.msra.mxu0 %v1206_v51  ;;  %v127_v10 = vld [vmem:[%s2188_s1 + $0x1e8] sm:$0xff]  ;;  %v78_v12 = vld [vmem:[%s2188_s1 + $0x60] sm:$0xff]  ;;  %v1246_v14 = vpack.c.bf16 %v109_v6, %v108_v4  ;;  %v96_v20 = vld [vmem:[%s2188_s1 + $0xf0] sm:$0xff] }
  0x13   :  { %1239 = vmatpush3.bf16.msra.mxu1 %v1238_v52  ;;  %1209 = vmatprep.subr.bf16.mxu0 %v1208_v53  ;;  %v79_v13 = vld [vmem:[%s2188_s1 + $0x68] sm:$0xff]  ;;  %v110_v16 = vld [vmem:[%s2188_s1 + $0x160] sm:$0xff]  ;;  %v1248_v19 = vpack.c.bf16 %v127_v10, %v126_v9  ;;  %v97_v21 = vld [vmem:[%s2188_s1 + $0xf8] sm:$0xff] }
  0x14   :  { %1241 = vmatprep.subr.bf16.mxu1 %v1240_v57  ;;  %v111_v17 = vld [vmem:[%s2188_s1 + $0x168] sm:$0xff]  ;;  %v17_v22 = vld [vmem:[%s2189_s0 + $0x18] sm:$0xff]  ;;  %v128_v23 = vld [vmem:[%s2188_s1 + $0x1f0] sm:$0xff]  ;;  %v1218_v25 = vpack.c.bf16 %v79_v13, %v78_v12  ;;  %v1220_v27 = vpack.c.bf16 %v97_v21, %v96_v20 }
  0x15   :  { %v15_v18 = vld [vmem:[%s2189_s0 + $0x8] sm:$0xff]  ;;  %v129_v24 = vld [vmem:[%s2188_s1 + $0x1f8] sm:$0xff]  ;;  %448 = vmatprep.mubr.f32.mxu1 %v17_v22  ;;  %v1250_v26 = vpack.c.bf16 %v111_v17, %v110_v16  ;;  %v80_v28 = vld [vmem:[%s2188_s1 + $0x70] sm:$0xff] }
  0x16   :  { %1211 = vmatpush3.bf16.msra.mxu0 %v1210_v63  ;;  %363 = vmatprep.mubr.f32.mxu0 %v15_v18  ;;  %v81_v29 = vld [vmem:[%s2188_s1 + $0x78] sm:$0xff]  ;;  %v112_v30 = vld [vmem:[%s2188_s1 + $0x170] sm:$0xff]  ;;  %v1252_v31 = vpack.c.bf16 %v129_v24, %v128_v23  ;;  %v146_v33 = vld [vmem:[%s2188_s1 + $0x280] sm:$0xff] }
  0x17   :  { %1243 = vmatpush3.bf16.msra.mxu1 %v1242_v0  ;;  %1213 = vmatprep.subr.bf16.mxu0 %v1212_v1  ;;  %v113_v32 = vld [vmem:[%s2188_s1 + $0x178] sm:$0xff]  ;;  %v147_v34 = vld [vmem:[%s2188_s1 + $0x288] sm:$0xff]  ;;  %v178_v35 = vld [vmem:[%s2188_s1 + $0x380] sm:$0xff]  ;;  %v1222_v37 = vpack.c.bf16 %v81_v29, %v80_v28 }
  0x18   :  { %1245 = vmatprep.subr.bf16.mxu1 %v1244_v5  ;;  %v179_v36 = vld [vmem:[%s2188_s1 + $0x388] sm:$0xff]  ;;  %v1254_v38 = vpack.c.bf16 %v113_v32, %v112_v30  ;;  %v1256_v39 = vpack.c.bf16 %v147_v34, %v146_v33  ;;  %v130_v40 = vld [vmem:[%s2188_s1 + $0x200] sm:$0xff]  ;;  %v148_v45 = vld [vmem:[%s2188_s1 + $0x290] sm:$0xff] }
  0x19   :  { %v131_v41 = vld [vmem:[%s2188_s1 + $0x208] sm:$0xff]  ;;  %v162_v42 = vld [vmem:[%s2188_s1 + $0x300] sm:$0xff]  ;;  %v1288_v43 = vpack.c.bf16 %v179_v36, %v178_v35  ;;  %v149_v46 = vld [vmem:[%s2188_s1 + $0x298] sm:$0xff] }
  0x1a   :  { %1215 = vmatpush3.bf16.msra.mxu0 %v1214_v11  ;;  %v163_v44 = vld [vmem:[%s2188_s1 + $0x308] sm:$0xff]  ;;  %v180_v47 = vld [vmem:[%s2188_s1 + $0x390] sm:$0xff]  ;;  %v181_v48 = vld [vmem:[%s2188_s1 + $0x398] sm:$0xff]  ;;  %v1258_v51 = vpack.c.bf16 %v131_v41, %v130_v40  ;;  %v1260_v53 = vpack.c.bf16 %v149_v46, %v148_v45 }
  0x1b   :  { %1247 = vmatpush3.bf16.msra.mxu1 %v1246_v14  ;;  %1217 = vmatprep.subr.bf16.mxu0 %v1216_v15  ;;  %v14_v49 = vld [vmem:[%s2189_s0] sm:$0xff]  ;;  %v16_v50 = vld [vmem:[%s2189_s0 + $0x10] sm:$0xff]  ;;  %v1290_v52 = vpack.c.bf16 %v163_v44, %v162_v42  ;;  %v133_v55 = vld [vmem:[%s2188_s1 + $0x218] sm:$0xff]  ;;  %v1292_v57 = vpack.c.bf16 %v181_v48, %v180_v47 }
  0x1c   :  { %1249 = vmatprep.subr.bf16.mxu1 %v1248_v19  ;;  %v132_v54 = vld [vmem:[%s2188_s1 + $0x210] sm:$0xff]  ;;  %v165_v58 = vld [vmem:[%s2188_s1 + $0x318] sm:$0xff]  ;;  %v150_v59 = vld [vmem:[%s2188_s1 + $0x2a0] sm:$0xff] }
  0x1d   :  { %v164_v56 = vld [vmem:[%s2188_s1 + $0x310] sm:$0xff]  ;;  %v151_v60 = vld [vmem:[%s2188_s1 + $0x2a8] sm:$0xff]  ;;  %v182_v61 = vld [vmem:[%s2188_s1 + $0x3a0] sm:$0xff]  ;;  %v1262_v0 = vpack.c.bf16 %v133_v55, %v132_v54 }
  0x1e   :  { %1219 = vmatpush3.bf16.msra.mxu0 %v1218_v25  ;;  %v183_v62 = vld [vmem:[%s2188_s1 + $0x3a8] sm:$0xff]  ;;  %v134_v63 = vld [vmem:[%s2188_s1 + $0x220] sm:$0xff]  ;;  %v28_v1 = vld [vmem:[%s2189_s0 + $0x70] sm:$0xff]  ;;  %v1294_v4 = vpack.c.bf16 %v165_v58, %v164_v56  ;;  %v1264_v5 = vpack.c.bf16 %v151_v60, %v150_v59 }
  0x1f   :  { %1251 = vmatpush3.bf16.msra.mxu1 %v1250_v26  ;;  %1221 = vmatprep.subr.bf16.mxu0 %v1220_v27  ;;  %v27_v2 = vld [vmem:[%s2189_s0 + $0x68] sm:$0xff]  ;;  %v30_v3 = vld [vmem:[%s2189_s0 + $0x80] sm:$0xff]  ;;  %v1296_v9 = vpack.c.bf16 %v183_v62, %v182_v61  ;;  %v152_v10 = vld [vmem:[%s2188_s1 + $0x2b0] sm:$0xff] }
  0x20   :  { %1253 = vmatprep.subr.bf16.mxu1 %v1252_v31  ;;  %v135_v6 = vld [vmem:[%s2188_s1 + $0x228] sm:$0xff]  ;;  %v166_v7 = vld [vmem:[%s2188_s1 + $0x320] sm:$0xff]  ;;  %v153_v11 = vld [vmem:[%s2188_s1 + $0x2b8] sm:$0xff] }
  0x21   :  { %v167_v8 = vld [vmem:[%s2188_s1 + $0x328] sm:$0xff]  ;;  %v29_v12 = vld [vmem:[%s2189_s0 + $0x78] sm:$0xff]  ;;  %v184_v13 = vld [vmem:[%s2188_s1 + $0x3b0] sm:$0xff]  ;;  %v1266_v16 = vpack.c.bf16 %v135_v6, %v134_v63  ;;  %v1268_v21 = vpack.c.bf16 %v153_v11, %v152_v10 }
  0x22   :  { %1223 = vmatpush3.bf16.msra.mxu0 %v1222_v37  ;;  %v185_v14 = vld [vmem:[%s2188_s1 + $0x3b8] sm:$0xff]  ;;  %v136_v15 = vld [vmem:[%s2188_s1 + $0x230] sm:$0xff]  ;;  %v43_v19 = vld [vmem:[%s2189_s0 + $0xe8] sm:$0xff]  ;;  %v1298_v20 = vpack.c.bf16 %v167_v8, %v166_v7 }
  0x23   :  { %1255 = vmatpush3.bf16.msra.mxu1 %v1254_v38  ;;  %1257 = vmatprep.subr.bf16.mxu0 %v1256_v39  ;;  %v41_v17 = vld [vmem:[%s2189_s0 + $0xd8] sm:$0xff]  ;;  %v40_v18 = vld [vmem:[%s2189_s0 + $0xd0] sm:$0xff]  ;;  %v1300_v25 = vpack.c.bf16 %v185_v14, %v184_v13  ;;  %v154_v26 = vld [vmem:[%s2188_s1 + $0x2c0] sm:$0xff] }
  0x24   :  { %1289 = vmatprep.subr.bf16.mxu1 %v1288_v43  ;;  %v137_v22 = vld [vmem:[%s2188_s1 + $0x238] sm:$0xff]  ;;  %v168_v23 = vld [vmem:[%s2188_s1 + $0x330] sm:$0xff]  ;;  %v155_v27 = vld [vmem:[%s2188_s1 + $0x2c8] sm:$0xff] }
  0x25   :  { %364 = vmatmul.mubr.f32.vlgmr.msra.gmra.mrb[0].mxu0 %v14_v49  ;;  %v169_v24 = vld [vmem:[%s2188_s1 + $0x338] sm:$0xff]  ;;  %v42_v28 = vld [vmem:[%s2189_s0 + $0xe0] sm:$0xff]  ;;  %v187_v30 = vld [vmem:[%s2188_s1 + $0x3c8] sm:$0xff]  ;;  %v1270_v32 = vpack.c.bf16 %v137_v22, %v136_v15  ;;  %v1272_v37 = vpack.c.bf16 %v155_v27, %v154_v26 }
  0x26   :  { %449 = vmatmul.mubr.f32.vlgmr.msra.gmra.mrb[0].mxu1 %v16_v50  ;;  %1259 = vmatpush3.bf16.msra.mxu0 %v1258_v51  ;;  %v186_v29 = vld [vmem:[%s2188_s1 + $0x3c0] sm:$0xff]  ;;  %v53_v34 = vld [vmem:[%s2189_s0 + $0x138] sm:$0xff]  ;;  %v56_v35 = vld [vmem:[%s2189_s0 + $0x150] sm:$0xff]  ;;  %v1302_v36 = vpack.c.bf16 %v169_v24, %v168_v23 }
  0x27   :  { %1291 = vmatpush3.bf16.msra.mxu1 %v1290_v52  ;;  %1261 = vmatprep.subr.bf16.mxu0 %v1260_v53  ;;  %v138_v31 = vld [vmem:[%s2188_s1 + $0x240] sm:$0xff]  ;;  %v139_v38 = vld [vmem:[%s2188_s1 + $0x248] sm:$0xff]  ;;  %v1304_v41 = vpack.c.bf16 %v187_v30, %v186_v29  ;;  %v156_v42 = vld [vmem:[%s2188_s1 + $0x2d0] sm:$0xff] }
  0x28   :  { %1293 = vmatprep.subr.bf16.mxu1 %v1292_v57  ;;  %368 = vmatprep.mubr.f32.mxu0 %v28_v1  ;;  %v54_v33 = vld [vmem:[%s2189_s0 + $0x140] sm:$0xff]  ;;  %v171_v40 = vld [vmem:[%s2188_s1 + $0x348] sm:$0xff]  ;;  %v157_v43 = vld [vmem:[%s2188_s1 + $0x2d8] sm:$0xff]  ;;  %v1274_v47 = vpack.c.bf16 %v139_v38, %v138_v31 }
  0x29   :  { %369 = vmatmul.mubr.f32.gmra.mrb[2].mxu0 %v27_v2  ;;  %453 = vmatprep.mubr.f32.mxu1 %v30_v3  ;;  %v170_v39 = vld [vmem:[%s2188_s1 + $0x340] sm:$0xff]  ;;  %v55_v44 = vld [vmem:[%s2189_s0 + $0x148] sm:$0xff]  ;;  %v188_v45 = vld [vmem:[%s2188_s1 + $0x3d0] sm:$0xff]  ;;  %v1276_v51 = vpack.c.bf16 %v157_v43, %v156_v42 }
  0x2a   :  { %1263 = vmatpush3.bf16.msra.mxu0 %v1262_v0  ;;  %454 = vmatmul.mubr.f32.gmra.mrb[2].mxu1 %v29_v12  ;;  %v189_v46 = vld [vmem:[%s2188_s1 + $0x3d8] sm:$0xff]  ;;  %v19_v48 = vld [vmem:[%s2189_s0 + $0x28] sm:$0xff]  ;;  %v1306_v50 = vpack.c.bf16 %v171_v40, %v170_v39  ;;  %v140_v52 = vld [vmem:[%s2188_s1 + $0x250] sm:$0xff] }
  0x2b   :  { %1295 = vmatpush3.bf16.msra.mxu1 %v1294_v4  ;;  %1265 = vmatprep.subr.bf16.mxu0 %v1264_v5  ;;  %v21_v49 = vld [vmem:[%s2189_s0 + $0x38] sm:$0xff]  ;;  %v172_v54 = vld [vmem:[%s2188_s1 + $0x350] sm:$0xff]  ;;  %v1308_v55 = vpack.c.bf16 %v189_v46, %v188_v45  ;;  %v158_v57 = vld [vmem:[%s2188_s1 + $0x2e0] sm:$0xff] }
  0x2c   :  { %1297 = vmatprep.subr.bf16.mxu1 %v1296_v9  ;;  %373 = vmatprep.mubr.f32.mxu0 %v41_v17  ;;  %v141_v53 = vld [vmem:[%s2188_s1 + $0x258] sm:$0xff]  ;;  %v159_v58 = vld [vmem:[%s2188_s1 + $0x2e8] sm:$0xff]  ;;  %v190_v59 = vld [vmem:[%s2188_s1 + $0x3e0] sm:$0xff] }
  0x2d   :  { %374 = vmatmul.mubr.f32.gmra.mrb[4].mxu0 %v40_v18  ;;  %458 = vmatprep.mubr.f32.mxu1 %v43_v19  ;;  %v173_v56 = vld [vmem:[%s2188_s1 + $0x358] sm:$0xff]  ;;  %v191_v60 = vld [vmem:[%s2188_s1 + $0x3e8] sm:$0xff]  ;;  %v1278_v61 = vpack.c.bf16 %v141_v53, %v140_v52  ;;  %v1280_v63 = vpack.c.bf16 %v159_v58, %v158_v57  ;;  %v142_v0 = vld [vmem:[%s2188_s1 + $0x260] sm:$0xff] }
  0x2e   :  { %1267 = vmatpush3.bf16.msra.mxu0 %v1266_v16  ;;  %459 = vmatmul.mubr.f32.gmra.mrb[4].mxu1 %v42_v28  ;;  %v1310_v62 = vpack.c.bf16 %v173_v56, %v172_v54  ;;  %v143_v1 = vld [vmem:[%s2188_s1 + $0x268] sm:$0xff]  ;;  %v174_v2 = vld [vmem:[%s2188_s1 + $0x360] sm:$0xff]  ;;  %v1312_v3 = vpack.c.bf16 %v191_v60, %v190_v59  ;;  %v160_v5 = vld [vmem:[%s2188_s1 + $0x2f0] sm:$0xff] }
  0x2f   :  { %1299 = vmatpush3.bf16.msra.mxu1 %v1298_v20  ;;  %1269 = vmatprep.subr.bf16.mxu0 %v1268_v21  ;;  %v175_v4 = vld [vmem:[%s2188_s1 + $0x368] sm:$0xff]  ;;  %v161_v6 = vld [vmem:[%s2188_s1 + $0x2f8] sm:$0xff]  ;;  %v192_v7 = vld [vmem:[%s2188_s1 + $0x3f0] sm:$0xff]  ;;  %v1282_v9 = vpack.c.bf16 %v143_v1, %v142_v0 }
  0x30   :  { %1301 = vmatprep.subr.bf16.mxu1 %v1300_v25  ;;  %378 = vmatprep.mubr.f32.mxu0 %v54_v33  ;;  %v193_v8 = vld [vmem:[%s2188_s1 + $0x3f8] sm:$0xff]  ;;  %v1314_v10 = vpack.c.bf16 %v175_v4, %v174_v2  ;;  %v1284_v11 = vpack.c.bf16 %v161_v6, %v160_v5  ;;  %v144_v12 = vld [vmem:[%s2188_s1 + $0x270] sm:$0xff]  ;;  %v210_v17 = vld [vmem:[%s2188_s1 + $0x480] sm:$0xff] }
  0x31   :  { %379 = vmatmul.mubr.f32.gmra.mrb[6].mxu0 %v53_v34  ;;  %463 = vmatprep.mubr.f32.mxu1 %v56_v35  ;;  %v145_v13 = vld [vmem:[%s2188_s1 + $0x278] sm:$0xff]  ;;  %v176_v14 = vld [vmem:[%s2188_s1 + $0x370] sm:$0xff]  ;;  %v1316_v15 = vpack.c.bf16 %v193_v8, %v192_v7  ;;  %v211_v18 = vld [vmem:[%s2188_s1 + $0x488] sm:$0xff] }
  0x32   :  { %1271 = vmatpush3.bf16.msra.mxu0 %v1270_v32  ;;  %464 = vmatmul.mubr.f32.gmra.mrb[6].mxu1 %v55_v44  ;;  %v177_v16 = vld [vmem:[%s2188_s1 + $0x378] sm:$0xff]  ;;  %v242_v19 = vld [vmem:[%s2188_s1 + $0x580] sm:$0xff]  ;;  %v243_v20 = vld [vmem:[%s2188_s1 + $0x588] sm:$0xff]  ;;  %v1286_v21 = vpack.c.bf16 %v145_v13, %v144_v12  ;;  %v1320_v23 = vpack.c.bf16 %v211_v18, %v210_v17 }
  0x33   :  { %1303 = vmatpush3.bf16.msra.mxu1 %v1302_v36  ;;  %1273 = vmatprep.subr.bf16.mxu0 %v1272_v37  ;;  %v1318_v22 = vpack.c.bf16 %v177_v16, %v176_v14  ;;  %v194_v24 = vld [vmem:[%s2188_s1 + $0x400] sm:$0xff]  ;;  %v195_v25 = vld [vmem:[%s2188_s1 + $0x408] sm:$0xff]  ;;  %v1352_v26 = vpack.c.bf16 %v243_v20, %v242_v19  ;;  %v212_v29 = vld [vmem:[%s2188_s1 + $0x490] sm:$0xff] }
  0x34   :  { %1305 = vmatprep.subr.bf16.mxu1 %v1304_v41  ;;  %533 = vmatprep.mubr.f32.mxu0 %v19_v48  ;;  %v226_v27 = vld [vmem:[%s2188_s1 + $0x500] sm:$0xff]  ;;  %v227_v28 = vld [vmem:[%s2188_s1 + $0x508] sm:$0xff]  ;;  %v213_v30 = vld [vmem:[%s2188_s1 + $0x498] sm:$0xff]  ;;  %v1322_v35 = vpack.c.bf16 %v195_v25, %v194_v24 }
  0x35   :  { %618 = vmatprep.mubr.f32.mxu1 %v21_v49  ;;  %v244_v31 = vld [vmem:[%s2188_s1 + $0x590] sm:$0xff]  ;;  %v245_v32 = vld [vmem:[%s2188_s1 + $0x598] sm:$0xff]  ;;  %v18_v33 = vld [vmem:[%s2189_s0 + $0x20] sm:$0xff]  ;;  %v1354_v36 = vpack.c.bf16 %v227_v28, %v226_v27  ;;  %v1324_v40 = vpack.c.bf16 %v213_v30, %v212_v29 }
  0x36   :  { %1275 = vmatpush3.bf16.msra.mxu0 %v1274_v47  ;;  %v20_v34 = vld [vmem:[%s2189_s0 + $0x30] sm:$0xff]  ;;  %v197_v39 = vld [vmem:[%s2188_s1 + $0x418] sm:$0xff]  ;;  %v1356_v41 = vpack.c.bf16 %v245_v32, %v244_v31  ;;  %v214_v44 = vld [vmem:[%s2188_s1 + $0x4a0] sm:$0xff] }
  0x37   :  { %1307 = vmatpush3.bf16.msra.mxu1 %v1306_v50  ;;  %1277 = vmatprep.subr.bf16.mxu0 %v1276_v51  ;;  %v32_v37 = vld [vmem:[%s2189_s0 + $0x90] sm:$0xff]  ;;  %v229_v43 = vld [vmem:[%s2188_s1 + $0x518] sm:$0xff]  ;;  %v215_v45 = vld [vmem:[%s2188_s1 + $0x4a8] sm:$0xff] }
  0x38   :  { %1309 = vmatprep.subr.bf16.mxu1 %v1308_v55  ;;  %v196_v38 = vld [vmem:[%s2188_s1 + $0x410] sm:$0xff]  ;;  %v246_v46 = vld [vmem:[%s2188_s1 + $0x5a0] sm:$0xff]  ;;  %v247_v47 = vld [vmem:[%s2188_s1 + $0x5a8] sm:$0xff]  ;;  %v1328_v57 = vpack.c.bf16 %v215_v45, %v214_v44 }
  0x39   :  { %v228_v42 = vld [vmem:[%s2188_s1 + $0x510] sm:$0xff]  ;;  %v31_v48 = vld [vmem:[%s2189_s0 + $0x88] sm:$0xff]  ;;  %v34_v49 = vld [vmem:[%s2189_s0 + $0xa0] sm:$0xff]  ;;  %v1326_v50 = vpack.c.bf16 %v197_v39, %v196_v38  ;;  %v1360_v58 = vpack.c.bf16 %v247_v47, %v246_v46 }
  0x3a   :  { %1279 = vmatpush3.bf16.msra.mxu0 %v1278_v61  ;;  %v33_v51 = vld [vmem:[%s2189_s0 + $0x98] sm:$0xff]  ;;  %v1358_v52 = vpack.c.bf16 %v229_v43, %v228_v42  ;;  %v198_v54 = vld [vmem:[%s2188_s1 + $0x420] sm:$0xff]  ;;  %v199_v55 = vld [vmem:[%s2188_s1 + $0x428] sm:$0xff] }
  0x3b   :  { %1311 = vmatpush3.bf16.msra.mxu1 %v1310_v62  ;;  %1281 = vmatprep.subr.bf16.mxu0 %v1280_v63  ;;  %v45_v53 = vld [vmem:[%s2189_s0 + $0xf8] sm:$0xff]  ;;  %v44_v56 = vld [vmem:[%s2189_s0 + $0xf0] sm:$0xff]  ;;  %v230_v59 = vld [vmem:[%s2188_s1 + $0x520] sm:$0xff]  ;;  %v1330_v2 = vpack.c.bf16 %v199_v55, %v198_v54 }
  0x3c   :  { %1313 = vmatprep.subr.bf16.mxu1 %v1312_v3  ;;  %v231_v60 = vld [vmem:[%s2188_s1 + $0x528] sm:$0xff]  ;;  %v216_v61 = vld [vmem:[%s2188_s1 + $0x4b0] sm:$0xff]  ;;  %v217_v62 = vld [vmem:[%s2188_s1 + $0x4b8] sm:$0xff] }
  0x3d   :  { %v248_v63 = vld [vmem:[%s2188_s1 + $0x5b0] sm:$0xff]  ;;  %v249_v0 = vld [vmem:[%s2188_s1 + $0x5b8] sm:$0xff]  ;;  %v47_v1 = vld [vmem:[%s2189_s0 + $0x108] sm:$0xff]  ;;  %v1362_v5 = vpack.c.bf16 %v231_v60, %v230_v59 }
  0x3e   :  { %1283 = vmatpush3.bf16.msra.mxu0 %v1282_v9  ;;  %v46_v3 = vld [vmem:[%s2189_s0 + $0x100] sm:$0xff]  ;;  %v200_v6 = vld [vmem:[%s2188_s1 + $0x430] sm:$0xff]  ;;  %v201_v7 = vld [vmem:[%s2188_s1 + $0x438] sm:$0xff]  ;;  %v1332_v9 = vpack.c.bf16 %v217_v62, %v216_v61 }
  0x3f   :  { %1315 = vmatpush3.bf16.msra.mxu1 %v1314_v10  ;;  %1285 = vmatprep.subr.bf16.mxu0 %v1284_v11  ;;  %v58_v4 = vld [vmem:[%s2189_s0 + $0x160] sm:$0xff]  ;;  %v232_v8 = vld [vmem:[%s2188_s1 + $0x530] sm:$0xff]  ;;  %v1364_v10 = vpack.c.bf16 %v249_v0, %v248_v63  ;;  %v233_v11 = vld [vmem:[%s2188_s1 + $0x538] sm:$0xff]  ;;  %v1334_v18 = vpack.c.bf16 %v201_v7, %v200_v6 }
  0x40   :  { %1317 = vmatprep.subr.bf16.mxu1 %v1316_v15  ;;  %v218_v12 = vld [vmem:[%s2188_s1 + $0x4c0] sm:$0xff]  ;;  %v219_v13 = vld [vmem:[%s2188_s1 + $0x4c8] sm:$0xff]  ;;  %v57_v16 = vld [vmem:[%s2189_s0 + $0x158] sm:$0xff]  ;;  %v1366_v20 = vpack.c.bf16 %v233_v11, %v232_v8 }
  0x41   :  { %v250_v14 = vld [vmem:[%s2188_s1 + $0x5c0] sm:$0xff]  ;;  %v251_v15 = vld [vmem:[%s2188_s1 + $0x5c8] sm:$0xff]  ;;  %v60_v17 = vld [vmem:[%s2189_s0 + $0x170] sm:$0xff] }
  0x42   :  { %1287 = vmatpush3.bf16.msra.mxu0 %v1286_v21  ;;  %v59_v19 = vld [vmem:[%s2189_s0 + $0x168] sm:$0xff]  ;;  %v1336_v21 = vpack.c.bf16 %v219_v13, %v218_v12  ;;  %v234_v24 = vld [vmem:[%s2188_s1 + $0x540] sm:$0xff]  ;;  %v1368_v25 = vpack.c.bf16 %v251_v15, %v250_v14  ;;  %v220_v27 = vld [vmem:[%s2188_s1 + $0x4d0] sm:$0xff] }
  0x43   :  { %1319 = vmatpush3.bf16.msra.mxu1 %v1318_v22  ;;  %1321 = vmatprep.subr.bf16.mxu0 %v1320_v23  ;;  %v202_v22 = vld [vmem:[%s2188_s1 + $0x440] sm:$0xff]  ;;  %v203_v23 = vld [vmem:[%s2188_s1 + $0x448] sm:$0xff]  ;;  %v221_v28 = vld [vmem:[%s2188_s1 + $0x4d8] sm:$0xff] }
  0x44   :  { %1353 = vmatprep.subr.bf16.mxu1 %v1352_v26  ;;  %v235_v26 = vld [vmem:[%s2188_s1 + $0x548] sm:$0xff]  ;;  %v252_v29 = vld [vmem:[%s2188_s1 + $0x5d0] sm:$0xff]  ;;  %v253_v30 = vld [vmem:[%s2188_s1 + $0x5d8] sm:$0xff]  ;;  %v1338_v32 = vpack.c.bf16 %v203_v23, %v202_v22 }
  0x45   :  { %534 = vmatmul.mubr.f32.vlgmr.msra.gmra.mrb[8].mxu0 %v18_v33  ;;  %v23_v31 = vld [vmem:[%s2189_s0 + $0x48] sm:$0xff]  ;;  %v204_v33 = vld [vmem:[%s2188_s1 + $0x450] sm:$0xff]  ;;  %v237_v39 = vld [vmem:[%s2188_s1 + $0x558] sm:$0xff] }
  0x46   :  { %619 = vmatmul.mubr.f32.vlgmr.msra.gmra.mrb[8].mxu1 %v20_v34  ;;  %1323 = vmatpush3.bf16.msra.mxu0 %v1322_v35  ;;  %v25_v34 = vld [vmem:[%s2189_s0 + $0x58] sm:$0xff]  ;;  %v1370_v35 = vpack.c.bf16 %v235_v26, %v234_v24  ;;  %v236_v38 = vld [vmem:[%s2188_s1 + $0x550] sm:$0xff]  ;;  %v223_v42 = vld [vmem:[%s2188_s1 + $0x4e8] sm:$0xff] }
  0x47   :  { %1355 = vmatpush3.bf16.msra.mxu1 %v1354_v36  ;;  %538 = vmatprep.mubr.f32.mxu0 %v32_v37  ;;  %v1340_v36 = vpack.c.bf16 %v221_v28, %v220_v27  ;;  %v205_v37 = vld [vmem:[%s2188_s1 + $0x458] sm:$0xff]  ;;  %v262_v43 = vld [vmem:[%s2190_s2] sm:$0xff]  ;;  %v255_v45 = vld [vmem:[%s2188_s1 + $0x5e8] sm:$0xff] }
  0x48   :  { %1325 = vmatprep.subr.bf16.mxu0 %v1324_v40  ;;  %1357 = vmatprep.subr.bf16.mxu1 %v1356_v41  ;;  %v1372_v40 = vpack.c.bf16 %v253_v30, %v252_v29  ;;  %v222_v41 = vld [vmem:[%s2188_s1 + $0x4e0] sm:$0xff]  ;;  %v264_v46 = vld [vmem:[%s2190_s2 + $0x10] sm:$0xff]  ;;  %v1342_v47 = vpack.c.bf16 %v205_v37, %v204_v33  ;;  %v265_v54 = vld [vmem:[%s2190_s2 + $0x18] sm:$0xff] }
  0x49   :  { %539 = vmatmul.mubr.f32.gmra.mrb[10].mxu0 %v31_v48  ;;  %623 = vmatprep.mubr.f32.mxu1 %v34_v49  ;;  %v254_v44 = vld [vmem:[%s2188_s1 + $0x5e0] sm:$0xff]  ;;  %v263_v49 = vld [vmem:[%s2190_s2 + $0x8] sm:$0xff]  ;;  %v256_v59 = vld [vmem:[%s2188_s1 + $0x5f0] sm:$0xff] }
  0x4a   :  { %1327 = vmatpush3.bf16.msra.mxu0 %v1326_v50  ;;  %624 = vmatmul.mubr.f32.gmra.mrb[10].mxu1 %v33_v51  ;;  %v206_v48 = vld [vmem:[%s2188_s1 + $0x460] sm:$0xff]  ;;  %v1374_v50 = vpack.c.bf16 %v237_v39, %v236_v38  ;;  %v1344_v51 = vpack.c.bf16 %v223_v42, %v222_v41  ;;  %v1376_v55 = vpack.c.bf16 %v255_v45, %v254_v44  ;;  %v257_v60 = vld [vmem:[%s2188_s1 + $0x5f8] sm:$0xff]  ;;  %v208_v0 = vld [vmem:[%s2188_s1 + $0x470] sm:$0xff] }
  0x4b   :  { %1359 = vmatpush3.bf16.msra.mxu1 %v1358_v52  ;;  %543 = vmatprep.mubr.f32.mxu0 %v45_v53  ;;  %v207_v52 = vld [vmem:[%s2188_s1 + $0x468] sm:$0xff]  ;;  %v238_v53 = vld [vmem:[%s2188_s1 + $0x560] sm:$0xff]  ;;  %v261_v11 = vld [vmem:[%s2188_s1 + $0x618] sm:$0xff] }
  0x4c   :  { %1329 = vmatprep.subr.bf16.mxu0 %v1328_v57  ;;  %1361 = vmatprep.subr.bf16.mxu1 %v1360_v58  ;;  %v224_v57 = vld [vmem:[%s2188_s1 + $0x4f0] sm:$0xff]  ;;  %v225_v58 = vld [vmem:[%s2188_s1 + $0x4f8] sm:$0xff]  ;;  %v1346_v61 = vpack.c.bf16 %v207_v52, %v206_v48  ;;  %v259_v6 = vld [vmem:[%s2188_s1 + $0x608] sm:$0xff] }
  0x4d   :  { %544 = vmatmul.mubr.f32.gmra.mrb[12].mxu0 %v44_v56  ;;  %628 = vmatprep.mubr.f32.mxu1 %v47_v1  ;;  %v239_v56 = vld [vmem:[%s2188_s1 + $0x568] sm:$0xff]  ;;  %v1348_v63 = vpack.c.bf16 %v225_v58, %v224_v57  ;;  %v209_v1 = vld [vmem:[%s2188_s1 + $0x478] sm:$0xff]  ;;  %v22_v12 = vld [vmem:[%s2189_s0 + $0x40] sm:$0xff] }
  0x4e   :  { %1331 = vmatpush3.bf16.msra.mxu0 %v1330_v2  ;;  %629 = vmatmul.mubr.f32.gmra.mrb[12].mxu1 %v46_v3  ;;  %v1378_v62 = vpack.c.bf16 %v239_v56, %v238_v53  ;;  %v240_v2 = vld [vmem:[%s2188_s1 + $0x570] sm:$0xff]  ;;  %v1380_v3 = vpack.c.bf16 %v257_v60, %v256_v59  ;;  %v1350_v7 = vpack.c.bf16 %v209_v1, %v208_v0  ;;  %v50_v22 = vld [vmem:[%s2189_s0 + $0x120] sm:$0xff]  ;;  %v63_v26 = vld [vmem:[%s2189_s0 + $0x188] sm:$0xff] }
  0x4f   :  { %1363 = vmatpush3.bf16.msra.mxu1 %v1362_v5  ;;  %548 = vmatprep.mubr.f32.mxu0 %v58_v4  ;;  %v241_v4 = vld [vmem:[%s2188_s1 + $0x578] sm:$0xff]  ;;  %v258_v5 = vld [vmem:[%s2188_s1 + $0x600] sm:$0xff]  ;;  %v24_v13 = vld [vmem:[%s2189_s0 + $0x50] sm:$0xff] }
  0x50   :  { %1333 = vmatprep.subr.bf16.mxu0 %v1332_v9  ;;  %1365 = vmatprep.subr.bf16.mxu1 %v1364_v10  ;;  %v1382_v8 = vpack.c.bf16 %v241_v4, %v240_v2  ;;  %v1384_v9 = vpack.c.bf16 %v259_v6, %v258_v5  ;;  %v260_v10 = vld [vmem:[%s2188_s1 + $0x610] sm:$0xff]  ;;  %v62_v23 = vld [vmem:[%s2189_s0 + $0x180] sm:$0xff]  ;;  %v39_v29 = vld [vmem:[%s2189_s0 + $0xc8] sm:$0xff] }
  0x51   :  { %549 = vmatmul.mubr.f32.gmra.mrb[14].mxu0 %v57_v16  ;;  %633 = vmatprep.mubr.f32.mxu1 %v60_v17  ;;  %v36_v14 = vld [vmem:[%s2189_s0 + $0xb0] sm:$0xff]  ;;  %v1388_v15 = vpack.c.bf16 %v261_v11, %v260_v10  ;;  %v38_v16 = vld [vmem:[%s2189_s0 + $0xc0] sm:$0xff]  ;;  %v35_v17 = vld [vmem:[%s2189_s0 + $0xa8] sm:$0xff] }
  0x52   :  { %1335 = vmatpush3.bf16.msra.mxu0 %v1334_v18  ;;  %634 = vmatmul.mubr.f32.gmra.mrb[14].mxu1 %v59_v19  ;;  %v37_v18 = vld [vmem:[%s2189_s0 + $0xb8] sm:$0xff]  ;;  %v64_v24 = vld [vmem:[%s2189_s0 + $0x190] sm:$0xff]  ;;  %v26_v27 = vld [vmem:[%s2189_s0 + $0x60] sm:$0xff] }
  0x53   :  { %1367 = vmatpush3.bf16.msra.mxu1 %v1366_v20  ;;  %1337 = vmatprep.subr.bf16.mxu0 %v1336_v21  ;;  %v49_v19 = vld [vmem:[%s2189_s0 + $0x118] sm:$0xff]  ;;  %v51_v20 = vld [vmem:[%s2189_s0 + $0x128] sm:$0xff]  ;;  %v48_v21 = vld [vmem:[%s2189_s0 + $0x110] sm:$0xff] }
  0x54   :  { %1369 = vmatprep.subr.bf16.mxu1 %v1368_v25  ;;  %703 = vmatprep.mubr.f32.mxu0 %v23_v31  ;;  %v61_v25 = vld [vmem:[%s2189_s0 + $0x178] sm:$0xff]  ;;  %v52_v28 = vld [vmem:[%s2189_s0 + $0x130] sm:$0xff] }
  0x55   :  { %788 = vmatprep.mubr.f32.mxu1 %v25_v34  ;;  %268 = vperm.xlu0 %1397, %v262_v43   ;;  %v65_v30 = vld [vmem:[%s2189_s0 + $0x198] sm:$0xff] }
  0x56   :  { %1339 = vmatpush3.bf16.msra.mxu0 %v1338_v32  ;;  %278 = vperm.xlu1 %1398, %v264_v46  }
  0x57   :  { %1371 = vmatpush3.bf16.msra.mxu1 %v1370_v35  ;;  %1341 = vmatprep.subr.bf16.mxu0 %v1340_v36 }
  0x58   :  { %1373 = vmatprep.subr.bf16.mxu1 %v1372_v40 }
  0x59   :  { %273 = vperm.xlu0 %1397, %v263_v49  }
  0x5a   :  { %1343 = vmatpush3.bf16.msra.mxu0 %v1342_v47  ;;  %283 = vperm.xlu1 %1398, %v265_v54  }
  0x5b   :  { %1375 = vmatpush3.bf16.msra.mxu1 %v1374_v50  ;;  %1345 = vmatprep.subr.bf16.mxu0 %v1344_v51 }
  0x5c   :  { %1377 = vmatprep.subr.bf16.mxu1 %v1376_v55 }
  0x5e   :  { %1347 = vmatpush3.bf16.msra.mxu0 %v1346_v61 }
  0x5f   :  { %1379 = vmatpush3.bf16.msra.mxu1 %v1378_v62  ;;  %1349 = vmatprep.subr.bf16.mxu0 %v1348_v63 }
  0x60   :  { %1381 = vmatprep.subr.bf16.mxu1 %v1380_v3 }
  0x62   :  { %1351 = vmatpush3.bf16.msra.mxu0 %v1350_v7 }
  0x63   :  { %1383 = vmatpush3.bf16.msra.mxu1 %v1382_v8  ;;  %1385 = vmatprep.subr.bf16.mxu0 %v1384_v9 }
  0x64   :  { %1392 = vmatprep.subr.bf16.mxu1 %v1384_v9 }
  0x65   :  { %704 = vmatmul.mubr.f32.vlgmr.msra.gmra.mrb[16].mxu0 %v22_v12 }
  0x66   :  { %789 = vmatmul.mubr.f32.vlgmr.msra.gmra.mrb[16].mxu1 %v24_v13  ;;  %1387 = vmatpush3.bf16.msra.mxu0 %v1384_v9 }
  0x67   :  { %1394 = vmatpush3.bf16.msra.mxu1 %v1384_v9  ;;  %708 = vmatprep.mubr.f32.mxu0 %v36_v14 }
  0x68   :  { %793 = vmatprep.mubr.f32.mxu1 %v38_v16  ;;  %1389 = vmatprep.subr.bf16.mxu0 %v1388_v15 }
  0x69   :  { %709 = vmatmul.mubr.f32.gmra.mrb[18].mxu0 %v35_v17  ;;  %1393 = vmatprep.subr.bf16.mxu1 %v1388_v15 }
  0x6a   :  { %794 = vmatmul.mubr.f32.gmra.mrb[18].mxu1 %v37_v18  ;;  %713 = vmatprep.mubr.f32.mxu0 %v49_v19 }
  0x6b   :  { %798 = vmatprep.mubr.f32.mxu1 %v51_v20  ;;  %1391 = vmatpush3.bf16.msra.mxu0 %v1388_v15 }
  0x6c   :  { %1395 = vmatpush3.bf16.msra.mxu1 %v1388_v15 }
  0x6d   :  { %714 = vmatmul.mubr.f32.gmra.mrb[20].mxu0 %v48_v21 }
  0x6e   :  { %799 = vmatmul.mubr.f32.gmra.mrb[20].mxu1 %v50_v22  ;;  %718 = vmatprep.mubr.f32.mxu0 %v62_v23 }
  0x6f   :  { %803 = vmatprep.mubr.f32.mxu1 %v64_v24 }
  0x71   :  { %719 = vmatmul.mubr.f32.gmra.mrb[22].mxu0 %v61_v25 }
  0x72   :  { %804 = vmatmul.mubr.f32.gmra.mrb[22].mxu1 %v63_v26  ;;  %1186 = vmatprep.mubr.msk.f32.mxu0 %vm286_vm0, %v26_v27 }
  0x73   :  { %1189 = vmatprep.mubr.msk.f32.mxu1 %vm286_vm0, %v52_v28 }
  0x75   :  { %1187 = vmatmul.mubr.msk.f32.vlgmr.msra.gmra.mrb[24].mxu0 %vm286_vm0, %v39_v29 }
  0x76   :  { %1190 = vmatmul.mubr.msk.f32.vlgmr.msra.gmra.mrb[24].mxu1 %vm286_vm0, %v65_v30 }
  0xd4   :  { %v269_v32 = vpop.permute.xlu0 %268 }
  0xd5   :  { %v279_v46 = vpop.permute.xlu1 %278 }
  0xd8   :  { %v274_v40 = vpop.permute.xlu0 %273 }
  0xd9   :  { %v284_v58 = vpop.permute.xlu1 %283 }
  0xf8   :  { %v938_v31 = vpop.f32.mrb[0].mxu0 }
  0xf9   :  { %v939_v33 = vpop.f32.mrb[1].mxu0  ;;  %v982_v34 = vpop.f32.mrb[0].mxu1 }
  0xfa   :  { %v940_v35 = vadd.f32 %v939_v33, %v938_v31  ;;  %v983_v36 = vpop.f32.mrb[1].mxu1 }
  0xfb   :  { %v984_v37 = vadd.f32 %v983_v36, %v982_v34 }
  0xfc   :  { %v366_v38 = vadd.f32 %v940_v35, %v269_v32  ;;  %v941_v39 = vpop.f32.mrb[2].mxu0 }
  0xfd   :  { %v942_v41 = vpop.f32.mrb[3].mxu0  ;;  %v985_v42 = vpop.f32.mrb[2].mxu1 }
  0xfe   :  { %v451_v43 = vadd.f32 %v984_v37, %v366_v38  ;;  %v943_v44 = vadd.f32 %v942_v41, %v941_v39  ;;  %v986_v45 = vpop.f32.mrb[3].mxu1 }
  0xff   :  { %v987_v47 = vadd.f32 %v986_v45, %v985_v42 }
 0x100   :  { %v371_v48 = vadd.f32 %v943_v44, %v274_v40  ;;  %v944_v49 = vpop.f32.mrb[4].mxu0 }
 0x101   :  { %v945_v50 = vpop.f32.mrb[5].mxu0  ;;  %v988_v51 = vpop.f32.mrb[4].mxu1 }
 0x102   :  { %v456_v52 = vadd.f32 %v987_v47, %v371_v48  ;;  %v946_v53 = vadd.f32 %v945_v50, %v944_v49  ;;  %v989_v54 = vpop.f32.mrb[5].mxu1 }
 0x103   :  { %v990_v55 = vadd.f32 %v989_v54, %v988_v51 }
 0x104   :  { %v376_v56 = vadd.f32 %v946_v53, %v279_v46  ;;  %v947_v57 = vpop.f32.mrb[6].mxu0 }
 0x105   :  { %v948_v59 = vpop.f32.mrb[7].mxu0  ;;  %v991_v60 = vpop.f32.mrb[6].mxu1 }
 0x106   :  { %v461_v61 = vadd.f32 %v990_v55, %v376_v56  ;;  %v949_v62 = vadd.f32 %v948_v59, %v947_v57  ;;  %v992_v63 = vpop.f32.mrb[7].mxu1 }
 0x107   :  { %v993_v0 = vadd.f32 %v992_v63, %v991_v60 }
 0x108   :  { %v381_v1 = vadd.f32 %v949_v62, %v284_v58 }
 0x10a   :  { %v466_v2 = vadd.f32 %v993_v0, %v381_v1 }
 0x118   :  { %v1026_v3 = vpop.f32.mrb[8].mxu0 }
 0x119   :  { %v1027_v4 = vpop.f32.mrb[9].mxu0  ;;  %v1070_v5 = vpop.f32.mrb[8].mxu1 }
 0x11a   :  { %v1028_v6 = vadd.f32 %v1027_v4, %v1026_v3  ;;  %v1071_v7 = vpop.f32.mrb[9].mxu1 }
 0x11b   :  { %v1072_v8 = vadd.f32 %v1071_v7, %v1070_v5 }
 0x11c   :  { %v536_v9 = vadd.f32 %v1028_v6, %v451_v43  ;;  %v1029_v10 = vpop.f32.mrb[10].mxu0 }
 0x11d   :  { %v1030_v11 = vpop.f32.mrb[11].mxu0  ;;  %v1073_v12 = vpop.f32.mrb[10].mxu1 }
 0x11e   :  { %v621_v13 = vadd.f32 %v1072_v8, %v536_v9  ;;  %v1031_v14 = vadd.f32 %v1030_v11, %v1029_v10  ;;  %v1074_v15 = vpop.f32.mrb[11].mxu1 }
 0x11f   :  { %v1075_v16 = vadd.f32 %v1074_v15, %v1073_v12 }
 0x120   :  { %v541_v17 = vadd.f32 %v1031_v14, %v456_v52  ;;  %v1032_v18 = vpop.f32.mrb[12].mxu0 }
 0x121   :  { %v1033_v19 = vpop.f32.mrb[13].mxu0  ;;  %v1076_v20 = vpop.f32.mrb[12].mxu1 }
 0x122   :  { %v626_v21 = vadd.f32 %v1075_v16, %v541_v17  ;;  %v1034_v22 = vadd.f32 %v1033_v19, %v1032_v18  ;;  %v1077_v23 = vpop.f32.mrb[13].mxu1 }
 0x123   :  { %v1078_v24 = vadd.f32 %v1077_v23, %v1076_v20 }
 0x124   :  { %v546_v25 = vadd.f32 %v1034_v22, %v461_v61  ;;  %v1035_v26 = vpop.f32.mrb[14].mxu0 }
 0x125   :  { %v1036_v27 = vpop.f32.mrb[15].mxu0  ;;  %v1079_v28 = vpop.f32.mrb[14].mxu1 }
 0x126   :  { %v631_v29 = vadd.f32 %v1078_v24, %v546_v25  ;;  %v1037_v30 = vadd.f32 %v1036_v27, %v1035_v26  ;;  %v1080_v31 = vpop.f32.mrb[15].mxu1 }
 0x127   :  { %v1081_v32 = vadd.f32 %v1080_v31, %v1079_v28 }
 0x128   :  { %v551_v33 = vadd.f32 %v1037_v30, %v466_v2 }
 0x12a   :  { %v636_v34 = vadd.f32 %v1081_v32, %v551_v33 }
 0x138   :  { %v1114_v35 = vpop.f32.mrb[16].mxu0 }
 0x139   :  { %v1115_v36 = vpop.f32.mrb[17].mxu0  ;;  %v1158_v37 = vpop.f32.mrb[16].mxu1 }
 0x13a   :  { %v1116_v38 = vadd.f32 %v1115_v36, %v1114_v35  ;;  %v1159_v39 = vpop.f32.mrb[17].mxu1 }
 0x13b   :  { %v1160_v40 = vadd.f32 %v1159_v39, %v1158_v37 }
 0x13c   :  { %v706_v41 = vadd.f32 %v1116_v38, %v621_v13  ;;  %v1117_v42 = vpop.f32.mrb[18].mxu0 }
 0x13d   :  { %v1118_v43 = vpop.f32.mrb[19].mxu0  ;;  %v1161_v44 = vpop.f32.mrb[18].mxu1 }
 0x13e   :  { %v1119_v45 = vadd.f32 %v1118_v43, %v1117_v42  ;;  %v1162_v46 = vpop.f32.mrb[19].mxu1  ;;  %v791_v47 = vadd.f32 %v1160_v40, %v706_v41 }
 0x13f   :  { %v1163_v48 = vadd.f32 %v1162_v46, %v1161_v44 }
 0x140   :  { %v711_v49 = vadd.f32 %v1119_v45, %v626_v21  ;;  %v1120_v50 = vpop.f32.mrb[20].mxu0 }
 0x141   :  { %v1121_v51 = vpop.f32.mrb[21].mxu0  ;;  %v1164_v52 = vpop.f32.mrb[20].mxu1 }
 0x142   :  { %v1122_v53 = vadd.f32 %v1121_v51, %v1120_v50  ;;  %v1165_v54 = vpop.f32.mrb[21].mxu1  ;;  %v796_v55 = vadd.f32 %v1163_v48, %v711_v49 }
 0x143   :  { %v1166_v56 = vadd.f32 %v1165_v54, %v1164_v52 }
 0x144   :  { %v716_v57 = vadd.f32 %v1122_v53, %v631_v29  ;;  %v1123_v58 = vpop.f32.mrb[22].mxu0 }
 0x145   :  { %v1124_v59 = vpop.f32.mrb[23].mxu0  ;;  %v1167_v60 = vpop.f32.mrb[22].mxu1 }
 0x146   :  { %v1125_v61 = vadd.f32 %v1124_v59, %v1123_v58  ;;  %v1168_v62 = vpop.f32.mrb[23].mxu1  ;;  %v801_v63 = vadd.f32 %v1166_v56, %v716_v57 }
 0x147   :  { %v1169_v0 = vadd.f32 %v1168_v62, %v1167_v60 }
 0x148   :  { %v721_v1 = vadd.f32 %v1125_v61, %v636_v34  ;;  %v1188_v2 = vpop.f32.mrb[24].mxu0 }
 0x149   :  { %v881_v3 = vadd.f32 %v1188_v2, %v796_v55  ;;  %v1191_v4 = vpop.f32.mrb[24].mxu1  ;;  %v875_v5 = vpop.f32.mrb[25].mxu0 }
 0x14a   :  { %v806_v6 = vadd.f32 %v1169_v0, %v721_v1  ;;  %v876_v7 = vadd.f32 %v875_v5, %v791_v47  ;;  %v885_v8 = vpop.f32.mrb[25].mxu1 }
 0x14b   :  { %895 = vst [vmem:[%s2191_s3 + $0x8] sm:$0xff] %v881_v3  ;;  %v886_v9 = vadd.f32 %v885_v8, %v801_v63 }
 0x14c   :  { %v891_v10 = vadd.f32 %v1191_v4, %v806_v6  ;;  %894 = vst [vmem:[%s2191_s3] sm:$0xff] %v876_v7 }
 0x14d   :  { %896 = vst [vmem:[%s2191_s3 + $0x10] sm:$0xff] %v886_v9 }
 0x14e   :  { %897 = vst [vmem:[%s2191_s3 + $0x18] sm:$0xff] %v891_v10 }

</bundles_post_ra>
